<compile_context>
chip_gen: v7x
topology: tpu7x:2x2x1
jax: 0.10.0
libtpu: 0.0.40
codegen_flags: <defaults>
</compile_context>

<pallas_src>
import functools

import jax
import jax.numpy as jnp
from jax.experimental import pallas as pl
from jax.experimental.pallas import tpu as pltpu


# ---------------------------------------------------------------------------
# Generic tiled matmul (+bias, +optional ReLU) kernels
# ---------------------------------------------------------------------------
def _mm_kernel_acc(a_ref, b_ref, bias_ref, o_ref, acc_ref, *, relu):
    """Tiled matmul with K-accumulation in a VMEM scratch."""
    @pl.when(pl.program_id(2) == 0)
    def _():
        acc_ref[...] = jnp.zeros_like(acc_ref)

    acc_ref[...] += jnp.dot(a_ref[...], b_ref[...],
                            preferred_element_type=jnp.float32)

    @pl.when(pl.program_id(2) == pl.num_programs(2) - 1)
    def _():
        r = acc_ref[...] + bias_ref[...]
        if relu:
            r = jnp.maximum(r, 0.0)
        o_ref[...] = r.astype(o_ref.dtype)


def _mm_kernel_single(a_ref, b_ref, bias_ref, o_ref, *, relu):
    """Single-K-step matmul: no accumulator scratch, write result directly."""
    r = jnp.dot(a_ref[...], b_ref[...],
                preferred_element_type=jnp.float32) + bias_ref[...]
    if relu:
        r = jnp.maximum(r, 0.0)
    o_ref[...] = r.astype(o_ref.dtype)


def matmul_bias_act(a, b, bias, *, relu, out_dtype, bm, bn, bk):
    """y = act(a @ b + bias) with explicit (bm, bn, bk) tiling."""
    m, k = a.shape
    k2, n = b.shape
    assert k == k2
    assert m % bm == 0 and n % bn == 0 and k % bk == 0
    bias2 = bias.reshape(1, n).astype(jnp.float32)
    nk = k // bk

    if nk == 1:
        kernel = functools.partial(_mm_kernel_single, relu=relu)
        grid = (m // bm, n // bn)
        in_specs = [
            pl.BlockSpec((bm, bk), lambda i, j: (i, 0)),
            pl.BlockSpec((bk, bn), lambda i, j: (0, j)),
            pl.BlockSpec((1, bn), lambda i, j: (0, j)),
        ]
        out_specs = pl.BlockSpec((bm, bn), lambda i, j: (i, j))
        scratch = []
        semantics = ("parallel", "parallel")
    else:
        kernel = functools.partial(_mm_kernel_acc, relu=relu)
        grid = (m // bm, n // bn, nk)
        in_specs = [
            pl.BlockSpec((bm, bk), lambda i, j, kk: (i, kk)),
            pl.BlockSpec((bk, bn), lambda i, j, kk: (kk, j)),
            pl.BlockSpec((1, bn), lambda i, j, kk: (0, j)),
        ]
        out_specs = pl.BlockSpec((bm, bn), lambda i, j, kk: (i, j))
        scratch = [pltpu.VMEM((bm, bn), jnp.float32)]
        semantics = ("parallel", "parallel", "arbitrary")

    return pl.pallas_call(
        kernel,
        out_shape=jax.ShapeDtypeStruct((m, n), out_dtype),
        grid_spec=pltpu.PrefetchScalarGridSpec(
            num_scalar_prefetch=0,
            grid=grid,
            in_specs=in_specs,
            out_specs=out_specs,
            scratch_shapes=scratch,
        ),
        compiler_params=pltpu.CompilerParams(
            dimension_semantics=semantics,
            vmem_limit_bytes=32 * 1024 * 1024,
        ),
    )(a, b, bias2)


# ---------------------------------------------------------------------------
# Fused conv2 (3x3, 64 -> 128, pad 1) + ReLU + 2x2 max-pool kernel
# ---------------------------------------------------------------------------
_IMGS_PER_STEP = 8  # images per grid step (amortises per-step fixed cost)


def _conv2_pool_kernel(y1_ref, w2_ref, b2_ref, o_ref, slab_ref):
    """Fused conv2 + bias + ReLU + 2x2 max-pool, B images per grid step.

    y1_ref  : (B, 28, 28, 64) bf16   conv1 output block (unpadded NHWC)
    w2_ref  : (3, 192, 128)   bf16   conv2 weights, [dy, dx*64 + cin, cout]
    b2_ref  : (1, 128)        f32    conv2 bias
    o_ref   : (B, 14, 14, 128) bf16  pooled output block
    slab_ref: (30, 34, 192)   f32    scratch: dx-shifted zero-padded slab,
                                     slab[r, w, dx*64+c] = y1_pad[r, w+dx, c]
    """
    # Zero once per grid step: only image-independent border regions rely on
    # it (the centre region is overwritten per image below).
    slab_ref[...] = jnp.zeros(slab_ref.shape, slab_ref.dtype)
    bias = b2_ref[...]  # (1, 128), hoisted out of all loops

    def img_body(img, carry):
        y1f = y1_ref[img].astype(jnp.float32)              # (28, 28, 64)
        # Three dx-shifted copies into the lane-merged scratch (K = 192).
        slab_ref[1:29, 1:29, 0:64] = y1f                   # dx = 0
        slab_ref[1:29, 0:28, 64:128] = y1f                 # dx = 1
        slab_ref[1:29, 0:27, 128:192] = y1f[:, 1:28, :]    # dx = 2

        def blk_body(blk, c2):
            # 4 conv rows -> 2 pooled rows per block.
            r0 = 4 * blk
            acc = jnp.zeros((128, 128), jnp.float32)
            for dy in range(3):                            # 3 MXU matmuls, K=192
                lhs = slab_ref[pl.ds(r0 + dy, 4), 0:32, :]          # (4, 32, 192)
                lhs = lhs.reshape(128, 192).astype(jnp.bfloat16)
                acc = acc + jnp.dot(lhs, w2_ref[dy],
                                    preferred_element_type=jnp.float32)
            # 2x2 max-pool on the VPU (no selection matmuls).
            a4 = acc.reshape(2, 2, 32, 128)                # (row-pair, row, w, c)
            rmax = jnp.maximum(a4[:, 0], a4[:, 1])         # (2, 32, 128)
            wp = rmax.reshape(2, 16, 2, 128)               # split width into pairs
            wmax = jnp.maximum(wp[:, :, 0, :], wp[:, :, 1, :])      # (2, 16, 128)
            # bias + ReLU commute with max-pool (channel-constant bias,
            # monotone ReLU), so apply them after pooling.
            out = jnp.maximum(wmax[:, 0:14, :] + bias, 0.0)         # (2, 14, 128)
            o_ref[img, pl.ds(2 * blk, 2), :, :] = out.astype(o_ref.dtype)
            return c2

        return jax.lax.fori_loop(0, 7, blk_body, carry)

    jax.lax.fori_loop(0, _IMGS_PER_STEP, img_body, 0)


def conv2_relu_pool(y1, w2m, b2):
    """y1: (N, 28, 28, 64) bf16 NHWC -> (N, 14, 14, 128) bf16 pooled."""
    n = y1.shape[0]
    assert n % _IMGS_PER_STEP == 0
    return pl.pallas_call(
        _conv2_pool_kernel,
        out_shape=jax.ShapeDtypeStruct((n, 14, 14, 128), jnp.bfloat16),
        grid_spec=pltpu.PrefetchScalarGridSpec(
            num_scalar_prefetch=0,
            grid=(n // _IMGS_PER_STEP,),
            in_specs=[
                pl.BlockSpec((_IMGS_PER_STEP, 28, 28, 64),
                             lambda i: (i, 0, 0, 0)),
                pl.BlockSpec((3, 192, 128), lambda i: (0, 0, 0)),
                pl.BlockSpec((1, 128), lambda i: (0, 0)),
            ],
            out_specs=pl.BlockSpec((_IMGS_PER_STEP, 14, 14, 128),
                                   lambda i: (i, 0, 0, 0)),
            scratch_shapes=[pltpu.VMEM((30, 34, 192), jnp.float32)],
        ),
        compiler_params=pltpu.CompilerParams(dimension_semantics=("parallel",)),
    )(y1, w2m, b2)


# ---------------------------------------------------------------------------
# Glue: im2col for the tiny conv1, tiling helpers, parameter prep
# ---------------------------------------------------------------------------
def _pick_bm(m, target):
    """Largest multiple-of-8 divisor of m that is <= target (or m itself)."""
    if m <= target:
        return m
    t = target - (target % 8)
    while t >= 8:
        if m % t == 0:
            return t
        t -= 8
    return m


def _pad_batch(n):
    """Round batch up to a multiple of 8; for large batches, nudge so a
    block size >= 128 divides it (bounds fc1 weight re-reads)."""
    n8 = ((n + 7) // 8) * 8
    if n8 <= 512:
        return n8
    cand = n8
    while _pick_bm(cand, 512) < 128:
        cand += 8
    return cand


def im2col_3x3(x):
    """x: (N, 28, 28, 1) -> (N*784, 9) patches in (dy, dx) column order."""
    n, h, w, _ = x.shape
    xp = jnp.pad(x, ((0, 0), (1, 1), (1, 1), (0, 0)))
    patches = [xp[:, dy:dy + h, dx:dx + w, :]
               for dy in range(3) for dx in range(3)]
    return jnp.concatenate(patches, axis=-1).reshape(n * h * w, 9)


def prepare_params(params):
    """One-time (outside jit) conversion of torch-layout params to kernel form."""
    # conv1: (64, 1, 3, 3) -> (9, 64), rows in (dy, dx) order.
    w1 = jnp.transpose(params["conv1_w"], (2, 3, 1, 0)).reshape(9, 64)
    # conv2: (128, 64, 3, 3) -> (3, 192, 128), [dy, dx*64 + cin, cout].
    w2m = jnp.transpose(params["conv2_w"], (2, 3, 1, 0)).reshape(3, 192, 128)
    # fc1: permute feature rows from torch NCHW-flatten (c*196 + h*14 + w)
    # to NHWC-flatten ((h*14 + w)*128 + c), then transpose to (K, N).
    fw1 = params["fc1_w"].reshape(1024, 128, 14, 14)
    fw1 = jnp.transpose(fw1, (2, 3, 1, 0)).reshape(14 * 14 * 128, 1024)
    # fc2: transpose and pad N 10 -> 128 for lane-dense output stores.
    fw2 = jnp.transpose(params["fc2_w"])                      # (1024, 10)
    fw2p = jnp.pad(fw2, ((0, 0), (0, 118)))                   # (1024, 128)
    fb2p = jnp.pad(params["fc2_b"], ((0, 118),))              # (128,)
    return {
        "w1": w1.astype(jnp.bfloat16),
        "b1": params["conv1_b"].astype(jnp.float32),
        "w2m": w2m.astype(jnp.bfloat16),
        "b2": params["conv2_b"].reshape(1, 128).astype(jnp.float32),
        "fw1": fw1.astype(jnp.bfloat16),
        "fb1": params["fc1_b"].astype(jnp.float32),
        "fw2p": fw2p.astype(jnp.bfloat16),
        "fb2p": fb2p.astype(jnp.float32),
    }


def normal_cnn_forward(x_nchw, p):
    n = x_nchw.shape[0]
    n_pad = max(_pad_batch(n), _IMGS_PER_STEP)

    x = jnp.transpose(x_nchw, (0, 2, 3, 1))                  # (N, 28, 28, 1)
    if n_pad != n:
        x = jnp.pad(x, ((0, n_pad - n), (0, 0), (0, 0), (0, 0)))

    # conv1 (1 -> 64, 3x3, pad 1) + ReLU: tiny-K matmul, bf16 output.
    patches = im2col_3x3(x).astype(jnp.bfloat16)             # (n_pad*784, 9)
    bm1 = _pick_bm(n_pad * 784, 3136)
    y1 = matmul_bias_act(patches, p["w1"], p["b1"], relu=True,
                         out_dtype=jnp.bfloat16, bm=bm1, bn=64, bk=9)
    y1 = y1.reshape(n_pad, 28, 28, 64)

    # conv2 (64 -> 128) + ReLU + 2x2 max-pool, fully fused; zero-padding is
    # built in a VMEM scratch (no padded activation in HBM).
    y3 = conv2_relu_pool(y1, p["w2m"], p["b2"])              # (n_pad, 14, 14, 128)
    y3 = y3.reshape(n_pad, 14 * 14 * 128)                    # NHWC flatten

    # fc1 (25088 -> 1024) + ReLU: bf16 weights, K tiled at 1792.
    # Keep 2 parallel N blocks when the M grid is a single block (dual-TC
    # v7x); otherwise use a single N block (no activation re-streaming).
    bm = _pick_bm(n_pad, 512)
    bn1 = 1024 if (n_pad // bm) >= 2 else 512
    y4 = matmul_bias_act(y3, p["fw1"], p["fb1"], relu=True,
                         out_dtype=jnp.bfloat16, bm=bm, bn=bn1, bk=1792)

    # TODO(synk): nn.Dropout(p=0.5) training-mode masking not implemented
    # (eval-mode identity semantics used).

    # fc2 (1024 -> 10, padded to 128 lanes), single-K-step kernel.
    y5 = matmul_bias_act(y4, p["fw2p"], p["fb2p"], relu=False,
                         out_dtype=jnp.float32, bm=bm, bn=128, bk=1024)
    return y5[:n, :10]


# ---------------------------------------------------------------------------
# Reference (torch-semantics, plain XLA) and test harness
# ---------------------------------------------------------------------------
def _torch_reference(x, params):
    dn = ("NCHW", "OIHW", "NCHW")
    y = jax.lax.conv_general_dilated(x, params["conv1_w"], (1, 1),
                                     ((1, 1), (1, 1)), dimension_numbers=dn)
    y = jax.nn.relu(y + params["conv1_b"].reshape(1, 64, 1, 1))
    y = jax.lax.conv_general_dilated(y, params["conv2_w"], (1, 1),
                                     ((1, 1), (1, 1)), dimension_numbers=dn)
    y = jax.nn.relu(y + params["conv2_b"].reshape(1, 128, 1, 1))
    n = y.shape[0]
    y = y.reshape(n, 128, 14, 2, 14, 2).max(axis=(3, 5))     # 2x2 max-pool
    y = y.reshape(n, 128 * 14 * 14)
    y = jax.nn.relu(y @ params["fc1_w"].T + params["fc1_b"])
    return y @ params["fc2_w"].T + params["fc2_b"]


def init_params(key):
    ks = jax.random.split(key, 8)
    s = 0.05
    return {
        "conv1_w": jax.random.normal(ks[0], (64, 1, 3, 3), jnp.float32) * s,
        "conv1_b": jax.random.normal(ks[1], (64,), jnp.float32) * s,
        "conv2_w": jax.random.normal(ks[2], (128, 64, 3, 3), jnp.float32) * s,
        "conv2_b": jax.random.normal(ks[3], (128,), jnp.float32) * s,
        "fc1_w": jax.random.normal(ks[4], (1024, 14 * 14 * 128), jnp.float32) * 0.01,
        "fc1_b": jax.random.normal(ks[5], (1024,), jnp.float32) * s,
        "fc2_w": jax.random.normal(ks[6], (10, 1024), jnp.float32) * 0.01,
        "fc2_b": jax.random.normal(ks[7], (10,), jnp.float32) * s,
    }


if __name__ == "__main__":
    key = jax.random.PRNGKey(0)
    pkey, xkey = jax.random.split(key)
    params = init_params(pkey)
    prepped = prepare_params(params)
    # fc1 expects 14*14*128 features -> spatial input must be 28x28, 1 channel.
    x = jax.random.normal(xkey, (2, 1, 28, 28), jnp.float32)

    out = jax.jit(normal_cnn_forward)(x, prepped)
    out = jax.block_until_ready(out)
    assert out.shape == (2, 10) and out.dtype == jnp.float32

    ref = _torch_reference(x, params)
    rel = float(jnp.linalg.norm(out - ref) / (jnp.linalg.norm(ref) + 1e-6))
    assert rel < 0.1, f"kernel/reference mismatch: rel_err={rel}"
    print("KERNEL_OK")
</pallas_src>

<mosaic_0001>
module attributes {stable_mosaic.version = 11 : i64} {
  func.func @_mm_kernel_single(%arg0: i32, %arg1: i32, %arg2: memref<3136x9xbf16, #tpu.memory_space<vmem>>, %arg3: memref<9x64xbf16, #tpu.memory_space<vmem>>, %arg4: memref<1x64xf32, #tpu.memory_space<vmem>>, %arg5: memref<3136x64xbf16, #tpu.memory_space<vmem>>) attributes {dimension_semantics = [#tpu.dimension_semantics<parallel>, #tpu.dimension_semantics<parallel>], iteration_bounds = array<i64: 2, 1>, scalar_prefetch = 0 : i64, scratch_operands = 0 : i64, tpu.core_type = #tpu.core_type<tc>, window_params = [{transform_indices = @transform_0, window_bounds = array<i64: 3136, 9>}, {transform_indices = @transform_1, window_bounds = array<i64: 9, 64>}, {transform_indices = @transform_2, window_bounds = array<i64: 1, 64>}, {transform_indices = @transform_3, window_bounds = array<i64: 3136, 64>}]} {
    %c0 = arith.constant 0 : index
    %c0_0 = arith.constant 0 : index
    %0 = vector.load %arg2[%c0, %c0_0] : memref<3136x9xbf16, #tpu.memory_space<vmem>>, vector<3136x9xbf16>
    %c0_1 = arith.constant 0 : index
    %c0_2 = arith.constant 0 : index
    %1 = vector.load %arg3[%c0_1, %c0_2] : memref<9x64xbf16, #tpu.memory_space<vmem>>, vector<9x64xbf16>
    %cst = arith.constant dense<0.000000e+00> : vector<3136x64xf32>
    %2 = tpu.matmul %0, %1, %cst {dimension_numbers = #tpu.dot_dimension_numbers<[1], [0], [0], [1], [0, 0, 1, 1], [], []>} : vector<3136x9xbf16>, vector<9x64xbf16>, vector<3136x64xf32> -> vector<3136x64xf32>
    %c0_3 = arith.constant 0 : index
    %c0_4 = arith.constant 0 : index
    %3 = vector.load %arg4[%c0_3, %c0_4] : memref<1x64xf32, #tpu.memory_space<vmem>>, vector<1x64xf32>
    %4 = vector.broadcast %3 : vector<1x64xf32> to vector<3136x64xf32>
    %5 = arith.addf %2, %4 : vector<3136x64xf32>
    %cst_5 = arith.constant 0.000000e+00 : f32
    %6 = vector.broadcast %cst_5 : f32 to vector<3136x64xf32>
    %7 = arith.maximumf %5, %6 : vector<3136x64xf32>
    %8 = arith.truncf %7 : vector<3136x64xf32> to vector<3136x64xbf16>
    %c0_6 = arith.constant 0 : index
    %c0_7 = arith.constant 0 : index
    %9 = vector.load %arg5[%c0_6, %c0_7] : memref<3136x64xbf16, #tpu.memory_space<vmem>>, vector<3136x64xbf16>
    tpu.vector_store %arg5[%c0_6, %c0_7], %8 {strides = array<i32>} : memref<3136x64xbf16, #tpu.memory_space<vmem>>, vector<3136x64xbf16>,
    return
  }
  func.func @transform_0(%arg0: i32, %arg1: i32) -> (i32, i32) {
    %c0_i32 = arith.constant 0 : i32
    %c0_i32_0 = arith.constant 0 : i32
    return %arg0, %c0_i32 : i32, i32
  }
  func.func @transform_1(%arg0: i32, %arg1: i32) -> (i32, i32) {
    %c0_i32 = arith.constant 0 : i32
    %c0_i32_0 = arith.constant 0 : i32
    return %c0_i32, %arg1 : i32, i32
  }
  func.func @transform_2(%arg0: i32, %arg1: i32) -> (i32, i32) {
    %c0_i32 = arith.constant 0 : i32
    %c0_i32_0 = arith.constant 0 : i32
    return %c0_i32, %arg1 : i32, i32
  }
  func.func @transform_3(%arg0: i32, %arg1: i32) -> (i32, i32) {
    %c0_i32 = arith.constant 0 : i32
    return %arg0, %arg1 : i32, i32
  }
}

module attributes {stable_mosaic.version = 11 : i64} {
  func.func @_conv2_pool_kernel(%arg0: i32, %arg1: memref<8x28x28x64xbf16, #tpu.memory_space<vmem>>, %arg2: memref<3x192x128xbf16, #tpu.memory_space<vmem>>, %arg3: memref<1x128xf32, #tpu.memory_space<vmem>>, %arg4: memref<8x14x14x128xbf16, #tpu.memory_space<vmem>>, %arg5: memref<30x34x192xf32, #tpu.memory_space<vmem>>) attributes {dimension_semantics = [#tpu.dimension_semantics<parallel>], iteration_bounds = array<i64: 1>, scalar_prefetch = 0 : i64, scratch_operands = 1 : i64, tpu.core_type = #tpu.core_type<tc>, window_params = [{transform_indices = @transform_0, window_bounds = array<i64: 8, 28, 28, 64>}, {pipeline_mode = #tpu.pipeline_mode<synchronous>, transform_indices = @transform_1, window_bounds = array<i64: 3, 192, 128>}, {pipeline_mode = #tpu.pipeline_mode<synchronous>, transform_indices = @transform_2, window_bounds = array<i64: 1, 128>}, {transform_indices = @transform_3, window_bounds = array<i64: 8, 14, 14, 128>}]} {
    %cst = arith.constant 0.000000e+00 : f32
    %0 = vector.broadcast %cst : f32 to vector<30x34x192xf32>
    %c0 = arith.constant 0 : index
    %c0_0 = arith.constant 0 : index
    %c0_1 = arith.constant 0 : index
    %1 = vector.load %arg5[%c0, %c0_0, %c0_1] : memref<30x34x192xf32, #tpu.memory_space<vmem>>, vector<30x34x192xf32>
    tpu.vector_store %arg5[%c0, %c0_0, %c0_1], %0 {strides = array<i32>} : memref<30x34x192xf32, #tpu.memory_space<vmem>>, vector<30x34x192xf32>,
    %c0_2 = arith.constant 0 : index
    %c0_3 = arith.constant 0 : index
    %2 = vector.load %arg3[%c0_2, %c0_3] : memref<1x128xf32, #tpu.memory_space<vmem>>, vector<1x128xf32>
    %c0_i32 = arith.constant 0 : i32
    %c8_i32 = arith.constant 8 : i32
    %3 = arith.addi %c0_i32, %c8_i32 : i32
    %c1_i32 = arith.constant 1 : i32
    scf.for %arg6 = %c0_i32 to %3 step %c1_i32  : i32 {
      %4 = arith.index_cast %arg6 : i32 to index
      %c0_5 = arith.constant 0 : index
      %c0_6 = arith.constant 0 : index
      %c0_7 = arith.constant 0 : index
      %5 = vector.load %arg1[%4, %c0_5, %c0_6, %c0_7] : memref<8x28x28x64xbf16, #tpu.memory_space<vmem>>, vector<1x28x28x64xbf16>
      %6 = vector.shape_cast %5 : vector<1x28x28x64xbf16> to vector<28x28x64xbf16>
      %7 = arith.extf %6 : vector<28x28x64xbf16> to vector<28x28x64xf32>
      %c1 = arith.constant 1 : index
      %c1_8 = arith.constant 1 : index
      %c0_9 = arith.constant 0 : index
      %8 = vector.load %arg5[%c1, %c1_8, %c0_9] : memref<30x34x192xf32, #tpu.memory_space<vmem>>, vector<28x28x64xf32>
      tpu.vector_store %arg5[%c1, %c1_8, %c0_9], %7 {strides = array<i32>} : memref<30x34x192xf32, #tpu.memory_space<vmem>>, vector<28x28x64xf32>,
      %c1_10 = arith.constant 1 : index
      %c0_11 = arith.constant 0 : index
      %c64 = arith.constant 64 : index
      %9 = vector.load %arg5[%c1_10, %c0_11, %c64] : memref<30x34x192xf32, #tpu.memory_space<vmem>>, vector<28x28x64xf32>
      tpu.vector_store %arg5[%c1_10, %c0_11, %c64], %7 {strides = array<i32>} : memref<30x34x192xf32, #tpu.memory_space<vmem>>, vector<28x28x64xf32>,
      %10 = vector.extract_strided_slice %7 {offsets = [0, 1, 0], sizes = [28, 27, 64], strides = [1, 1, 1]} : vector<28x28x64xf32> to vector<28x27x64xf32>
      %c1_12 = arith.constant 1 : index
      %c0_13 = arith.constant 0 : index
      %c128 = arith.constant 128 : index
      %11 = vector.load %arg5[%c1_12, %c0_13, %c128] : memref<30x34x192xf32, #tpu.memory_space<vmem>>, vector<28x27x64xf32>
      tpu.vector_store %arg5[%c1_12, %c0_13, %c128], %10 {strides = array<i32>} : memref<30x34x192xf32, #tpu.memory_space<vmem>>, vector<28x27x64xf32>,
      %c0_i32_14 = arith.constant 0 : i32
      %c7_i32 = arith.constant 7 : i32
      %12 = arith.addi %c0_i32_14, %c7_i32 : i32
      %c1_i32_15 = arith.constant 1 : i32
      scf.for %arg7 = %c0_i32_14 to %12 step %c1_i32_15  : i32 {
        %c4_i32 = arith.constant 4 : i32
        %13 = arith.muli %c4_i32, %arg7 : i32
        %cst_17 = arith.constant 0.000000e+00 : f32
        %14 = vector.broadcast %cst_17 : f32 to vector<128x128xf32>
        %c0_i32_18 = arith.constant 0 : i32
        %15 = arith.addi %13, %c0_i32_18 : i32
        %16 = arith.index_cast %15 : i32 to index
        %c0_19 = arith.constant 0 : index
        %c0_20 = arith.constant 0 : index
        %17 = vector.load %arg5[%16, %c0_19, %c0_20] : memref<30x34x192xf32, #tpu.memory_space<vmem>>, vector<4x32x192xf32>
        %18 = vector.shape_cast %17 : vector<4x32x192xf32> to vector<128x192xf32>
        %19 = arith.truncf %18 : vector<128x192xf32> to vector<128x192xbf16>
        %c0_21 = arith.constant 0 : index
        %c0_22 = arith.constant 0 : index
        %c0_23 = arith.constant 0 : index
        %20 = vector.load %arg2[%c0_21, %c0_22, %c0_23] : memref<3x192x128xbf16, #tpu.memory_space<vmem>>, vector<1x192x128xbf16>
        %21 = vector.shape_cast %20 : vector<1x192x128xbf16> to vector<192x128xbf16>
        %cst_24 = arith.constant dense<0.000000e+00> : vector<128x128xf32>
        %22 = tpu.matmul %19, %21, %cst_24 {dimension_numbers = #tpu.dot_dimension_numbers<[1], [0], [0], [1], [0, 0, 1, 1], [], []>} : vector<128x192xbf16>, vector<192x128xbf16>, vector<128x128xf32> -> vector<128x128xf32>
        %23 = arith.addf %14, %22 : vector<128x128xf32>
        %c1_i32_25 = arith.constant 1 : i32
        %24 = arith.addi %13, %c1_i32_25 : i32
        %25 = arith.index_cast %24 : i32 to index
        %c0_26 = arith.constant 0 : index
        %c0_27 = arith.constant 0 : index
        %26 = vector.load %arg5[%25, %c0_26, %c0_27] : memref<30x34x192xf32, #tpu.memory_space<vmem>>, vector<4x32x192xf32>
        %27 = vector.shape_cast %26 : vector<4x32x192xf32> to vector<128x192xf32>
        %28 = arith.truncf %27 : vector<128x192xf32> to vector<128x192xbf16>
        %c1_28 = arith.constant 1 : index
        %c0_29 = arith.constant 0 : index
        %c0_30 = arith.constant 0 : index
        %29 = vector.load %arg2[%c1_28, %c0_29, %c0_30] : memref<3x192x128xbf16, #tpu.memory_space<vmem>>, vector<1x192x128xbf16>
        %30 = vector.shape_cast %29 : vector<1x192x128xbf16> to vector<192x128xbf16>
        %cst_31 = arith.constant dense<0.000000e+00> : vector<128x128xf32>
        %31 = tpu.matmul %28, %30, %cst_31 {dimension_numbers = #tpu.dot_dimension_numbers<[1], [0], [0], [1], [0, 0, 1, 1], [], []>} : vector<128x192xbf16>, vector<192x128xbf16>, vector<128x128xf32> -> vector<128x128xf32>
        %32 = arith.addf %23, %31 : vector<128x128xf32>
        %c2_i32 = arith.constant 2 : i32
        %33 = arith.addi %13, %c2_i32 : i32
        %34 = arith.index_cast %33 : i32 to index
        %c0_32 = arith.constant 0 : index
        %c0_33 = arith.constant 0 : index
        %35 = vector.load %arg5[%34, %c0_32, %c0_33] : memref<30x34x192xf32, #tpu.memory_space<vmem>>, vector<4x32x192xf32>
        %36 = vector.shape_cast %35 : vector<4x32x192xf32> to vector<128x192xf32>
        %37 = arith.truncf %36 : vector<128x192xf32> to vector<128x192xbf16>
        %c2 = arith.constant 2 : index
        %c0_34 = arith.constant 0 : index
        %c0_35 = arith.constant 0 : index
        %38 = vector.load %arg2[%c2, %c0_34, %c0_35] : memref<3x192x128xbf16, #tpu.memory_space<vmem>>, vector<1x192x128xbf16>
        %39 = vector.shape_cast %38 : vector<1x192x128xbf16> to vector<192x128xbf16>
        %cst_36 = arith.constant dense<0.000000e+00> : vector<128x128xf32>
        %40 = tpu.matmul %37, %39, %cst_36 {dimension_numbers = #tpu.dot_dimension_numbers<[1], [0], [0], [1], [0, 0, 1, 1], [], []>} : vector<128x192xbf16>, vector<192x128xbf16>, vector<128x128xf32> -> vector<128x128xf32>
        %41 = arith.addf %32, %40 : vector<128x128xf32>
        %42 = vector.shape_cast %41 : vector<128x128xf32> to vector<2x2x32x128xf32>
        %43 = vector.extract_strided_slice %42 {offsets = [0, 0, 0, 0], sizes = [2, 1, 32, 128], strides = [1, 1, 1, 1]} : vector<2x2x32x128xf32> to vector<2x1x32x128xf32>
        %44 = vector.shape_cast %43 : vector<2x1x32x128xf32> to vector<2x32x128xf32>
        %45 = vector.extract_strided_slice %42 {offsets = [0, 1, 0, 0], sizes = [2, 1, 32, 128], strides = [1, 1, 1, 1]} : vector<2x2x32x128xf32> to vector<2x1x32x128xf32>
        %46 = vector.shape_cast %45 : vector<2x1x32x128xf32> to vector<2x32x128xf32>
        %47 = arith.maximumf %44, %46 : vector<2x32x128xf32>
        %48 = vector.shape_cast %47 : vector<2x32x128xf32> to vector<2x16x2x128xf32>
        %49 = vector.extract_strided_slice %48 {offsets = [0, 0, 0, 0], sizes = [2, 16, 1, 128], strides = [1, 1, 1, 1]} : vector<2x16x2x128xf32> to vector<2x16x1x128xf32>
        %50 = vector.shape_cast %49 : vector<2x16x1x128xf32> to vector<2x16x128xf32>
        %51 = vector.extract_strided_slice %48 {offsets = [0, 0, 1, 0], sizes = [2, 16, 1, 128], strides = [1, 1, 1, 1]} : vector<2x16x2x128xf32> to vector<2x16x1x128xf32>
        %52 = vector.shape_cast %51 : vector<2x16x1x128xf32> to vector<2x16x128xf32>
        %53 = arith.maximumf %50, %52 : vector<2x16x128xf32>
        %54 = vector.extract_strided_slice %53 {offsets = [0, 0, 0], sizes = [2, 14, 128], strides = [1, 1, 1]} : vector<2x16x128xf32> to vector<2x14x128xf32>
        %55 = vector.shape_cast %2 : vector<1x128xf32> to vector<1x1x128xf32>
        %56 = vector.broadcast %55 : vector<1x1x128xf32> to vector<2x14x128xf32>
        %57 = arith.addf %54, %56 : vector<2x14x128xf32>
        %cst_37 = arith.constant 0.000000e+00 : f32
        %58 = vector.broadcast %cst_37 : f32 to vector<2x14x128xf32>
        %59 = arith.maximumf %57, %58 : vector<2x14x128xf32>
        %60 = arith.truncf %59 : vector<2x14x128xf32> to vector<2x14x128xbf16>
        %c2_i32_38 = arith.constant 2 : i32
        %61 = arith.muli %c2_i32_38, %arg7 : i32
        %62 = arith.index_cast %arg6 : i32 to index
        %63 = arith.index_cast %61 : i32 to index
        %c0_39 = arith.constant 0 : index
        %c0_40 = arith.constant 0 : index
        %64 = vector.load %arg4[%62, %63, %c0_39, %c0_40] : memref<8x14x14x128xbf16, #tpu.memory_space<vmem>>, vector<1x2x14x128xbf16>
        %65 = vector.shape_cast %64 : vector<1x2x14x128xbf16> to vector<2x14x128xbf16>
        %66 = vector.shape_cast %60 : vector<2x14x128xbf16> to vector<1x2x14x128xbf16>
        tpu.vector_store %arg4[%62, %63, %c0_39, %c0_40], %66 {strides = array<i32>} : memref<8x14x14x128xbf16, #tpu.memory_space<vmem>>, vector<1x2x14x128xbf16>,
      }
      %c7_i32_16 = arith.constant 7 : i32
    }
    %c8_i32_4 = arith.constant 8 : i32
    return
  }
  func.func @transform_0(%arg0: i32) -> (i32, i32, i32, i32) {
    %c0_i32 = arith.constant 0 : i32
    %c0_i32_0 = arith.constant 0 : i32
    %c0_i32_1 = arith.constant 0 : i32
    %c0_i32_2 = arith.constant 0 : i32
    return %arg0, %c0_i32, %c0_i32_0, %c0_i32_1 : i32, i32, i32, i32
  }
  func.func @transform_1(%arg0: i32) -> (i32, i32, i32) {
    %c0_i32 = arith.constant 0 : i32
    %c0_i32_0 = arith.constant 0 : i32
    %c0_i32_1 = arith.constant 0 : i32
    %c0_i32_2 = arith.constant 0 : i32
    return %c0_i32, %c0_i32_0, %c0_i32_1 : i32, i32, i32
  }
  func.func @transform_2(%arg0: i32) -> (i32, i32) {
    %c0_i32 = arith.constant 0 : i32
    %c0_i32_0 = arith.constant 0 : i32
    %c0_i32_1 = arith.constant 0 : i32
    return %c0_i32, %c0_i32_0 : i32, i32
  }
  func.func @transform_3(%arg0: i32) -> (i32, i32, i32, i32) {
    %c0_i32 = arith.constant 0 : i32
    %c0_i32_0 = arith.constant 0 : i32
    %c0_i32_1 = arith.constant 0 : i32
    %c0_i32_2 = arith.constant 0 : i32
    return %arg0, %c0_i32, %c0_i32_0, %c0_i32_1 : i32, i32, i32, i32
  }
}

module attributes {stable_mosaic.version = 11 : i64} {
  func.func @_mm_kernel_acc(%arg0: i32, %arg1: i32, %arg2: i32, %arg3: memref<8x1792xbf16, #tpu.memory_space<vmem>>, %arg4: memref<1792x512xbf16, #tpu.memory_space<vmem>>, %arg5: memref<1x512xf32, #tpu.memory_space<vmem>>, %arg6: memref<8x512xbf16, #tpu.memory_space<vmem>>, %arg7: memref<8x512xf32, #tpu.memory_space<vmem>>) attributes {dimension_semantics = [#tpu.dimension_semantics<parallel>, #tpu.dimension_semantics<parallel>, #tpu.dimension_semantics<arbitrary>], iteration_bounds = array<i64: 1, 2, 14>, scalar_prefetch = 0 : i64, scratch_operands = 1 : i64, tpu.core_type = #tpu.core_type<tc>, window_params = [{transform_indices = @transform_0, window_bounds = array<i64: 8, 1792>}, {transform_indices = @transform_1, window_bounds = array<i64: 1792, 512>}, {transform_indices = @transform_2, window_bounds = array<i64: 1, 512>}, {transform_indices = @transform_3, window_bounds = array<i64: 8, 512>}]} {
    %c0_i32 = arith.constant 0 : i32
    %0 = arith.cmpi eq, %arg2, %c0_i32 : i32
    %1 = arith.extui %0 : i1 to i32
    %c0_i32_0 = arith.constant 0 : i32
    %2 = arith.cmpi ne, %1, %c0_i32_0 : i32
    scf.if %2 {
      %cst_9 = arith.constant 0.000000e+00 : f32
      %12 = vector.broadcast %cst_9 : f32 to vector<8x512xf32>
      %c0_10 = arith.constant 0 : index
      %c0_11 = arith.constant 0 : index
      %13 = vector.load %arg7[%c0_10, %c0_11] : memref<8x512xf32, #tpu.memory_space<vmem>>, vector<8x512xf32>
      tpu.vector_store %arg7[%c0_10, %c0_11], %12 {strides = array<i32>} : memref<8x512xf32, #tpu.memory_space<vmem>>, vector<8x512xf32>,
    } else {
    }
    %c0 = arith.constant 0 : index
    %c0_1 = arith.constant 0 : index
    %3 = vector.load %arg7[%c0, %c0_1] : memref<8x512xf32, #tpu.memory_space<vmem>>, vector<8x512xf32>
    %c0_2 = arith.constant 0 : index
    %c0_3 = arith.constant 0 : index
    %4 = vector.load %arg3[%c0_2, %c0_3] : memref<8x1792xbf16, #tpu.memory_space<vmem>>, vector<8x1792xbf16>
    %c0_4 = arith.constant 0 : index
    %c0_5 = arith.constant 0 : index
    %5 = vector.load %arg4[%c0_4, %c0_5] : memref<1792x512xbf16, #tpu.memory_space<vmem>>, vector<1792x512xbf16>
    %cst = arith.constant dense<0.000000e+00> : vector<8x512xf32>
    %6 = tpu.matmul %4, %5, %cst {dimension_numbers = #tpu.dot_dimension_numbers<[1], [0], [0], [1], [0, 0, 1, 1], [], []>} : vector<8x1792xbf16>, vector<1792x512xbf16>, vector<8x512xf32> -> vector<8x512xf32>
    %7 = arith.addf %3, %6 : vector<8x512xf32>
    %c0_6 = arith.constant 0 : index
    %c0_7 = arith.constant 0 : index
    %8 = vector.load %arg7[%c0_6, %c0_7] : memref<8x512xf32, #tpu.memory_space<vmem>>, vector<8x512xf32>
    tpu.vector_store %arg7[%c0_6, %c0_7], %7 {strides = array<i32>} : memref<8x512xf32, #tpu.memory_space<vmem>>, vector<8x512xf32>,
    %c13_i32 = arith.constant 13 : i32
    %9 = arith.cmpi eq, %arg2, %c13_i32 : i32
    %10 = arith.extui %9 : i1 to i32
    %c0_i32_8 = arith.constant 0 : i32
    %11 = arith.cmpi ne, %10, %c0_i32_8 : i32
    scf.if %11 {
      %c0_9 = arith.constant 0 : index
      %c0_10 = arith.constant 0 : index
      %12 = vector.load %arg7[%c0_9, %c0_10] : memref<8x512xf32, #tpu.memory_space<vmem>>, vector<8x512xf32>
      %c0_11 = arith.constant 0 : index
      %c0_12 = arith.constant 0 : index
      %13 = vector.load %arg5[%c0_11, %c0_12] : memref<1x512xf32, #tpu.memory_space<vmem>>, vector<1x512xf32>
      %14 = vector.broadcast %13 : vector<1x512xf32> to vector<8x512xf32>
      %15 = arith.addf %12, %14 : vector<8x512xf32>
      %cst_13 = arith.constant 0.000000e+00 : f32
      %16 = vector.broadcast %cst_13 : f32 to vector<8x512xf32>
      %17 = arith.maximumf %15, %16 : vector<8x512xf32>
      %18 = arith.truncf %17 : vector<8x512xf32> to vector<8x512xbf16>
      %c0_14 = arith.constant 0 : index
      %c0_15 = arith.constant 0 : index
      %19 = vector.load %arg6[%c0_14, %c0_15] : memref<8x512xbf16, #tpu.memory_space<vmem>>, vector<8x512xbf16>
      tpu.vector_store %arg6[%c0_14, %c0_15], %18 {strides = array<i32>} : memref<8x512xbf16, #tpu.memory_space<vmem>>, vector<8x512xbf16>,
    } else {
    }
    return
  }
  func.func @transform_0(%arg0: i32, %arg1: i32, %arg2: i32) -> (i32, i32) {
    %c0_i32 = arith.constant 0 : i32
    return %arg0, %arg2 : i32, i32
  }
  func.func @transform_1(%arg0: i32, %arg1: i32, %arg2: i32) -> (i32, i32) {
    %c0_i32 = arith.constant 0 : i32
    return %arg2, %arg1 : i32, i32
  }
  func.func @transform_2(%arg0: i32, %arg1: i32, %arg2: i32) -> (i32, i32) {
    %c0_i32 = arith.constant 0 : i32
    %c0_i32_0 = arith.constant 0 : i32
    return %c0_i32, %arg1 : i32, i32
  }
  func.func @transform_3(%arg0: i32, %arg1: i32, %arg2: i32) -> (i32, i32) {
    %c0_i32 = arith.constant 0 : i32
    return %arg0, %arg1 : i32, i32
  }
}

module attributes {stable_mosaic.version = 11 : i64} {
  func.func @_mm_kernel_single(%arg0: i32, %arg1: i32, %arg2: memref<8x1024xbf16, #tpu.memory_space<vmem>>, %arg3: memref<1024x128xbf16, #tpu.memory_space<vmem>>, %arg4: memref<1x128xf32, #tpu.memory_space<vmem>>, %arg5: memref<8x128xf32, #tpu.memory_space<vmem>>) attributes {dimension_semantics = [#tpu.dimension_semantics<parallel>, #tpu.dimension_semantics<parallel>], iteration_bounds = array<i64: 1, 1>, scalar_prefetch = 0 : i64, scratch_operands = 0 : i64, tpu.core_type = #tpu.core_type<tc>, window_params = [{transform_indices = @transform_0, window_bounds = array<i64: 8, 1024>}, {transform_indices = @transform_1, window_bounds = array<i64: 1024, 128>}, {transform_indices = @transform_2, window_bounds = array<i64: 1, 128>}, {transform_indices = @transform_3, window_bounds = array<i64: 8, 128>}]} {
    %c0 = arith.constant 0 : index
    %c0_0 = arith.constant 0 : index
    %0 = vector.load %arg2[%c0, %c0_0] : memref<8x1024xbf16, #tpu.memory_space<vmem>>, vector<8x1024xbf16>
    %c0_1 = arith.constant 0 : index
    %c0_2 = arith.constant 0 : index
    %1 = vector.load %arg3[%c0_1, %c0_2] : memref<1024x128xbf16, #tpu.memory_space<vmem>>, vector<1024x128xbf16>
    %cst = arith.constant dense<0.000000e+00> : vector<8x128xf32>
    %2 = tpu.matmul %0, %1, %cst {dimension_numbers = #tpu.dot_dimension_numbers<[1], [0], [0], [1], [0, 0, 1, 1], [], []>} : vector<8x1024xbf16>, vector<1024x128xbf16>, vector<8x128xf32> -> vector<8x128xf32>
    %c0_3 = arith.constant 0 : index
    %c0_4 = arith.constant 0 : index
    %3 = vector.load %arg4[%c0_3, %c0_4] : memref<1x128xf32, #tpu.memory_space<vmem>>, vector<1x128xf32>
    %4 = vector.broadcast %3 : vector<1x128xf32> to vector<8x128xf32>
    %5 = arith.addf %2, %4 : vector<8x128xf32>
    %c0_5 = arith.constant 0 : index
    %c0_6 = arith.constant 0 : index
    %6 = vector.load %arg5[%c0_5, %c0_6] : memref<8x128xf32, #tpu.memory_space<vmem>>, vector<8x128xf32>
    tpu.vector_store %arg5[%c0_5, %c0_6], %5 {strides = array<i32>} : memref<8x128xf32, #tpu.memory_space<vmem>>, vector<8x128xf32>,
    return
  }
  func.func @transform_0(%arg0: i32, %arg1: i32) -> (i32, i32) {
    %c0_i32 = arith.constant 0 : i32
    %c0_i32_0 = arith.constant 0 : i32
    return %arg0, %c0_i32 : i32, i32
  }
  func.func @transform_1(%arg0: i32, %arg1: i32) -> (i32, i32) {
    %c0_i32 = arith.constant 0 : i32
    %c0_i32_0 = arith.constant 0 : i32
    return %c0_i32, %arg1 : i32, i32
  }
  func.func @transform_2(%arg0: i32, %arg1: i32) -> (i32, i32) {
    %c0_i32 = arith.constant 0 : i32
    %c0_i32_0 = arith.constant 0 : i32
    return %c0_i32, %arg1 : i32, i32
  }
  func.func @transform_3(%arg0: i32, %arg1: i32) -> (i32, i32) {
    %c0_i32 = arith.constant 0 : i32
    return %arg0, %arg1 : i32, i32
  }
}

</mosaic_0001>

<bundles_post_ra>
// kernel: normal_cnn_forward.4
= control target key start
LH: loop header
LB: loop body
LE: loop exit
PB: predicated region body
PF: predicated region fallthrough
CT: control target
= control target key end

     0   :  { %s8317_s12 = smov 0   ;;  %s8319_s13 = smov 0   ;;  %s9947_s0 = inlined_call_operand.vmem [shape: bf16[6272,9], index: 0, kind: input, shape index: {}]   ;;  %s9948_s1 = inlined_call_operand.vmem [shape: bf16[9,64], index: 1, kind: input, shape index: {}]   ;;  %s9949_s2 = inlined_call_operand.vmem [shape: f32[1,64], index: 2, kind: input, shape index: {}]   ;;  %s9950_s3 = inlined_call_operand.vmem [shape: bf16[6272,64], index: 3, kind: output, shape index: {}]  }
   0x1   :  { %s8321_s14 = smov 0  }
   0x2 LB: > { %s25_s15 = sadd.s32 1, %s8290_s13  ;;  %p6270_p0 = scmp.ge.s32.totalorder %s8294_s14, 1  ;;  %s8294_s14 = sphi %s8321_s14, %s13_s14   ;;  %s8290_s13 = sphi %s8319_s13, %s9952_s13   ;;  %s8286_s12 = sphi %s8317_s12, %s9951_s12  }
   0x3   : > { %p27_p1 = scmp.ge.s32.totalorder %s25_s15, 2  ;;  %p169_p2 = scmp.lt.s32.totalorder %s8294_s14, 3 }
   0x5   : > { %s9954_s15 = smov (%p27_p1, %s25_s15), 0  ;;  %p170_p3 = pnand %p6270_p0, %p169_p2 }
   0x6   : > { %v8071_v0 = vld [vmem:[%s9948_s1] sm:$0x1f] (!%p170_p3)   ;;  %vm2201_vm0 = vcmask (!%p170_p3), 1043456   ;;  %vm2202_vm1 = vcmask (!%p170_p3), 1044480   ;;  %s203_s18 = smul.u32 (!%p170_p3), 392, %s8286_s12  ;;  %v8296_v1 = vmov (!%p170_p3), 65535  }
   0x7   : > { %173 = sbr.rel (%p170_p3) target bundleno = 625 (0x271), region = 32  ;;  %v2203_v2 = vsel (!%p170_p3), %vm2201_vm0, 4294967295, %v8296_v1  ;;  %vm1612_vm2 = vcmask (!%p170_p3), 72704   ;;  %vm5769_vm3 = vcmask (!%p170_p3), 519168  }
   0x8   : > { %v2204_v3 = vsel (!%p170_p3), %vm2202_vm1, %v2203_v2, 0  ;;  %p204_p4 = scmp.lt.s32.totalorder (!%p170_p3), %s203_s18, 783 }
   0x9   : > { %v2206_v4 = vand.u32 (!%p170_p3), %v8071_v0, %v2204_v3 }
   0xb   : > { %7650 = vmatprep.subr.bf16.mxu0 (!%p170_p3), %v2206_v4  ;;  %8044 = vmatprep.subr.bf16.mxu1 (!%p170_p3), %v2206_v4 }
   0xc   : > { %7651 = vmatpush3.bf16.msra.mxu0 (!%p170_p3), %v2206_v4  ;;  %8045 = vmatpush3.bf16.msra.mxu1 (!%p170_p3), %v2206_v4 }
   0xe   : > { %s9956_s18 = smov (!%p204_p4, %s203_s18), 783 }
   0xf   : > { %s6271_s19 = sshll.u32 %s9956_s18, 2 }
  0x10   : > { %s8346_s22 = scalar_lea.vmem %s9947_s0, %s6271_s19  ;;  %s8587_s27 = scalar_lea.vmem %s9950_s3, %s6271_s19 }
  0x11   : > { %v8072_v5 = vld [vmem:[%s8346_s22] sm:$0xff]   ;;  %v8073_v6 = vld [vmem:[%s8346_s22 + $0x310] sm:$0xff]   ;;  %v8074_v7 = vld [vmem:[%s8346_s22 + $0x8] sm:$0xff]  }
  0x12   : > { %7652 = vmatprep.mubr.msk.bf16.mxu0 %vm1612_vm2, %v8072_v5  ;;  %7848 = vmatprep.mubr.msk.bf16.mxu1 %vm1612_vm2, %v8073_v6  ;;  %v8075_v8 = vld [vmem:[%s8346_s22 + $0x318] sm:$0xff]   ;;  %v8076_v9 = vld [vmem:[%s8346_s22 + $0x10] sm:$0xff]   ;;  %v8077_v10 = vld [vmem:[%s8346_s22 + $0x320] sm:$0xff]  }
  0x13   : > { %7653 = vmatmul.mubr.msk.bf16.vlgmr.msra.gmra.mrb[0].mxu0 %vm1612_vm2, %v8074_v7  ;;  %7849 = vmatmul.mubr.msk.bf16.vlgmr.msra.gmra.mrb[0].mxu1 %vm1612_vm2, %v8075_v8  ;;  %v8078_v11 = vld [vmem:[%s8346_s22 + $0x18] sm:$0xff]   ;;  %v8079_v12 = vld [vmem:[%s8346_s22 + $0x328] sm:$0xff]   ;;  %v8080_v13 = vld [vmem:[%s8346_s22 + $0x20] sm:$0xff]  }
  0x14   : > { %7656 = vmatprep.mubr.msk.bf16.mxu0 %vm1612_vm2, %v8076_v9  ;;  %7852 = vmatprep.mubr.msk.bf16.mxu1 %vm1612_vm2, %v8077_v10  ;;  %v8081_v14 = vld [vmem:[%s8346_s22 + $0x330] sm:$0xff]   ;;  %v8082_v15 = vld [vmem:[%s8346_s22 + $0x28] sm:$0xff]   ;;  %v8083_v16 = vld [vmem:[%s8346_s22 + $0x338] sm:$0xff]  }
  0x15   : > { %v8084_v17 = vld [vmem:[%s8346_s22 + $0x30] sm:$0xff]   ;;  %v8085_v18 = vld [vmem:[%s8346_s22 + $0x340] sm:$0xff]   ;;  %v8086_v19 = vld [vmem:[%s8346_s22 + $0x38] sm:$0xff]  }
  0x16   : > { %v8087_v20 = vld [vmem:[%s8346_s22 + $0x348] sm:$0xff]   ;;  %v8088_v21 = vld [vmem:[%s8346_s22 + $0x40] sm:$0xff]   ;;  %v8089_v22 = vld [vmem:[%s8346_s22 + $0x350] sm:$0xff]  }
  0x17   : > { %v8090_v23 = vld [vmem:[%s8346_s22 + $0x48] sm:$0xff]   ;;  %v8091_v24 = vld [vmem:[%s8346_s22 + $0x358] sm:$0xff]   ;;  %v8092_v25 = vld [vmem:[%s8346_s22 + $0x50] sm:$0xff]  }
  0x18   : > { %v8093_v26 = vld [vmem:[%s8346_s22 + $0x360] sm:$0xff]   ;;  %v8094_v27 = vld [vmem:[%s8346_s22 + $0x58] sm:$0xff]   ;;  %v8095_v28 = vld [vmem:[%s8346_s22 + $0x368] sm:$0xff]  }
  0x19   : > { %v8096_v29 = vld [vmem:[%s8346_s22 + $0x60] sm:$0xff]   ;;  %v8097_v30 = vld [vmem:[%s8346_s22 + $0x370] sm:$0xff]   ;;  %v8098_v31 = vld [vmem:[%s8346_s22 + $0x68] sm:$0xff]  }
  0x1a   : > { %v8099_v32 = vld [vmem:[%s8346_s22 + $0x378] sm:$0xff]   ;;  %v8100_v33 = vld [vmem:[%s8346_s22 + $0x70] sm:$0xff]   ;;  %v8101_v34 = vld [vmem:[%s8346_s22 + $0x380] sm:$0xff]  }
  0x1b   : > { %7657 = vmatmul.mubr.msk.bf16.gmra.mrb[4].mxu0 %vm1612_vm2, %v8078_v11  ;;  %7853 = vmatmul.mubr.msk.bf16.gmra.mrb[4].mxu1 %vm1612_vm2, %v8079_v12  ;;  %v8102_v35 = vld [vmem:[%s8346_s22 + $0x78] sm:$0xff]   ;;  %v8103_v36 = vld [vmem:[%s8346_s22 + $0x388] sm:$0xff]   ;;  %v8104_v37 = vld [vmem:[%s8346_s22 + $0x80] sm:$0xff]  }
  0x1c   : > { %7660 = vmatprep.mubr.msk.bf16.mxu0 %vm1612_vm2, %v8080_v13  ;;  %7856 = vmatprep.mubr.msk.bf16.mxu1 %vm1612_vm2, %v8081_v14  ;;  %v8105_v38 = vld [vmem:[%s8346_s22 + $0x390] sm:$0xff]   ;;  %v8106_v39 = vld [vmem:[%s8346_s22 + $0x88] sm:$0xff]   ;;  %v8107_v40 = vld [vmem:[%s8346_s22 + $0x398] sm:$0xff]  }
  0x1d   : > { %v8108_v41 = vld [vmem:[%s8346_s22 + $0x90] sm:$0xff]   ;;  %v8109_v42 = vld [vmem:[%s8346_s22 + $0x3a0] sm:$0xff]   ;;  %v8110_v43 = vld [vmem:[%s8346_s22 + $0x98] sm:$0xff]  }
  0x1e   : > { %v8111_v44 = vld [vmem:[%s8346_s22 + $0x3a8] sm:$0xff]   ;;  %v8112_v45 = vld [vmem:[%s8346_s22 + $0xa0] sm:$0xff]   ;;  %v8113_v46 = vld [vmem:[%s8346_s22 + $0x3b0] sm:$0xff]  }
  0x1f   : > { %v8114_v47 = vld [vmem:[%s8346_s22 + $0xa8] sm:$0xff]   ;;  %v8115_v48 = vld [vmem:[%s8346_s22 + $0x3b8] sm:$0xff]   ;;  %v8116_v49 = vld [vmem:[%s8346_s22 + $0xb0] sm:$0xff]  }
  0x20   : > { %v8117_v50 = vld [vmem:[%s8346_s22 + $0x3c0] sm:$0xff]   ;;  %v8118_v51 = vld [vmem:[%s8346_s22 + $0xb8] sm:$0xff]   ;;  %v8119_v52 = vld [vmem:[%s8346_s22 + $0x3c8] sm:$0xff]  }
  0x21   : > { %v8120_v53 = vld [vmem:[%s8346_s22 + $0xc0] sm:$0xff]   ;;  %v8121_v54 = vld [vmem:[%s8346_s22 + $0x3d0] sm:$0xff]   ;;  %v8122_v55 = vld [vmem:[%s8346_s22 + $0xc8] sm:$0xff]  }
  0x22   : > { %v8123_v56 = vld [vmem:[%s8346_s22 + $0x3d8] sm:$0xff]   ;;  %v8124_v57 = vld [vmem:[%s8346_s22 + $0xd0] sm:$0xff]   ;;  %v8125_v58 = vld [vmem:[%s8346_s22 + $0x3e0] sm:$0xff]  }
  0x23   : > { %7661 = vmatmul.mubr.msk.bf16.gmra.mrb[8].mxu0 %vm1612_vm2, %v8082_v15  ;;  %7857 = vmatmul.mubr.msk.bf16.gmra.mrb[8].mxu1 %vm1612_vm2, %v8083_v16  ;;  %v8126_v59 = vld [vmem:[%s8346_s22 + $0xd8] sm:$0xff]   ;;  %v8127_v60 = vld [vmem:[%s8346_s22 + $0x3e8] sm:$0xff]   ;;  %v8128_v61 = vld [vmem:[%s8346_s22 + $0xe0] sm:$0xff]  }
  0x24   : > { %7664 = vmatprep.mubr.msk.bf16.mxu0 %vm1612_vm2, %v8084_v17  ;;  %7860 = vmatprep.mubr.msk.bf16.mxu1 %vm1612_vm2, %v8085_v18  ;;  %v8129_v62 = vld [vmem:[%s8346_s22 + $0x3f0] sm:$0xff]   ;;  %v8130_v63 = vld [vmem:[%s8346_s22 + $0xe8] sm:$0xff]   ;;  %v8131_v0 = vld [vmem:[%s8346_s22 + $0x3f8] sm:$0xff]  }
  0x25   : > { %v8132_v1 = vld [vmem:[%s8346_s22 + $0xf0] sm:$0xff]   ;;  %v8133_v2 = vld [vmem:[%s8346_s22 + $0x400] sm:$0xff]   ;;  %v8134_v3 = vld [vmem:[%s8346_s22 + $0xf8] sm:$0xff]  }
  0x26   : > { %v8135_v4 = vld [vmem:[%s8346_s22 + $0x408] sm:$0xff]   ;;  %v8136_v5 = vld [vmem:[%s8346_s22 + $0x100] sm:$0xff]   ;;  %v8137_v6 = vld [vmem:[%s8346_s22 + $0x410] sm:$0xff]  }
  0x27   : > { %v8138_v7 = vld [vmem:[%s8346_s22 + $0x108] sm:$0xff]   ;;  %v8139_v8 = vld [vmem:[%s8346_s22 + $0x418] sm:$0xff]   ;;  %v8140_v9 = vld [vmem:[%s8346_s22 + $0x110] sm:$0xff]  }
  0x28   : > { %v8141_v10 = vld [vmem:[%s8346_s22 + $0x420] sm:$0xff]   ;;  %v8142_v11 = vld [vmem:[%s8346_s22 + $0x118] sm:$0xff]   ;;  %v8143_v12 = vld [vmem:[%s8346_s22 + $0x428] sm:$0xff]  }
  0x29   : > { %v8144_v13 = vld [vmem:[%s8346_s22 + $0x120] sm:$0xff]   ;;  %v8145_v14 = vld [vmem:[%s8346_s22 + $0x430] sm:$0xff]   ;;  %v8146_v15 = vld [vmem:[%s8346_s22 + $0x128] sm:$0xff]  }
  0x2a   : > { %v8147_v16 = vld [vmem:[%s8346_s22 + $0x438] sm:$0xff]   ;;  %v8148_v17 = vld [vmem:[%s8346_s22 + $0x130] sm:$0xff]   ;;  %v8149_v18 = vld [vmem:[%s8346_s22 + $0x440] sm:$0xff]  }
  0x2b   : > { %7665 = vmatmul.mubr.msk.bf16.gmra.mrb[12].mxu0 %vm1612_vm2, %v8086_v19  ;;  %7861 = vmatmul.mubr.msk.bf16.gmra.mrb[12].mxu1 %vm1612_vm2, %v8087_v20  ;;  %v8150_v19 = vld [vmem:[%s8346_s22 + $0x138] sm:$0xff]   ;;  %v8151_v20 = vld [vmem:[%s8346_s22 + $0x448] sm:$0xff]  }
  0x2c   : > { %7668 = vmatprep.mubr.msk.bf16.mxu0 %vm1612_vm2, %v8088_v21  ;;  %7864 = vmatprep.mubr.msk.bf16.mxu1 %vm1612_vm2, %v8089_v22  ;;  %v8152_v21 = vld [vmem:[%s8346_s22 + $0x140] sm:$0xff]   ;;  %v8153_v22 = vld [vmem:[%s8346_s22 + $0x450] sm:$0xff]  }
  0x33   : > { %7669 = vmatmul.mubr.msk.bf16.gmra.mrb[16].mxu0 %vm1612_vm2, %v8090_v23  ;;  %7865 = vmatmul.mubr.msk.bf16.gmra.mrb[16].mxu1 %vm1612_vm2, %v8091_v24  ;;  %v8154_v23 = vld [vmem:[%s8346_s22 + $0x148] sm:$0xff]   ;;  %v8155_v24 = vld [vmem:[%s8346_s22 + $0x458] sm:$0xff]  }
  0x34   : > { %7672 = vmatprep.mubr.msk.bf16.mxu0 %vm1612_vm2, %v8092_v25  ;;  %7868 = vmatprep.mubr.msk.bf16.mxu1 %vm1612_vm2, %v8093_v26  ;;  %v8156_v25 = vld [vmem:[%s8346_s22 + $0x150] sm:$0xff]   ;;  %v8157_v26 = vld [vmem:[%s8346_s22 + $0x460] sm:$0xff]  }
  0x3b   : > { %7673 = vmatmul.mubr.msk.bf16.gmra.mrb[20].mxu0 %vm1612_vm2, %v8094_v27  ;;  %7869 = vmatmul.mubr.msk.bf16.gmra.mrb[20].mxu1 %vm1612_vm2, %v8095_v28  ;;  %v8158_v27 = vld [vmem:[%s8346_s22 + $0x158] sm:$0xff]   ;;  %v8159_v28 = vld [vmem:[%s8346_s22 + $0x468] sm:$0xff]  }
  0x3c   : > { %7676 = vmatprep.mubr.msk.bf16.mxu0 %vm1612_vm2, %v8096_v29  ;;  %7872 = vmatprep.mubr.msk.bf16.mxu1 %vm1612_vm2, %v8097_v30  ;;  %v8160_v29 = vld [vmem:[%s8346_s22 + $0x160] sm:$0xff]   ;;  %v8161_v30 = vld [vmem:[%s8346_s22 + $0x470] sm:$0xff]  }
  0x43   : > { %7677 = vmatmul.mubr.msk.bf16.gmra.mrb[24].mxu0 %vm1612_vm2, %v8098_v31  ;;  %7873 = vmatmul.mubr.msk.bf16.gmra.mrb[24].mxu1 %vm1612_vm2, %v8099_v32  ;;  %v8162_v31 = vld [vmem:[%s8346_s22 + $0x168] sm:$0xff]   ;;  %v8163_v32 = vld [vmem:[%s8346_s22 + $0x478] sm:$0xff]  }
  0x44   : > { %7680 = vmatprep.mubr.msk.bf16.mxu0 %vm1612_vm2, %v8100_v33  ;;  %7876 = vmatprep.mubr.msk.bf16.mxu1 %vm1612_vm2, %v8101_v34  ;;  %v8164_v33 = vld [vmem:[%s8346_s22 + $0x170] sm:$0xff]   ;;  %v8165_v34 = vld [vmem:[%s8346_s22 + $0x480] sm:$0xff]  }
  0x4b   : > { %7681 = vmatmul.mubr.msk.bf16.gmra.mrb[28].mxu0 %vm1612_vm2, %v8102_v35  ;;  %7877 = vmatmul.mubr.msk.bf16.gmra.mrb[28].mxu1 %vm1612_vm2, %v8103_v36  ;;  %v8166_v35 = vld [vmem:[%s8346_s22 + $0x178] sm:$0xff]   ;;  %v8167_v36 = vld [vmem:[%s8346_s22 + $0x488] sm:$0xff]  }
  0x4c   : > { %7684 = vmatprep.mubr.msk.bf16.mxu0 %vm1612_vm2, %v8104_v37  ;;  %7880 = vmatprep.mubr.msk.bf16.mxu1 %vm1612_vm2, %v8105_v38  ;;  %v8168_v37 = vld [vmem:[%s8346_s22 + $0x180] sm:$0xff]   ;;  %v8169_v38 = vld [vmem:[%s8346_s22 + $0x490] sm:$0xff]  }
  0x53   : > { %7685 = vmatmul.mubr.msk.bf16.gmra.mrb[32].mxu0 %vm1612_vm2, %v8106_v39  ;;  %7881 = vmatmul.mubr.msk.bf16.gmra.mrb[32].mxu1 %vm1612_vm2, %v8107_v40  ;;  %v8170_v39 = vld [vmem:[%s8346_s22 + $0x188] sm:$0xff]   ;;  %v8171_v40 = vld [vmem:[%s8346_s22 + $0x498] sm:$0xff]  }
  0x54   : > { %7688 = vmatprep.mubr.msk.bf16.mxu0 %vm1612_vm2, %v8108_v41  ;;  %7884 = vmatprep.mubr.msk.bf16.mxu1 %vm1612_vm2, %v8109_v42  ;;  %v8172_v41 = vld [vmem:[%s8346_s22 + $0x190] sm:$0xff]   ;;  %v8173_v42 = vld [vmem:[%s8346_s22 + $0x4a0] sm:$0xff]  }
  0x5b   : > { %7689 = vmatmul.mubr.msk.bf16.gmra.mrb[36].mxu0 %vm1612_vm2, %v8110_v43  ;;  %7885 = vmatmul.mubr.msk.bf16.gmra.mrb[36].mxu1 %vm1612_vm2, %v8111_v44  ;;  %v8174_v43 = vld [vmem:[%s8346_s22 + $0x198] sm:$0xff]   ;;  %v8175_v44 = vld [vmem:[%s8346_s22 + $0x4a8] sm:$0xff]  }
  0x5c   : > { %7692 = vmatprep.mubr.msk.bf16.mxu0 %vm1612_vm2, %v8112_v45  ;;  %7888 = vmatprep.mubr.msk.bf16.mxu1 %vm1612_vm2, %v8113_v46  ;;  %v8176_v45 = vld [vmem:[%s8346_s22 + $0x1a0] sm:$0xff]   ;;  %v8177_v46 = vld [vmem:[%s8346_s22 + $0x4b0] sm:$0xff]  }
  0x63   : > { %7693 = vmatmul.mubr.msk.bf16.gmra.mrb[40].mxu0 %vm1612_vm2, %v8114_v47  ;;  %7889 = vmatmul.mubr.msk.bf16.gmra.mrb[40].mxu1 %vm1612_vm2, %v8115_v48  ;;  %v8178_v47 = vld [vmem:[%s8346_s22 + $0x1a8] sm:$0xff]   ;;  %v8179_v48 = vld [vmem:[%s8346_s22 + $0x4b8] sm:$0xff]  }
  0x64   : > { %7696 = vmatprep.mubr.msk.bf16.mxu0 %vm1612_vm2, %v8116_v49  ;;  %7892 = vmatprep.mubr.msk.bf16.mxu1 %vm1612_vm2, %v8117_v50  ;;  %v8180_v49 = vld [vmem:[%s8346_s22 + $0x1b0] sm:$0xff]   ;;  %v8181_v50 = vld [vmem:[%s8346_s22 + $0x4c0] sm:$0xff]  }
  0x6b   : > { %7697 = vmatmul.mubr.msk.bf16.gmra.mrb[44].mxu0 %vm1612_vm2, %v8118_v51  ;;  %7893 = vmatmul.mubr.msk.bf16.gmra.mrb[44].mxu1 %vm1612_vm2, %v8119_v52  ;;  %v8569_v51 = vld [vmem:[%s9949_s2] ss:$0 sm:$0xff] }
  0x6c   : > { %7700 = vmatprep.mubr.msk.bf16.mxu0 %vm1612_vm2, %v8120_v53  ;;  %7896 = vmatprep.mubr.msk.bf16.mxu1 %vm1612_vm2, %v8121_v54 }
  0x73   : > { %7701 = vmatmul.mubr.msk.bf16.gmra.mrb[48].mxu0 %vm1612_vm2, %v8122_v55  ;;  %7897 = vmatmul.mubr.msk.bf16.gmra.mrb[48].mxu1 %vm1612_vm2, %v8123_v56  ;;  %v8182_v56 = vld [vmem:[%s8346_s22 + $0x1b8] sm:$0xff]  }
  0x74   : > { %7704 = vmatprep.mubr.msk.bf16.mxu0 %vm1612_vm2, %v8124_v57  ;;  %7900 = vmatprep.mubr.msk.bf16.mxu1 %vm1612_vm2, %v8125_v58 }
  0x7b   : > { %7705 = vmatmul.mubr.msk.bf16.gmra.mrb[52].mxu0 %vm1612_vm2, %v8126_v59  ;;  %7901 = vmatmul.mubr.msk.bf16.gmra.mrb[52].mxu1 %vm1612_vm2, %v8127_v60 }
  0x7c   : > { %7708 = vmatprep.mubr.msk.bf16.mxu0 %vm1612_vm2, %v8128_v61  ;;  %7904 = vmatprep.mubr.msk.bf16.mxu1 %vm1612_vm2, %v8129_v62  ;;  %v8183_v61 = vld [vmem:[%s8346_s22 + $0x4c8] sm:$0xff]   ;;  %v8184_v62 = vld [vmem:[%s8346_s22 + $0x1c0] sm:$0xff]  }
  0x83   : > { %7709 = vmatmul.mubr.msk.bf16.gmra.mrb[56].mxu0 %vm1612_vm2, %v8130_v63  ;;  %7905 = vmatmul.mubr.msk.bf16.gmra.mrb[56].mxu1 %vm1612_vm2, %v8131_v0 }
  0x84   : > { %7712 = vmatprep.mubr.msk.bf16.mxu0 %vm1612_vm2, %v8132_v1  ;;  %7908 = vmatprep.mubr.msk.bf16.mxu1 %vm1612_vm2, %v8133_v2 }
  0x8b   : > { %7713 = vmatmul.mubr.msk.bf16.gmra.mrb[60].mxu0 %vm1612_vm2, %v8134_v3  ;;  %7909 = vmatmul.mubr.msk.bf16.gmra.mrb[60].mxu1 %vm1612_vm2, %v8135_v4  ;;  %v8185_v4 = vld [vmem:[%s8346_s22 + $0x4d0] sm:$0xff]  }
  0x8c   : > { %7716 = vmatprep.mubr.msk.bf16.mxu0 %vm1612_vm2, %v8136_v5  ;;  %7912 = vmatprep.mubr.msk.bf16.mxu1 %vm1612_vm2, %v8137_v6 }
  0x93   : > { %7717 = vmatmul.mubr.msk.bf16.gmra.mrb[64].mxu0 %vm1612_vm2, %v8138_v7  ;;  %7913 = vmatmul.mubr.msk.bf16.gmra.mrb[64].mxu1 %vm1612_vm2, %v8139_v8 }
  0x94   : > { %7720 = vmatprep.mubr.msk.bf16.mxu0 %vm1612_vm2, %v8140_v9  ;;  %7916 = vmatprep.mubr.msk.bf16.mxu1 %vm1612_vm2, %v8141_v10 }
  0x9b   : > { %7721 = vmatmul.mubr.msk.bf16.gmra.mrb[68].mxu0 %vm1612_vm2, %v8142_v11  ;;  %7917 = vmatmul.mubr.msk.bf16.gmra.mrb[68].mxu1 %vm1612_vm2, %v8143_v12 }
  0x9c   : > { %7724 = vmatprep.mubr.msk.bf16.mxu0 %vm1612_vm2, %v8144_v13  ;;  %7920 = vmatprep.mubr.msk.bf16.mxu1 %vm1612_vm2, %v8145_v14 }
  0xa3   : > { %7725 = vmatmul.mubr.msk.bf16.gmra.mrb[72].mxu0 %vm1612_vm2, %v8146_v15  ;;  %7921 = vmatmul.mubr.msk.bf16.gmra.mrb[72].mxu1 %vm1612_vm2, %v8147_v16 }
  0xa4   : > { %7728 = vmatprep.mubr.msk.bf16.mxu0 %vm1612_vm2, %v8148_v17  ;;  %7924 = vmatprep.mubr.msk.bf16.mxu1 %vm1612_vm2, %v8149_v18 }
  0xab   : > { %7729 = vmatmul.mubr.msk.bf16.gmra.mrb[76].mxu0 %vm1612_vm2, %v8150_v19  ;;  %7925 = vmatmul.mubr.msk.bf16.gmra.mrb[76].mxu1 %vm1612_vm2, %v8151_v20 }
  0xac   : > { %7732 = vmatprep.mubr.msk.bf16.mxu0 %vm1612_vm2, %v8152_v21  ;;  %7928 = vmatprep.mubr.msk.bf16.mxu1 %vm1612_vm2, %v8153_v22 }
  0xb3   : > { %7733 = vmatmul.mubr.msk.bf16.gmra.mrb[80].mxu0 %vm1612_vm2, %v8154_v23  ;;  %7929 = vmatmul.mubr.msk.bf16.gmra.mrb[80].mxu1 %vm1612_vm2, %v8155_v24 }
  0xb4   : > { %7736 = vmatprep.mubr.msk.bf16.mxu0 %vm1612_vm2, %v8156_v25  ;;  %7932 = vmatprep.mubr.msk.bf16.mxu1 %vm1612_vm2, %v8157_v26 }
  0xbb   : > { %7737 = vmatmul.mubr.msk.bf16.gmra.mrb[84].mxu0 %vm1612_vm2, %v8158_v27  ;;  %7933 = vmatmul.mubr.msk.bf16.gmra.mrb[84].mxu1 %vm1612_vm2, %v8159_v28  ;;  %v8186_v28 = vld [vmem:[%s8346_s22 + $0x1c8] sm:$0xff]  }
  0xbc   : > { %7740 = vmatprep.mubr.msk.bf16.mxu0 %vm1612_vm2, %v8160_v29  ;;  %7936 = vmatprep.mubr.msk.bf16.mxu1 %vm1612_vm2, %v8161_v30 }
  0xc3   : > { %7741 = vmatmul.mubr.msk.bf16.gmra.mrb[88].mxu0 %vm1612_vm2, %v8162_v31  ;;  %7937 = vmatmul.mubr.msk.bf16.gmra.mrb[88].mxu1 %vm1612_vm2, %v8163_v32 }
  0xc4   : > { %7744 = vmatprep.mubr.msk.bf16.mxu0 %vm1612_vm2, %v8164_v33  ;;  %7940 = vmatprep.mubr.msk.bf16.mxu1 %vm1612_vm2, %v8165_v34  ;;  %v8187_v33 = vld [vmem:[%s8346_s22 + $0x4d8] sm:$0xff]   ;;  %v8188_v34 = vld [vmem:[%s8346_s22 + $0x1d0] sm:$0xff]  }
  0xcb   : > { %7745 = vmatmul.mubr.msk.bf16.gmra.mrb[92].mxu0 %vm1612_vm2, %v8166_v35  ;;  %7941 = vmatmul.mubr.msk.bf16.gmra.mrb[92].mxu1 %vm1612_vm2, %v8167_v36 }
  0xcc   : > { %7748 = vmatprep.mubr.msk.bf16.mxu0 %vm1612_vm2, %v8168_v37  ;;  %7944 = vmatprep.mubr.msk.bf16.mxu1 %vm1612_vm2, %v8169_v38 }
  0xd3   : > { %7749 = vmatmul.mubr.msk.bf16.gmra.mrb[96].mxu0 %vm1612_vm2, %v8170_v39  ;;  %7945 = vmatmul.mubr.msk.bf16.gmra.mrb[96].mxu1 %vm1612_vm2, %v8171_v40  ;;  %v8189_v40 = vld [vmem:[%s8346_s22 + $0x4e0] sm:$0xff]  }
  0xd4   : > { %7752 = vmatprep.mubr.msk.bf16.mxu0 %vm1612_vm2, %v8172_v41  ;;  %7948 = vmatprep.mubr.msk.bf16.mxu1 %vm1612_vm2, %v8173_v42 }
  0xdb   : > { %7753 = vmatmul.mubr.msk.bf16.gmra.mrb[100].mxu0 %vm1612_vm2, %v8174_v43  ;;  %7949 = vmatmul.mubr.msk.bf16.gmra.mrb[100].mxu1 %vm1612_vm2, %v8175_v44 }
  0xdc   : > { %7756 = vmatprep.mubr.msk.bf16.mxu0 %vm1612_vm2, %v8176_v45  ;;  %7952 = vmatprep.mubr.msk.bf16.mxu1 %vm1612_vm2, %v8177_v46 }
  0xe3   : > { %7757 = vmatmul.mubr.msk.bf16.gmra.mrb[104].mxu0 %vm1612_vm2, %v8178_v47  ;;  %7953 = vmatmul.mubr.msk.bf16.gmra.mrb[104].mxu1 %vm1612_vm2, %v8179_v48 }
  0xe4   : > { %7760 = vmatprep.mubr.msk.bf16.mxu0 %vm1612_vm2, %v8180_v49  ;;  %7956 = vmatprep.mubr.msk.bf16.mxu1 %vm1612_vm2, %v8181_v50 }
  0xe6   : > { %v7654_v52 = vpop.f32.mrb[0].mxu0  ;;  %v7850_v54 = vpop.f32.mrb[0].mxu1 }
  0xe7   : > { %v2251_v53 = vadd.f32 %v7654_v52, %v8569_v51  ;;  %v2242_v55 = vpop.f32.mrb[1].mxu0  ;;  %v3035_v57 = vadd.f32 %v7850_v54, %v8569_v51  ;;  %v3026_v59 = vpop.f32.mrb[1].mxu1 }
  0xe8   : > { %v2243_v58 = vadd.f32 %v8569_v51, %v2242_v55  ;;  %v7655_v60 = vpop.f32.mrb[2].mxu0  ;;  %v3027_v0 = vadd.f32 %v8569_v51, %v3026_v59  ;;  %v7851_v2 = vpop.f32.mrb[2].mxu1 }
  0xe9   : > { %v3811_v63 = vmax.f32 %v2251_v53, 0.0  ;;  %v2254_v1 = vadd.f32 %v7655_v60, %v8569_v51  ;;  %v2245_v3 = vpop.f32.mrb[3].mxu0  ;;  %v4007_v5 = vmax.f32 %v3035_v57, 0.0  ;;  %v3038_v7 = vadd.f32 %v7851_v2, %v8569_v51  ;;  %v3029_v9 = vpop.f32.mrb[3].mxu1 }
  0xea   : > { %v3809_v6 = vmax.f32 %v2243_v58, 0.0  ;;  %v2246_v8 = vadd.f32 %v8569_v51, %v2245_v3  ;;  %v4005_v11 = vmax.f32 %v3027_v0, 0.0  ;;  %v3030_v13 = vadd.f32 %v8569_v51, %v3029_v9 }
  0xeb   : > { %v7063_v10 = vpack.c.bf16 %v3811_v63, %v3811_v63  ;;  %v3812_v12 = vmax.f32 %v2254_v1, 0.0  ;;  %7761 = vmatmul.mubr.msk.bf16.gmra.mrb[108].mxu0 %vm1612_vm2, %v8182_v56  ;;  %v7259_v14 = vpack.c.bf16 %v4007_v5, %v4007_v5  ;;  %v4008_v16 = vmax.f32 %v3038_v7, 0.0  ;;  %7957 = vmatmul.mubr.msk.bf16.gmra.mrb[108].mxu1 %vm1612_vm2, %v8183_v61  ;;  %v8190_v1 = vld [vmem:[%s8346_s22 + $0x1d8] sm:$0xff]   ;;  %v8192_v7 = vld [vmem:[%s8346_s22 + $0x1e0] sm:$0xff]  }
  0xec   : > { %v7061_v15 = vpack.c.bf16 %v3809_v6, %v3809_v6  ;;  %v3810_v17 = vmax.f32 %v2246_v8, 0.0  ;;  %7764 = vmatprep.mubr.msk.bf16.mxu0 %vm1612_vm2, %v8184_v62  ;;  %v7257_v18 = vpack.c.bf16 %v4005_v11, %v4005_v11  ;;  %v4006_v20 = vmax.f32 %v3030_v13, 0.0  ;;  %7960 = vmatprep.mubr.msk.bf16.mxu1 %vm1612_vm2, %v8185_v4  ;;  %v8191_v6 = vld [vmem:[%s8346_s22 + $0x4e8] sm:$0xff]   ;;  %v8193_v13 = vld [vmem:[%s8346_s22 + $0x4f0] sm:$0xff]  }
  0xed   : > { %5772 = vst.msk [vmem:[%s8587_s27 + $0x8] sm:$0xf] %vm5769_vm3, %v7063_v10  ;;  %v7064_v19 = vpack.c.bf16 %v3812_v12, %v3812_v12  ;;  %5968 = vst.msk [vmem:[%s8587_s27 + $0x318] sm:$0xf] %vm5769_vm3, %v7259_v14  ;;  %v7260_v21 = vpack.c.bf16 %v4008_v16, %v4008_v16 }
  0xee   : > { %5770 = vst.msk [vmem:[%s8587_s27] sm:$0xf] %vm5769_vm3, %v7061_v15  ;;  %v7062_v22 = vpack.c.bf16 %v3810_v17, %v3810_v17  ;;  %v7658_v23 = vpop.f32.mrb[4].mxu0  ;;  %5966 = vst.msk [vmem:[%s8587_s27 + $0x310] sm:$0xf] %vm5769_vm3, %v7257_v18  ;;  %v7258_v24 = vpack.c.bf16 %v4006_v20, %v4006_v20  ;;  %v7854_v26 = vpop.f32.mrb[4].mxu1 }
  0xef   : > { %5773 = vst.msk [vmem:[%s8587_s27 + $0xc] sm:$0xf] %vm5769_vm3, %v7064_v19  ;;  %v2267_v25 = vadd.f32 %v7658_v23, %v8569_v51  ;;  %v2258_v27 = vpop.f32.mrb[5].mxu0  ;;  %5969 = vst.msk [vmem:[%s8587_s27 + $0x31c] sm:$0xf] %vm5769_vm3, %v7260_v21  ;;  %v3051_v29 = vadd.f32 %v7854_v26, %v8569_v51  ;;  %v3042_v31 = vpop.f32.mrb[5].mxu1 }
  0xf0   : > { %5771 = vst.msk [vmem:[%s8587_s27 + $0x4] sm:$0xf] %vm5769_vm3, %v7062_v22  ;;  %v2259_v30 = vadd.f32 %v8569_v51, %v2258_v27  ;;  %v7659_v32 = vpop.f32.mrb[6].mxu0  ;;  %5967 = vst.msk [vmem:[%s8587_s27 + $0x314] sm:$0xf] %vm5769_vm3, %v7258_v24  ;;  %v3043_v36 = vadd.f32 %v8569_v51, %v3042_v31  ;;  %v7855_v38 = vpop.f32.mrb[6].mxu1 }
  0xf1   : > { %v3815_v35 = vmax.f32 %v2267_v25, 0.0  ;;  %v2270_v37 = vadd.f32 %v7659_v32, %v8569_v51  ;;  %v2261_v39 = vpop.f32.mrb[7].mxu0  ;;  %v4011_v41 = vmax.f32 %v3051_v29, 0.0  ;;  %v3054_v43 = vadd.f32 %v7855_v38, %v8569_v51  ;;  %v3045_v45 = vpop.f32.mrb[7].mxu1 }
  0xf2   : > { %v3813_v42 = vmax.f32 %v2259_v30, 0.0  ;;  %v2262_v44 = vadd.f32 %v8569_v51, %v2261_v39  ;;  %v4009_v47 = vmax.f32 %v3043_v36, 0.0  ;;  %v3046_v49 = vadd.f32 %v8569_v51, %v3045_v45 }
  0xf3   : > { %v7067_v46 = vpack.c.bf16 %v3815_v35, %v3815_v35  ;;  %v3816_v48 = vmax.f32 %v2270_v37, 0.0  ;;  %7765 = vmatmul.mubr.msk.bf16.gmra.mrb[112].mxu0 %vm1612_vm2, %v8186_v28  ;;  %v7263_v50 = vpack.c.bf16 %v4011_v41, %v4011_v41  ;;  %v4012_v53 = vmax.f32 %v3054_v43, 0.0  ;;  %7961 = vmatmul.mubr.msk.bf16.gmra.mrb[112].mxu1 %vm1612_vm2, %v8187_v33  ;;  %v8194_v37 = vld [vmem:[%s8346_s22 + $0x1e8] sm:$0xff]   ;;  %v8196_v43 = vld [vmem:[%s8346_s22 + $0x1f0] sm:$0xff]  }
  0xf4   : > { %v7065_v52 = vpack.c.bf16 %v3813_v42, %v3813_v42  ;;  %v3814_v54 = vmax.f32 %v2262_v44, 0.0  ;;  %7768 = vmatprep.mubr.msk.bf16.mxu0 %vm1612_vm2, %v8188_v34  ;;  %v7261_v55 = vpack.c.bf16 %v4009_v47, %v4009_v47  ;;  %v4010_v57 = vmax.f32 %v3046_v49, 0.0  ;;  %7964 = vmatprep.mubr.msk.bf16.mxu1 %vm1612_vm2, %v8189_v40  ;;  %v8195_v42 = vld [vmem:[%s8346_s22 + $0x4f8] sm:$0xff]   ;;  %v8197_v49 = vld [vmem:[%s8346_s22 + $0x500] sm:$0xff]  }
  0xf5   : > { %5776 = vst.msk [vmem:[%s8587_s27 + $0x18] sm:$0xf] %vm5769_vm3, %v7067_v46  ;;  %v7068_v56 = vpack.c.bf16 %v3816_v48, %v3816_v48  ;;  %5972 = vst.msk [vmem:[%s8587_s27 + $0x328] sm:$0xf] %vm5769_vm3, %v7263_v50  ;;  %v7264_v58 = vpack.c.bf16 %v4012_v53, %v4012_v53 }
  0xf6   : > { %5774 = vst.msk [vmem:[%s8587_s27 + $0x10] sm:$0xf] %vm5769_vm3, %v7065_v52  ;;  %v7066_v59 = vpack.c.bf16 %v3814_v54, %v3814_v54  ;;  %v7662_v60 = vpop.f32.mrb[8].mxu0  ;;  %5970 = vst.msk [vmem:[%s8587_s27 + $0x320] sm:$0xf] %vm5769_vm3, %v7261_v55  ;;  %v7262_v61 = vpack.c.bf16 %v4010_v57, %v4010_v57  ;;  %v7858_v63 = vpop.f32.mrb[8].mxu1 }
  0xf7   : > { %5777 = vst.msk [vmem:[%s8587_s27 + $0x1c] sm:$0xf] %vm5769_vm3, %v7068_v56  ;;  %v2283_v62 = vadd.f32 %v7662_v60, %v8569_v51  ;;  %v2274_v0 = vpop.f32.mrb[9].mxu0  ;;  %5973 = vst.msk [vmem:[%s8587_s27 + $0x32c] sm:$0xf] %vm5769_vm3, %v7264_v58  ;;  %v3067_v2 = vadd.f32 %v7858_v63, %v8569_v51  ;;  %v3058_v4 = vpop.f32.mrb[9].mxu1 }
  0xf8   : > { %5775 = vst.msk [vmem:[%s8587_s27 + $0x14] sm:$0xf] %vm5769_vm3, %v7066_v59  ;;  %v2275_v3 = vadd.f32 %v8569_v51, %v2274_v0  ;;  %v7663_v5 = vpop.f32.mrb[10].mxu0  ;;  %5971 = vst.msk [vmem:[%s8587_s27 + $0x324] sm:$0xf] %vm5769_vm3, %v7262_v61  ;;  %v3059_v9 = vadd.f32 %v8569_v51, %v3058_v4  ;;  %v7859_v11 = vpop.f32.mrb[10].mxu1 }
  0xf9   : > { %v3819_v8 = vmax.f32 %v2283_v62, 0.0  ;;  %v2286_v10 = vadd.f32 %v7663_v5, %v8569_v51  ;;  %v2277_v12 = vpop.f32.mrb[11].mxu0  ;;  %v4015_v14 = vmax.f32 %v3067_v2, 0.0  ;;  %v3070_v16 = vadd.f32 %v7859_v11, %v8569_v51  ;;  %v3061_v18 = vpop.f32.mrb[11].mxu1 }
  0xfa   : > { %v3817_v15 = vmax.f32 %v2275_v3, 0.0  ;;  %v2278_v17 = vadd.f32 %v8569_v51, %v2277_v12  ;;  %v4013_v20 = vmax.f32 %v3059_v9, 0.0  ;;  %v3062_v22 = vadd.f32 %v8569_v51, %v3061_v18 }
  0xfb   : > { %v7071_v19 = vpack.c.bf16 %v3819_v8, %v3819_v8  ;;  %v3820_v21 = vmax.f32 %v2286_v10, 0.0  ;;  %7769 = vmatmul.mubr.msk.bf16.gmra.mrb[116].mxu0 %vm1612_vm2, %v8190_v1  ;;  %v7267_v23 = vpack.c.bf16 %v4015_v14, %v4015_v14  ;;  %v4016_v25 = vmax.f32 %v3070_v16, 0.0  ;;  %7965 = vmatmul.mubr.msk.bf16.gmra.mrb[116].mxu1 %vm1612_vm2, %v8191_v6  ;;  %v8198_v10 = vld [vmem:[%s8346_s22 + $0x1f8] sm:$0xff]   ;;  %v8200_v16 = vld [vmem:[%s8346_s22 + $0x200] sm:$0xff]  }
  0xfc   : > { %v7069_v24 = vpack.c.bf16 %v3817_v15, %v3817_v15  ;;  %v3818_v26 = vmax.f32 %v2278_v17, 0.0  ;;  %7772 = vmatprep.mubr.msk.bf16.mxu0 %vm1612_vm2, %v8192_v7  ;;  %v7265_v27 = vpack.c.bf16 %v4013_v20, %v4013_v20  ;;  %v4014_v29 = vmax.f32 %v3062_v22, 0.0  ;;  %7968 = vmatprep.mubr.msk.bf16.mxu1 %vm1612_vm2, %v8193_v13  ;;  %v8199_v15 = vld [vmem:[%s8346_s22 + $0x508] sm:$0xff]   ;;  %v8201_v22 = vld [vmem:[%s8346_s22 + $0x510] sm:$0xff]  }
  0xfd   : > { %5780 = vst.msk [vmem:[%s8587_s27 + $0x28] sm:$0xf] %vm5769_vm3, %v7071_v19  ;;  %v7072_v28 = vpack.c.bf16 %v3820_v21, %v3820_v21  ;;  %5976 = vst.msk [vmem:[%s8587_s27 + $0x338] sm:$0xf] %vm5769_vm3, %v7267_v23  ;;  %v7268_v30 = vpack.c.bf16 %v4016_v25, %v4016_v25 }
  0xfe   : > { %5778 = vst.msk [vmem:[%s8587_s27 + $0x20] sm:$0xf] %vm5769_vm3, %v7069_v24  ;;  %v7070_v31 = vpack.c.bf16 %v3818_v26, %v3818_v26  ;;  %v7666_v32 = vpop.f32.mrb[12].mxu0  ;;  %5974 = vst.msk [vmem:[%s8587_s27 + $0x330] sm:$0xf] %vm5769_vm3, %v7265_v27  ;;  %v7266_v33 = vpack.c.bf16 %v4014_v29, %v4014_v29  ;;  %v7862_v35 = vpop.f32.mrb[12].mxu1 }
  0xff   : > { %5781 = vst.msk [vmem:[%s8587_s27 + $0x2c] sm:$0xf] %vm5769_vm3, %v7072_v28  ;;  %v2299_v34 = vadd.f32 %v7666_v32, %v8569_v51  ;;  %v2290_v36 = vpop.f32.mrb[13].mxu0  ;;  %5977 = vst.msk [vmem:[%s8587_s27 + $0x33c] sm:$0xf] %vm5769_vm3, %v7268_v30  ;;  %v3083_v38 = vadd.f32 %v7862_v35, %v8569_v51  ;;  %v3074_v40 = vpop.f32.mrb[13].mxu1 }
 0x100   : > { %5779 = vst.msk [vmem:[%s8587_s27 + $0x24] sm:$0xf] %vm5769_vm3, %v7070_v31  ;;  %v2291_v39 = vadd.f32 %v8569_v51, %v2290_v36  ;;  %v7667_v41 = vpop.f32.mrb[14].mxu0  ;;  %5975 = vst.msk [vmem:[%s8587_s27 + $0x334] sm:$0xf] %vm5769_vm3, %v7266_v33  ;;  %v3075_v45 = vadd.f32 %v8569_v51, %v3074_v40  ;;  %v7863_v47 = vpop.f32.mrb[14].mxu1 }
 0x101   : > { %v3823_v44 = vmax.f32 %v2299_v34, 0.0  ;;  %v2302_v46 = vadd.f32 %v7667_v41, %v8569_v51  ;;  %v2293_v48 = vpop.f32.mrb[15].mxu0  ;;  %v4019_v50 = vmax.f32 %v3083_v38, 0.0  ;;  %v3086_v53 = vadd.f32 %v7863_v47, %v8569_v51  ;;  %v3077_v55 = vpop.f32.mrb[15].mxu1 }
 0x102   : > { %v3821_v52 = vmax.f32 %v2291_v39, 0.0  ;;  %v2294_v54 = vadd.f32 %v8569_v51, %v2293_v48  ;;  %v4017_v57 = vmax.f32 %v3075_v45, 0.0  ;;  %v3078_v59 = vadd.f32 %v8569_v51, %v3077_v55 }
 0x103   : > { %v7075_v56 = vpack.c.bf16 %v3823_v44, %v3823_v44  ;;  %v3824_v58 = vmax.f32 %v2302_v46, 0.0  ;;  %7773 = vmatmul.mubr.msk.bf16.gmra.mrb[120].mxu0 %vm1612_vm2, %v8194_v37  ;;  %v7271_v60 = vpack.c.bf16 %v4019_v50, %v4019_v50  ;;  %v4020_v62 = vmax.f32 %v3086_v53, 0.0  ;;  %7969 = vmatmul.mubr.msk.bf16.gmra.mrb[120].mxu1 %vm1612_vm2, %v8195_v42  ;;  %v8202_v46 = vld [vmem:[%s8346_s22 + $0x208] sm:$0xff]   ;;  %v8204_v53 = vld [vmem:[%s8346_s22 + $0x210] sm:$0xff]  }
 0x104   : > { %v7073_v61 = vpack.c.bf16 %v3821_v52, %v3821_v52  ;;  %v3822_v63 = vmax.f32 %v2294_v54, 0.0  ;;  %7776 = vmatprep.mubr.msk.bf16.mxu0 %vm1612_vm2, %v8196_v43  ;;  %v7269_v0 = vpack.c.bf16 %v4017_v57, %v4017_v57  ;;  %v4018_v2 = vmax.f32 %v3078_v59, 0.0  ;;  %7972 = vmatprep.mubr.msk.bf16.mxu1 %vm1612_vm2, %v8197_v49  ;;  %v8203_v52 = vld [vmem:[%s8346_s22 + $0x518] sm:$0xff]   ;;  %v8205_v59 = vld [vmem:[%s8346_s22 + $0x520] sm:$0xff]  }
 0x105   : > { %5784 = vst.msk [vmem:[%s8587_s27 + $0x38] sm:$0xf] %vm5769_vm3, %v7075_v56  ;;  %v7076_v1 = vpack.c.bf16 %v3824_v58, %v3824_v58  ;;  %5980 = vst.msk [vmem:[%s8587_s27 + $0x348] sm:$0xf] %vm5769_vm3, %v7271_v60  ;;  %v7272_v3 = vpack.c.bf16 %v4020_v62, %v4020_v62 }
 0x106   : > { %5782 = vst.msk [vmem:[%s8587_s27 + $0x30] sm:$0xf] %vm5769_vm3, %v7073_v61  ;;  %v7074_v4 = vpack.c.bf16 %v3822_v63, %v3822_v63  ;;  %v7670_v5 = vpop.f32.mrb[16].mxu0  ;;  %5978 = vst.msk [vmem:[%s8587_s27 + $0x340] sm:$0xf] %vm5769_vm3, %v7269_v0  ;;  %v7270_v6 = vpack.c.bf16 %v4018_v2, %v4018_v2  ;;  %v7866_v8 = vpop.f32.mrb[16].mxu1 }
 0x107   : > { %5785 = vst.msk [vmem:[%s8587_s27 + $0x3c] sm:$0xf] %vm5769_vm3, %v7076_v1  ;;  %v2315_v7 = vadd.f32 %v7670_v5, %v8569_v51  ;;  %v2306_v9 = vpop.f32.mrb[17].mxu0  ;;  %5981 = vst.msk [vmem:[%s8587_s27 + $0x34c] sm:$0xf] %vm5769_vm3, %v7272_v3  ;;  %v3099_v11 = vadd.f32 %v7866_v8, %v8569_v51  ;;  %v3090_v13 = vpop.f32.mrb[17].mxu1 }
 0x108   : > { %5783 = vst.msk [vmem:[%s8587_s27 + $0x34] sm:$0xf] %vm5769_vm3, %v7074_v4  ;;  %v2307_v12 = vadd.f32 %v8569_v51, %v2306_v9  ;;  %v7671_v14 = vpop.f32.mrb[18].mxu0  ;;  %5979 = vst.msk [vmem:[%s8587_s27 + $0x344] sm:$0xf] %vm5769_vm3, %v7270_v6  ;;  %v3091_v18 = vadd.f32 %v8569_v51, %v3090_v13  ;;  %v7867_v20 = vpop.f32.mrb[18].mxu1 }
 0x109   : > { %v3827_v17 = vmax.f32 %v2315_v7, 0.0  ;;  %v2318_v19 = vadd.f32 %v7671_v14, %v8569_v51  ;;  %v2309_v21 = vpop.f32.mrb[19].mxu0  ;;  %v4023_v23 = vmax.f32 %v3099_v11, 0.0  ;;  %v3102_v25 = vadd.f32 %v7867_v20, %v8569_v51  ;;  %v3093_v27 = vpop.f32.mrb[19].mxu1 }
 0x10a   : > { %v3825_v24 = vmax.f32 %v2307_v12, 0.0  ;;  %v2310_v26 = vadd.f32 %v8569_v51, %v2309_v21  ;;  %v4021_v29 = vmax.f32 %v3091_v18, 0.0  ;;  %v3094_v31 = vadd.f32 %v8569_v51, %v3093_v27 }
 0x10b   : > { %v7079_v28 = vpack.c.bf16 %v3827_v17, %v3827_v17  ;;  %v3828_v30 = vmax.f32 %v2318_v19, 0.0  ;;  %7777 = vmatmul.mubr.msk.bf16.gmra.mrb[124].mxu0 %vm1612_vm2, %v8198_v10  ;;  %v7275_v32 = vpack.c.bf16 %v4023_v23, %v4023_v23  ;;  %v4024_v34 = vmax.f32 %v3102_v25, 0.0  ;;  %7973 = vmatmul.mubr.msk.bf16.gmra.mrb[124].mxu1 %vm1612_vm2, %v8199_v15  ;;  %v8206_v19 = vld [vmem:[%s8346_s22 + $0x218] sm:$0xff]   ;;  %v8208_v25 = vld [vmem:[%s8346_s22 + $0x220] sm:$0xff]  }
 0x10c   : > { %v7077_v33 = vpack.c.bf16 %v3825_v24, %v3825_v24  ;;  %v3826_v35 = vmax.f32 %v2310_v26, 0.0  ;;  %7780 = vmatprep.mubr.msk.bf16.mxu0 %vm1612_vm2, %v8200_v16  ;;  %v7273_v36 = vpack.c.bf16 %v4021_v29, %v4021_v29  ;;  %v4022_v38 = vmax.f32 %v3094_v31, 0.0  ;;  %7976 = vmatprep.mubr.msk.bf16.mxu1 %vm1612_vm2, %v8201_v22  ;;  %v8207_v24 = vld [vmem:[%s8346_s22 + $0x528] sm:$0xff]   ;;  %v8209_v31 = vld [vmem:[%s8346_s22 + $0x530] sm:$0xff]  }
 0x10d   : > { %5788 = vst.msk [vmem:[%s8587_s27 + $0x48] sm:$0xf] %vm5769_vm3, %v7079_v28  ;;  %v7080_v37 = vpack.c.bf16 %v3828_v30, %v3828_v30  ;;  %5984 = vst.msk [vmem:[%s8587_s27 + $0x358] sm:$0xf] %vm5769_vm3, %v7275_v32  ;;  %v7276_v39 = vpack.c.bf16 %v4024_v34, %v4024_v34 }
 0x10e   : > { %5786 = vst.msk [vmem:[%s8587_s27 + $0x40] sm:$0xf] %vm5769_vm3, %v7077_v33  ;;  %v7078_v40 = vpack.c.bf16 %v3826_v35, %v3826_v35  ;;  %v7674_v41 = vpop.f32.mrb[20].mxu0  ;;  %5982 = vst.msk [vmem:[%s8587_s27 + $0x350] sm:$0xf] %vm5769_vm3, %v7273_v36  ;;  %v7274_v42 = vpack.c.bf16 %v4022_v38, %v4022_v38  ;;  %v7870_v44 = vpop.f32.mrb[20].mxu1 }
 0x10f   : > { %5789 = vst.msk [vmem:[%s8587_s27 + $0x4c] sm:$0xf] %vm5769_vm3, %v7080_v37  ;;  %v2331_v43 = vadd.f32 %v7674_v41, %v8569_v51  ;;  %v2322_v45 = vpop.f32.mrb[21].mxu0  ;;  %5985 = vst.msk [vmem:[%s8587_s27 + $0x35c] sm:$0xf] %vm5769_vm3, %v7276_v39  ;;  %v3115_v47 = vadd.f32 %v7870_v44, %v8569_v51  ;;  %v3106_v49 = vpop.f32.mrb[21].mxu1 }
 0x110   : > { %5787 = vst.msk [vmem:[%s8587_s27 + $0x44] sm:$0xf] %vm5769_vm3, %v7078_v40  ;;  %v2323_v48 = vadd.f32 %v8569_v51, %v2322_v45  ;;  %v7675_v50 = vpop.f32.mrb[22].mxu0  ;;  %5983 = vst.msk [vmem:[%s8587_s27 + $0x354] sm:$0xf] %vm5769_vm3, %v7274_v42  ;;  %v3107_v55 = vadd.f32 %v8569_v51, %v3106_v49  ;;  %v7871_v57 = vpop.f32.mrb[22].mxu1 }
 0x111   : > { %v3831_v54 = vmax.f32 %v2331_v43, 0.0  ;;  %v2334_v56 = vadd.f32 %v7675_v50, %v8569_v51  ;;  %v2325_v58 = vpop.f32.mrb[23].mxu0  ;;  %v4027_v60 = vmax.f32 %v3115_v47, 0.0  ;;  %v3118_v62 = vadd.f32 %v7871_v57, %v8569_v51  ;;  %v3109_v0 = vpop.f32.mrb[23].mxu1 }
 0x112   : > { %v3829_v61 = vmax.f32 %v2323_v48, 0.0  ;;  %v2326_v63 = vadd.f32 %v8569_v51, %v2325_v58  ;;  %v4025_v2 = vmax.f32 %v3107_v55, 0.0  ;;  %v3110_v4 = vadd.f32 %v8569_v51, %v3109_v0 }
 0x113   : > { %v7083_v1 = vpack.c.bf16 %v3831_v54, %v3831_v54  ;;  %v3832_v3 = vmax.f32 %v2334_v56, 0.0  ;;  %7781 = vmatmul.mubr.msk.bf16.gmra.mrb[128].mxu0 %vm1612_vm2, %v8202_v46  ;;  %v7279_v5 = vpack.c.bf16 %v4027_v60, %v4027_v60  ;;  %v4028_v7 = vmax.f32 %v3118_v62, 0.0  ;;  %7977 = vmatmul.mubr.msk.bf16.gmra.mrb[128].mxu1 %vm1612_vm2, %v8203_v52  ;;  %v8210_v56 = vld [vmem:[%s8346_s22 + $0x228] sm:$0xff]   ;;  %v8212_v62 = vld [vmem:[%s8346_s22 + $0x230] sm:$0xff]  }
 0x114   : > { %v7081_v6 = vpack.c.bf16 %v3829_v61, %v3829_v61  ;;  %v3830_v8 = vmax.f32 %v2326_v63, 0.0  ;;  %7784 = vmatprep.mubr.msk.bf16.mxu0 %vm1612_vm2, %v8204_v53  ;;  %v7277_v9 = vpack.c.bf16 %v4025_v2, %v4025_v2  ;;  %v4026_v11 = vmax.f32 %v3110_v4, 0.0  ;;  %7980 = vmatprep.mubr.msk.bf16.mxu1 %vm1612_vm2, %v8205_v59  ;;  %v8211_v61 = vld [vmem:[%s8346_s22 + $0x538] sm:$0xff]   ;;  %v8213_v4 = vld [vmem:[%s8346_s22 + $0x540] sm:$0xff]  }
 0x115   : > { %5792 = vst.msk [vmem:[%s8587_s27 + $0x58] sm:$0xf] %vm5769_vm3, %v7083_v1  ;;  %v7084_v10 = vpack.c.bf16 %v3832_v3, %v3832_v3  ;;  %5988 = vst.msk [vmem:[%s8587_s27 + $0x368] sm:$0xf] %vm5769_vm3, %v7279_v5  ;;  %v7280_v12 = vpack.c.bf16 %v4028_v7, %v4028_v7 }
 0x116   : > { %5790 = vst.msk [vmem:[%s8587_s27 + $0x50] sm:$0xf] %vm5769_vm3, %v7081_v6  ;;  %v7082_v13 = vpack.c.bf16 %v3830_v8, %v3830_v8  ;;  %v7678_v14 = vpop.f32.mrb[24].mxu0  ;;  %5986 = vst.msk [vmem:[%s8587_s27 + $0x360] sm:$0xf] %vm5769_vm3, %v7277_v9  ;;  %v7278_v15 = vpack.c.bf16 %v4026_v11, %v4026_v11  ;;  %v7874_v17 = vpop.f32.mrb[24].mxu1 }
 0x117   : > { %5793 = vst.msk [vmem:[%s8587_s27 + $0x5c] sm:$0xf] %vm5769_vm3, %v7084_v10  ;;  %v2347_v16 = vadd.f32 %v7678_v14, %v8569_v51  ;;  %v2338_v18 = vpop.f32.mrb[25].mxu0  ;;  %5989 = vst.msk [vmem:[%s8587_s27 + $0x36c] sm:$0xf] %vm5769_vm3, %v7280_v12  ;;  %v3131_v20 = vadd.f32 %v7874_v17, %v8569_v51  ;;  %v3122_v22 = vpop.f32.mrb[25].mxu1 }
 0x118   : > { %5791 = vst.msk [vmem:[%s8587_s27 + $0x54] sm:$0xf] %vm5769_vm3, %v7082_v13  ;;  %v2339_v21 = vadd.f32 %v8569_v51, %v2338_v18  ;;  %v7679_v23 = vpop.f32.mrb[26].mxu0  ;;  %5987 = vst.msk [vmem:[%s8587_s27 + $0x364] sm:$0xf] %vm5769_vm3, %v7278_v15  ;;  %v3123_v27 = vadd.f32 %v8569_v51, %v3122_v22  ;;  %v7875_v29 = vpop.f32.mrb[26].mxu1 }
 0x119   : > { %v3835_v26 = vmax.f32 %v2347_v16, 0.0  ;;  %v2350_v28 = vadd.f32 %v7679_v23, %v8569_v51  ;;  %v2341_v30 = vpop.f32.mrb[27].mxu0  ;;  %v4031_v32 = vmax.f32 %v3131_v20, 0.0  ;;  %v3134_v34 = vadd.f32 %v7875_v29, %v8569_v51  ;;  %v3125_v36 = vpop.f32.mrb[27].mxu1 }
 0x11a   : > { %v3833_v33 = vmax.f32 %v2339_v21, 0.0  ;;  %v2342_v35 = vadd.f32 %v8569_v51, %v2341_v30  ;;  %v4029_v38 = vmax.f32 %v3123_v27, 0.0  ;;  %v3126_v40 = vadd.f32 %v8569_v51, %v3125_v36 }
 0x11b   : > { %v7087_v37 = vpack.c.bf16 %v3835_v26, %v3835_v26  ;;  %v3836_v39 = vmax.f32 %v2350_v28, 0.0  ;;  %7785 = vmatmul.mubr.msk.bf16.gmra.mrb[132].mxu0 %vm1612_vm2, %v8206_v19  ;;  %v7283_v41 = vpack.c.bf16 %v4031_v32, %v4031_v32  ;;  %v4032_v43 = vmax.f32 %v3134_v34, 0.0  ;;  %7981 = vmatmul.mubr.msk.bf16.gmra.mrb[132].mxu1 %vm1612_vm2, %v8207_v24  ;;  %v8214_v28 = vld [vmem:[%s8346_s22 + $0x238] sm:$0xff]   ;;  %v8216_v34 = vld [vmem:[%s8346_s22 + $0x240] sm:$0xff]  }
 0x11c   : > { %v7085_v42 = vpack.c.bf16 %v3833_v33, %v3833_v33  ;;  %v3834_v44 = vmax.f32 %v2342_v35, 0.0  ;;  %7788 = vmatprep.mubr.msk.bf16.mxu0 %vm1612_vm2, %v8208_v25  ;;  %v7281_v45 = vpack.c.bf16 %v4029_v38, %v4029_v38  ;;  %v4030_v47 = vmax.f32 %v3126_v40, 0.0  ;;  %7984 = vmatprep.mubr.msk.bf16.mxu1 %vm1612_vm2, %v8209_v31  ;;  %v8215_v33 = vld [vmem:[%s8346_s22 + $0x548] sm:$0xff]   ;;  %v8217_v40 = vld [vmem:[%s8346_s22 + $0x550] sm:$0xff]  }
 0x11d   : > { %5796 = vst.msk [vmem:[%s8587_s27 + $0x68] sm:$0xf] %vm5769_vm3, %v7087_v37  ;;  %v7088_v46 = vpack.c.bf16 %v3836_v39, %v3836_v39  ;;  %5992 = vst.msk [vmem:[%s8587_s27 + $0x378] sm:$0xf] %vm5769_vm3, %v7283_v41  ;;  %v7284_v48 = vpack.c.bf16 %v4032_v43, %v4032_v43 }
 0x11e   : > { %5794 = vst.msk [vmem:[%s8587_s27 + $0x60] sm:$0xf] %vm5769_vm3, %v7085_v42  ;;  %v7086_v49 = vpack.c.bf16 %v3834_v44, %v3834_v44  ;;  %v7682_v50 = vpop.f32.mrb[28].mxu0  ;;  %5990 = vst.msk [vmem:[%s8587_s27 + $0x370] sm:$0xf] %vm5769_vm3, %v7281_v45  ;;  %v7282_v52 = vpack.c.bf16 %v4030_v47, %v4030_v47  ;;  %v7878_v54 = vpop.f32.mrb[28].mxu1 }
 0x11f   : > { %5797 = vst.msk [vmem:[%s8587_s27 + $0x6c] sm:$0xf] %vm5769_vm3, %v7088_v46  ;;  %v2363_v53 = vadd.f32 %v7682_v50, %v8569_v51  ;;  %v2354_v55 = vpop.f32.mrb[29].mxu0  ;;  %5993 = vst.msk [vmem:[%s8587_s27 + $0x37c] sm:$0xf] %vm5769_vm3, %v7284_v48  ;;  %v3147_v57 = vadd.f32 %v7878_v54, %v8569_v51  ;;  %v3138_v59 = vpop.f32.mrb[29].mxu1 }
 0x120   : > { %5795 = vst.msk [vmem:[%s8587_s27 + $0x64] sm:$0xf] %vm5769_vm3, %v7086_v49  ;;  %v2355_v58 = vadd.f32 %v8569_v51, %v2354_v55  ;;  %v7683_v60 = vpop.f32.mrb[30].mxu0  ;;  %5991 = vst.msk [vmem:[%s8587_s27 + $0x374] sm:$0xf] %vm5769_vm3, %v7282_v52  ;;  %v3139_v0 = vadd.f32 %v8569_v51, %v3138_v59  ;;  %v7879_v2 = vpop.f32.mrb[30].mxu1 }
 0x121   : > { %v3839_v63 = vmax.f32 %v2363_v53, 0.0  ;;  %v2366_v1 = vadd.f32 %v7683_v60, %v8569_v51  ;;  %v2357_v3 = vpop.f32.mrb[31].mxu0  ;;  %v4035_v5 = vmax.f32 %v3147_v57, 0.0  ;;  %v3150_v7 = vadd.f32 %v7879_v2, %v8569_v51  ;;  %v3141_v9 = vpop.f32.mrb[31].mxu1 }
 0x122   : > { %v3837_v6 = vmax.f32 %v2355_v58, 0.0  ;;  %v2358_v8 = vadd.f32 %v8569_v51, %v2357_v3  ;;  %v4033_v11 = vmax.f32 %v3139_v0, 0.0  ;;  %v3142_v13 = vadd.f32 %v8569_v51, %v3141_v9 }
 0x123   : > { %v7091_v10 = vpack.c.bf16 %v3839_v63, %v3839_v63  ;;  %v3840_v12 = vmax.f32 %v2366_v1, 0.0  ;;  %7789 = vmatmul.mubr.msk.bf16.gmra.mrb[136].mxu0 %vm1612_vm2, %v8210_v56  ;;  %v7287_v14 = vpack.c.bf16 %v4035_v5, %v4035_v5  ;;  %v4036_v16 = vmax.f32 %v3150_v7, 0.0  ;;  %7985 = vmatmul.mubr.msk.bf16.gmra.mrb[136].mxu1 %vm1612_vm2, %v8211_v61  ;;  %v8218_v1 = vld [vmem:[%s8346_s22 + $0x248] sm:$0xff]   ;;  %v8220_v7 = vld [vmem:[%s8346_s22 + $0x250] sm:$0xff]  }
 0x124   : > { %v7089_v15 = vpack.c.bf16 %v3837_v6, %v3837_v6  ;;  %v3838_v17 = vmax.f32 %v2358_v8, 0.0  ;;  %7792 = vmatprep.mubr.msk.bf16.mxu0 %vm1612_vm2, %v8212_v62  ;;  %v7285_v18 = vpack.c.bf16 %v4033_v11, %v4033_v11  ;;  %v4034_v20 = vmax.f32 %v3142_v13, 0.0  ;;  %7988 = vmatprep.mubr.msk.bf16.mxu1 %vm1612_vm2, %v8213_v4  ;;  %v8219_v6 = vld [vmem:[%s8346_s22 + $0x558] sm:$0xff]   ;;  %v8221_v13 = vld [vmem:[%s8346_s22 + $0x560] sm:$0xff]  }
 0x125   : > { %5800 = vst.msk [vmem:[%s8587_s27 + $0x78] sm:$0xf] %vm5769_vm3, %v7091_v10  ;;  %v7092_v19 = vpack.c.bf16 %v3840_v12, %v3840_v12  ;;  %5996 = vst.msk [vmem:[%s8587_s27 + $0x388] sm:$0xf] %vm5769_vm3, %v7287_v14  ;;  %v7288_v21 = vpack.c.bf16 %v4036_v16, %v4036_v16 }
 0x126   : > { %5798 = vst.msk [vmem:[%s8587_s27 + $0x70] sm:$0xf] %vm5769_vm3, %v7089_v15  ;;  %v7090_v22 = vpack.c.bf16 %v3838_v17, %v3838_v17  ;;  %v7686_v23 = vpop.f32.mrb[32].mxu0  ;;  %5994 = vst.msk [vmem:[%s8587_s27 + $0x380] sm:$0xf] %vm5769_vm3, %v7285_v18  ;;  %v7286_v24 = vpack.c.bf16 %v4034_v20, %v4034_v20  ;;  %v7882_v26 = vpop.f32.mrb[32].mxu1 }
 0x127   : > { %5801 = vst.msk [vmem:[%s8587_s27 + $0x7c] sm:$0xf] %vm5769_vm3, %v7092_v19  ;;  %v2379_v25 = vadd.f32 %v7686_v23, %v8569_v51  ;;  %v2370_v27 = vpop.f32.mrb[33].mxu0  ;;  %5997 = vst.msk [vmem:[%s8587_s27 + $0x38c] sm:$0xf] %vm5769_vm3, %v7288_v21  ;;  %v3163_v29 = vadd.f32 %v7882_v26, %v8569_v51  ;;  %v3154_v31 = vpop.f32.mrb[33].mxu1 }
 0x128   : > { %5799 = vst.msk [vmem:[%s8587_s27 + $0x74] sm:$0xf] %vm5769_vm3, %v7090_v22  ;;  %v2371_v30 = vadd.f32 %v8569_v51, %v2370_v27  ;;  %v7687_v32 = vpop.f32.mrb[34].mxu0  ;;  %5995 = vst.msk [vmem:[%s8587_s27 + $0x384] sm:$0xf] %vm5769_vm3, %v7286_v24  ;;  %v3155_v36 = vadd.f32 %v8569_v51, %v3154_v31  ;;  %v7883_v38 = vpop.f32.mrb[34].mxu1 }
 0x129   : > { %v3843_v35 = vmax.f32 %v2379_v25, 0.0  ;;  %v2382_v37 = vadd.f32 %v7687_v32, %v8569_v51  ;;  %v2373_v39 = vpop.f32.mrb[35].mxu0  ;;  %v4039_v41 = vmax.f32 %v3163_v29, 0.0  ;;  %v3166_v43 = vadd.f32 %v7883_v38, %v8569_v51  ;;  %v3157_v45 = vpop.f32.mrb[35].mxu1 }
 0x12a   : > { %v3841_v42 = vmax.f32 %v2371_v30, 0.0  ;;  %v2374_v44 = vadd.f32 %v8569_v51, %v2373_v39  ;;  %v4037_v47 = vmax.f32 %v3155_v36, 0.0  ;;  %v3158_v49 = vadd.f32 %v8569_v51, %v3157_v45 }
 0x12b   : > { %v7095_v46 = vpack.c.bf16 %v3843_v35, %v3843_v35  ;;  %v3844_v48 = vmax.f32 %v2382_v37, 0.0  ;;  %7793 = vmatmul.mubr.msk.bf16.gmra.mrb[140].mxu0 %vm1612_vm2, %v8214_v28  ;;  %v7291_v50 = vpack.c.bf16 %v4039_v41, %v4039_v41  ;;  %v4040_v53 = vmax.f32 %v3166_v43, 0.0  ;;  %7989 = vmatmul.mubr.msk.bf16.gmra.mrb[140].mxu1 %vm1612_vm2, %v8215_v33  ;;  %v8222_v37 = vld [vmem:[%s8346_s22 + $0x258] sm:$0xff]   ;;  %v8224_v43 = vld [vmem:[%s8346_s22 + $0x260] sm:$0xff]  }
 0x12c   : > { %v7093_v52 = vpack.c.bf16 %v3841_v42, %v3841_v42  ;;  %v3842_v54 = vmax.f32 %v2374_v44, 0.0  ;;  %7796 = vmatprep.mubr.msk.bf16.mxu0 %vm1612_vm2, %v8216_v34  ;;  %v7289_v55 = vpack.c.bf16 %v4037_v47, %v4037_v47  ;;  %v4038_v57 = vmax.f32 %v3158_v49, 0.0  ;;  %7992 = vmatprep.mubr.msk.bf16.mxu1 %vm1612_vm2, %v8217_v40  ;;  %v8223_v42 = vld [vmem:[%s8346_s22 + $0x568] sm:$0xff]   ;;  %v8225_v49 = vld [vmem:[%s8346_s22 + $0x570] sm:$0xff]  }
 0x12d   : > { %5804 = vst.msk [vmem:[%s8587_s27 + $0x88] sm:$0xf] %vm5769_vm3, %v7095_v46  ;;  %v7096_v56 = vpack.c.bf16 %v3844_v48, %v3844_v48  ;;  %6000 = vst.msk [vmem:[%s8587_s27 + $0x398] sm:$0xf] %vm5769_vm3, %v7291_v50  ;;  %v7292_v58 = vpack.c.bf16 %v4040_v53, %v4040_v53 }
 0x12e   : > { %5802 = vst.msk [vmem:[%s8587_s27 + $0x80] sm:$0xf] %vm5769_vm3, %v7093_v52  ;;  %v7094_v59 = vpack.c.bf16 %v3842_v54, %v3842_v54  ;;  %v7690_v60 = vpop.f32.mrb[36].mxu0  ;;  %5998 = vst.msk [vmem:[%s8587_s27 + $0x390] sm:$0xf] %vm5769_vm3, %v7289_v55  ;;  %v7290_v61 = vpack.c.bf16 %v4038_v57, %v4038_v57  ;;  %v7886_v63 = vpop.f32.mrb[36].mxu1 }
 0x12f   : > { %5805 = vst.msk [vmem:[%s8587_s27 + $0x8c] sm:$0xf] %vm5769_vm3, %v7096_v56  ;;  %v2395_v62 = vadd.f32 %v7690_v60, %v8569_v51  ;;  %v2386_v0 = vpop.f32.mrb[37].mxu0  ;;  %6001 = vst.msk [vmem:[%s8587_s27 + $0x39c] sm:$0xf] %vm5769_vm3, %v7292_v58  ;;  %v3179_v2 = vadd.f32 %v7886_v63, %v8569_v51  ;;  %v3170_v4 = vpop.f32.mrb[37].mxu1 }
 0x130   : > { %5803 = vst.msk [vmem:[%s8587_s27 + $0x84] sm:$0xf] %vm5769_vm3, %v7094_v59  ;;  %v2387_v3 = vadd.f32 %v8569_v51, %v2386_v0  ;;  %v7691_v5 = vpop.f32.mrb[38].mxu0  ;;  %5999 = vst.msk [vmem:[%s8587_s27 + $0x394] sm:$0xf] %vm5769_vm3, %v7290_v61  ;;  %v3171_v9 = vadd.f32 %v8569_v51, %v3170_v4  ;;  %v7887_v11 = vpop.f32.mrb[38].mxu1 }
 0x131   : > { %v3847_v8 = vmax.f32 %v2395_v62, 0.0  ;;  %v2398_v10 = vadd.f32 %v7691_v5, %v8569_v51  ;;  %v2389_v12 = vpop.f32.mrb[39].mxu0  ;;  %v4043_v14 = vmax.f32 %v3179_v2, 0.0  ;;  %v3182_v16 = vadd.f32 %v7887_v11, %v8569_v51  ;;  %v3173_v18 = vpop.f32.mrb[39].mxu1 }
 0x132   : > { %v3845_v15 = vmax.f32 %v2387_v3, 0.0  ;;  %v2390_v17 = vadd.f32 %v8569_v51, %v2389_v12  ;;  %v4041_v20 = vmax.f32 %v3171_v9, 0.0  ;;  %v3174_v22 = vadd.f32 %v8569_v51, %v3173_v18 }
 0x133   : > { %v7099_v19 = vpack.c.bf16 %v3847_v8, %v3847_v8  ;;  %v3848_v21 = vmax.f32 %v2398_v10, 0.0  ;;  %7797 = vmatmul.mubr.msk.bf16.gmra.mrb[144].mxu0 %vm1612_vm2, %v8218_v1  ;;  %v7295_v23 = vpack.c.bf16 %v4043_v14, %v4043_v14  ;;  %v4044_v25 = vmax.f32 %v3182_v16, 0.0  ;;  %7993 = vmatmul.mubr.msk.bf16.gmra.mrb[144].mxu1 %vm1612_vm2, %v8219_v6  ;;  %v8929_v6 = vld [vmem:[%s9949_s2] ss:$0 sm:$0xff]  ;;  %v8226_v10 = vld [vmem:[%s8346_s22 + $0x268] sm:$0xff]   ;;  %v8228_v16 = vld [vmem:[%s8346_s22 + $0x270] sm:$0xff]  }
 0x134   : > { %v7097_v24 = vpack.c.bf16 %v3845_v15, %v3845_v15  ;;  %v3846_v26 = vmax.f32 %v2390_v17, 0.0  ;;  %7800 = vmatprep.mubr.msk.bf16.mxu0 %vm1612_vm2, %v8220_v7  ;;  %v7293_v27 = vpack.c.bf16 %v4041_v20, %v4041_v20  ;;  %v4042_v29 = vmax.f32 %v3174_v22, 0.0  ;;  %7996 = vmatprep.mubr.msk.bf16.mxu1 %vm1612_vm2, %v8221_v13  ;;  %v8227_v15 = vld [vmem:[%s8346_s22 + $0x578] sm:$0xff]   ;;  %v8229_v22 = vld [vmem:[%s8346_s22 + $0x580] sm:$0xff]  }
 0x135   : > { %5808 = vst.msk [vmem:[%s8587_s27 + $0x98] sm:$0xf] %vm5769_vm3, %v7099_v19  ;;  %v7100_v28 = vpack.c.bf16 %v3848_v21, %v3848_v21  ;;  %6004 = vst.msk [vmem:[%s8587_s27 + $0x3a8] sm:$0xf] %vm5769_vm3, %v7295_v23  ;;  %v7296_v30 = vpack.c.bf16 %v4044_v25, %v4044_v25 }
 0x136   : > { %5806 = vst.msk [vmem:[%s8587_s27 + $0x90] sm:$0xf] %vm5769_vm3, %v7097_v24  ;;  %v7098_v31 = vpack.c.bf16 %v3846_v26, %v3846_v26  ;;  %v7694_v32 = vpop.f32.mrb[40].mxu0  ;;  %6002 = vst.msk [vmem:[%s8587_s27 + $0x3a0] sm:$0xf] %vm5769_vm3, %v7293_v27  ;;  %v7294_v33 = vpack.c.bf16 %v4042_v29, %v4042_v29  ;;  %v7890_v35 = vpop.f32.mrb[40].mxu1 }
 0x137   : > { %5809 = vst.msk [vmem:[%s8587_s27 + $0x9c] sm:$0xf] %vm5769_vm3, %v7100_v28  ;;  %v2411_v34 = vadd.f32 %v7694_v32, %v8569_v51  ;;  %v2402_v36 = vpop.f32.mrb[41].mxu0  ;;  %6005 = vst.msk [vmem:[%s8587_s27 + $0x3ac] sm:$0xf] %vm5769_vm3, %v7296_v30  ;;  %v3195_v38 = vadd.f32 %v7890_v35, %v8569_v51  ;;  %v3186_v40 = vpop.f32.mrb[41].mxu1 }
 0x138   : > { %5807 = vst.msk [vmem:[%s8587_s27 + $0x94] sm:$0xf] %vm5769_vm3, %v7098_v31  ;;  %v2403_v39 = vadd.f32 %v8569_v51, %v2402_v36  ;;  %v7695_v41 = vpop.f32.mrb[42].mxu0  ;;  %6003 = vst.msk [vmem:[%s8587_s27 + $0x3a4] sm:$0xf] %vm5769_vm3, %v7294_v33  ;;  %v3187_v45 = vadd.f32 %v8569_v51, %v3186_v40  ;;  %v7891_v47 = vpop.f32.mrb[42].mxu1 }
 0x139   : > { %v3851_v44 = vmax.f32 %v2411_v34, 0.0  ;;  %v2414_v46 = vadd.f32 %v7695_v41, %v8569_v51  ;;  %v2405_v48 = vpop.f32.mrb[43].mxu0  ;;  %v4047_v50 = vmax.f32 %v3195_v38, 0.0  ;;  %v3198_v53 = vadd.f32 %v7891_v47, %v8569_v51  ;;  %v3189_v55 = vpop.f32.mrb[43].mxu1 }
 0x13a   : > { %v3849_v52 = vmax.f32 %v2403_v39, 0.0  ;;  %v2406_v54 = vadd.f32 %v8569_v51, %v2405_v48  ;;  %v4045_v57 = vmax.f32 %v3187_v45, 0.0  ;;  %v3190_v59 = vadd.f32 %v8569_v51, %v3189_v55 }
 0x13b   : > { %v7103_v56 = vpack.c.bf16 %v3851_v44, %v3851_v44  ;;  %v3852_v58 = vmax.f32 %v2414_v46, 0.0  ;;  %7801 = vmatmul.mubr.msk.bf16.gmra.mrb[148].mxu0 %vm1612_vm2, %v8222_v37  ;;  %v7299_v60 = vpack.c.bf16 %v4047_v50, %v4047_v50  ;;  %v4048_v62 = vmax.f32 %v3198_v53, 0.0  ;;  %7997 = vmatmul.mubr.msk.bf16.gmra.mrb[148].mxu1 %vm1612_vm2, %v8223_v42  ;;  %v8230_v46 = vld [vmem:[%s8346_s22 + $0x278] sm:$0xff]   ;;  %v8232_v53 = vld [vmem:[%s8346_s22 + $0x280] sm:$0xff]  }
 0x13c   : > { %v7101_v61 = vpack.c.bf16 %v3849_v52, %v3849_v52  ;;  %v3850_v63 = vmax.f32 %v2406_v54, 0.0  ;;  %7804 = vmatprep.mubr.msk.bf16.mxu0 %vm1612_vm2, %v8224_v43  ;;  %v7297_v0 = vpack.c.bf16 %v4045_v57, %v4045_v57  ;;  %v4046_v2 = vmax.f32 %v3190_v59, 0.0  ;;  %8000 = vmatprep.mubr.msk.bf16.mxu1 %vm1612_vm2, %v8225_v49  ;;  %v8231_v52 = vld [vmem:[%s8346_s22 + $0x588] sm:$0xff]   ;;  %v8233_v59 = vld [vmem:[%s8346_s22 + $0x590] sm:$0xff]  }
 0x13d   : > { %5812 = vst.msk [vmem:[%s8587_s27 + $0xa8] sm:$0xf] %vm5769_vm3, %v7103_v56  ;;  %v7104_v1 = vpack.c.bf16 %v3852_v58, %v3852_v58  ;;  %6008 = vst.msk [vmem:[%s8587_s27 + $0x3b8] sm:$0xf] %vm5769_vm3, %v7299_v60  ;;  %v7300_v51 = vpack.c.bf16 %v4048_v62, %v4048_v62 }
 0x13e   : > { %5810 = vst.msk [vmem:[%s8587_s27 + $0xa0] sm:$0xf] %vm5769_vm3, %v7101_v61  ;;  %v7102_v3 = vpack.c.bf16 %v3850_v63, %v3850_v63  ;;  %v7698_v4 = vpop.f32.mrb[44].mxu0  ;;  %6006 = vst.msk [vmem:[%s8587_s27 + $0x3b0] sm:$0xf] %vm5769_vm3, %v7297_v0  ;;  %v7298_v5 = vpack.c.bf16 %v4046_v2, %v4046_v2  ;;  %v7894_v8 = vpop.f32.mrb[44].mxu1 }
 0x13f   : > { %5813 = vst.msk [vmem:[%s8587_s27 + $0xac] sm:$0xf] %vm5769_vm3, %v7104_v1  ;;  %v2427_v7 = vadd.f32 %v8929_v6, %v7698_v4  ;;  %v2418_v9 = vpop.f32.mrb[45].mxu0  ;;  %6009 = vst.msk [vmem:[%s8587_s27 + $0x3bc] sm:$0xf] %vm5769_vm3, %v7300_v51  ;;  %v3211_v11 = vadd.f32 %v8929_v6, %v7894_v8  ;;  %v3202_v13 = vpop.f32.mrb[45].mxu1 }
 0x140   : > { %5811 = vst.msk [vmem:[%s8587_s27 + $0xa4] sm:$0xf] %vm5769_vm3, %v7102_v3  ;;  %v2419_v12 = vadd.f32 %v8929_v6, %v2418_v9  ;;  %v7699_v14 = vpop.f32.mrb[46].mxu0  ;;  %6007 = vst.msk [vmem:[%s8587_s27 + $0x3b4] sm:$0xf] %vm5769_vm3, %v7298_v5  ;;  %v3203_v18 = vadd.f32 %v8929_v6, %v3202_v13  ;;  %v7895_v20 = vpop.f32.mrb[46].mxu1 }
 0x141   : > { %v3855_v17 = vmax.f32 %v2427_v7, 0.0  ;;  %v2430_v19 = vadd.f32 %v8929_v6, %v7699_v14  ;;  %v2421_v21 = vpop.f32.mrb[47].mxu0  ;;  %v4051_v23 = vmax.f32 %v3211_v11, 0.0  ;;  %v3214_v25 = vadd.f32 %v8929_v6, %v7895_v20  ;;  %v3205_v27 = vpop.f32.mrb[47].mxu1 }
 0x142   : > { %v3853_v24 = vmax.f32 %v2419_v12, 0.0  ;;  %v2422_v26 = vadd.f32 %v8929_v6, %v2421_v21  ;;  %v4049_v29 = vmax.f32 %v3203_v18, 0.0  ;;  %v3206_v31 = vadd.f32 %v8929_v6, %v3205_v27 }
 0x143   : > { %v7107_v28 = vpack.c.bf16 %v3855_v17, %v3855_v17  ;;  %v3856_v30 = vmax.f32 %v2430_v19, 0.0  ;;  %7805 = vmatmul.mubr.msk.bf16.gmra.mrb[152].mxu0 %vm1612_vm2, %v8226_v10  ;;  %v7303_v32 = vpack.c.bf16 %v4051_v23, %v4051_v23  ;;  %v4052_v34 = vmax.f32 %v3214_v25, 0.0  ;;  %8001 = vmatmul.mubr.msk.bf16.gmra.mrb[152].mxu1 %vm1612_vm2, %v8227_v15  ;;  %v8234_v19 = vld [vmem:[%s8346_s22 + $0x288] sm:$0xff]   ;;  %v8236_v25 = vld [vmem:[%s8346_s22 + $0x290] sm:$0xff]  }
 0x144   : > { %v7105_v33 = vpack.c.bf16 %v3853_v24, %v3853_v24  ;;  %v3854_v35 = vmax.f32 %v2422_v26, 0.0  ;;  %7808 = vmatprep.mubr.msk.bf16.mxu0 %vm1612_vm2, %v8228_v16  ;;  %v7301_v36 = vpack.c.bf16 %v4049_v29, %v4049_v29  ;;  %v4050_v38 = vmax.f32 %v3206_v31, 0.0  ;;  %8004 = vmatprep.mubr.msk.bf16.mxu1 %vm1612_vm2, %v8229_v22  ;;  %v8235_v24 = vld [vmem:[%s8346_s22 + $0x598] sm:$0xff]   ;;  %v8237_v31 = vld [vmem:[%s8346_s22 + $0x5a0] sm:$0xff]  }
 0x145   : > { %5816 = vst.msk [vmem:[%s8587_s27 + $0xb8] sm:$0xf] %vm5769_vm3, %v7107_v28  ;;  %v7108_v37 = vpack.c.bf16 %v3856_v30, %v3856_v30  ;;  %6012 = vst.msk [vmem:[%s8587_s27 + $0x3c8] sm:$0xf] %vm5769_vm3, %v7303_v32  ;;  %v7304_v39 = vpack.c.bf16 %v4052_v34, %v4052_v34 }
 0x146   : > { %5814 = vst.msk [vmem:[%s8587_s27 + $0xb0] sm:$0xf] %vm5769_vm3, %v7105_v33  ;;  %v7106_v40 = vpack.c.bf16 %v3854_v35, %v3854_v35  ;;  %v7702_v41 = vpop.f32.mrb[48].mxu0  ;;  %6010 = vst.msk [vmem:[%s8587_s27 + $0x3c0] sm:$0xf] %vm5769_vm3, %v7301_v36  ;;  %v7302_v42 = vpack.c.bf16 %v4050_v38, %v4050_v38  ;;  %v7898_v44 = vpop.f32.mrb[48].mxu1 }
 0x147   : > { %5817 = vst.msk [vmem:[%s8587_s27 + $0xbc] sm:$0xf] %vm5769_vm3, %v7108_v37  ;;  %v2443_v43 = vadd.f32 %v8929_v6, %v7702_v41  ;;  %v2434_v45 = vpop.f32.mrb[49].mxu0  ;;  %6013 = vst.msk [vmem:[%s8587_s27 + $0x3cc] sm:$0xf] %vm5769_vm3, %v7304_v39  ;;  %v3227_v47 = vadd.f32 %v8929_v6, %v7898_v44  ;;  %v3218_v49 = vpop.f32.mrb[49].mxu1 }
 0x148   : > { %5815 = vst.msk [vmem:[%s8587_s27 + $0xb4] sm:$0xf] %vm5769_vm3, %v7106_v40  ;;  %v2435_v48 = vadd.f32 %v8929_v6, %v2434_v45  ;;  %v7703_v50 = vpop.f32.mrb[50].mxu0  ;;  %6011 = vst.msk [vmem:[%s8587_s27 + $0x3c4] sm:$0xf] %vm5769_vm3, %v7302_v42  ;;  %v3219_v55 = vadd.f32 %v8929_v6, %v3218_v49  ;;  %v7899_v57 = vpop.f32.mrb[50].mxu1 }
 0x149   : > { %v3859_v54 = vmax.f32 %v2443_v43, 0.0  ;;  %v2446_v56 = vadd.f32 %v8929_v6, %v7703_v50  ;;  %v2437_v58 = vpop.f32.mrb[51].mxu0  ;;  %v4055_v60 = vmax.f32 %v3227_v47, 0.0  ;;  %v3230_v62 = vadd.f32 %v8929_v6, %v7899_v57  ;;  %v3221_v0 = vpop.f32.mrb[51].mxu1 }
 0x14a   : > { %v3857_v61 = vmax.f32 %v2435_v48, 0.0  ;;  %v2438_v63 = vadd.f32 %v8929_v6, %v2437_v58  ;;  %v4053_v2 = vmax.f32 %v3219_v55, 0.0  ;;  %v3222_v3 = vadd.f32 %v8929_v6, %v3221_v0 }
 0x14b   : > { %v7111_v1 = vpack.c.bf16 %v3859_v54, %v3859_v54  ;;  %v3860_v51 = vmax.f32 %v2446_v56, 0.0  ;;  %7809 = vmatmul.mubr.msk.bf16.gmra.mrb[156].mxu0 %vm1612_vm2, %v8230_v46  ;;  %v7307_v4 = vpack.c.bf16 %v4055_v60, %v4055_v60  ;;  %v4056_v7 = vmax.f32 %v3230_v62, 0.0  ;;  %8005 = vmatmul.mubr.msk.bf16.gmra.mrb[156].mxu1 %vm1612_vm2, %v8231_v52  ;;  %v8238_v56 = vld [vmem:[%s8346_s22 + $0x298] sm:$0xff]   ;;  %v8240_v62 = vld [vmem:[%s8346_s22 + $0x2a0] sm:$0xff]  }
 0x14c   : > { %v7109_v5 = vpack.c.bf16 %v3857_v61, %v3857_v61  ;;  %v3858_v8 = vmax.f32 %v2438_v63, 0.0  ;;  %7812 = vmatprep.mubr.msk.bf16.mxu0 %vm1612_vm2, %v8232_v53  ;;  %v7305_v9 = vpack.c.bf16 %v4053_v2, %v4053_v2  ;;  %v4054_v11 = vmax.f32 %v3222_v3, 0.0  ;;  %8008 = vmatprep.mubr.msk.bf16.mxu1 %vm1612_vm2, %v8233_v59  ;;  %v8239_v61 = vld [vmem:[%s8346_s22 + $0x5a8] sm:$0xff]   ;;  %v8241_v3 = vld [vmem:[%s8346_s22 + $0x5b0] sm:$0xff]  }
 0x14d   : > { %5820 = vst.msk [vmem:[%s8587_s27 + $0xc8] sm:$0xf] %vm5769_vm3, %v7111_v1  ;;  %v7112_v10 = vpack.c.bf16 %v3860_v51, %v3860_v51  ;;  %6016 = vst.msk [vmem:[%s8587_s27 + $0x3d8] sm:$0xf] %vm5769_vm3, %v7307_v4  ;;  %v7308_v12 = vpack.c.bf16 %v4056_v7, %v4056_v7 }
 0x14e   : > { %5818 = vst.msk [vmem:[%s8587_s27 + $0xc0] sm:$0xf] %vm5769_vm3, %v7109_v5  ;;  %v7110_v13 = vpack.c.bf16 %v3858_v8, %v3858_v8  ;;  %v7706_v14 = vpop.f32.mrb[52].mxu0  ;;  %6014 = vst.msk [vmem:[%s8587_s27 + $0x3d0] sm:$0xf] %vm5769_vm3, %v7305_v9  ;;  %v7306_v15 = vpack.c.bf16 %v4054_v11, %v4054_v11  ;;  %v7902_v17 = vpop.f32.mrb[52].mxu1 }
 0x14f   : > { %5821 = vst.msk [vmem:[%s8587_s27 + $0xcc] sm:$0xf] %vm5769_vm3, %v7112_v10  ;;  %v2459_v16 = vadd.f32 %v8929_v6, %v7706_v14  ;;  %v2450_v18 = vpop.f32.mrb[53].mxu0  ;;  %6017 = vst.msk [vmem:[%s8587_s27 + $0x3dc] sm:$0xf] %vm5769_vm3, %v7308_v12  ;;  %v3243_v20 = vadd.f32 %v8929_v6, %v7902_v17  ;;  %v3234_v22 = vpop.f32.mrb[53].mxu1 }
 0x150   : > { %5819 = vst.msk [vmem:[%s8587_s27 + $0xc4] sm:$0xf] %vm5769_vm3, %v7110_v13  ;;  %v2451_v21 = vadd.f32 %v8929_v6, %v2450_v18  ;;  %v7707_v23 = vpop.f32.mrb[54].mxu0  ;;  %6015 = vst.msk [vmem:[%s8587_s27 + $0x3d4] sm:$0xf] %vm5769_vm3, %v7306_v15  ;;  %v3235_v27 = vadd.f32 %v8929_v6, %v3234_v22  ;;  %v7903_v29 = vpop.f32.mrb[54].mxu1 }
 0x151   : > { %v3863_v26 = vmax.f32 %v2459_v16, 0.0  ;;  %v2462_v28 = vadd.f32 %v8929_v6, %v7707_v23  ;;  %v2453_v30 = vpop.f32.mrb[55].mxu0  ;;  %v4059_v32 = vmax.f32 %v3243_v20, 0.0  ;;  %v3246_v34 = vadd.f32 %v8929_v6, %v7903_v29  ;;  %v3237_v36 = vpop.f32.mrb[55].mxu1 }
 0x152   : > { %v3861_v33 = vmax.f32 %v2451_v21, 0.0  ;;  %v2454_v35 = vadd.f32 %v8929_v6, %v2453_v30  ;;  %v4057_v38 = vmax.f32 %v3235_v27, 0.0  ;;  %v3238_v40 = vadd.f32 %v8929_v6, %v3237_v36 }
 0x153   : > { %v7115_v37 = vpack.c.bf16 %v3863_v26, %v3863_v26  ;;  %v3864_v39 = vmax.f32 %v2462_v28, 0.0  ;;  %7813 = vmatmul.mubr.msk.bf16.gmra.mrb[160].mxu0 %vm1612_vm2, %v8234_v19  ;;  %v7311_v41 = vpack.c.bf16 %v4059_v32, %v4059_v32  ;;  %v4060_v43 = vmax.f32 %v3246_v34, 0.0  ;;  %8009 = vmatmul.mubr.msk.bf16.gmra.mrb[160].mxu1 %vm1612_vm2, %v8235_v24  ;;  %v8242_v28 = vld [vmem:[%s8346_s22 + $0x2a8] sm:$0xff]   ;;  %v8244_v34 = vld [vmem:[%s8346_s22 + $0x2b0] sm:$0xff]  }
 0x154   : > { %v7113_v42 = vpack.c.bf16 %v3861_v33, %v3861_v33  ;;  %v3862_v44 = vmax.f32 %v2454_v35, 0.0  ;;  %7816 = vmatprep.mubr.msk.bf16.mxu0 %vm1612_vm2, %v8236_v25  ;;  %v7309_v45 = vpack.c.bf16 %v4057_v38, %v4057_v38  ;;  %v4058_v47 = vmax.f32 %v3238_v40, 0.0  ;;  %8012 = vmatprep.mubr.msk.bf16.mxu1 %vm1612_vm2, %v8237_v31  ;;  %v8243_v33 = vld [vmem:[%s8346_s22 + $0x5b8] sm:$0xff]   ;;  %v8245_v40 = vld [vmem:[%s8346_s22 + $0x5c0] sm:$0xff]  }
 0x155   : > { %5824 = vst.msk [vmem:[%s8587_s27 + $0xd8] sm:$0xf] %vm5769_vm3, %v7115_v37  ;;  %v7116_v46 = vpack.c.bf16 %v3864_v39, %v3864_v39  ;;  %6020 = vst.msk [vmem:[%s8587_s27 + $0x3e8] sm:$0xf] %vm5769_vm3, %v7311_v41  ;;  %v7312_v48 = vpack.c.bf16 %v4060_v43, %v4060_v43 }
 0x156   : > { %5822 = vst.msk [vmem:[%s8587_s27 + $0xd0] sm:$0xf] %vm5769_vm3, %v7113_v42  ;;  %v7114_v49 = vpack.c.bf16 %v3862_v44, %v3862_v44  ;;  %v7710_v50 = vpop.f32.mrb[56].mxu0  ;;  %6018 = vst.msk [vmem:[%s8587_s27 + $0x3e0] sm:$0xf] %vm5769_vm3, %v7309_v45  ;;  %v7310_v52 = vpack.c.bf16 %v4058_v47, %v4058_v47  ;;  %v7906_v54 = vpop.f32.mrb[56].mxu1 }
 0x157   : > { %5825 = vst.msk [vmem:[%s8587_s27 + $0xdc] sm:$0xf] %vm5769_vm3, %v7116_v46  ;;  %v2475_v53 = vadd.f32 %v8929_v6, %v7710_v50  ;;  %v2466_v55 = vpop.f32.mrb[57].mxu0  ;;  %6021 = vst.msk [vmem:[%s8587_s27 + $0x3ec] sm:$0xf] %vm5769_vm3, %v7312_v48  ;;  %v3259_v57 = vadd.f32 %v8929_v6, %v7906_v54  ;;  %v3250_v59 = vpop.f32.mrb[57].mxu1 }
 0x158   : > { %5823 = vst.msk [vmem:[%s8587_s27 + $0xd4] sm:$0xf] %vm5769_vm3, %v7114_v49  ;;  %v2467_v58 = vadd.f32 %v8929_v6, %v2466_v55  ;;  %v7711_v60 = vpop.f32.mrb[58].mxu0  ;;  %6019 = vst.msk [vmem:[%s8587_s27 + $0x3e4] sm:$0xf] %vm5769_vm3, %v7310_v52  ;;  %v3251_v0 = vadd.f32 %v8929_v6, %v3250_v59  ;;  %v7907_v2 = vpop.f32.mrb[58].mxu1 }
 0x159   : > { %v3867_v63 = vmax.f32 %v2475_v53, 0.0  ;;  %v2478_v1 = vadd.f32 %v8929_v6, %v7711_v60  ;;  %v2469_v51 = vpop.f32.mrb[59].mxu0  ;;  %v4063_v4 = vmax.f32 %v3259_v57, 0.0  ;;  %v3262_v7 = vadd.f32 %v8929_v6, %v7907_v2  ;;  %v3253_v9 = vpop.f32.mrb[59].mxu1 }
 0x15a   : > { %v3865_v5 = vmax.f32 %v2467_v58, 0.0  ;;  %v2470_v8 = vadd.f32 %v8929_v6, %v2469_v51  ;;  %v4061_v11 = vmax.f32 %v3251_v0, 0.0  ;;  %v3254_v13 = vadd.f32 %v8929_v6, %v3253_v9 }
 0x15b   : > { %v7119_v10 = vpack.c.bf16 %v3867_v63, %v3867_v63  ;;  %v3868_v12 = vmax.f32 %v2478_v1, 0.0  ;;  %7817 = vmatmul.mubr.msk.bf16.gmra.mrb[164].mxu0 %vm1612_vm2, %v8238_v56  ;;  %v7315_v14 = vpack.c.bf16 %v4063_v4, %v4063_v4  ;;  %v4064_v16 = vmax.f32 %v3262_v7, 0.0  ;;  %8013 = vmatmul.mubr.msk.bf16.gmra.mrb[164].mxu1 %vm1612_vm2, %v8239_v61  ;;  %v8246_v1 = vld [vmem:[%s8346_s22 + $0x2b8] sm:$0xff]   ;;  %v8248_v7 = vld [vmem:[%s8346_s22 + $0x2c0] sm:$0xff]  }
 0x15c   : > { %v7117_v15 = vpack.c.bf16 %v3865_v5, %v3865_v5  ;;  %v3866_v17 = vmax.f32 %v2470_v8, 0.0  ;;  %7820 = vmatprep.mubr.msk.bf16.mxu0 %vm1612_vm2, %v8240_v62  ;;  %v7313_v18 = vpack.c.bf16 %v4061_v11, %v4061_v11  ;;  %v4062_v20 = vmax.f32 %v3254_v13, 0.0  ;;  %8016 = vmatprep.mubr.msk.bf16.mxu1 %vm1612_vm2, %v8241_v3  ;;  %v8247_v5 = vld [vmem:[%s8346_s22 + $0x5c8] sm:$0xff]   ;;  %v8249_v13 = vld [vmem:[%s8346_s22 + $0x5d0] sm:$0xff]  }
 0x15d   : > { %5828 = vst.msk [vmem:[%s8587_s27 + $0xe8] sm:$0xf] %vm5769_vm3, %v7119_v10  ;;  %v7120_v19 = vpack.c.bf16 %v3868_v12, %v3868_v12  ;;  %6024 = vst.msk [vmem:[%s8587_s27 + $0x3f8] sm:$0xf] %vm5769_vm3, %v7315_v14  ;;  %v7316_v21 = vpack.c.bf16 %v4064_v16, %v4064_v16 }
 0x15e   : > { %5826 = vst.msk [vmem:[%s8587_s27 + $0xe0] sm:$0xf] %vm5769_vm3, %v7117_v15  ;;  %v7118_v22 = vpack.c.bf16 %v3866_v17, %v3866_v17  ;;  %v7714_v23 = vpop.f32.mrb[60].mxu0  ;;  %6022 = vst.msk [vmem:[%s8587_s27 + $0x3f0] sm:$0xf] %vm5769_vm3, %v7313_v18  ;;  %v7314_v24 = vpack.c.bf16 %v4062_v20, %v4062_v20  ;;  %v7910_v26 = vpop.f32.mrb[60].mxu1 }
 0x15f   : > { %5829 = vst.msk [vmem:[%s8587_s27 + $0xec] sm:$0xf] %vm5769_vm3, %v7120_v19  ;;  %v2491_v25 = vadd.f32 %v8929_v6, %v7714_v23  ;;  %v2482_v27 = vpop.f32.mrb[61].mxu0  ;;  %6025 = vst.msk [vmem:[%s8587_s27 + $0x3fc] sm:$0xf] %vm5769_vm3, %v7316_v21  ;;  %v3275_v29 = vadd.f32 %v8929_v6, %v7910_v26  ;;  %v3266_v31 = vpop.f32.mrb[61].mxu1 }
 0x160   : > { %5827 = vst.msk [vmem:[%s8587_s27 + $0xe4] sm:$0xf] %vm5769_vm3, %v7118_v22  ;;  %v2483_v30 = vadd.f32 %v8929_v6, %v2482_v27  ;;  %v7715_v32 = vpop.f32.mrb[62].mxu0  ;;  %6023 = vst.msk [vmem:[%s8587_s27 + $0x3f4] sm:$0xf] %vm5769_vm3, %v7314_v24  ;;  %v3267_v36 = vadd.f32 %v8929_v6, %v3266_v31  ;;  %v7911_v38 = vpop.f32.mrb[62].mxu1 }
 0x161   : > { %v3871_v35 = vmax.f32 %v2491_v25, 0.0  ;;  %v2494_v37 = vadd.f32 %v8929_v6, %v7715_v32  ;;  %v2485_v39 = vpop.f32.mrb[63].mxu0  ;;  %v4067_v41 = vmax.f32 %v3275_v29, 0.0  ;;  %v3278_v43 = vadd.f32 %v8929_v6, %v7911_v38  ;;  %v3269_v45 = vpop.f32.mrb[63].mxu1 }
 0x162   : > { %v3869_v42 = vmax.f32 %v2483_v30, 0.0  ;;  %v2486_v44 = vadd.f32 %v8929_v6, %v2485_v39  ;;  %v4065_v47 = vmax.f32 %v3267_v36, 0.0  ;;  %v3270_v49 = vadd.f32 %v8929_v6, %v3269_v45 }
 0x163   : > { %v7123_v46 = vpack.c.bf16 %v3871_v35, %v3871_v35  ;;  %v3872_v48 = vmax.f32 %v2494_v37, 0.0  ;;  %7821 = vmatmul.mubr.msk.bf16.gmra.mrb[168].mxu0 %vm1612_vm2, %v8242_v28  ;;  %v7319_v50 = vpack.c.bf16 %v4067_v41, %v4067_v41  ;;  %v4068_v53 = vmax.f32 %v3278_v43, 0.0  ;;  %8017 = vmatmul.mubr.msk.bf16.gmra.mrb[168].mxu1 %vm1612_vm2, %v8243_v33  ;;  %v8250_v37 = vld [vmem:[%s8346_s22 + $0x2c8] sm:$0xff]   ;;  %v8252_v43 = vld [vmem:[%s8346_s22 + $0x2d0] sm:$0xff]  }
 0x164   : > { %v7121_v52 = vpack.c.bf16 %v3869_v42, %v3869_v42  ;;  %v3870_v54 = vmax.f32 %v2486_v44, 0.0  ;;  %7824 = vmatprep.mubr.msk.bf16.mxu0 %vm1612_vm2, %v8244_v34  ;;  %v7317_v55 = vpack.c.bf16 %v4065_v47, %v4065_v47  ;;  %v4066_v57 = vmax.f32 %v3270_v49, 0.0  ;;  %8020 = vmatprep.mubr.msk.bf16.mxu1 %vm1612_vm2, %v8245_v40  ;;  %v8251_v42 = vld [vmem:[%s8346_s22 + $0x5d8] sm:$0xff]   ;;  %v8253_v49 = vld [vmem:[%s8346_s22 + $0x5e0] sm:$0xff]  }
 0x165   : > { %5832 = vst.msk [vmem:[%s8587_s27 + $0xf8] sm:$0xf] %vm5769_vm3, %v7123_v46  ;;  %v7124_v56 = vpack.c.bf16 %v3872_v48, %v3872_v48  ;;  %6028 = vst.msk [vmem:[%s8587_s27 + $0x408] sm:$0xf] %vm5769_vm3, %v7319_v50  ;;  %v7320_v58 = vpack.c.bf16 %v4068_v53, %v4068_v53 }
 0x166   : > { %5830 = vst.msk [vmem:[%s8587_s27 + $0xf0] sm:$0xf] %vm5769_vm3, %v7121_v52  ;;  %v7122_v59 = vpack.c.bf16 %v3870_v54, %v3870_v54  ;;  %v7718_v60 = vpop.f32.mrb[64].mxu0  ;;  %6026 = vst.msk [vmem:[%s8587_s27 + $0x400] sm:$0xf] %vm5769_vm3, %v7317_v55  ;;  %v7318_v61 = vpack.c.bf16 %v4066_v57, %v4066_v57  ;;  %v7914_v63 = vpop.f32.mrb[64].mxu1 }
 0x167   : > { %5833 = vst.msk [vmem:[%s8587_s27 + $0xfc] sm:$0xf] %vm5769_vm3, %v7124_v56  ;;  %v2507_v62 = vadd.f32 %v8929_v6, %v7718_v60  ;;  %v2498_v0 = vpop.f32.mrb[65].mxu0  ;;  %6029 = vst.msk [vmem:[%s8587_s27 + $0x40c] sm:$0xf] %vm5769_vm3, %v7320_v58  ;;  %v3291_v2 = vadd.f32 %v8929_v6, %v7914_v63  ;;  %v3282_v3 = vpop.f32.mrb[65].mxu1 }
 0x168   : > { %5831 = vst.msk [vmem:[%s8587_s27 + $0xf4] sm:$0xf] %vm5769_vm3, %v7122_v59  ;;  %v2499_v51 = vadd.f32 %v8929_v6, %v2498_v0  ;;  %v7719_v4 = vpop.f32.mrb[66].mxu0  ;;  %6027 = vst.msk [vmem:[%s8587_s27 + $0x404] sm:$0xf] %vm5769_vm3, %v7318_v61  ;;  %v3283_v9 = vadd.f32 %v8929_v6, %v3282_v3  ;;  %v7915_v11 = vpop.f32.mrb[66].mxu1 }
 0x169   : > { %v3875_v8 = vmax.f32 %v2507_v62, 0.0  ;;  %v2510_v10 = vadd.f32 %v8929_v6, %v7719_v4  ;;  %v2501_v12 = vpop.f32.mrb[67].mxu0  ;;  %v4071_v14 = vmax.f32 %v3291_v2, 0.0  ;;  %v3294_v16 = vadd.f32 %v8929_v6, %v7915_v11  ;;  %v3285_v18 = vpop.f32.mrb[67].mxu1 }
 0x16a   : > { %v3873_v15 = vmax.f32 %v2499_v51, 0.0  ;;  %v2502_v17 = vadd.f32 %v8929_v6, %v2501_v12  ;;  %v4069_v20 = vmax.f32 %v3283_v9, 0.0  ;;  %v3286_v22 = vadd.f32 %v8929_v6, %v3285_v18 }
 0x16b   : > { %v7127_v19 = vpack.c.bf16 %v3875_v8, %v3875_v8  ;;  %v3876_v21 = vmax.f32 %v2510_v10, 0.0  ;;  %7825 = vmatmul.mubr.msk.bf16.gmra.mrb[172].mxu0 %vm1612_vm2, %v8246_v1  ;;  %v7323_v23 = vpack.c.bf16 %v4071_v14, %v4071_v14  ;;  %v4072_v25 = vmax.f32 %v3294_v16, 0.0  ;;  %8021 = vmatmul.mubr.msk.bf16.gmra.mrb[172].mxu1 %vm1612_vm2, %v8247_v5  ;;  %v8254_v10 = vld [vmem:[%s8346_s22 + $0x2d8] sm:$0xff]   ;;  %v8256_v16 = vld [vmem:[%s8346_s22 + $0x2e0] sm:$0xff]  }
 0x16c   : > { %v7125_v24 = vpack.c.bf16 %v3873_v15, %v3873_v15  ;;  %v3874_v26 = vmax.f32 %v2502_v17, 0.0  ;;  %7828 = vmatprep.mubr.msk.bf16.mxu0 %vm1612_vm2, %v8248_v7  ;;  %v7321_v27 = vpack.c.bf16 %v4069_v20, %v4069_v20  ;;  %v4070_v29 = vmax.f32 %v3286_v22, 0.0  ;;  %8024 = vmatprep.mubr.msk.bf16.mxu1 %vm1612_vm2, %v8249_v13  ;;  %v8255_v15 = vld [vmem:[%s8346_s22 + $0x5e8] sm:$0xff]   ;;  %v8257_v22 = vld [vmem:[%s8346_s22 + $0x5f0] sm:$0xff]  }
 0x16d   : > { %5836 = vst.msk [vmem:[%s8587_s27 + $0x108] sm:$0xf] %vm5769_vm3, %v7127_v19  ;;  %v7128_v28 = vpack.c.bf16 %v3876_v21, %v3876_v21  ;;  %6032 = vst.msk [vmem:[%s8587_s27 + $0x418] sm:$0xf] %vm5769_vm3, %v7323_v23  ;;  %v7324_v30 = vpack.c.bf16 %v4072_v25, %v4072_v25 }
 0x16e   : > { %5834 = vst.msk [vmem:[%s8587_s27 + $0x100] sm:$0xf] %vm5769_vm3, %v7125_v24  ;;  %v7126_v31 = vpack.c.bf16 %v3874_v26, %v3874_v26  ;;  %v7722_v32 = vpop.f32.mrb[68].mxu0  ;;  %6030 = vst.msk [vmem:[%s8587_s27 + $0x410] sm:$0xf] %vm5769_vm3, %v7321_v27  ;;  %v7322_v33 = vpack.c.bf16 %v4070_v29, %v4070_v29  ;;  %v7918_v35 = vpop.f32.mrb[68].mxu1 }
 0x16f   : > { %5837 = vst.msk [vmem:[%s8587_s27 + $0x10c] sm:$0xf] %vm5769_vm3, %v7128_v28  ;;  %v2523_v34 = vadd.f32 %v8929_v6, %v7722_v32  ;;  %v2514_v36 = vpop.f32.mrb[69].mxu0  ;;  %6033 = vst.msk [vmem:[%s8587_s27 + $0x41c] sm:$0xf] %vm5769_vm3, %v7324_v30  ;;  %v3307_v38 = vadd.f32 %v8929_v6, %v7918_v35  ;;  %v3298_v40 = vpop.f32.mrb[69].mxu1 }
 0x170   : > { %5835 = vst.msk [vmem:[%s8587_s27 + $0x104] sm:$0xf] %vm5769_vm3, %v7126_v31  ;;  %v2515_v39 = vadd.f32 %v8929_v6, %v2514_v36  ;;  %v7723_v41 = vpop.f32.mrb[70].mxu0  ;;  %6031 = vst.msk [vmem:[%s8587_s27 + $0x414] sm:$0xf] %vm5769_vm3, %v7322_v33  ;;  %v3299_v45 = vadd.f32 %v8929_v6, %v3298_v40  ;;  %v7919_v47 = vpop.f32.mrb[70].mxu1 }
 0x171   : > { %v3879_v44 = vmax.f32 %v2523_v34, 0.0  ;;  %v2526_v46 = vadd.f32 %v8929_v6, %v7723_v41  ;;  %v2517_v48 = vpop.f32.mrb[71].mxu0  ;;  %v4075_v50 = vmax.f32 %v3307_v38, 0.0  ;;  %v3310_v53 = vadd.f32 %v8929_v6, %v7919_v47  ;;  %v3301_v55 = vpop.f32.mrb[71].mxu1 }
 0x172   : > { %v3877_v52 = vmax.f32 %v2515_v39, 0.0  ;;  %v2518_v54 = vadd.f32 %v8929_v6, %v2517_v48  ;;  %v4073_v57 = vmax.f32 %v3299_v45, 0.0  ;;  %v3302_v59 = vadd.f32 %v8929_v6, %v3301_v55 }
 0x173   : > { %v7131_v56 = vpack.c.bf16 %v3879_v44, %v3879_v44  ;;  %v3880_v58 = vmax.f32 %v2526_v46, 0.0  ;;  %7829 = vmatmul.mubr.msk.bf16.gmra.mrb[176].mxu0 %vm1612_vm2, %v8250_v37  ;;  %v7327_v60 = vpack.c.bf16 %v4075_v50, %v4075_v50  ;;  %v4076_v62 = vmax.f32 %v3310_v53, 0.0  ;;  %8025 = vmatmul.mubr.msk.bf16.gmra.mrb[176].mxu1 %vm1612_vm2, %v8251_v42  ;;  %v8258_v46 = vld [vmem:[%s8346_s22 + $0x2e8] sm:$0xff]   ;;  %v8260_v53 = vld [vmem:[%s8346_s22 + $0x2f0] sm:$0xff]  }
 0x174   : > { %v7129_v61 = vpack.c.bf16 %v3877_v52, %v3877_v52  ;;  %v3878_v63 = vmax.f32 %v2518_v54, 0.0  ;;  %7832 = vmatprep.mubr.msk.bf16.mxu0 %vm1612_vm2, %v8252_v43  ;;  %v7325_v0 = vpack.c.bf16 %v4073_v57, %v4073_v57  ;;  %v4074_v2 = vmax.f32 %v3302_v59, 0.0  ;;  %8028 = vmatprep.mubr.msk.bf16.mxu1 %vm1612_vm2, %v8253_v49  ;;  %v8259_v52 = vld [vmem:[%s8346_s22 + $0x5f8] sm:$0xff]   ;;  %v8261_v59 = vld [vmem:[%s8346_s22 + $0x600] sm:$0xff]  }
 0x175   : > { %5840 = vst.msk [vmem:[%s8587_s27 + $0x118] sm:$0xf] %vm5769_vm3, %v7131_v56  ;;  %v7132_v1 = vpack.c.bf16 %v3880_v58, %v3880_v58  ;;  %6036 = vst.msk [vmem:[%s8587_s27 + $0x428] sm:$0xf] %vm5769_vm3, %v7327_v60  ;;  %v7328_v51 = vpack.c.bf16 %v4076_v62, %v4076_v62 }
 0x176   : > { %5838 = vst.msk [vmem:[%s8587_s27 + $0x110] sm:$0xf] %vm5769_vm3, %v7129_v61  ;;  %v7130_v3 = vpack.c.bf16 %v3878_v63, %v3878_v63  ;;  %v7726_v4 = vpop.f32.mrb[72].mxu0  ;;  %6034 = vst.msk [vmem:[%s8587_s27 + $0x420] sm:$0xf] %vm5769_vm3, %v7325_v0  ;;  %v7326_v5 = vpack.c.bf16 %v4074_v2, %v4074_v2  ;;  %v7922_v8 = vpop.f32.mrb[72].mxu1 }
 0x177   : > { %5841 = vst.msk [vmem:[%s8587_s27 + $0x11c] sm:$0xf] %vm5769_vm3, %v7132_v1  ;;  %v2539_v7 = vadd.f32 %v8929_v6, %v7726_v4  ;;  %v2530_v9 = vpop.f32.mrb[73].mxu0  ;;  %6037 = vst.msk [vmem:[%s8587_s27 + $0x42c] sm:$0xf] %vm5769_vm3, %v7328_v51  ;;  %v3323_v11 = vadd.f32 %v8929_v6, %v7922_v8  ;;  %v3314_v13 = vpop.f32.mrb[73].mxu1 }
 0x178   : > { %5839 = vst.msk [vmem:[%s8587_s27 + $0x114] sm:$0xf] %vm5769_vm3, %v7130_v3  ;;  %v2531_v12 = vadd.f32 %v8929_v6, %v2530_v9  ;;  %v7727_v14 = vpop.f32.mrb[74].mxu0  ;;  %6035 = vst.msk [vmem:[%s8587_s27 + $0x424] sm:$0xf] %vm5769_vm3, %v7326_v5  ;;  %v3315_v18 = vadd.f32 %v8929_v6, %v3314_v13  ;;  %v7923_v20 = vpop.f32.mrb[74].mxu1 }
 0x179   : > { %v3883_v17 = vmax.f32 %v2539_v7, 0.0  ;;  %v2542_v19 = vadd.f32 %v8929_v6, %v7727_v14  ;;  %v2533_v21 = vpop.f32.mrb[75].mxu0  ;;  %v4079_v23 = vmax.f32 %v3323_v11, 0.0  ;;  %v3326_v25 = vadd.f32 %v8929_v6, %v7923_v20  ;;  %v3317_v27 = vpop.f32.mrb[75].mxu1 }
 0x17a   : > { %v3881_v24 = vmax.f32 %v2531_v12, 0.0  ;;  %v2534_v26 = vadd.f32 %v8929_v6, %v2533_v21  ;;  %v4077_v29 = vmax.f32 %v3315_v18, 0.0  ;;  %v3318_v31 = vadd.f32 %v8929_v6, %v3317_v27 }
 0x17b   : > { %v7135_v28 = vpack.c.bf16 %v3883_v17, %v3883_v17  ;;  %v3884_v30 = vmax.f32 %v2542_v19, 0.0  ;;  %7833 = vmatmul.mubr.msk.bf16.gmra.mrb[180].mxu0 %vm1612_vm2, %v8254_v10  ;;  %v7331_v32 = vpack.c.bf16 %v4079_v23, %v4079_v23  ;;  %v4080_v34 = vmax.f32 %v3326_v25, 0.0  ;;  %8029 = vmatmul.mubr.msk.bf16.gmra.mrb[180].mxu1 %vm1612_vm2, %v8255_v15  ;;  %v8262_v19 = vld [vmem:[%s8346_s22 + $0x2f8] sm:$0xff]   ;;  %v8264_v25 = vld [vmem:[%s8346_s22 + $0x300] sm:$0xff]  }
 0x17c   : > { %v7133_v33 = vpack.c.bf16 %v3881_v24, %v3881_v24  ;;  %v3882_v35 = vmax.f32 %v2534_v26, 0.0  ;;  %7836 = vmatprep.mubr.msk.bf16.mxu0 %vm1612_vm2, %v8256_v16  ;;  %v7329_v36 = vpack.c.bf16 %v4077_v29, %v4077_v29  ;;  %v4078_v38 = vmax.f32 %v3318_v31, 0.0  ;;  %8032 = vmatprep.mubr.msk.bf16.mxu1 %vm1612_vm2, %v8257_v22  ;;  %v8263_v24 = vld [vmem:[%s8346_s22 + $0x608] sm:$0xff]   ;;  %v8265_v31 = vld [vmem:[%s8346_s22 + $0x610] sm:$0xff]  }
 0x17d   : > { %5844 = vst.msk [vmem:[%s8587_s27 + $0x128] sm:$0xf] %vm5769_vm3, %v7135_v28  ;;  %v7136_v37 = vpack.c.bf16 %v3884_v30, %v3884_v30  ;;  %6040 = vst.msk [vmem:[%s8587_s27 + $0x438] sm:$0xf] %vm5769_vm3, %v7331_v32  ;;  %v7332_v39 = vpack.c.bf16 %v4080_v34, %v4080_v34 }
 0x17e   : > { %5842 = vst.msk [vmem:[%s8587_s27 + $0x120] sm:$0xf] %vm5769_vm3, %v7133_v33  ;;  %v7134_v40 = vpack.c.bf16 %v3882_v35, %v3882_v35  ;;  %v7730_v41 = vpop.f32.mrb[76].mxu0  ;;  %6038 = vst.msk [vmem:[%s8587_s27 + $0x430] sm:$0xf] %vm5769_vm3, %v7329_v36  ;;  %v7330_v42 = vpack.c.bf16 %v4078_v38, %v4078_v38  ;;  %v7926_v44 = vpop.f32.mrb[76].mxu1 }
 0x17f   : > { %5845 = vst.msk [vmem:[%s8587_s27 + $0x12c] sm:$0xf] %vm5769_vm3, %v7136_v37  ;;  %v2555_v43 = vadd.f32 %v8929_v6, %v7730_v41  ;;  %v2546_v45 = vpop.f32.mrb[77].mxu0  ;;  %6041 = vst.msk [vmem:[%s8587_s27 + $0x43c] sm:$0xf] %vm5769_vm3, %v7332_v39  ;;  %v3339_v47 = vadd.f32 %v8929_v6, %v7926_v44  ;;  %v3330_v49 = vpop.f32.mrb[77].mxu1 }
 0x180   : > { %5843 = vst.msk [vmem:[%s8587_s27 + $0x124] sm:$0xf] %vm5769_vm3, %v7134_v40  ;;  %v2547_v48 = vadd.f32 %v8929_v6, %v2546_v45  ;;  %v7731_v50 = vpop.f32.mrb[78].mxu0  ;;  %6039 = vst.msk [vmem:[%s8587_s27 + $0x434] sm:$0xf] %vm5769_vm3, %v7330_v42  ;;  %v3331_v55 = vadd.f32 %v8929_v6, %v3330_v49  ;;  %v7927_v57 = vpop.f32.mrb[78].mxu1 }
 0x181   : > { %v3887_v54 = vmax.f32 %v2555_v43, 0.0  ;;  %v2558_v56 = vadd.f32 %v8929_v6, %v7731_v50  ;;  %v2549_v58 = vpop.f32.mrb[79].mxu0  ;;  %v4083_v60 = vmax.f32 %v3339_v47, 0.0  ;;  %v3342_v62 = vadd.f32 %v8929_v6, %v7927_v57  ;;  %v3333_v0 = vpop.f32.mrb[79].mxu1 }
 0x182   : > { %v3885_v61 = vmax.f32 %v2547_v48, 0.0  ;;  %v2550_v63 = vadd.f32 %v8929_v6, %v2549_v58  ;;  %v4081_v2 = vmax.f32 %v3331_v55, 0.0  ;;  %v3334_v3 = vadd.f32 %v8929_v6, %v3333_v0 }
 0x183   : > { %v7139_v1 = vpack.c.bf16 %v3887_v54, %v3887_v54  ;;  %v3888_v51 = vmax.f32 %v2558_v56, 0.0  ;;  %7837 = vmatmul.mubr.msk.bf16.gmra.mrb[184].mxu0 %vm1612_vm2, %v8258_v46  ;;  %v7335_v4 = vpack.c.bf16 %v4083_v60, %v4083_v60  ;;  %v4084_v7 = vmax.f32 %v3342_v62, 0.0  ;;  %8033 = vmatmul.mubr.msk.bf16.gmra.mrb[184].mxu1 %vm1612_vm2, %v8259_v52  ;;  %v8266_v56 = vld [vmem:[%s8346_s22 + $0x308] sm:$0xff]  }
 0x184   : > { %v7137_v5 = vpack.c.bf16 %v3885_v61, %v3885_v61  ;;  %v3886_v8 = vmax.f32 %v2550_v63, 0.0  ;;  %7840 = vmatprep.mubr.msk.bf16.mxu0 %vm1612_vm2, %v8260_v53  ;;  %v7333_v9 = vpack.c.bf16 %v4081_v2, %v4081_v2  ;;  %v4082_v11 = vmax.f32 %v3334_v3, 0.0  ;;  %8036 = vmatprep.mubr.msk.bf16.mxu1 %vm1612_vm2, %v8261_v59  ;;  %v8267_v61 = vld [vmem:[%s8346_s22 + $0x618] sm:$0xff]  }
 0x185   : > { %5848 = vst.msk [vmem:[%s8587_s27 + $0x138] sm:$0xf] %vm5769_vm3, %v7139_v1  ;;  %v7140_v10 = vpack.c.bf16 %v3888_v51, %v3888_v51  ;;  %6044 = vst.msk [vmem:[%s8587_s27 + $0x448] sm:$0xf] %vm5769_vm3, %v7335_v4  ;;  %v7336_v12 = vpack.c.bf16 %v4084_v7, %v4084_v7 }
 0x186   : > { %5846 = vst.msk [vmem:[%s8587_s27 + $0x130] sm:$0xf] %vm5769_vm3, %v7137_v5  ;;  %v7138_v13 = vpack.c.bf16 %v3886_v8, %v3886_v8  ;;  %v7734_v14 = vpop.f32.mrb[80].mxu0  ;;  %6042 = vst.msk [vmem:[%s8587_s27 + $0x440] sm:$0xf] %vm5769_vm3, %v7333_v9  ;;  %v7334_v15 = vpack.c.bf16 %v4082_v11, %v4082_v11  ;;  %v7930_v17 = vpop.f32.mrb[80].mxu1 }
 0x187   : > { %5849 = vst.msk [vmem:[%s8587_s27 + $0x13c] sm:$0xf] %vm5769_vm3, %v7140_v10  ;;  %v2571_v16 = vadd.f32 %v8929_v6, %v7734_v14  ;;  %v2562_v18 = vpop.f32.mrb[81].mxu0  ;;  %6045 = vst.msk [vmem:[%s8587_s27 + $0x44c] sm:$0xf] %vm5769_vm3, %v7336_v12  ;;  %v3355_v20 = vadd.f32 %v8929_v6, %v7930_v17  ;;  %v3346_v22 = vpop.f32.mrb[81].mxu1 }
 0x188   : > { %5847 = vst.msk [vmem:[%s8587_s27 + $0x134] sm:$0xf] %vm5769_vm3, %v7138_v13  ;;  %v2563_v21 = vadd.f32 %v8929_v6, %v2562_v18  ;;  %v7735_v23 = vpop.f32.mrb[82].mxu0  ;;  %6043 = vst.msk [vmem:[%s8587_s27 + $0x444] sm:$0xf] %vm5769_vm3, %v7334_v15  ;;  %v3347_v27 = vadd.f32 %v8929_v6, %v3346_v22  ;;  %v7931_v29 = vpop.f32.mrb[82].mxu1 }
 0x189   : > { %v3891_v26 = vmax.f32 %v2571_v16, 0.0  ;;  %v2574_v28 = vadd.f32 %v8929_v6, %v7735_v23  ;;  %v2565_v30 = vpop.f32.mrb[83].mxu0  ;;  %v4087_v32 = vmax.f32 %v3355_v20, 0.0  ;;  %v3358_v34 = vadd.f32 %v8929_v6, %v7931_v29  ;;  %v3349_v36 = vpop.f32.mrb[83].mxu1  ;;  %v9282_v22 = vld [vmem:[%s9949_s2] ss:$0 sm:$0xff] }
 0x18a   : > { %v3889_v33 = vmax.f32 %v2563_v21, 0.0  ;;  %v2566_v35 = vadd.f32 %v8929_v6, %v2565_v30  ;;  %v4085_v38 = vmax.f32 %v3347_v27, 0.0  ;;  %v3350_v40 = vadd.f32 %v8929_v6, %v3349_v36 }
 0x18b   : > { %v7143_v37 = vpack.c.bf16 %v3891_v26, %v3891_v26  ;;  %v3892_v39 = vmax.f32 %v2574_v28, 0.0  ;;  %7841 = vmatmul.mubr.msk.bf16.gmra.mrb[188].mxu0 %vm1612_vm2, %v8262_v19  ;;  %v7339_v41 = vpack.c.bf16 %v4087_v32, %v4087_v32  ;;  %v4088_v43 = vmax.f32 %v3358_v34, 0.0  ;;  %8037 = vmatmul.mubr.msk.bf16.gmra.mrb[188].mxu1 %vm1612_vm2, %v8263_v24 }
 0x18c   : > { %v7141_v42 = vpack.c.bf16 %v3889_v33, %v3889_v33  ;;  %v3890_v44 = vmax.f32 %v2566_v35, 0.0  ;;  %7844 = vmatprep.mubr.msk.bf16.mxu0 %vm1612_vm2, %v8264_v25  ;;  %v7337_v45 = vpack.c.bf16 %v4085_v38, %v4085_v38  ;;  %v4086_v47 = vmax.f32 %v3350_v40, 0.0  ;;  %8040 = vmatprep.mubr.msk.bf16.mxu1 %vm1612_vm2, %v8265_v31 }
 0x18d   : > { %5852 = vst.msk [vmem:[%s8587_s27 + $0x148] sm:$0xf] %vm5769_vm3, %v7143_v37  ;;  %v7144_v46 = vpack.c.bf16 %v3892_v39, %v3892_v39  ;;  %6048 = vst.msk [vmem:[%s8587_s27 + $0x458] sm:$0xf] %vm5769_vm3, %v7339_v41  ;;  %v7340_v48 = vpack.c.bf16 %v4088_v43, %v4088_v43 }
 0x18e   : > { %5850 = vst.msk [vmem:[%s8587_s27 + $0x140] sm:$0xf] %vm5769_vm3, %v7141_v42  ;;  %v7142_v49 = vpack.c.bf16 %v3890_v44, %v3890_v44  ;;  %v7738_v50 = vpop.f32.mrb[84].mxu0  ;;  %6046 = vst.msk [vmem:[%s8587_s27 + $0x450] sm:$0xf] %vm5769_vm3, %v7337_v45  ;;  %v7338_v52 = vpack.c.bf16 %v4086_v47, %v4086_v47  ;;  %v7934_v54 = vpop.f32.mrb[84].mxu1 }
 0x18f   : > { %5853 = vst.msk [vmem:[%s8587_s27 + $0x14c] sm:$0xf] %vm5769_vm3, %v7144_v46  ;;  %v2587_v53 = vadd.f32 %v8929_v6, %v7738_v50  ;;  %v2578_v55 = vpop.f32.mrb[85].mxu0  ;;  %6049 = vst.msk [vmem:[%s8587_s27 + $0x45c] sm:$0xf] %vm5769_vm3, %v7340_v48  ;;  %v3371_v57 = vadd.f32 %v8929_v6, %v7934_v54  ;;  %v3362_v59 = vpop.f32.mrb[85].mxu1 }
 0x190   : > { %5851 = vst.msk [vmem:[%s8587_s27 + $0x144] sm:$0xf] %vm5769_vm3, %v7142_v49  ;;  %v2579_v58 = vadd.f32 %v8929_v6, %v2578_v55  ;;  %v7739_v60 = vpop.f32.mrb[86].mxu0  ;;  %6047 = vst.msk [vmem:[%s8587_s27 + $0x454] sm:$0xf] %vm5769_vm3, %v7338_v52  ;;  %v3363_v63 = vadd.f32 %v8929_v6, %v3362_v59  ;;  %v7935_v1 = vpop.f32.mrb[86].mxu1 }
 0x191   : > { %v3895_v62 = vmax.f32 %v2587_v53, 0.0  ;;  %v2590_v0 = vadd.f32 %v8929_v6, %v7739_v60  ;;  %v2581_v2 = vpop.f32.mrb[87].mxu0  ;;  %v4091_v51 = vmax.f32 %v3371_v57, 0.0  ;;  %v3374_v4 = vadd.f32 %v8929_v6, %v7935_v1  ;;  %v3365_v7 = vpop.f32.mrb[87].mxu1 }
 0x192   : > { %v3893_v3 = vmax.f32 %v2579_v58, 0.0  ;;  %v2582_v5 = vadd.f32 %v8929_v6, %v2581_v2  ;;  %v4089_v9 = vmax.f32 %v3363_v63, 0.0  ;;  %v3366_v11 = vadd.f32 %v8929_v6, %v3365_v7 }
 0x193   : > { %v7147_v8 = vpack.c.bf16 %v3895_v62, %v3895_v62  ;;  %v3896_v10 = vmax.f32 %v2590_v0, 0.0  ;;  %7845 = vmatmul.mubr.msk.bf16.gmra.mrb[192].mxu0 %vm1612_vm2, %v8266_v56  ;;  %v7343_v12 = vpack.c.bf16 %v4091_v51, %v4091_v51  ;;  %v4092_v14 = vmax.f32 %v3374_v4, 0.0  ;;  %8041 = vmatmul.mubr.msk.bf16.gmra.mrb[192].mxu1 %vm1612_vm2, %v8267_v61 }
 0x194   : > { %v7145_v13 = vpack.c.bf16 %v3893_v3, %v3893_v3  ;;  %v3894_v15 = vmax.f32 %v2582_v5, 0.0  ;;  %v7341_v16 = vpack.c.bf16 %v4089_v9, %v4089_v9  ;;  %v4090_v18 = vmax.f32 %v3366_v11, 0.0 }
 0x195   : > { %5856 = vst.msk [vmem:[%s8587_s27 + $0x158] sm:$0xf] %vm5769_vm3, %v7147_v8  ;;  %v7148_v17 = vpack.c.bf16 %v3896_v10, %v3896_v10  ;;  %6052 = vst.msk [vmem:[%s8587_s27 + $0x468] sm:$0xf] %vm5769_vm3, %v7343_v12  ;;  %v7344_v6 = vpack.c.bf16 %v4092_v14, %v4092_v14 }
 0x196   : > { %5854 = vst.msk [vmem:[%s8587_s27 + $0x150] sm:$0xf] %vm5769_vm3, %v7145_v13  ;;  %v7146_v19 = vpack.c.bf16 %v3894_v15, %v3894_v15  ;;  %v7742_v20 = vpop.f32.mrb[88].mxu0  ;;  %6050 = vst.msk [vmem:[%s8587_s27 + $0x460] sm:$0xf] %vm5769_vm3, %v7341_v16  ;;  %v7342_v21 = vpack.c.bf16 %v4090_v18, %v4090_v18  ;;  %v7938_v24 = vpop.f32.mrb[88].mxu1 }
 0x197   : > { %5857 = vst.msk [vmem:[%s8587_s27 + $0x15c] sm:$0xf] %vm5769_vm3, %v7148_v17  ;;  %v2603_v23 = vadd.f32 %v9282_v22, %v7742_v20  ;;  %v2594_v25 = vpop.f32.mrb[89].mxu0  ;;  %6053 = vst.msk [vmem:[%s8587_s27 + $0x46c] sm:$0xf] %vm5769_vm3, %v7344_v6  ;;  %v3387_v26 = vadd.f32 %v9282_v22, %v7938_v24  ;;  %v3378_v28 = vpop.f32.mrb[89].mxu1 }
 0x198   : > { %5855 = vst.msk [vmem:[%s8587_s27 + $0x154] sm:$0xf] %vm5769_vm3, %v7146_v19  ;;  %v2595_v27 = vadd.f32 %v9282_v22, %v2594_v25  ;;  %v7743_v29 = vpop.f32.mrb[90].mxu0  ;;  %6051 = vst.msk [vmem:[%s8587_s27 + $0x464] sm:$0xf] %vm5769_vm3, %v7342_v21  ;;  %v3379_v31 = vadd.f32 %v9282_v22, %v3378_v28  ;;  %v7939_v33 = vpop.f32.mrb[90].mxu1 }
 0x199   : > { %v3899_v30 = vmax.f32 %v2603_v23, 0.0  ;;  %v2606_v32 = vadd.f32 %v9282_v22, %v7743_v29  ;;  %v2597_v34 = vpop.f32.mrb[91].mxu0  ;;  %v4095_v35 = vmax.f32 %v3387_v26, 0.0  ;;  %v3390_v37 = vadd.f32 %v9282_v22, %v7939_v33  ;;  %v3381_v39 = vpop.f32.mrb[91].mxu1 }
 0x19a   : > { %v3897_v36 = vmax.f32 %v2595_v27, 0.0  ;;  %v2598_v38 = vadd.f32 %v9282_v22, %v2597_v34  ;;  %v4093_v41 = vmax.f32 %v3379_v31, 0.0  ;;  %v3382_v43 = vadd.f32 %v9282_v22, %v3381_v39 }
 0x19b   : > { %v7151_v40 = vpack.c.bf16 %v3899_v30, %v3899_v30  ;;  %v3900_v42 = vmax.f32 %v2606_v32, 0.0  ;;  %v7347_v44 = vpack.c.bf16 %v4095_v35, %v4095_v35  ;;  %v4096_v46 = vmax.f32 %v3390_v37, 0.0 }
 0x19c   : > { %v7149_v45 = vpack.c.bf16 %v3897_v36, %v3897_v36  ;;  %v3898_v47 = vmax.f32 %v2598_v38, 0.0  ;;  %v7345_v48 = vpack.c.bf16 %v4093_v41, %v4093_v41  ;;  %v4094_v50 = vmax.f32 %v3382_v43, 0.0 }
 0x19d   : > { %5860 = vst.msk [vmem:[%s8587_s27 + $0x168] sm:$0xf] %vm5769_vm3, %v7151_v40  ;;  %v7152_v49 = vpack.c.bf16 %v3900_v42, %v3900_v42  ;;  %6056 = vst.msk [vmem:[%s8587_s27 + $0x478] sm:$0xf] %vm5769_vm3, %v7347_v44  ;;  %v7348_v52 = vpack.c.bf16 %v4096_v46, %v4096_v46 }
 0x19e   : > { %5858 = vst.msk [vmem:[%s8587_s27 + $0x160] sm:$0xf] %vm5769_vm3, %v7149_v45  ;;  %v7150_v53 = vpack.c.bf16 %v3898_v47, %v3898_v47  ;;  %v7746_v54 = vpop.f32.mrb[92].mxu0  ;;  %6054 = vst.msk [vmem:[%s8587_s27 + $0x470] sm:$0xf] %vm5769_vm3, %v7345_v48  ;;  %v7346_v55 = vpack.c.bf16 %v4094_v50, %v4094_v50  ;;  %v7942_v57 = vpop.f32.mrb[92].mxu1 }
 0x19f   : > { %5861 = vst.msk [vmem:[%s8587_s27 + $0x16c] sm:$0xf] %vm5769_vm3, %v7152_v49  ;;  %v2619_v56 = vadd.f32 %v9282_v22, %v7746_v54  ;;  %v2610_v58 = vpop.f32.mrb[93].mxu0  ;;  %6057 = vst.msk [vmem:[%s8587_s27 + $0x47c] sm:$0xf] %vm5769_vm3, %v7348_v52  ;;  %v3403_v59 = vadd.f32 %v9282_v22, %v7942_v57  ;;  %v3394_v61 = vpop.f32.mrb[93].mxu1 }
 0x1a0   : > { %5859 = vst.msk [vmem:[%s8587_s27 + $0x164] sm:$0xf] %vm5769_vm3, %v7150_v53  ;;  %v2611_v60 = vadd.f32 %v9282_v22, %v2610_v58  ;;  %v7747_v62 = vpop.f32.mrb[94].mxu0  ;;  %6055 = vst.msk [vmem:[%s8587_s27 + $0x474] sm:$0xf] %vm5769_vm3, %v7346_v55  ;;  %v3395_v0 = vadd.f32 %v9282_v22, %v3394_v61  ;;  %v7943_v2 = vpop.f32.mrb[94].mxu1 }
 0x1a1   : > { %v3903_v63 = vmax.f32 %v2619_v56, 0.0  ;;  %v2622_v1 = vadd.f32 %v9282_v22, %v7747_v62  ;;  %v2613_v51 = vpop.f32.mrb[95].mxu0  ;;  %v4099_v3 = vmax.f32 %v3403_v59, 0.0  ;;  %v3406_v5 = vadd.f32 %v9282_v22, %v7943_v2  ;;  %v3397_v8 = vpop.f32.mrb[95].mxu1 }
 0x1a2   : > { %v3901_v4 = vmax.f32 %v2611_v60, 0.0  ;;  %v2614_v7 = vadd.f32 %v9282_v22, %v2613_v51  ;;  %v4097_v10 = vmax.f32 %v3395_v0, 0.0  ;;  %v3398_v12 = vadd.f32 %v9282_v22, %v3397_v8 }
 0x1a3   : > { %v7155_v9 = vpack.c.bf16 %v3903_v63, %v3903_v63  ;;  %v3904_v11 = vmax.f32 %v2622_v1, 0.0  ;;  %v7351_v13 = vpack.c.bf16 %v4099_v3, %v4099_v3  ;;  %v4100_v15 = vmax.f32 %v3406_v5, 0.0 }
 0x1a4   : > { %v7153_v14 = vpack.c.bf16 %v3901_v4, %v3901_v4  ;;  %v3902_v16 = vmax.f32 %v2614_v7, 0.0  ;;  %v7349_v17 = vpack.c.bf16 %v4097_v10, %v4097_v10  ;;  %v4098_v6 = vmax.f32 %v3398_v12, 0.0 }
 0x1a5   : > { %5864 = vst.msk [vmem:[%s8587_s27 + $0x178] sm:$0xf] %vm5769_vm3, %v7155_v9  ;;  %v7156_v18 = vpack.c.bf16 %v3904_v11, %v3904_v11  ;;  %6060 = vst.msk [vmem:[%s8587_s27 + $0x488] sm:$0xf] %vm5769_vm3, %v7351_v13  ;;  %v7352_v19 = vpack.c.bf16 %v4100_v15, %v4100_v15 }
 0x1a6   : > { %5862 = vst.msk [vmem:[%s8587_s27 + $0x170] sm:$0xf] %vm5769_vm3, %v7153_v14  ;;  %v7154_v20 = vpack.c.bf16 %v3902_v16, %v3902_v16  ;;  %v7750_v21 = vpop.f32.mrb[96].mxu0  ;;  %6058 = vst.msk [vmem:[%s8587_s27 + $0x480] sm:$0xf] %vm5769_vm3, %v7349_v17  ;;  %v7350_v23 = vpack.c.bf16 %v4098_v6, %v4098_v6  ;;  %v7946_v25 = vpop.f32.mrb[96].mxu1 }
 0x1a7   : > { %5865 = vst.msk [vmem:[%s8587_s27 + $0x17c] sm:$0xf] %vm5769_vm3, %v7156_v18  ;;  %v2635_v24 = vadd.f32 %v9282_v22, %v7750_v21  ;;  %v2626_v26 = vpop.f32.mrb[97].mxu0  ;;  %6061 = vst.msk [vmem:[%s8587_s27 + $0x48c] sm:$0xf] %vm5769_vm3, %v7352_v19  ;;  %v3419_v27 = vadd.f32 %v9282_v22, %v7946_v25  ;;  %v3410_v29 = vpop.f32.mrb[97].mxu1 }
 0x1a8   : > { %5863 = vst.msk [vmem:[%s8587_s27 + $0x174] sm:$0xf] %vm5769_vm3, %v7154_v20  ;;  %v2627_v28 = vadd.f32 %v9282_v22, %v2626_v26  ;;  %v7751_v30 = vpop.f32.mrb[98].mxu0  ;;  %6059 = vst.msk [vmem:[%s8587_s27 + $0x484] sm:$0xf] %vm5769_vm3, %v7350_v23  ;;  %v3411_v32 = vadd.f32 %v9282_v22, %v3410_v29  ;;  %v7947_v34 = vpop.f32.mrb[98].mxu1 }
 0x1a9   : > { %v3907_v31 = vmax.f32 %v2635_v24, 0.0  ;;  %v2638_v33 = vadd.f32 %v9282_v22, %v7751_v30  ;;  %v2629_v35 = vpop.f32.mrb[99].mxu0  ;;  %v4103_v36 = vmax.f32 %v3419_v27, 0.0  ;;  %v3422_v38 = vadd.f32 %v9282_v22, %v7947_v34  ;;  %v3413_v40 = vpop.f32.mrb[99].mxu1 }
 0x1aa   : > { %v3905_v37 = vmax.f32 %v2627_v28, 0.0  ;;  %v2630_v39 = vadd.f32 %v9282_v22, %v2629_v35  ;;  %v4101_v42 = vmax.f32 %v3411_v32, 0.0  ;;  %v3414_v44 = vadd.f32 %v9282_v22, %v3413_v40 }
 0x1ab   : > { %v7159_v41 = vpack.c.bf16 %v3907_v31, %v3907_v31  ;;  %v3908_v43 = vmax.f32 %v2638_v33, 0.0  ;;  %v7355_v45 = vpack.c.bf16 %v4103_v36, %v4103_v36  ;;  %v4104_v47 = vmax.f32 %v3422_v38, 0.0 }
 0x1ac   : > { %v7157_v46 = vpack.c.bf16 %v3905_v37, %v3905_v37  ;;  %v3906_v48 = vmax.f32 %v2630_v39, 0.0  ;;  %v7353_v49 = vpack.c.bf16 %v4101_v42, %v4101_v42  ;;  %v4102_v52 = vmax.f32 %v3414_v44, 0.0 }
 0x1ad   : > { %5868 = vst.msk [vmem:[%s8587_s27 + $0x188] sm:$0xf] %vm5769_vm3, %v7159_v41  ;;  %v7160_v50 = vpack.c.bf16 %v3908_v43, %v3908_v43  ;;  %6064 = vst.msk [vmem:[%s8587_s27 + $0x498] sm:$0xf] %vm5769_vm3, %v7355_v45  ;;  %v7356_v53 = vpack.c.bf16 %v4104_v47, %v4104_v47 }
 0x1ae   : > { %5866 = vst.msk [vmem:[%s8587_s27 + $0x180] sm:$0xf] %vm5769_vm3, %v7157_v46  ;;  %v7158_v54 = vpack.c.bf16 %v3906_v48, %v3906_v48  ;;  %v7754_v55 = vpop.f32.mrb[100].mxu0  ;;  %6062 = vst.msk [vmem:[%s8587_s27 + $0x490] sm:$0xf] %vm5769_vm3, %v7353_v49  ;;  %v7354_v56 = vpack.c.bf16 %v4102_v52, %v4102_v52  ;;  %v7950_v58 = vpop.f32.mrb[100].mxu1 }
 0x1af   : > { %5869 = vst.msk [vmem:[%s8587_s27 + $0x18c] sm:$0xf] %vm5769_vm3, %v7160_v50  ;;  %v2651_v57 = vadd.f32 %v9282_v22, %v7754_v55  ;;  %v2642_v59 = vpop.f32.mrb[101].mxu0  ;;  %6065 = vst.msk [vmem:[%s8587_s27 + $0x49c] sm:$0xf] %vm5769_vm3, %v7356_v53  ;;  %v3435_v60 = vadd.f32 %v9282_v22, %v7950_v58  ;;  %v3426_v62 = vpop.f32.mrb[101].mxu1 }
 0x1b0   : > { %5867 = vst.msk [vmem:[%s8587_s27 + $0x184] sm:$0xf] %vm5769_vm3, %v7158_v54  ;;  %v2643_v61 = vadd.f32 %v9282_v22, %v2642_v59  ;;  %v7755_v63 = vpop.f32.mrb[102].mxu0  ;;  %6063 = vst.msk [vmem:[%s8587_s27 + $0x494] sm:$0xf] %vm5769_vm3, %v7354_v56  ;;  %v3427_v1 = vadd.f32 %v9282_v22, %v3426_v62  ;;  %v7951_v51 = vpop.f32.mrb[102].mxu1 }
 0x1b1   : > { %v3911_v0 = vmax.f32 %v2651_v57, 0.0  ;;  %v2654_v2 = vadd.f32 %v9282_v22, %v7755_v63  ;;  %v2645_v3 = vpop.f32.mrb[103].mxu0  ;;  %v4107_v4 = vmax.f32 %v3435_v60, 0.0  ;;  %v3438_v7 = vadd.f32 %v9282_v22, %v7951_v51  ;;  %v3429_v9 = vpop.f32.mrb[103].mxu1 }
 0x1b2   : > { %v3909_v5 = vmax.f32 %v2643_v61, 0.0  ;;  %v2646_v8 = vadd.f32 %v9282_v22, %v2645_v3  ;;  %v4105_v11 = vmax.f32 %v3427_v1, 0.0  ;;  %v3430_v13 = vadd.f32 %v9282_v22, %v3429_v9 }
 0x1b3   : > { %v7163_v10 = vpack.c.bf16 %v3911_v0, %v3911_v0  ;;  %v3912_v12 = vmax.f32 %v2654_v2, 0.0  ;;  %v7359_v14 = vpack.c.bf16 %v4107_v4, %v4107_v4  ;;  %v4108_v16 = vmax.f32 %v3438_v7, 0.0 }
 0x1b4   : > { %v7161_v15 = vpack.c.bf16 %v3909_v5, %v3909_v5  ;;  %v3910_v17 = vmax.f32 %v2646_v8, 0.0  ;;  %v7357_v18 = vpack.c.bf16 %v4105_v11, %v4105_v11  ;;  %v4106_v19 = vmax.f32 %v3430_v13, 0.0 }
 0x1b5   : > { %5872 = vst.msk [vmem:[%s8587_s27 + $0x198] sm:$0xf] %vm5769_vm3, %v7163_v10  ;;  %v7164_v6 = vpack.c.bf16 %v3912_v12, %v3912_v12  ;;  %6068 = vst.msk [vmem:[%s8587_s27 + $0x4a8] sm:$0xf] %vm5769_vm3, %v7359_v14  ;;  %v7360_v20 = vpack.c.bf16 %v4108_v16, %v4108_v16 }
 0x1b6   : > { %5870 = vst.msk [vmem:[%s8587_s27 + $0x190] sm:$0xf] %vm5769_vm3, %v7161_v15  ;;  %v7162_v21 = vpack.c.bf16 %v3910_v17, %v3910_v17  ;;  %v7758_v23 = vpop.f32.mrb[104].mxu0  ;;  %6066 = vst.msk [vmem:[%s8587_s27 + $0x4a0] sm:$0xf] %vm5769_vm3, %v7357_v18  ;;  %v7358_v24 = vpack.c.bf16 %v4106_v19, %v4106_v19  ;;  %v7954_v26 = vpop.f32.mrb[104].mxu1 }
 0x1b7   : > { %5873 = vst.msk [vmem:[%s8587_s27 + $0x19c] sm:$0xf] %vm5769_vm3, %v7164_v6  ;;  %v2667_v25 = vadd.f32 %v9282_v22, %v7758_v23  ;;  %v2658_v27 = vpop.f32.mrb[105].mxu0  ;;  %6069 = vst.msk [vmem:[%s8587_s27 + $0x4ac] sm:$0xf] %vm5769_vm3, %v7360_v20  ;;  %v3451_v28 = vadd.f32 %v9282_v22, %v7954_v26  ;;  %v3442_v30 = vpop.f32.mrb[105].mxu1 }
 0x1b8   : > { %5871 = vst.msk [vmem:[%s8587_s27 + $0x194] sm:$0xf] %vm5769_vm3, %v7162_v21  ;;  %v2659_v29 = vadd.f32 %v9282_v22, %v2658_v27  ;;  %v7759_v31 = vpop.f32.mrb[106].mxu0  ;;  %6067 = vst.msk [vmem:[%s8587_s27 + $0x4a4] sm:$0xf] %vm5769_vm3, %v7358_v24  ;;  %v3443_v33 = vadd.f32 %v9282_v22, %v3442_v30  ;;  %v7955_v35 = vpop.f32.mrb[106].mxu1 }
 0x1b9   : > { %v3915_v32 = vmax.f32 %v2667_v25, 0.0  ;;  %v2670_v34 = vadd.f32 %v9282_v22, %v7759_v31  ;;  %v2661_v36 = vpop.f32.mrb[107].mxu0  ;;  %v4111_v37 = vmax.f32 %v3451_v28, 0.0  ;;  %v3454_v39 = vadd.f32 %v9282_v22, %v7955_v35  ;;  %v3445_v41 = vpop.f32.mrb[107].mxu1 }
 0x1ba   : > { %v3913_v38 = vmax.f32 %v2659_v29, 0.0  ;;  %v2662_v40 = vadd.f32 %v9282_v22, %v2661_v36  ;;  %v4109_v43 = vmax.f32 %v3443_v33, 0.0  ;;  %v3446_v45 = vadd.f32 %v9282_v22, %v3445_v41 }
 0x1bb   : > { %v7167_v42 = vpack.c.bf16 %v3915_v32, %v3915_v32  ;;  %v3916_v44 = vmax.f32 %v2670_v34, 0.0  ;;  %v7363_v46 = vpack.c.bf16 %v4111_v37, %v4111_v37  ;;  %v4112_v48 = vmax.f32 %v3454_v39, 0.0 }
 0x1bc   : > { %v7165_v47 = vpack.c.bf16 %v3913_v38, %v3913_v38  ;;  %v3914_v49 = vmax.f32 %v2662_v40, 0.0  ;;  %v7361_v50 = vpack.c.bf16 %v4109_v43, %v4109_v43  ;;  %v4110_v53 = vmax.f32 %v3446_v45, 0.0 }
 0x1bd   : > { %5876 = vst.msk [vmem:[%s8587_s27 + $0x1a8] sm:$0xf] %vm5769_vm3, %v7167_v42  ;;  %v7168_v52 = vpack.c.bf16 %v3916_v44, %v3916_v44  ;;  %6072 = vst.msk [vmem:[%s8587_s27 + $0x4b8] sm:$0xf] %vm5769_vm3, %v7363_v46  ;;  %v7364_v54 = vpack.c.bf16 %v4112_v48, %v4112_v48 }
 0x1be   : > { %5874 = vst.msk [vmem:[%s8587_s27 + $0x1a0] sm:$0xf] %vm5769_vm3, %v7165_v47  ;;  %v7166_v55 = vpack.c.bf16 %v3914_v49, %v3914_v49  ;;  %v7762_v56 = vpop.f32.mrb[108].mxu0  ;;  %6070 = vst.msk [vmem:[%s8587_s27 + $0x4b0] sm:$0xf] %vm5769_vm3, %v7361_v50  ;;  %v7362_v57 = vpack.c.bf16 %v4110_v53, %v4110_v53  ;;  %v7958_v59 = vpop.f32.mrb[108].mxu1 }
 0x1bf   : > { %5877 = vst.msk [vmem:[%s8587_s27 + $0x1ac] sm:$0xf] %vm5769_vm3, %v7168_v52  ;;  %v2683_v58 = vadd.f32 %v9282_v22, %v7762_v56  ;;  %v2674_v60 = vpop.f32.mrb[109].mxu0  ;;  %6073 = vst.msk [vmem:[%s8587_s27 + $0x4bc] sm:$0xf] %vm5769_vm3, %v7364_v54  ;;  %v3467_v61 = vadd.f32 %v9282_v22, %v7958_v59  ;;  %v3458_v63 = vpop.f32.mrb[109].mxu1 }
 0x1c0   : > { %5875 = vst.msk [vmem:[%s8587_s27 + $0x1a4] sm:$0xf] %vm5769_vm3, %v7166_v55  ;;  %v2675_v62 = vadd.f32 %v9282_v22, %v2674_v60  ;;  %v7763_v0 = vpop.f32.mrb[110].mxu0  ;;  %6071 = vst.msk [vmem:[%s8587_s27 + $0x4b4] sm:$0xf] %vm5769_vm3, %v7362_v57  ;;  %v3459_v2 = vadd.f32 %v9282_v22, %v3458_v63  ;;  %v7959_v3 = vpop.f32.mrb[110].mxu1 }
 0x1c1   : > { %v3919_v1 = vmax.f32 %v2683_v58, 0.0  ;;  %v2686_v51 = vadd.f32 %v9282_v22, %v7763_v0  ;;  %v2677_v4 = vpop.f32.mrb[111].mxu0  ;;  %v4115_v5 = vmax.f32 %v3467_v61, 0.0  ;;  %v3470_v8 = vadd.f32 %v9282_v22, %v7959_v3  ;;  %v3461_v10 = vpop.f32.mrb[111].mxu1 }
 0x1c2   : > { %v3917_v7 = vmax.f32 %v2675_v62, 0.0  ;;  %v2678_v9 = vadd.f32 %v9282_v22, %v2677_v4  ;;  %v4113_v12 = vmax.f32 %v3459_v2, 0.0  ;;  %v3462_v14 = vadd.f32 %v9282_v22, %v3461_v10 }
 0x1c3   : > { %v7171_v11 = vpack.c.bf16 %v3919_v1, %v3919_v1  ;;  %v3920_v13 = vmax.f32 %v2686_v51, 0.0  ;;  %v7367_v15 = vpack.c.bf16 %v4115_v5, %v4115_v5  ;;  %v4116_v17 = vmax.f32 %v3470_v8, 0.0 }
 0x1c4   : > { %v7169_v16 = vpack.c.bf16 %v3917_v7, %v3917_v7  ;;  %v3918_v18 = vmax.f32 %v2678_v9, 0.0  ;;  %v7365_v6 = vpack.c.bf16 %v4113_v12, %v4113_v12  ;;  %v4114_v20 = vmax.f32 %v3462_v14, 0.0 }
 0x1c5   : > { %5880 = vst.msk [vmem:[%s8587_s27 + $0x1b8] sm:$0xf] %vm5769_vm3, %v7171_v11  ;;  %v7172_v19 = vpack.c.bf16 %v3920_v13, %v3920_v13  ;;  %6076 = vst.msk [vmem:[%s8587_s27 + $0x4c8] sm:$0xf] %vm5769_vm3, %v7367_v15  ;;  %v7368_v21 = vpack.c.bf16 %v4116_v17, %v4116_v17 }
 0x1c6   : > { %5878 = vst.msk [vmem:[%s8587_s27 + $0x1b0] sm:$0xf] %vm5769_vm3, %v7169_v16  ;;  %v7170_v23 = vpack.c.bf16 %v3918_v18, %v3918_v18  ;;  %v7766_v24 = vpop.f32.mrb[112].mxu0  ;;  %6074 = vst.msk [vmem:[%s8587_s27 + $0x4c0] sm:$0xf] %vm5769_vm3, %v7365_v6  ;;  %v7366_v25 = vpack.c.bf16 %v4114_v20, %v4114_v20  ;;  %v7962_v27 = vpop.f32.mrb[112].mxu1 }
 0x1c7   : > { %5881 = vst.msk [vmem:[%s8587_s27 + $0x1bc] sm:$0xf] %vm5769_vm3, %v7172_v19  ;;  %v2699_v26 = vadd.f32 %v9282_v22, %v7766_v24  ;;  %v2690_v28 = vpop.f32.mrb[113].mxu0  ;;  %6077 = vst.msk [vmem:[%s8587_s27 + $0x4cc] sm:$0xf] %vm5769_vm3, %v7368_v21  ;;  %v3483_v29 = vadd.f32 %v9282_v22, %v7962_v27  ;;  %v3474_v31 = vpop.f32.mrb[113].mxu1 }
 0x1c8   : > { %5879 = vst.msk [vmem:[%s8587_s27 + $0x1b4] sm:$0xf] %vm5769_vm3, %v7170_v23  ;;  %v2691_v30 = vadd.f32 %v9282_v22, %v2690_v28  ;;  %v7767_v32 = vpop.f32.mrb[114].mxu0  ;;  %6075 = vst.msk [vmem:[%s8587_s27 + $0x4c4] sm:$0xf] %vm5769_vm3, %v7366_v25  ;;  %v3475_v34 = vadd.f32 %v9282_v22, %v3474_v31  ;;  %v7963_v36 = vpop.f32.mrb[114].mxu1 }
 0x1c9   : > { %v3923_v33 = vmax.f32 %v2699_v26, 0.0  ;;  %v2702_v35 = vadd.f32 %v9282_v22, %v7767_v32  ;;  %v2693_v37 = vpop.f32.mrb[115].mxu0  ;;  %v4119_v38 = vmax.f32 %v3483_v29, 0.0  ;;  %v3486_v40 = vadd.f32 %v9282_v22, %v7963_v36  ;;  %v3477_v42 = vpop.f32.mrb[115].mxu1 }
 0x1ca   : > { %v3921_v39 = vmax.f32 %v2691_v30, 0.0  ;;  %v2694_v41 = vadd.f32 %v9282_v22, %v2693_v37  ;;  %v4117_v44 = vmax.f32 %v3475_v34, 0.0  ;;  %v3478_v46 = vadd.f32 %v9282_v22, %v3477_v42 }
 0x1cb   : > { %v7175_v43 = vpack.c.bf16 %v3923_v33, %v3923_v33  ;;  %v3924_v45 = vmax.f32 %v2702_v35, 0.0  ;;  %v7371_v47 = vpack.c.bf16 %v4119_v38, %v4119_v38  ;;  %v4120_v49 = vmax.f32 %v3486_v40, 0.0 }
 0x1cc   : > { %v7173_v48 = vpack.c.bf16 %v3921_v39, %v3921_v39  ;;  %v3922_v50 = vmax.f32 %v2694_v41, 0.0  ;;  %v7369_v52 = vpack.c.bf16 %v4117_v44, %v4117_v44  ;;  %v4118_v54 = vmax.f32 %v3478_v46, 0.0 }
 0x1cd   : > { %5884 = vst.msk [vmem:[%s8587_s27 + $0x1c8] sm:$0xf] %vm5769_vm3, %v7175_v43  ;;  %v7176_v53 = vpack.c.bf16 %v3924_v45, %v3924_v45  ;;  %6080 = vst.msk [vmem:[%s8587_s27 + $0x4d8] sm:$0xf] %vm5769_vm3, %v7371_v47  ;;  %v7372_v55 = vpack.c.bf16 %v4120_v49, %v4120_v49 }
 0x1ce   : > { %5882 = vst.msk [vmem:[%s8587_s27 + $0x1c0] sm:$0xf] %vm5769_vm3, %v7173_v48  ;;  %v7174_v56 = vpack.c.bf16 %v3922_v50, %v3922_v50  ;;  %v7770_v57 = vpop.f32.mrb[116].mxu0  ;;  %6078 = vst.msk [vmem:[%s8587_s27 + $0x4d0] sm:$0xf] %vm5769_vm3, %v7369_v52  ;;  %v7370_v58 = vpack.c.bf16 %v4118_v54, %v4118_v54  ;;  %v7966_v60 = vpop.f32.mrb[116].mxu1 }
 0x1cf   : > { %5885 = vst.msk [vmem:[%s8587_s27 + $0x1cc] sm:$0xf] %vm5769_vm3, %v7176_v53  ;;  %v2715_v59 = vadd.f32 %v9282_v22, %v7770_v57  ;;  %v2706_v61 = vpop.f32.mrb[117].mxu0  ;;  %6081 = vst.msk [vmem:[%s8587_s27 + $0x4dc] sm:$0xf] %vm5769_vm3, %v7372_v55  ;;  %v3499_v62 = vadd.f32 %v9282_v22, %v7966_v60  ;;  %v3490_v0 = vpop.f32.mrb[117].mxu1 }
 0x1d0   : > { %5883 = vst.msk [vmem:[%s8587_s27 + $0x1c4] sm:$0xf] %vm5769_vm3, %v7174_v56  ;;  %v2707_v63 = vadd.f32 %v9282_v22, %v2706_v61  ;;  %v7771_v1 = vpop.f32.mrb[118].mxu0  ;;  %6079 = vst.msk [vmem:[%s8587_s27 + $0x4d4] sm:$0xf] %vm5769_vm3, %v7370_v58  ;;  %v3491_v51 = vadd.f32 %v9282_v22, %v3490_v0  ;;  %v7967_v4 = vpop.f32.mrb[118].mxu1 }
 0x1d1   : > { %v3927_v2 = vmax.f32 %v2715_v59, 0.0  ;;  %v2718_v3 = vadd.f32 %v9282_v22, %v7771_v1  ;;  %v2709_v5 = vpop.f32.mrb[119].mxu0  ;;  %v4123_v7 = vmax.f32 %v3499_v62, 0.0  ;;  %v3502_v9 = vadd.f32 %v9282_v22, %v7967_v4  ;;  %v3493_v11 = vpop.f32.mrb[119].mxu1 }
 0x1d2   : > { %v3925_v8 = vmax.f32 %v2707_v63, 0.0  ;;  %v2710_v10 = vadd.f32 %v9282_v22, %v2709_v5  ;;  %v4121_v13 = vmax.f32 %v3491_v51, 0.0  ;;  %v3494_v15 = vadd.f32 %v9282_v22, %v3493_v11 }
 0x1d3   : > { %v7179_v12 = vpack.c.bf16 %v3927_v2, %v3927_v2  ;;  %v3928_v14 = vmax.f32 %v2718_v3, 0.0  ;;  %v7375_v16 = vpack.c.bf16 %v4123_v7, %v4123_v7  ;;  %v4124_v18 = vmax.f32 %v3502_v9, 0.0 }
 0x1d4   : > { %v7177_v17 = vpack.c.bf16 %v3925_v8, %v3925_v8  ;;  %v3926_v6 = vmax.f32 %v2710_v10, 0.0  ;;  %v7373_v19 = vpack.c.bf16 %v4121_v13, %v4121_v13  ;;  %v4122_v21 = vmax.f32 %v3494_v15, 0.0 }
 0x1d5   : > { %5888 = vst.msk [vmem:[%s8587_s27 + $0x1d8] sm:$0xf] %vm5769_vm3, %v7179_v12  ;;  %v7180_v20 = vpack.c.bf16 %v3928_v14, %v3928_v14  ;;  %6084 = vst.msk [vmem:[%s8587_s27 + $0x4e8] sm:$0xf] %vm5769_vm3, %v7375_v16  ;;  %v7376_v23 = vpack.c.bf16 %v4124_v18, %v4124_v18 }
 0x1d6   : > { %5886 = vst.msk [vmem:[%s8587_s27 + $0x1d0] sm:$0xf] %vm5769_vm3, %v7177_v17  ;;  %v7178_v24 = vpack.c.bf16 %v3926_v6, %v3926_v6  ;;  %v7774_v25 = vpop.f32.mrb[120].mxu0  ;;  %6082 = vst.msk [vmem:[%s8587_s27 + $0x4e0] sm:$0xf] %vm5769_vm3, %v7373_v19  ;;  %v7374_v26 = vpack.c.bf16 %v4122_v21, %v4122_v21  ;;  %v7970_v28 = vpop.f32.mrb[120].mxu1 }
 0x1d7   : > { %5889 = vst.msk [vmem:[%s8587_s27 + $0x1dc] sm:$0xf] %vm5769_vm3, %v7180_v20  ;;  %v2731_v27 = vadd.f32 %v9282_v22, %v7774_v25  ;;  %v2722_v29 = vpop.f32.mrb[121].mxu0  ;;  %6085 = vst.msk [vmem:[%s8587_s27 + $0x4ec] sm:$0xf] %vm5769_vm3, %v7376_v23  ;;  %v3515_v30 = vadd.f32 %v9282_v22, %v7970_v28  ;;  %v3506_v32 = vpop.f32.mrb[121].mxu1 }
 0x1d8   : > { %5887 = vst.msk [vmem:[%s8587_s27 + $0x1d4] sm:$0xf] %vm5769_vm3, %v7178_v24  ;;  %v2723_v31 = vadd.f32 %v9282_v22, %v2722_v29  ;;  %v7775_v33 = vpop.f32.mrb[122].mxu0  ;;  %6083 = vst.msk [vmem:[%s8587_s27 + $0x4e4] sm:$0xf] %vm5769_vm3, %v7374_v26  ;;  %v3507_v35 = vadd.f32 %v9282_v22, %v3506_v32  ;;  %v7971_v37 = vpop.f32.mrb[122].mxu1 }
 0x1d9   : > { %v3931_v34 = vmax.f32 %v2731_v27, 0.0  ;;  %v2734_v36 = vadd.f32 %v9282_v22, %v7775_v33  ;;  %v2725_v38 = vpop.f32.mrb[123].mxu0  ;;  %v4127_v39 = vmax.f32 %v3515_v30, 0.0  ;;  %v3518_v41 = vadd.f32 %v9282_v22, %v7971_v37  ;;  %v3509_v43 = vpop.f32.mrb[123].mxu1 }
 0x1da   : > { %v3929_v40 = vmax.f32 %v2723_v31, 0.0  ;;  %v2726_v42 = vadd.f32 %v9282_v22, %v2725_v38  ;;  %v4125_v45 = vmax.f32 %v3507_v35, 0.0  ;;  %v3510_v47 = vadd.f32 %v9282_v22, %v3509_v43 }
 0x1db   : > { %v7183_v44 = vpack.c.bf16 %v3931_v34, %v3931_v34  ;;  %v3932_v46 = vmax.f32 %v2734_v36, 0.0  ;;  %v7379_v48 = vpack.c.bf16 %v4127_v39, %v4127_v39  ;;  %v4128_v50 = vmax.f32 %v3518_v41, 0.0 }
 0x1dc   : > { %v7181_v49 = vpack.c.bf16 %v3929_v40, %v3929_v40  ;;  %v3930_v52 = vmax.f32 %v2726_v42, 0.0  ;;  %v7377_v53 = vpack.c.bf16 %v4125_v45, %v4125_v45  ;;  %v4126_v55 = vmax.f32 %v3510_v47, 0.0 }
 0x1dd   : > { %5892 = vst.msk [vmem:[%s8587_s27 + $0x1e8] sm:$0xf] %vm5769_vm3, %v7183_v44  ;;  %v7184_v54 = vpack.c.bf16 %v3932_v46, %v3932_v46  ;;  %6088 = vst.msk [vmem:[%s8587_s27 + $0x4f8] sm:$0xf] %vm5769_vm3, %v7379_v48  ;;  %v7380_v56 = vpack.c.bf16 %v4128_v50, %v4128_v50 }
 0x1de   : > { %5890 = vst.msk [vmem:[%s8587_s27 + $0x1e0] sm:$0xf] %vm5769_vm3, %v7181_v49  ;;  %v7182_v57 = vpack.c.bf16 %v3930_v52, %v3930_v52  ;;  %v7778_v58 = vpop.f32.mrb[124].mxu0  ;;  %6086 = vst.msk [vmem:[%s8587_s27 + $0x4f0] sm:$0xf] %vm5769_vm3, %v7377_v53  ;;  %v7378_v59 = vpack.c.bf16 %v4126_v55, %v4126_v55  ;;  %v7974_v61 = vpop.f32.mrb[124].mxu1 }
 0x1df   : > { %5893 = vst.msk [vmem:[%s8587_s27 + $0x1ec] sm:$0xf] %vm5769_vm3, %v7184_v54  ;;  %v2747_v60 = vadd.f32 %v9282_v22, %v7778_v58  ;;  %v2738_v62 = vpop.f32.mrb[125].mxu0  ;;  %6089 = vst.msk [vmem:[%s8587_s27 + $0x4fc] sm:$0xf] %vm5769_vm3, %v7380_v56  ;;  %v3531_v63 = vadd.f32 %v9282_v22, %v7974_v61  ;;  %v3522_v1 = vpop.f32.mrb[125].mxu1 }
 0x1e0   : > { %5891 = vst.msk [vmem:[%s8587_s27 + $0x1e4] sm:$0xf] %vm5769_vm3, %v7182_v57  ;;  %v2739_v0 = vadd.f32 %v9282_v22, %v2738_v62  ;;  %v7779_v2 = vpop.f32.mrb[126].mxu0  ;;  %6087 = vst.msk [vmem:[%s8587_s27 + $0x4f4] sm:$0xf] %vm5769_vm3, %v7378_v59  ;;  %v3523_v3 = vadd.f32 %v9282_v22, %v3522_v1  ;;  %v7975_v5 = vpop.f32.mrb[126].mxu1 }
 0x1e1   : > { %v3935_v51 = vmax.f32 %v2747_v60, 0.0  ;;  %v2750_v4 = vadd.f32 %v9282_v22, %v7779_v2  ;;  %v2741_v7 = vpop.f32.mrb[127].mxu0  ;;  %v4131_v8 = vmax.f32 %v3531_v63, 0.0  ;;  %v3534_v10 = vadd.f32 %v9282_v22, %v7975_v5  ;;  %v3525_v12 = vpop.f32.mrb[127].mxu1 }
 0x1e2   : > { %v3933_v9 = vmax.f32 %v2739_v0, 0.0  ;;  %v2742_v11 = vadd.f32 %v9282_v22, %v2741_v7  ;;  %v4129_v14 = vmax.f32 %v3523_v3, 0.0  ;;  %v3526_v16 = vadd.f32 %v9282_v22, %v3525_v12 }
 0x1e3   : > { %v7187_v13 = vpack.c.bf16 %v3935_v51, %v3935_v51  ;;  %v3936_v15 = vmax.f32 %v2750_v4, 0.0  ;;  %v7383_v17 = vpack.c.bf16 %v4131_v8, %v4131_v8  ;;  %v4132_v6 = vmax.f32 %v3534_v10, 0.0 }
 0x1e4   : > { %v7185_v18 = vpack.c.bf16 %v3933_v9, %v3933_v9  ;;  %v3934_v19 = vmax.f32 %v2742_v11, 0.0  ;;  %v7381_v20 = vpack.c.bf16 %v4129_v14, %v4129_v14  ;;  %v4130_v23 = vmax.f32 %v3526_v16, 0.0 }
 0x1e5   : > { %5896 = vst.msk [vmem:[%s8587_s27 + $0x1f8] sm:$0xf] %vm5769_vm3, %v7187_v13  ;;  %v7188_v21 = vpack.c.bf16 %v3936_v15, %v3936_v15  ;;  %6092 = vst.msk [vmem:[%s8587_s27 + $0x508] sm:$0xf] %vm5769_vm3, %v7383_v17  ;;  %v7384_v24 = vpack.c.bf16 %v4132_v6, %v4132_v6 }
 0x1e6   : > { %5894 = vst.msk [vmem:[%s8587_s27 + $0x1f0] sm:$0xf] %vm5769_vm3, %v7185_v18  ;;  %v7186_v25 = vpack.c.bf16 %v3934_v19, %v3934_v19  ;;  %v7782_v26 = vpop.f32.mrb[128].mxu0  ;;  %6090 = vst.msk [vmem:[%s8587_s27 + $0x500] sm:$0xf] %vm5769_vm3, %v7381_v20  ;;  %v7382_v27 = vpack.c.bf16 %v4130_v23, %v4130_v23  ;;  %v7978_v29 = vpop.f32.mrb[128].mxu1 }
 0x1e7   : > { %5897 = vst.msk [vmem:[%s8587_s27 + $0x1fc] sm:$0xf] %vm5769_vm3, %v7188_v21  ;;  %v2763_v28 = vadd.f32 %v9282_v22, %v7782_v26  ;;  %v2754_v30 = vpop.f32.mrb[129].mxu0  ;;  %6093 = vst.msk [vmem:[%s8587_s27 + $0x50c] sm:$0xf] %vm5769_vm3, %v7384_v24  ;;  %v3547_v31 = vadd.f32 %v9282_v22, %v7978_v29  ;;  %v3538_v33 = vpop.f32.mrb[129].mxu1 }
 0x1e8   : > { %5895 = vst.msk [vmem:[%s8587_s27 + $0x1f4] sm:$0xf] %vm5769_vm3, %v7186_v25  ;;  %v2755_v32 = vadd.f32 %v9282_v22, %v2754_v30  ;;  %v7783_v34 = vpop.f32.mrb[130].mxu0  ;;  %6091 = vst.msk [vmem:[%s8587_s27 + $0x504] sm:$0xf] %vm5769_vm3, %v7382_v27  ;;  %v3539_v36 = vadd.f32 %v9282_v22, %v3538_v33  ;;  %v7979_v38 = vpop.f32.mrb[130].mxu1 }
 0x1e9   : > { %v3939_v35 = vmax.f32 %v2763_v28, 0.0  ;;  %v2766_v37 = vadd.f32 %v9282_v22, %v7783_v34  ;;  %v2757_v39 = vpop.f32.mrb[131].mxu0  ;;  %v4135_v40 = vmax.f32 %v3547_v31, 0.0  ;;  %v3550_v42 = vadd.f32 %v9282_v22, %v7979_v38  ;;  %v3541_v44 = vpop.f32.mrb[131].mxu1 }
 0x1ea   : > { %v3937_v41 = vmax.f32 %v2755_v32, 0.0  ;;  %v2758_v43 = vadd.f32 %v9282_v22, %v2757_v39  ;;  %v4133_v46 = vmax.f32 %v3539_v36, 0.0  ;;  %v3542_v48 = vadd.f32 %v9282_v22, %v3541_v44 }
 0x1eb   : > { %v7191_v45 = vpack.c.bf16 %v3939_v35, %v3939_v35  ;;  %v3940_v47 = vmax.f32 %v2766_v37, 0.0  ;;  %v7387_v49 = vpack.c.bf16 %v4135_v40, %v4135_v40  ;;  %v4136_v52 = vmax.f32 %v3550_v42, 0.0 }
 0x1ec   : > { %v7189_v50 = vpack.c.bf16 %v3937_v41, %v3937_v41  ;;  %v3938_v53 = vmax.f32 %v2758_v43, 0.0  ;;  %v7385_v54 = vpack.c.bf16 %v4133_v46, %v4133_v46  ;;  %v4134_v56 = vmax.f32 %v3542_v48, 0.0 }
 0x1ed   : > { %5900 = vst.msk [vmem:[%s8587_s27 + $0x208] sm:$0xf] %vm5769_vm3, %v7191_v45  ;;  %v7192_v55 = vpack.c.bf16 %v3940_v47, %v3940_v47  ;;  %6096 = vst.msk [vmem:[%s8587_s27 + $0x518] sm:$0xf] %vm5769_vm3, %v7387_v49  ;;  %v7388_v57 = vpack.c.bf16 %v4136_v52, %v4136_v52 }
 0x1ee   : > { %5898 = vst.msk [vmem:[%s8587_s27 + $0x200] sm:$0xf] %vm5769_vm3, %v7189_v50  ;;  %v7190_v58 = vpack.c.bf16 %v3938_v53, %v3938_v53  ;;  %v7786_v59 = vpop.f32.mrb[132].mxu0  ;;  %6094 = vst.msk [vmem:[%s8587_s27 + $0x510] sm:$0xf] %vm5769_vm3, %v7385_v54  ;;  %v7386_v60 = vpack.c.bf16 %v4134_v56, %v4134_v56  ;;  %v7982_v62 = vpop.f32.mrb[132].mxu1 }
 0x1ef   : > { %5901 = vst.msk [vmem:[%s8587_s27 + $0x20c] sm:$0xf] %vm5769_vm3, %v7192_v55  ;;  %v2779_v61 = vadd.f32 %v9282_v22, %v7786_v59  ;;  %v2770_v63 = vpop.f32.mrb[133].mxu0  ;;  %6097 = vst.msk [vmem:[%s8587_s27 + $0x51c] sm:$0xf] %vm5769_vm3, %v7388_v57  ;;  %v3563_v0 = vadd.f32 %v9282_v22, %v7982_v62  ;;  %v3554_v2 = vpop.f32.mrb[133].mxu1 }
 0x1f0   : > { %5899 = vst.msk [vmem:[%s8587_s27 + $0x204] sm:$0xf] %vm5769_vm3, %v7190_v58  ;;  %v2771_v1 = vadd.f32 %v9282_v22, %v2770_v63  ;;  %v7787_v51 = vpop.f32.mrb[134].mxu0  ;;  %6095 = vst.msk [vmem:[%s8587_s27 + $0x514] sm:$0xf] %vm5769_vm3, %v7386_v60  ;;  %v3555_v4 = vadd.f32 %v9282_v22, %v3554_v2  ;;  %v7983_v7 = vpop.f32.mrb[134].mxu1 }
 0x1f1   : > { %v3943_v3 = vmax.f32 %v2779_v61, 0.0  ;;  %v2782_v5 = vadd.f32 %v9282_v22, %v7787_v51  ;;  %v2773_v8 = vpop.f32.mrb[135].mxu0  ;;  %v4139_v9 = vmax.f32 %v3563_v0, 0.0  ;;  %v3566_v11 = vadd.f32 %v9282_v22, %v7983_v7  ;;  %v3557_v13 = vpop.f32.mrb[135].mxu1  ;;  %v9599_v61 = vld [vmem:[%s9949_s2] ss:$0 sm:$0xff] }
 0x1f2   : > { %v3941_v10 = vmax.f32 %v2771_v1, 0.0  ;;  %v2774_v12 = vadd.f32 %v9282_v22, %v2773_v8  ;;  %v4137_v15 = vmax.f32 %v3555_v4, 0.0  ;;  %v3558_v17 = vadd.f32 %v9282_v22, %v3557_v13 }
 0x1f3   : > { %v7195_v14 = vpack.c.bf16 %v3943_v3, %v3943_v3  ;;  %v3944_v16 = vmax.f32 %v2782_v5, 0.0  ;;  %v7391_v18 = vpack.c.bf16 %v4139_v9, %v4139_v9  ;;  %v4140_v19 = vmax.f32 %v3566_v11, 0.0 }
 0x1f4   : > { %v7193_v6 = vpack.c.bf16 %v3941_v10, %v3941_v10  ;;  %v3942_v20 = vmax.f32 %v2774_v12, 0.0  ;;  %v7389_v21 = vpack.c.bf16 %v4137_v15, %v4137_v15  ;;  %v4138_v24 = vmax.f32 %v3558_v17, 0.0 }
 0x1f5   : > { %5904 = vst.msk [vmem:[%s8587_s27 + $0x218] sm:$0xf] %vm5769_vm3, %v7195_v14  ;;  %v7196_v23 = vpack.c.bf16 %v3944_v16, %v3944_v16  ;;  %6100 = vst.msk [vmem:[%s8587_s27 + $0x528] sm:$0xf] %vm5769_vm3, %v7391_v18  ;;  %v7392_v25 = vpack.c.bf16 %v4140_v19, %v4140_v19 }
 0x1f6   : > { %5902 = vst.msk [vmem:[%s8587_s27 + $0x210] sm:$0xf] %vm5769_vm3, %v7193_v6  ;;  %v7194_v26 = vpack.c.bf16 %v3942_v20, %v3942_v20  ;;  %v7790_v27 = vpop.f32.mrb[136].mxu0  ;;  %6098 = vst.msk [vmem:[%s8587_s27 + $0x520] sm:$0xf] %vm5769_vm3, %v7389_v21  ;;  %v7390_v28 = vpack.c.bf16 %v4138_v24, %v4138_v24  ;;  %v7986_v30 = vpop.f32.mrb[136].mxu1 }
 0x1f7   : > { %5905 = vst.msk [vmem:[%s8587_s27 + $0x21c] sm:$0xf] %vm5769_vm3, %v7196_v23  ;;  %v2795_v29 = vadd.f32 %v9282_v22, %v7790_v27  ;;  %v2786_v31 = vpop.f32.mrb[137].mxu0  ;;  %6101 = vst.msk [vmem:[%s8587_s27 + $0x52c] sm:$0xf] %vm5769_vm3, %v7392_v25  ;;  %v3579_v32 = vadd.f32 %v9282_v22, %v7986_v30  ;;  %v3570_v34 = vpop.f32.mrb[137].mxu1 }
 0x1f8   : > { %5903 = vst.msk [vmem:[%s8587_s27 + $0x214] sm:$0xf] %vm5769_vm3, %v7194_v26  ;;  %v2787_v33 = vadd.f32 %v9282_v22, %v2786_v31  ;;  %v7791_v35 = vpop.f32.mrb[138].mxu0  ;;  %6099 = vst.msk [vmem:[%s8587_s27 + $0x524] sm:$0xf] %vm5769_vm3, %v7390_v28  ;;  %v3571_v37 = vadd.f32 %v9282_v22, %v3570_v34  ;;  %v7987_v39 = vpop.f32.mrb[138].mxu1 }
 0x1f9   : > { %v3947_v36 = vmax.f32 %v2795_v29, 0.0  ;;  %v2798_v38 = vadd.f32 %v9282_v22, %v7791_v35  ;;  %v2789_v40 = vpop.f32.mrb[139].mxu0  ;;  %v4143_v41 = vmax.f32 %v3579_v32, 0.0  ;;  %v3582_v43 = vadd.f32 %v9282_v22, %v7987_v39  ;;  %v3573_v45 = vpop.f32.mrb[139].mxu1 }
 0x1fa   : > { %v3945_v42 = vmax.f32 %v2787_v33, 0.0  ;;  %v2790_v44 = vadd.f32 %v9282_v22, %v2789_v40  ;;  %v4141_v47 = vmax.f32 %v3571_v37, 0.0  ;;  %v3574_v49 = vadd.f32 %v9282_v22, %v3573_v45 }
 0x1fb   : > { %v7199_v46 = vpack.c.bf16 %v3947_v36, %v3947_v36  ;;  %v3948_v48 = vmax.f32 %v2798_v38, 0.0  ;;  %v7395_v50 = vpack.c.bf16 %v4143_v41, %v4143_v41  ;;  %v4144_v53 = vmax.f32 %v3582_v43, 0.0 }
 0x1fc   : > { %v7197_v52 = vpack.c.bf16 %v3945_v42, %v3945_v42  ;;  %v3946_v54 = vmax.f32 %v2790_v44, 0.0  ;;  %v7393_v55 = vpack.c.bf16 %v4141_v47, %v4141_v47  ;;  %v4142_v57 = vmax.f32 %v3574_v49, 0.0 }
 0x1fd   : > { %5908 = vst.msk [vmem:[%s8587_s27 + $0x228] sm:$0xf] %vm5769_vm3, %v7199_v46  ;;  %v7200_v56 = vpack.c.bf16 %v3948_v48, %v3948_v48  ;;  %6104 = vst.msk [vmem:[%s8587_s27 + $0x538] sm:$0xf] %vm5769_vm3, %v7395_v50  ;;  %v7396_v58 = vpack.c.bf16 %v4144_v53, %v4144_v53 }
 0x1fe   : > { %5906 = vst.msk [vmem:[%s8587_s27 + $0x220] sm:$0xf] %vm5769_vm3, %v7197_v52  ;;  %v7198_v59 = vpack.c.bf16 %v3946_v54, %v3946_v54  ;;  %v7794_v60 = vpop.f32.mrb[140].mxu0  ;;  %6102 = vst.msk [vmem:[%s8587_s27 + $0x530] sm:$0xf] %vm5769_vm3, %v7393_v55  ;;  %v7394_v22 = vpack.c.bf16 %v4142_v57, %v4142_v57  ;;  %v7990_v63 = vpop.f32.mrb[140].mxu1 }
 0x1ff   : > { %5909 = vst.msk [vmem:[%s8587_s27 + $0x22c] sm:$0xf] %vm5769_vm3, %v7200_v56  ;;  %v2811_v62 = vadd.f32 %v9599_v61, %v7794_v60  ;;  %v2802_v0 = vpop.f32.mrb[141].mxu0  ;;  %6105 = vst.msk [vmem:[%s8587_s27 + $0x53c] sm:$0xf] %vm5769_vm3, %v7396_v58  ;;  %v3595_v1 = vadd.f32 %v9599_v61, %v7990_v63  ;;  %v3586_v51 = vpop.f32.mrb[141].mxu1 }
 0x200   : > { %5907 = vst.msk [vmem:[%s8587_s27 + $0x224] sm:$0xf] %vm5769_vm3, %v7198_v59  ;;  %v2803_v2 = vadd.f32 %v9599_v61, %v2802_v0  ;;  %v7795_v3 = vpop.f32.mrb[142].mxu0  ;;  %6103 = vst.msk [vmem:[%s8587_s27 + $0x534] sm:$0xf] %vm5769_vm3, %v7394_v22  ;;  %v3587_v5 = vadd.f32 %v9599_v61, %v3586_v51  ;;  %v7991_v8 = vpop.f32.mrb[142].mxu1 }
 0x201   : > { %v3951_v4 = vmax.f32 %v2811_v62, 0.0  ;;  %v2814_v7 = vadd.f32 %v9599_v61, %v7795_v3  ;;  %v2805_v9 = vpop.f32.mrb[143].mxu0  ;;  %v4147_v10 = vmax.f32 %v3595_v1, 0.0  ;;  %v3598_v12 = vadd.f32 %v9599_v61, %v7991_v8  ;;  %v3589_v14 = vpop.f32.mrb[143].mxu1 }
 0x202   : > { %v3949_v11 = vmax.f32 %v2803_v2, 0.0  ;;  %v2806_v13 = vadd.f32 %v9599_v61, %v2805_v9  ;;  %v4145_v16 = vmax.f32 %v3587_v5, 0.0  ;;  %v3590_v18 = vadd.f32 %v9599_v61, %v3589_v14 }
 0x203   : > { %v7203_v15 = vpack.c.bf16 %v3951_v4, %v3951_v4  ;;  %v3952_v17 = vmax.f32 %v2814_v7, 0.0  ;;  %v7399_v6 = vpack.c.bf16 %v4147_v10, %v4147_v10  ;;  %v4148_v20 = vmax.f32 %v3598_v12, 0.0 }
 0x204   : > { %v7201_v19 = vpack.c.bf16 %v3949_v11, %v3949_v11  ;;  %v3950_v21 = vmax.f32 %v2806_v13, 0.0  ;;  %v7397_v23 = vpack.c.bf16 %v4145_v16, %v4145_v16  ;;  %v4146_v25 = vmax.f32 %v3590_v18, 0.0 }
 0x205   : > { %5912 = vst.msk [vmem:[%s8587_s27 + $0x238] sm:$0xf] %vm5769_vm3, %v7203_v15  ;;  %v7204_v24 = vpack.c.bf16 %v3952_v17, %v3952_v17  ;;  %6108 = vst.msk [vmem:[%s8587_s27 + $0x548] sm:$0xf] %vm5769_vm3, %v7399_v6  ;;  %v7400_v26 = vpack.c.bf16 %v4148_v20, %v4148_v20 }
 0x206   : > { %5910 = vst.msk [vmem:[%s8587_s27 + $0x230] sm:$0xf] %vm5769_vm3, %v7201_v19  ;;  %v7202_v27 = vpack.c.bf16 %v3950_v21, %v3950_v21  ;;  %v7798_v28 = vpop.f32.mrb[144].mxu0  ;;  %6106 = vst.msk [vmem:[%s8587_s27 + $0x540] sm:$0xf] %vm5769_vm3, %v7397_v23  ;;  %v7398_v29 = vpack.c.bf16 %v4146_v25, %v4146_v25  ;;  %v7994_v31 = vpop.f32.mrb[144].mxu1 }
 0x207   : > { %5913 = vst.msk [vmem:[%s8587_s27 + $0x23c] sm:$0xf] %vm5769_vm3, %v7204_v24  ;;  %v2827_v30 = vadd.f32 %v9599_v61, %v7798_v28  ;;  %v2818_v32 = vpop.f32.mrb[145].mxu0  ;;  %6109 = vst.msk [vmem:[%s8587_s27 + $0x54c] sm:$0xf] %vm5769_vm3, %v7400_v26  ;;  %v3611_v33 = vadd.f32 %v9599_v61, %v7994_v31  ;;  %v3602_v35 = vpop.f32.mrb[145].mxu1 }
 0x208   : > { %5911 = vst.msk [vmem:[%s8587_s27 + $0x234] sm:$0xf] %vm5769_vm3, %v7202_v27  ;;  %v2819_v34 = vadd.f32 %v9599_v61, %v2818_v32  ;;  %v7799_v36 = vpop.f32.mrb[146].mxu0  ;;  %6107 = vst.msk [vmem:[%s8587_s27 + $0x544] sm:$0xf] %vm5769_vm3, %v7398_v29  ;;  %v3603_v38 = vadd.f32 %v9599_v61, %v3602_v35  ;;  %v7995_v40 = vpop.f32.mrb[146].mxu1 }
 0x209   : > { %v3955_v37 = vmax.f32 %v2827_v30, 0.0  ;;  %v2830_v39 = vadd.f32 %v9599_v61, %v7799_v36  ;;  %v2821_v41 = vpop.f32.mrb[147].mxu0  ;;  %v4151_v42 = vmax.f32 %v3611_v33, 0.0  ;;  %v3614_v44 = vadd.f32 %v9599_v61, %v7995_v40  ;;  %v3605_v46 = vpop.f32.mrb[147].mxu1 }
 0x20a   : > { %v3953_v43 = vmax.f32 %v2819_v34, 0.0  ;;  %v2822_v45 = vadd.f32 %v9599_v61, %v2821_v41  ;;  %v4149_v48 = vmax.f32 %v3603_v38, 0.0  ;;  %v3606_v50 = vadd.f32 %v9599_v61, %v3605_v46 }
 0x20b   : > { %v7207_v47 = vpack.c.bf16 %v3955_v37, %v3955_v37  ;;  %v3956_v49 = vmax.f32 %v2830_v39, 0.0  ;;  %v7403_v52 = vpack.c.bf16 %v4151_v42, %v4151_v42  ;;  %v4152_v54 = vmax.f32 %v3614_v44, 0.0 }
 0x20c   : > { %v7205_v53 = vpack.c.bf16 %v3953_v43, %v3953_v43  ;;  %v3954_v55 = vmax.f32 %v2822_v45, 0.0  ;;  %v7401_v56 = vpack.c.bf16 %v4149_v48, %v4149_v48  ;;  %v4150_v58 = vmax.f32 %v3606_v50, 0.0 }
 0x20d   : > { %5916 = vst.msk [vmem:[%s8587_s27 + $0x248] sm:$0xf] %vm5769_vm3, %v7207_v47  ;;  %v7208_v57 = vpack.c.bf16 %v3956_v49, %v3956_v49  ;;  %6112 = vst.msk [vmem:[%s8587_s27 + $0x558] sm:$0xf] %vm5769_vm3, %v7403_v52  ;;  %v7404_v59 = vpack.c.bf16 %v4152_v54, %v4152_v54 }
 0x20e   : > { %5914 = vst.msk [vmem:[%s8587_s27 + $0x240] sm:$0xf] %vm5769_vm3, %v7205_v53  ;;  %v7206_v60 = vpack.c.bf16 %v3954_v55, %v3954_v55  ;;  %v7802_v22 = vpop.f32.mrb[148].mxu0  ;;  %6110 = vst.msk [vmem:[%s8587_s27 + $0x550] sm:$0xf] %vm5769_vm3, %v7401_v56  ;;  %v7402_v62 = vpack.c.bf16 %v4150_v58, %v4150_v58  ;;  %v7998_v0 = vpop.f32.mrb[148].mxu1 }
 0x20f   : > { %5917 = vst.msk [vmem:[%s8587_s27 + $0x24c] sm:$0xf] %vm5769_vm3, %v7208_v57  ;;  %v2843_v63 = vadd.f32 %v9599_v61, %v7802_v22  ;;  %v2834_v1 = vpop.f32.mrb[149].mxu0  ;;  %6113 = vst.msk [vmem:[%s8587_s27 + $0x55c] sm:$0xf] %vm5769_vm3, %v7404_v59  ;;  %v3627_v2 = vadd.f32 %v9599_v61, %v7998_v0  ;;  %v3618_v3 = vpop.f32.mrb[149].mxu1 }
 0x210   : > { %5915 = vst.msk [vmem:[%s8587_s27 + $0x244] sm:$0xf] %vm5769_vm3, %v7206_v60  ;;  %v2835_v51 = vadd.f32 %v9599_v61, %v2834_v1  ;;  %v7803_v4 = vpop.f32.mrb[150].mxu0  ;;  %6111 = vst.msk [vmem:[%s8587_s27 + $0x554] sm:$0xf] %vm5769_vm3, %v7402_v62  ;;  %v3619_v7 = vadd.f32 %v9599_v61, %v3618_v3  ;;  %v7999_v9 = vpop.f32.mrb[150].mxu1 }
 0x211   : > { %v3959_v5 = vmax.f32 %v2843_v63, 0.0  ;;  %v2846_v8 = vadd.f32 %v9599_v61, %v7803_v4  ;;  %v2837_v10 = vpop.f32.mrb[151].mxu0  ;;  %v4155_v11 = vmax.f32 %v3627_v2, 0.0  ;;  %v3630_v13 = vadd.f32 %v9599_v61, %v7999_v9  ;;  %v3621_v15 = vpop.f32.mrb[151].mxu1 }
 0x212   : > { %v3957_v12 = vmax.f32 %v2835_v51, 0.0  ;;  %v2838_v14 = vadd.f32 %v9599_v61, %v2837_v10  ;;  %v4153_v17 = vmax.f32 %v3619_v7, 0.0  ;;  %v3622_v6 = vadd.f32 %v9599_v61, %v3621_v15 }
 0x213   : > { %v7211_v16 = vpack.c.bf16 %v3959_v5, %v3959_v5  ;;  %v3960_v18 = vmax.f32 %v2846_v8, 0.0  ;;  %v7407_v19 = vpack.c.bf16 %v4155_v11, %v4155_v11  ;;  %v4156_v21 = vmax.f32 %v3630_v13, 0.0 }
 0x214   : > { %v7209_v20 = vpack.c.bf16 %v3957_v12, %v3957_v12  ;;  %v3958_v23 = vmax.f32 %v2838_v14, 0.0  ;;  %v7405_v24 = vpack.c.bf16 %v4153_v17, %v4153_v17  ;;  %v4154_v26 = vmax.f32 %v3622_v6, 0.0 }
 0x215   : > { %5920 = vst.msk [vmem:[%s8587_s27 + $0x258] sm:$0xf] %vm5769_vm3, %v7211_v16  ;;  %v7212_v25 = vpack.c.bf16 %v3960_v18, %v3960_v18  ;;  %6116 = vst.msk [vmem:[%s8587_s27 + $0x568] sm:$0xf] %vm5769_vm3, %v7407_v19  ;;  %v7408_v27 = vpack.c.bf16 %v4156_v21, %v4156_v21 }
 0x216   : > { %5918 = vst.msk [vmem:[%s8587_s27 + $0x250] sm:$0xf] %vm5769_vm3, %v7209_v20  ;;  %v7210_v28 = vpack.c.bf16 %v3958_v23, %v3958_v23  ;;  %v7806_v29 = vpop.f32.mrb[152].mxu0  ;;  %6114 = vst.msk [vmem:[%s8587_s27 + $0x560] sm:$0xf] %vm5769_vm3, %v7405_v24  ;;  %v7406_v30 = vpack.c.bf16 %v4154_v26, %v4154_v26  ;;  %v8002_v32 = vpop.f32.mrb[152].mxu1 }
 0x217   : > { %5921 = vst.msk [vmem:[%s8587_s27 + $0x25c] sm:$0xf] %vm5769_vm3, %v7212_v25  ;;  %v2859_v31 = vadd.f32 %v9599_v61, %v7806_v29  ;;  %v2850_v33 = vpop.f32.mrb[153].mxu0  ;;  %6117 = vst.msk [vmem:[%s8587_s27 + $0x56c] sm:$0xf] %vm5769_vm3, %v7408_v27  ;;  %v3643_v34 = vadd.f32 %v9599_v61, %v8002_v32  ;;  %v3634_v36 = vpop.f32.mrb[153].mxu1 }
 0x218   : > { %5919 = vst.msk [vmem:[%s8587_s27 + $0x254] sm:$0xf] %vm5769_vm3, %v7210_v28  ;;  %v2851_v35 = vadd.f32 %v9599_v61, %v2850_v33  ;;  %v7807_v37 = vpop.f32.mrb[154].mxu0  ;;  %6115 = vst.msk [vmem:[%s8587_s27 + $0x564] sm:$0xf] %vm5769_vm3, %v7406_v30  ;;  %v3635_v39 = vadd.f32 %v9599_v61, %v3634_v36  ;;  %v8003_v41 = vpop.f32.mrb[154].mxu1 }
 0x219   : > { %v3963_v38 = vmax.f32 %v2859_v31, 0.0  ;;  %v2862_v40 = vadd.f32 %v9599_v61, %v7807_v37  ;;  %v2853_v42 = vpop.f32.mrb[155].mxu0  ;;  %v4159_v43 = vmax.f32 %v3643_v34, 0.0  ;;  %v3646_v45 = vadd.f32 %v9599_v61, %v8003_v41  ;;  %v3637_v47 = vpop.f32.mrb[155].mxu1 }
 0x21a   : > { %v3961_v44 = vmax.f32 %v2851_v35, 0.0  ;;  %v2854_v46 = vadd.f32 %v9599_v61, %v2853_v42  ;;  %v4157_v49 = vmax.f32 %v3635_v39, 0.0  ;;  %v3638_v52 = vadd.f32 %v9599_v61, %v3637_v47 }
 0x21b   : > { %v7215_v48 = vpack.c.bf16 %v3963_v38, %v3963_v38  ;;  %v3964_v50 = vmax.f32 %v2862_v40, 0.0  ;;  %v7411_v53 = vpack.c.bf16 %v4159_v43, %v4159_v43  ;;  %v4160_v55 = vmax.f32 %v3646_v45, 0.0 }
 0x21c   : > { %v7213_v54 = vpack.c.bf16 %v3961_v44, %v3961_v44  ;;  %v3962_v56 = vmax.f32 %v2854_v46, 0.0  ;;  %v7409_v57 = vpack.c.bf16 %v4157_v49, %v4157_v49  ;;  %v4158_v59 = vmax.f32 %v3638_v52, 0.0 }
 0x21d   : > { %5924 = vst.msk [vmem:[%s8587_s27 + $0x268] sm:$0xf] %vm5769_vm3, %v7215_v48  ;;  %v7216_v58 = vpack.c.bf16 %v3964_v50, %v3964_v50  ;;  %6120 = vst.msk [vmem:[%s8587_s27 + $0x578] sm:$0xf] %vm5769_vm3, %v7411_v53  ;;  %v7412_v60 = vpack.c.bf16 %v4160_v55, %v4160_v55 }
 0x21e   : > { %5922 = vst.msk [vmem:[%s8587_s27 + $0x260] sm:$0xf] %vm5769_vm3, %v7213_v54  ;;  %v7214_v22 = vpack.c.bf16 %v3962_v56, %v3962_v56  ;;  %v7810_v62 = vpop.f32.mrb[156].mxu0  ;;  %6118 = vst.msk [vmem:[%s8587_s27 + $0x570] sm:$0xf] %vm5769_vm3, %v7409_v57  ;;  %v7410_v63 = vpack.c.bf16 %v4158_v59, %v4158_v59  ;;  %v8006_v1 = vpop.f32.mrb[156].mxu1 }
 0x21f   : > { %5925 = vst.msk [vmem:[%s8587_s27 + $0x26c] sm:$0xf] %vm5769_vm3, %v7216_v58  ;;  %v2875_v0 = vadd.f32 %v9599_v61, %v7810_v62  ;;  %v2866_v2 = vpop.f32.mrb[157].mxu0  ;;  %6121 = vst.msk [vmem:[%s8587_s27 + $0x57c] sm:$0xf] %vm5769_vm3, %v7412_v60  ;;  %v3659_v51 = vadd.f32 %v9599_v61, %v8006_v1  ;;  %v3650_v4 = vpop.f32.mrb[157].mxu1 }
 0x220   : > { %5923 = vst.msk [vmem:[%s8587_s27 + $0x264] sm:$0xf] %vm5769_vm3, %v7214_v22  ;;  %v2867_v3 = vadd.f32 %v9599_v61, %v2866_v2  ;;  %v7811_v5 = vpop.f32.mrb[158].mxu0  ;;  %6119 = vst.msk [vmem:[%s8587_s27 + $0x574] sm:$0xf] %vm5769_vm3, %v7410_v63  ;;  %v3651_v8 = vadd.f32 %v9599_v61, %v3650_v4  ;;  %v8007_v10 = vpop.f32.mrb[158].mxu1 }
 0x221   : > { %v3967_v7 = vmax.f32 %v2875_v0, 0.0  ;;  %v2878_v9 = vadd.f32 %v9599_v61, %v7811_v5  ;;  %v2869_v11 = vpop.f32.mrb[159].mxu0  ;;  %v4163_v12 = vmax.f32 %v3659_v51, 0.0  ;;  %v3662_v14 = vadd.f32 %v9599_v61, %v8007_v10  ;;  %v3653_v16 = vpop.f32.mrb[159].mxu1 }
 0x222   : > { %v3965_v13 = vmax.f32 %v2867_v3, 0.0  ;;  %v2870_v15 = vadd.f32 %v9599_v61, %v2869_v11  ;;  %v4161_v18 = vmax.f32 %v3651_v8, 0.0  ;;  %v3654_v19 = vadd.f32 %v9599_v61, %v3653_v16 }
 0x223   : > { %v7219_v17 = vpack.c.bf16 %v3967_v7, %v3967_v7  ;;  %v3968_v6 = vmax.f32 %v2878_v9, 0.0  ;;  %v7415_v20 = vpack.c.bf16 %v4163_v12, %v4163_v12  ;;  %v4164_v23 = vmax.f32 %v3662_v14, 0.0 }
 0x224   : > { %v7217_v21 = vpack.c.bf16 %v3965_v13, %v3965_v13  ;;  %v3966_v24 = vmax.f32 %v2870_v15, 0.0  ;;  %v7413_v25 = vpack.c.bf16 %v4161_v18, %v4161_v18  ;;  %v4162_v27 = vmax.f32 %v3654_v19, 0.0 }
 0x225   : > { %5928 = vst.msk [vmem:[%s8587_s27 + $0x278] sm:$0xf] %vm5769_vm3, %v7219_v17  ;;  %v7220_v26 = vpack.c.bf16 %v3968_v6, %v3968_v6  ;;  %6124 = vst.msk [vmem:[%s8587_s27 + $0x588] sm:$0xf] %vm5769_vm3, %v7415_v20  ;;  %v7416_v28 = vpack.c.bf16 %v4164_v23, %v4164_v23 }
 0x226   : > { %5926 = vst.msk [vmem:[%s8587_s27 + $0x270] sm:$0xf] %vm5769_vm3, %v7217_v21  ;;  %v7218_v29 = vpack.c.bf16 %v3966_v24, %v3966_v24  ;;  %v7814_v30 = vpop.f32.mrb[160].mxu0  ;;  %6122 = vst.msk [vmem:[%s8587_s27 + $0x580] sm:$0xf] %vm5769_vm3, %v7413_v25  ;;  %v7414_v31 = vpack.c.bf16 %v4162_v27, %v4162_v27  ;;  %v8010_v33 = vpop.f32.mrb[160].mxu1 }
 0x227   : > { %5929 = vst.msk [vmem:[%s8587_s27 + $0x27c] sm:$0xf] %vm5769_vm3, %v7220_v26  ;;  %v2891_v32 = vadd.f32 %v9599_v61, %v7814_v30  ;;  %v2882_v34 = vpop.f32.mrb[161].mxu0  ;;  %6125 = vst.msk [vmem:[%s8587_s27 + $0x58c] sm:$0xf] %vm5769_vm3, %v7416_v28  ;;  %v3675_v35 = vadd.f32 %v9599_v61, %v8010_v33  ;;  %v3666_v37 = vpop.f32.mrb[161].mxu1 }
 0x228   : > { %5927 = vst.msk [vmem:[%s8587_s27 + $0x274] sm:$0xf] %vm5769_vm3, %v7218_v29  ;;  %v2883_v36 = vadd.f32 %v9599_v61, %v2882_v34  ;;  %v7815_v38 = vpop.f32.mrb[162].mxu0  ;;  %6123 = vst.msk [vmem:[%s8587_s27 + $0x584] sm:$0xf] %vm5769_vm3, %v7414_v31  ;;  %v3667_v40 = vadd.f32 %v9599_v61, %v3666_v37  ;;  %v8011_v42 = vpop.f32.mrb[162].mxu1 }
 0x229   : > { %v3971_v39 = vmax.f32 %v2891_v32, 0.0  ;;  %v2894_v41 = vadd.f32 %v9599_v61, %v7815_v38  ;;  %v2885_v43 = vpop.f32.mrb[163].mxu0  ;;  %v4167_v44 = vmax.f32 %v3675_v35, 0.0  ;;  %v3678_v46 = vadd.f32 %v9599_v61, %v8011_v42  ;;  %v3669_v48 = vpop.f32.mrb[163].mxu1 }
 0x22a   : > { %v3969_v45 = vmax.f32 %v2883_v36, 0.0  ;;  %v2886_v47 = vadd.f32 %v9599_v61, %v2885_v43  ;;  %v4165_v50 = vmax.f32 %v3667_v40, 0.0  ;;  %v3670_v53 = vadd.f32 %v9599_v61, %v3669_v48 }
 0x22b   : > { %v7223_v49 = vpack.c.bf16 %v3971_v39, %v3971_v39  ;;  %v3972_v52 = vmax.f32 %v2894_v41, 0.0  ;;  %v7419_v54 = vpack.c.bf16 %v4167_v44, %v4167_v44  ;;  %v4168_v56 = vmax.f32 %v3678_v46, 0.0 }
 0x22c   : > { %v7221_v55 = vpack.c.bf16 %v3969_v45, %v3969_v45  ;;  %v3970_v57 = vmax.f32 %v2886_v47, 0.0  ;;  %v7417_v58 = vpack.c.bf16 %v4165_v50, %v4165_v50  ;;  %v4166_v60 = vmax.f32 %v3670_v53, 0.0 }
 0x22d   : > { %5932 = vst.msk [vmem:[%s8587_s27 + $0x288] sm:$0xf] %vm5769_vm3, %v7223_v49  ;;  %v7224_v59 = vpack.c.bf16 %v3972_v52, %v3972_v52  ;;  %6128 = vst.msk [vmem:[%s8587_s27 + $0x598] sm:$0xf] %vm5769_vm3, %v7419_v54  ;;  %v7420_v22 = vpack.c.bf16 %v4168_v56, %v4168_v56 }
 0x22e   : > { %5930 = vst.msk [vmem:[%s8587_s27 + $0x280] sm:$0xf] %vm5769_vm3, %v7221_v55  ;;  %v7222_v62 = vpack.c.bf16 %v3970_v57, %v3970_v57  ;;  %v7818_v63 = vpop.f32.mrb[164].mxu0  ;;  %6126 = vst.msk [vmem:[%s8587_s27 + $0x590] sm:$0xf] %vm5769_vm3, %v7417_v58  ;;  %v7418_v0 = vpack.c.bf16 %v4166_v60, %v4166_v60  ;;  %v8014_v2 = vpop.f32.mrb[164].mxu1 }
 0x22f   : > { %5933 = vst.msk [vmem:[%s8587_s27 + $0x28c] sm:$0xf] %vm5769_vm3, %v7224_v59  ;;  %v2907_v1 = vadd.f32 %v9599_v61, %v7818_v63  ;;  %v2898_v51 = vpop.f32.mrb[165].mxu0  ;;  %6129 = vst.msk [vmem:[%s8587_s27 + $0x59c] sm:$0xf] %vm5769_vm3, %v7420_v22  ;;  %v3691_v3 = vadd.f32 %v9599_v61, %v8014_v2  ;;  %v3682_v5 = vpop.f32.mrb[165].mxu1 }
 0x230   : > { %5931 = vst.msk [vmem:[%s8587_s27 + $0x284] sm:$0xf] %vm5769_vm3, %v7222_v62  ;;  %v2899_v4 = vadd.f32 %v9599_v61, %v2898_v51  ;;  %v7819_v7 = vpop.f32.mrb[166].mxu0  ;;  %6127 = vst.msk [vmem:[%s8587_s27 + $0x594] sm:$0xf] %vm5769_vm3, %v7418_v0  ;;  %v3683_v9 = vadd.f32 %v9599_v61, %v3682_v5  ;;  %v8015_v11 = vpop.f32.mrb[166].mxu1 }
 0x231   : > { %v3975_v8 = vmax.f32 %v2907_v1, 0.0  ;;  %v2910_v10 = vadd.f32 %v9599_v61, %v7819_v7  ;;  %v2901_v12 = vpop.f32.mrb[167].mxu0  ;;  %v4171_v13 = vmax.f32 %v3691_v3, 0.0  ;;  %v3694_v15 = vadd.f32 %v9599_v61, %v8015_v11  ;;  %v3685_v17 = vpop.f32.mrb[167].mxu1 }
 0x232   : > { %v3973_v14 = vmax.f32 %v2899_v4, 0.0  ;;  %v2902_v16 = vadd.f32 %v9599_v61, %v2901_v12  ;;  %v4169_v6 = vmax.f32 %v3683_v9, 0.0  ;;  %v3686_v20 = vadd.f32 %v9599_v61, %v3685_v17 }
 0x233   : > { %v7227_v18 = vpack.c.bf16 %v3975_v8, %v3975_v8  ;;  %v3976_v19 = vmax.f32 %v2910_v10, 0.0  ;;  %v7423_v21 = vpack.c.bf16 %v4171_v13, %v4171_v13  ;;  %v4172_v24 = vmax.f32 %v3694_v15, 0.0 }
 0x234   : > { %v7225_v23 = vpack.c.bf16 %v3973_v14, %v3973_v14  ;;  %v3974_v25 = vmax.f32 %v2902_v16, 0.0  ;;  %v7421_v26 = vpack.c.bf16 %v4169_v6, %v4169_v6  ;;  %v4170_v28 = vmax.f32 %v3686_v20, 0.0 }
 0x235   : > { %5936 = vst.msk [vmem:[%s8587_s27 + $0x298] sm:$0xf] %vm5769_vm3, %v7227_v18  ;;  %v7228_v27 = vpack.c.bf16 %v3976_v19, %v3976_v19  ;;  %6132 = vst.msk [vmem:[%s8587_s27 + $0x5a8] sm:$0xf] %vm5769_vm3, %v7423_v21  ;;  %v7424_v29 = vpack.c.bf16 %v4172_v24, %v4172_v24 }
 0x236   : > { %5934 = vst.msk [vmem:[%s8587_s27 + $0x290] sm:$0xf] %vm5769_vm3, %v7225_v23  ;;  %v7226_v30 = vpack.c.bf16 %v3974_v25, %v3974_v25  ;;  %v7822_v31 = vpop.f32.mrb[168].mxu0  ;;  %6130 = vst.msk [vmem:[%s8587_s27 + $0x5a0] sm:$0xf] %vm5769_vm3, %v7421_v26  ;;  %v7422_v32 = vpack.c.bf16 %v4170_v28, %v4170_v28  ;;  %v8018_v34 = vpop.f32.mrb[168].mxu1 }
 0x237   : > { %5937 = vst.msk [vmem:[%s8587_s27 + $0x29c] sm:$0xf] %vm5769_vm3, %v7228_v27  ;;  %v2923_v33 = vadd.f32 %v9599_v61, %v7822_v31  ;;  %v2914_v35 = vpop.f32.mrb[169].mxu0  ;;  %6133 = vst.msk [vmem:[%s8587_s27 + $0x5ac] sm:$0xf] %vm5769_vm3, %v7424_v29  ;;  %v3707_v36 = vadd.f32 %v9599_v61, %v8018_v34  ;;  %v3698_v38 = vpop.f32.mrb[169].mxu1 }
 0x238   : > { %5935 = vst.msk [vmem:[%s8587_s27 + $0x294] sm:$0xf] %vm5769_vm3, %v7226_v30  ;;  %v2915_v37 = vadd.f32 %v9599_v61, %v2914_v35  ;;  %v7823_v39 = vpop.f32.mrb[170].mxu0  ;;  %6131 = vst.msk [vmem:[%s8587_s27 + $0x5a4] sm:$0xf] %vm5769_vm3, %v7422_v32  ;;  %v3699_v41 = vadd.f32 %v9599_v61, %v3698_v38  ;;  %v8019_v43 = vpop.f32.mrb[170].mxu1 }
 0x239   : > { %v3979_v40 = vmax.f32 %v2923_v33, 0.0  ;;  %v2926_v42 = vadd.f32 %v9599_v61, %v7823_v39  ;;  %v2917_v44 = vpop.f32.mrb[171].mxu0  ;;  %v4175_v45 = vmax.f32 %v3707_v36, 0.0  ;;  %v3710_v47 = vadd.f32 %v9599_v61, %v8019_v43  ;;  %v3701_v49 = vpop.f32.mrb[171].mxu1 }
 0x23a   : > { %v3977_v46 = vmax.f32 %v2915_v37, 0.0  ;;  %v2918_v48 = vadd.f32 %v9599_v61, %v2917_v44  ;;  %v4173_v52 = vmax.f32 %v3699_v41, 0.0  ;;  %v3702_v54 = vadd.f32 %v9599_v61, %v3701_v49 }
 0x23b   : > { %v7231_v50 = vpack.c.bf16 %v3979_v40, %v3979_v40  ;;  %v3980_v53 = vmax.f32 %v2926_v42, 0.0  ;;  %v7427_v55 = vpack.c.bf16 %v4175_v45, %v4175_v45  ;;  %v4176_v57 = vmax.f32 %v3710_v47, 0.0 }
 0x23c   : > { %v7229_v56 = vpack.c.bf16 %v3977_v46, %v3977_v46  ;;  %v3978_v58 = vmax.f32 %v2918_v48, 0.0  ;;  %v7425_v59 = vpack.c.bf16 %v4173_v52, %v4173_v52  ;;  %v4174_v22 = vmax.f32 %v3702_v54, 0.0 }
 0x23d   : > { %5940 = vst.msk [vmem:[%s8587_s27 + $0x2a8] sm:$0xf] %vm5769_vm3, %v7231_v50  ;;  %v7232_v60 = vpack.c.bf16 %v3980_v53, %v3980_v53  ;;  %6136 = vst.msk [vmem:[%s8587_s27 + $0x5b8] sm:$0xf] %vm5769_vm3, %v7427_v55  ;;  %v7428_v62 = vpack.c.bf16 %v4176_v57, %v4176_v57 }
 0x23e   : > { %5938 = vst.msk [vmem:[%s8587_s27 + $0x2a0] sm:$0xf] %vm5769_vm3, %v7229_v56  ;;  %v7230_v63 = vpack.c.bf16 %v3978_v58, %v3978_v58  ;;  %v7826_v0 = vpop.f32.mrb[172].mxu0  ;;  %6134 = vst.msk [vmem:[%s8587_s27 + $0x5b0] sm:$0xf] %vm5769_vm3, %v7425_v59  ;;  %v7426_v1 = vpack.c.bf16 %v4174_v22, %v4174_v22  ;;  %v8022_v51 = vpop.f32.mrb[172].mxu1 }
 0x23f   : > { %5941 = vst.msk [vmem:[%s8587_s27 + $0x2ac] sm:$0xf] %vm5769_vm3, %v7232_v60  ;;  %v2939_v2 = vadd.f32 %v9599_v61, %v7826_v0  ;;  %v2930_v3 = vpop.f32.mrb[173].mxu0  ;;  %6137 = vst.msk [vmem:[%s8587_s27 + $0x5bc] sm:$0xf] %vm5769_vm3, %v7428_v62  ;;  %v3723_v4 = vadd.f32 %v9599_v61, %v8022_v51  ;;  %v3714_v7 = vpop.f32.mrb[173].mxu1 }
 0x240   : > { %5939 = vst.msk [vmem:[%s8587_s27 + $0x2a4] sm:$0xf] %vm5769_vm3, %v7230_v63  ;;  %v2931_v5 = vadd.f32 %v9599_v61, %v2930_v3  ;;  %v7827_v8 = vpop.f32.mrb[174].mxu0  ;;  %6135 = vst.msk [vmem:[%s8587_s27 + $0x5b4] sm:$0xf] %vm5769_vm3, %v7426_v1  ;;  %v3715_v10 = vadd.f32 %v9599_v61, %v3714_v7  ;;  %v8023_v12 = vpop.f32.mrb[174].mxu1 }
 0x241   : > { %v3983_v9 = vmax.f32 %v2939_v2, 0.0  ;;  %v2942_v11 = vadd.f32 %v9599_v61, %v7827_v8  ;;  %v2933_v13 = vpop.f32.mrb[175].mxu0  ;;  %v4179_v14 = vmax.f32 %v3723_v4, 0.0  ;;  %v3726_v16 = vadd.f32 %v9599_v61, %v8023_v12  ;;  %v3717_v18 = vpop.f32.mrb[175].mxu1 }
 0x242   : > { %v3981_v15 = vmax.f32 %v2931_v5, 0.0  ;;  %v2934_v17 = vadd.f32 %v9599_v61, %v2933_v13  ;;  %v4177_v19 = vmax.f32 %v3715_v10, 0.0  ;;  %v3718_v21 = vadd.f32 %v9599_v61, %v3717_v18 }
 0x243   : > { %v7235_v6 = vpack.c.bf16 %v3983_v9, %v3983_v9  ;;  %v3984_v20 = vmax.f32 %v2942_v11, 0.0  ;;  %v7431_v23 = vpack.c.bf16 %v4179_v14, %v4179_v14  ;;  %v4180_v25 = vmax.f32 %v3726_v16, 0.0 }
 0x244   : > { %v7233_v24 = vpack.c.bf16 %v3981_v15, %v3981_v15  ;;  %v3982_v26 = vmax.f32 %v2934_v17, 0.0  ;;  %v7429_v27 = vpack.c.bf16 %v4177_v19, %v4177_v19  ;;  %v4178_v29 = vmax.f32 %v3718_v21, 0.0 }
 0x245   : > { %5944 = vst.msk [vmem:[%s8587_s27 + $0x2b8] sm:$0xf] %vm5769_vm3, %v7235_v6  ;;  %v7236_v28 = vpack.c.bf16 %v3984_v20, %v3984_v20  ;;  %6140 = vst.msk [vmem:[%s8587_s27 + $0x5c8] sm:$0xf] %vm5769_vm3, %v7431_v23  ;;  %v7432_v30 = vpack.c.bf16 %v4180_v25, %v4180_v25 }
 0x246   : > { %5942 = vst.msk [vmem:[%s8587_s27 + $0x2b0] sm:$0xf] %vm5769_vm3, %v7233_v24  ;;  %v7234_v31 = vpack.c.bf16 %v3982_v26, %v3982_v26  ;;  %v7830_v32 = vpop.f32.mrb[176].mxu0  ;;  %6138 = vst.msk [vmem:[%s8587_s27 + $0x5c0] sm:$0xf] %vm5769_vm3, %v7429_v27  ;;  %v7430_v33 = vpack.c.bf16 %v4178_v29, %v4178_v29  ;;  %v8026_v35 = vpop.f32.mrb[176].mxu1 }
 0x247   : > { %5945 = vst.msk [vmem:[%s8587_s27 + $0x2bc] sm:$0xf] %vm5769_vm3, %v7236_v28  ;;  %v2955_v34 = vadd.f32 %v9599_v61, %v7830_v32  ;;  %v2946_v36 = vpop.f32.mrb[177].mxu0  ;;  %6141 = vst.msk [vmem:[%s8587_s27 + $0x5cc] sm:$0xf] %vm5769_vm3, %v7432_v30  ;;  %v3739_v37 = vadd.f32 %v9599_v61, %v8026_v35  ;;  %v3730_v39 = vpop.f32.mrb[177].mxu1 }
 0x248   : > { %5943 = vst.msk [vmem:[%s8587_s27 + $0x2b4] sm:$0xf] %vm5769_vm3, %v7234_v31  ;;  %v2947_v38 = vadd.f32 %v9599_v61, %v2946_v36  ;;  %v7831_v40 = vpop.f32.mrb[178].mxu0  ;;  %6139 = vst.msk [vmem:[%s8587_s27 + $0x5c4] sm:$0xf] %vm5769_vm3, %v7430_v33  ;;  %v3731_v42 = vadd.f32 %v9599_v61, %v3730_v39  ;;  %v8027_v44 = vpop.f32.mrb[178].mxu1 }
 0x249   : > { %v3987_v41 = vmax.f32 %v2955_v34, 0.0  ;;  %v2958_v43 = vadd.f32 %v9599_v61, %v7831_v40  ;;  %v2949_v45 = vpop.f32.mrb[179].mxu0  ;;  %v4183_v46 = vmax.f32 %v3739_v37, 0.0  ;;  %v3742_v48 = vadd.f32 %v9599_v61, %v8027_v44  ;;  %v3733_v50 = vpop.f32.mrb[179].mxu1 }
 0x24a   : > { %v3985_v47 = vmax.f32 %v2947_v38, 0.0  ;;  %v2950_v49 = vadd.f32 %v9599_v61, %v2949_v45  ;;  %v4181_v53 = vmax.f32 %v3731_v42, 0.0  ;;  %v3734_v55 = vadd.f32 %v9599_v61, %v3733_v50 }
 0x24b   : > { %v7239_v52 = vpack.c.bf16 %v3987_v41, %v3987_v41  ;;  %v3988_v54 = vmax.f32 %v2958_v43, 0.0  ;;  %v7435_v56 = vpack.c.bf16 %v4183_v46, %v4183_v46  ;;  %v4184_v58 = vmax.f32 %v3742_v48, 0.0 }
 0x24c   : > { %v7237_v57 = vpack.c.bf16 %v3985_v47, %v3985_v47  ;;  %v3986_v59 = vmax.f32 %v2950_v49, 0.0  ;;  %v7433_v60 = vpack.c.bf16 %v4181_v53, %v4181_v53  ;;  %v4182_v62 = vmax.f32 %v3734_v55, 0.0 }
 0x24d   : > { %5948 = vst.msk [vmem:[%s8587_s27 + $0x2c8] sm:$0xf] %vm5769_vm3, %v7239_v52  ;;  %v7240_v22 = vpack.c.bf16 %v3988_v54, %v3988_v54  ;;  %6144 = vst.msk [vmem:[%s8587_s27 + $0x5d8] sm:$0xf] %vm5769_vm3, %v7435_v56  ;;  %v7436_v63 = vpack.c.bf16 %v4184_v58, %v4184_v58 }
 0x24e   : > { %5946 = vst.msk [vmem:[%s8587_s27 + $0x2c0] sm:$0xf] %vm5769_vm3, %v7237_v57  ;;  %v7238_v0 = vpack.c.bf16 %v3986_v59, %v3986_v59  ;;  %v7834_v1 = vpop.f32.mrb[180].mxu0  ;;  %6142 = vst.msk [vmem:[%s8587_s27 + $0x5d0] sm:$0xf] %vm5769_vm3, %v7433_v60  ;;  %v7434_v2 = vpack.c.bf16 %v4182_v62, %v4182_v62  ;;  %v8030_v3 = vpop.f32.mrb[180].mxu1 }
 0x24f   : > { %5949 = vst.msk [vmem:[%s8587_s27 + $0x2cc] sm:$0xf] %vm5769_vm3, %v7240_v22  ;;  %v2971_v51 = vadd.f32 %v9599_v61, %v7834_v1  ;;  %v2962_v4 = vpop.f32.mrb[181].mxu0  ;;  %6145 = vst.msk [vmem:[%s8587_s27 + $0x5dc] sm:$0xf] %vm5769_vm3, %v7436_v63  ;;  %v3755_v5 = vadd.f32 %v9599_v61, %v8030_v3  ;;  %v3746_v8 = vpop.f32.mrb[181].mxu1 }
 0x250   : > { %5947 = vst.msk [vmem:[%s8587_s27 + $0x2c4] sm:$0xf] %vm5769_vm3, %v7238_v0  ;;  %v2963_v7 = vadd.f32 %v9599_v61, %v2962_v4  ;;  %v7835_v9 = vpop.f32.mrb[182].mxu0  ;;  %6143 = vst.msk [vmem:[%s8587_s27 + $0x5d4] sm:$0xf] %vm5769_vm3, %v7434_v2  ;;  %v3747_v11 = vadd.f32 %v9599_v61, %v3746_v8  ;;  %v8031_v13 = vpop.f32.mrb[182].mxu1 }
 0x251   : > { %v3991_v10 = vmax.f32 %v2971_v51, 0.0  ;;  %v2974_v12 = vadd.f32 %v9599_v61, %v7835_v9  ;;  %v2965_v14 = vpop.f32.mrb[183].mxu0  ;;  %v4187_v15 = vmax.f32 %v3755_v5, 0.0  ;;  %v3758_v17 = vadd.f32 %v9599_v61, %v8031_v13  ;;  %v3749_v6 = vpop.f32.mrb[183].mxu1 }
 0x252   : > { %v3989_v16 = vmax.f32 %v2963_v7, 0.0  ;;  %v2966_v18 = vadd.f32 %v9599_v61, %v2965_v14  ;;  %v4185_v20 = vmax.f32 %v3747_v11, 0.0  ;;  %v3750_v23 = vadd.f32 %v9599_v61, %v3749_v6 }
 0x253   : > { %v7243_v19 = vpack.c.bf16 %v3991_v10, %v3991_v10  ;;  %v3992_v21 = vmax.f32 %v2974_v12, 0.0  ;;  %v7439_v24 = vpack.c.bf16 %v4187_v15, %v4187_v15  ;;  %v4188_v26 = vmax.f32 %v3758_v17, 0.0 }
 0x254   : > { %v7241_v25 = vpack.c.bf16 %v3989_v16, %v3989_v16  ;;  %v3990_v27 = vmax.f32 %v2966_v18, 0.0  ;;  %v7437_v28 = vpack.c.bf16 %v4185_v20, %v4185_v20  ;;  %v4186_v30 = vmax.f32 %v3750_v23, 0.0 }
 0x255   : > { %5952 = vst.msk [vmem:[%s8587_s27 + $0x2d8] sm:$0xf] %vm5769_vm3, %v7243_v19  ;;  %v7244_v29 = vpack.c.bf16 %v3992_v21, %v3992_v21  ;;  %6148 = vst.msk [vmem:[%s8587_s27 + $0x5e8] sm:$0xf] %vm5769_vm3, %v7439_v24  ;;  %v7440_v31 = vpack.c.bf16 %v4188_v26, %v4188_v26 }
 0x256   : > { %5950 = vst.msk [vmem:[%s8587_s27 + $0x2d0] sm:$0xf] %vm5769_vm3, %v7241_v25  ;;  %v7242_v32 = vpack.c.bf16 %v3990_v27, %v3990_v27  ;;  %v7838_v33 = vpop.f32.mrb[184].mxu0  ;;  %6146 = vst.msk [vmem:[%s8587_s27 + $0x5e0] sm:$0xf] %vm5769_vm3, %v7437_v28  ;;  %v7438_v34 = vpack.c.bf16 %v4186_v30, %v4186_v30  ;;  %v8034_v36 = vpop.f32.mrb[184].mxu1 }
 0x257   : > { %5953 = vst.msk [vmem:[%s8587_s27 + $0x2dc] sm:$0xf] %vm5769_vm3, %v7244_v29  ;;  %v2987_v35 = vadd.f32 %v9599_v61, %v7838_v33  ;;  %v2978_v37 = vpop.f32.mrb[185].mxu0  ;;  %6149 = vst.msk [vmem:[%s8587_s27 + $0x5ec] sm:$0xf] %vm5769_vm3, %v7440_v31  ;;  %v3771_v38 = vadd.f32 %v9599_v61, %v8034_v36  ;;  %v3762_v40 = vpop.f32.mrb[185].mxu1 }
 0x258   : > { %5951 = vst.msk [vmem:[%s8587_s27 + $0x2d4] sm:$0xf] %vm5769_vm3, %v7242_v32  ;;  %v2979_v39 = vadd.f32 %v9599_v61, %v2978_v37  ;;  %v7839_v41 = vpop.f32.mrb[186].mxu0  ;;  %6147 = vst.msk [vmem:[%s8587_s27 + $0x5e4] sm:$0xf] %vm5769_vm3, %v7438_v34  ;;  %v3763_v43 = vadd.f32 %v9599_v61, %v3762_v40  ;;  %v8035_v45 = vpop.f32.mrb[186].mxu1 }
 0x259   : > { %v3995_v42 = vmax.f32 %v2987_v35, 0.0  ;;  %v2990_v44 = vadd.f32 %v9599_v61, %v7839_v41  ;;  %v2981_v46 = vpop.f32.mrb[187].mxu0  ;;  %v4191_v47 = vmax.f32 %v3771_v38, 0.0  ;;  %v3774_v49 = vadd.f32 %v9599_v61, %v8035_v45  ;;  %v3765_v52 = vpop.f32.mrb[187].mxu1  ;;  %v8271_v35 = vld [vmem:[%s9949_s2] ss:$0 sm:$0xff] }
 0x25a   : > { %v3993_v48 = vmax.f32 %v2979_v39, 0.0  ;;  %v2982_v50 = vadd.f32 %v9599_v61, %v2981_v46  ;;  %v4189_v54 = vmax.f32 %v3763_v43, 0.0  ;;  %v3766_v56 = vadd.f32 %v9599_v61, %v3765_v52 }
 0x25b   : > { %v7247_v53 = vpack.c.bf16 %v3995_v42, %v3995_v42  ;;  %v3996_v55 = vmax.f32 %v2990_v44, 0.0  ;;  %v7443_v57 = vpack.c.bf16 %v4191_v47, %v4191_v47  ;;  %v4192_v59 = vmax.f32 %v3774_v49, 0.0 }
 0x25c   : > { %v7245_v58 = vpack.c.bf16 %v3993_v48, %v3993_v48  ;;  %v3994_v60 = vmax.f32 %v2982_v50, 0.0  ;;  %v7441_v22 = vpack.c.bf16 %v4189_v54, %v4189_v54  ;;  %v4190_v63 = vmax.f32 %v3766_v56, 0.0 }
 0x25d   : > { %5956 = vst.msk [vmem:[%s8587_s27 + $0x2e8] sm:$0xf] %vm5769_vm3, %v7247_v53  ;;  %v7248_v62 = vpack.c.bf16 %v3996_v55, %v3996_v55  ;;  %6152 = vst.msk [vmem:[%s8587_s27 + $0x5f8] sm:$0xf] %vm5769_vm3, %v7443_v57  ;;  %v7444_v0 = vpack.c.bf16 %v4192_v59, %v4192_v59 }
 0x25e   : > { %5954 = vst.msk [vmem:[%s8587_s27 + $0x2e0] sm:$0xf] %vm5769_vm3, %v7245_v58  ;;  %v7246_v1 = vpack.c.bf16 %v3994_v60, %v3994_v60  ;;  %v7842_v2 = vpop.f32.mrb[188].mxu0  ;;  %6150 = vst.msk [vmem:[%s8587_s27 + $0x5f0] sm:$0xf] %vm5769_vm3, %v7441_v22  ;;  %v7442_v51 = vpack.c.bf16 %v4190_v63, %v4190_v63  ;;  %v8038_v4 = vpop.f32.mrb[188].mxu1 }
 0x25f   : > { %5957 = vst.msk [vmem:[%s8587_s27 + $0x2ec] sm:$0xf] %vm5769_vm3, %v7248_v62  ;;  %v3003_v3 = vadd.f32 %v9599_v61, %v7842_v2  ;;  %v2994_v5 = vpop.f32.mrb[189].mxu0  ;;  %6153 = vst.msk [vmem:[%s8587_s27 + $0x5fc] sm:$0xf] %vm5769_vm3, %v7444_v0  ;;  %v3787_v7 = vadd.f32 %v9599_v61, %v8038_v4  ;;  %v3778_v9 = vpop.f32.mrb[189].mxu1 }
 0x260   : > { %5955 = vst.msk [vmem:[%s8587_s27 + $0x2e4] sm:$0xf] %vm5769_vm3, %v7246_v1  ;;  %v2995_v8 = vadd.f32 %v9599_v61, %v2994_v5  ;;  %v7843_v10 = vpop.f32.mrb[190].mxu0  ;;  %6151 = vst.msk [vmem:[%s8587_s27 + $0x5f4] sm:$0xf] %vm5769_vm3, %v7442_v51  ;;  %v3779_v12 = vadd.f32 %v9599_v61, %v3778_v9  ;;  %v8039_v14 = vpop.f32.mrb[190].mxu1 }
 0x261   : > { %v3999_v11 = vmax.f32 %v3003_v3, 0.0  ;;  %v3006_v13 = vadd.f32 %v9599_v61, %v7843_v10  ;;  %v2997_v15 = vpop.f32.mrb[191].mxu0  ;;  %v4195_v16 = vmax.f32 %v3787_v7, 0.0  ;;  %v3790_v18 = vadd.f32 %v9599_v61, %v8039_v14  ;;  %v3781_v19 = vpop.f32.mrb[191].mxu1 }
 0x262   : > { %v3997_v17 = vmax.f32 %v2995_v8, 0.0  ;;  %v2998_v6 = vadd.f32 %v9599_v61, %v2997_v15  ;;  %v4193_v21 = vmax.f32 %v3779_v12, 0.0  ;;  %v3782_v24 = vadd.f32 %v9599_v61, %v3781_v19 }
 0x263   : > { %v7251_v20 = vpack.c.bf16 %v3999_v11, %v3999_v11  ;;  %v4000_v23 = vmax.f32 %v3006_v13, 0.0  ;;  %v7447_v25 = vpack.c.bf16 %v4195_v16, %v4195_v16  ;;  %v4196_v27 = vmax.f32 %v3790_v18, 0.0 }
 0x264   : > { %v7249_v26 = vpack.c.bf16 %v3997_v17, %v3997_v17  ;;  %v3998_v28 = vmax.f32 %v2998_v6, 0.0  ;;  %v7445_v29 = vpack.c.bf16 %v4193_v21, %v4193_v21  ;;  %v4194_v31 = vmax.f32 %v3782_v24, 0.0 }
 0x265   : > { %5960 = vst.msk [vmem:[%s8587_s27 + $0x2f8] sm:$0xf] %vm5769_vm3, %v7251_v20  ;;  %v7252_v30 = vpack.c.bf16 %v4000_v23, %v4000_v23  ;;  %6156 = vst.msk [vmem:[%s8587_s27 + $0x608] sm:$0xf] %vm5769_vm3, %v7447_v25  ;;  %v7448_v32 = vpack.c.bf16 %v4196_v27, %v4196_v27 }
 0x266   : > { %5958 = vst.msk [vmem:[%s8587_s27 + $0x2f0] sm:$0xf] %vm5769_vm3, %v7249_v26  ;;  %v7250_v33 = vpack.c.bf16 %v3998_v28, %v3998_v28  ;;  %v7846_v34 = vpop.f32.mrb[192].mxu0  ;;  %6154 = vst.msk [vmem:[%s8587_s27 + $0x600] sm:$0xf] %vm5769_vm3, %v7445_v29  ;;  %v7446_v61 = vpack.c.bf16 %v4194_v31, %v4194_v31  ;;  %v8042_v37 = vpop.f32.mrb[192].mxu1 }
 0x267   : > { %5961 = vst.msk [vmem:[%s8587_s27 + $0x2fc] sm:$0xf] %vm5769_vm3, %v7252_v30  ;;  %v3019_v36 = vadd.f32 %v8271_v35, %v7846_v34  ;;  %v3010_v38 = vpop.f32.mrb[193].mxu0  ;;  %6157 = vst.msk [vmem:[%s8587_s27 + $0x60c] sm:$0xf] %vm5769_vm3, %v7448_v32  ;;  %v3803_v39 = vadd.f32 %v8271_v35, %v8042_v37  ;;  %v3794_v41 = vpop.f32.mrb[193].mxu1 }
 0x268   : > { %5959 = vst.msk [vmem:[%s8587_s27 + $0x2f4] sm:$0xf] %vm5769_vm3, %v7250_v33  ;;  %v3011_v40 = vadd.f32 %v8271_v35, %v3010_v38  ;;  %v7847_v42 = vpop.f32.mrb[194].mxu0  ;;  %6155 = vst.msk [vmem:[%s8587_s27 + $0x604] sm:$0xf] %vm5769_vm3, %v7446_v61  ;;  %v3795_v44 = vadd.f32 %v8271_v35, %v3794_v41  ;;  %v8043_v46 = vpop.f32.mrb[194].mxu1 }
 0x269   : > { %v4003_v43 = vmax.f32 %v3019_v36, 0.0  ;;  %v3022_v45 = vadd.f32 %v8271_v35, %v7847_v42  ;;  %v3013_v47 = vpop.f32.mrb[195].mxu0  ;;  %v4199_v48 = vmax.f32 %v3803_v39, 0.0  ;;  %v3806_v50 = vadd.f32 %v8271_v35, %v8043_v46  ;;  %v3797_v53 = vpop.f32.mrb[195].mxu1 }
 0x26a   : > { %v4001_v49 = vmax.f32 %v3011_v40, 0.0  ;;  %v3014_v52 = vadd.f32 %v8271_v35, %v3013_v47  ;;  %v4197_v55 = vmax.f32 %v3795_v44, 0.0  ;;  %v3798_v57 = vadd.f32 %v8271_v35, %v3797_v53 }
 0x26b   : > { %v7255_v54 = vpack.c.bf16 %v4003_v43, %v4003_v43  ;;  %v4004_v56 = vmax.f32 %v3022_v45, 0.0  ;;  %v7451_v58 = vpack.c.bf16 %v4199_v48, %v4199_v48  ;;  %v4200_v60 = vmax.f32 %v3806_v50, 0.0 }
 0x26c   : > { %v7253_v59 = vpack.c.bf16 %v4001_v49, %v4001_v49  ;;  %v4002_v22 = vmax.f32 %v3014_v52, 0.0  ;;  %v7449_v62 = vpack.c.bf16 %v4197_v55, %v4197_v55  ;;  %v4198_v0 = vmax.f32 %v3798_v57, 0.0 }
 0x26d   : > { %5964 = vst.msk [vmem:[%s8587_s27 + $0x308] sm:$0xf] %vm5769_vm3, %v7255_v54  ;;  %v7256_v63 = vpack.c.bf16 %v4004_v56, %v4004_v56  ;;  %6160 = vst.msk [vmem:[%s8587_s27 + $0x618] sm:$0xf] %vm5769_vm3, %v7451_v58  ;;  %v7452_v1 = vpack.c.bf16 %v4200_v60, %v4200_v60 }
 0x26e   : > { %5962 = vst.msk [vmem:[%s8587_s27 + $0x300] sm:$0xf] %vm5769_vm3, %v7253_v59  ;;  %v7254_v2 = vpack.c.bf16 %v4002_v22, %v4002_v22  ;;  %6158 = vst.msk [vmem:[%s8587_s27 + $0x610] sm:$0xf] %vm5769_vm3, %v7449_v62  ;;  %v7450_v51 = vpack.c.bf16 %v4198_v0, %v4198_v0 }
 0x26f   : > { %5965 = vst.msk [vmem:[%s8587_s27 + $0x30c] sm:$0xf] %vm5769_vm3, %v7256_v63  ;;  %6161 = vst.msk [vmem:[%s8587_s27 + $0x61c] sm:$0xf] %vm5769_vm3, %v7452_v1 }
 0x270   : > { %5963 = vst.msk [vmem:[%s8587_s27 + $0x304] sm:$0xf] %vm5769_vm3, %v7254_v2  ;;  %6159 = vst.msk [vmem:[%s8587_s27 + $0x614] sm:$0xf] %vm5769_vm3, %v7450_v51 }
 0x271 PF: > { %s13_s14 = sadd.s32 1, %s8294_s14   ;;  %s9951_s12 = smov %s8290_s13 }
 0x272   : > { %p10_p5 = scmp.ge.s32.totalorder %s13_s14, 4   ;;  %s9952_s13 = smov %s9954_s15 }
 0x274   :  { %12 = sbr.rel (!%p10_p5) target bundleno = 2 (0x2), region = 68 }

// kernel: normal_cnn_forward.5
= control target key start
LH: loop header
LB: loop body
LE: loop exit
PB: predicated region body
PF: predicated region fallthrough
CT: control target
= control target key end

     0   :  { %vm16_vm0 = vcmask 523264   ;;  %vm25_vm1 = vcmask 517120   ;;  %v4224_v0 = vmov 0.0   ;;  %s6630_s0 = inlined_call_operand.vmem [shape: bf16[8,28,28,64], index: 0, kind: input, shape index: {}]   ;;  %s6631_s1 = inlined_call_operand.vmem [shape: bf16[3,192,128], index: 1, kind: input, shape index: {}]   ;;  %s6632_s2 = inlined_call_operand.vmem [shape: f32[1,128], index: 2, kind: input, shape index: {}]   ;;  %s6633_s3 = inlined_call_operand.vmem [shape: bf16[8,14,14,128], index: 3, kind: output, shape index: {}]  }
   0x1   :  { %15 = vst [vmem:[#allocation2] sm:$0xff] %v4224_v0  ;;  %18 = vst [vmem:[#allocation2 + $0x10] sm:$0xff] %v4224_v0  ;;  %v4641_v1 = vld [vmem:[%s6632_s2] ss:$0 sm:$0xff]  ;;  %s4703_s2 = smov 0  }
   0x2   :  { %20 = vst [vmem:[#allocation2 + $0x20] sm:$0xff] %v4224_v0  ;;  %22 = vst [vmem:[#allocation2 + $0x30] sm:$0xff] %v4224_v0 }
   0x3   :  { %24 = vst [vmem:[#allocation2 + $0x40] sm:$0x3] %v4224_v0  ;;  %27 = vst [vmem:[#allocation2 + $0x50] sm:$0xff] %v4224_v0 }
   0x4   :  { %29 = vst [vmem:[#allocation2 + $0x60] sm:$0xff] %v4224_v0  ;;  %31 = vst [vmem:[#allocation2 + $0x70] sm:$0xff] %v4224_v0 }
   0x5   :  { %33 = vst [vmem:[#allocation2 + $0x80] sm:$0xff] %v4224_v0  ;;  %35 = vst [vmem:[#allocation2 + $0x90] sm:$0x3] %v4224_v0 }
   0x6   :  { %37 = vst [vmem:[#allocation2 + $0xa0] sm:$0xff] %v4224_v0  ;;  %39 = vst [vmem:[#allocation2 + $0xb0] sm:$0xff] %v4224_v0 }
   0x7   :  { %41 = vst [vmem:[#allocation2 + $0xc0] sm:$0xff] %v4224_v0  ;;  %43 = vst [vmem:[#allocation2 + $0xd0] sm:$0xff] %v4224_v0 }
   0x8   :  { %45 = vst [vmem:[#allocation2 + $0xe0] sm:$0x3] %v4224_v0  ;;  %47 = vst [vmem:[#allocation2 + $0xf0] sm:$0xff] %v4224_v0 }
   0x9   :  { %49 = vst [vmem:[#allocation2 + $0x100] sm:$0xff] %v4224_v0  ;;  %51 = vst [vmem:[#allocation2 + $0x110] sm:$0xff] %v4224_v0 }
   0xa   :  { %53 = vst [vmem:[#allocation2 + $0x120] sm:$0xff] %v4224_v0  ;;  %55 = vst [vmem:[#allocation2 + $0x130] sm:$0x3] %v4224_v0 }
   0xb   :  { %57 = vst [vmem:[#allocation2 + $0x140] sm:$0xff] %v4224_v0  ;;  %59 = vst [vmem:[#allocation2 + $0x150] sm:$0xff] %v4224_v0 }
   0xc   :  { %61 = vst [vmem:[#allocation2 + $0x160] sm:$0xff] %v4224_v0  ;;  %63 = vst [vmem:[#allocation2 + $0x170] sm:$0xff] %v4224_v0 }
   0xd   :  { %65 = vst [vmem:[#allocation2 + $0x180] sm:$0x3] %v4224_v0  ;;  %67 = vst [vmem:[#allocation2 + $0x190] sm:$0xff] %v4224_v0 }
   0xe   :  { %69 = vst [vmem:[#allocation2 + $0x1a0] sm:$0xff] %v4224_v0  ;;  %71 = vst [vmem:[#allocation2 + $0x1b0] sm:$0xff] %v4224_v0 }
   0xf   :  { %73 = vst [vmem:[#allocation2 + $0x1c0] sm:$0xff] %v4224_v0  ;;  %75 = vst [vmem:[#allocation2 + $0x1d0] sm:$0x3] %v4224_v0 }
  0x10   :  { %77 = vst [vmem:[#allocation2 + $0x1e0] sm:$0xff] %v4224_v0  ;;  %79 = vst [vmem:[#allocation2 + $0x1f0] sm:$0xff] %v4224_v0 }
  0x11   :  { %81 = vst [vmem:[#allocation2 + $0x200] sm:$0xff] %v4224_v0  ;;  %83 = vst [vmem:[#allocation2 + $0x210] sm:$0xff] %v4224_v0 }
  0x12   :  { %85 = vst [vmem:[#allocation2 + $0x220] sm:$0x3] %v4224_v0  ;;  %87 = vst [vmem:[#allocation2 + $0x230] sm:$0xff] %v4224_v0 }
  0x13   :  { %89 = vst [vmem:[#allocation2 + $0x240] sm:$0xff] %v4224_v0  ;;  %91 = vst [vmem:[#allocation2 + $0x250] sm:$0xff] %v4224_v0 }
  0x14   :  { %93 = vst [vmem:[#allocation2 + $0x260] sm:$0xff] %v4224_v0  ;;  %95 = vst [vmem:[#allocation2 + $0x270] sm:$0x3] %v4224_v0 }
  0x15   :  { %97 = vst [vmem:[#allocation2 + $0x280] sm:$0xff] %v4224_v0  ;;  %99 = vst [vmem:[#allocation2 + $0x290] sm:$0xff] %v4224_v0 }
  0x16   :  { %101 = vst [vmem:[#allocation2 + $0x2a0] sm:$0xff] %v4224_v0  ;;  %103 = vst [vmem:[#allocation2 + $0x2b0] sm:$0xff] %v4224_v0 }
  0x17   :  { %105 = vst [vmem:[#allocation2 + $0x2c0] sm:$0x3] %v4224_v0  ;;  %107 = vst [vmem:[#allocation2 + $0x2d0] sm:$0xff] %v4224_v0 }
  0x18   :  { %109 = vst [vmem:[#allocation2 + $0x2e0] sm:$0xff] %v4224_v0  ;;  %111 = vst [vmem:[#allocation2 + $0x2f0] sm:$0xff] %v4224_v0 }
  0x19   :  { %113 = vst [vmem:[#allocation2 + $0x300] sm:$0xff] %v4224_v0  ;;  %115 = vst [vmem:[#allocation2 + $0x310] sm:$0x3] %v4224_v0 }
  0x1a   :  { %117 = vst [vmem:[#allocation2 + $0x320] sm:$0xff] %v4224_v0  ;;  %119 = vst [vmem:[#allocation2 + $0x330] sm:$0xff] %v4224_v0 }
  0x1b   :  { %121 = vst [vmem:[#allocation2 + $0x340] sm:$0xff] %v4224_v0  ;;  %123 = vst [vmem:[#allocation2 + $0x350] sm:$0xff] %v4224_v0 }
  0x1c   :  { %125 = vst [vmem:[#allocation2 + $0x360] sm:$0x3] %v4224_v0  ;;  %127 = vst [vmem:[#allocation2 + $0x370] sm:$0xff] %v4224_v0 }
  0x1d   :  { %129 = vst [vmem:[#allocation2 + $0x380] sm:$0xff] %v4224_v0  ;;  %131 = vst [vmem:[#allocation2 + $0x390] sm:$0xff] %v4224_v0 }
  0x1e   :  { %133 = vst [vmem:[#allocation2 + $0x3a0] sm:$0xff] %v4224_v0  ;;  %135 = vst [vmem:[#allocation2 + $0x3b0] sm:$0x3] %v4224_v0 }
  0x1f   :  { %137 = vst [vmem:[#allocation2 + $0x3c0] sm:$0xff] %v4224_v0  ;;  %139 = vst [vmem:[#allocation2 + $0x3d0] sm:$0xff] %v4224_v0 }
  0x20   :  { %141 = vst [vmem:[#allocation2 + $0x3e0] sm:$0xff] %v4224_v0  ;;  %143 = vst [vmem:[#allocation2 + $0x3f0] sm:$0xff] %v4224_v0 }
  0x21   :  { %145 = vst [vmem:[#allocation2 + $0x400] sm:$0x3] %v4224_v0  ;;  %147 = vst [vmem:[#allocation2 + $0x410] sm:$0xff] %v4224_v0 }
  0x22   :  { %149 = vst [vmem:[#allocation2 + $0x420] sm:$0xff] %v4224_v0  ;;  %151 = vst [vmem:[#allocation2 + $0x430] sm:$0xff] %v4224_v0 }
  0x23   :  { %153 = vst [vmem:[#allocation2 + $0x440] sm:$0xff] %v4224_v0  ;;  %155 = vst [vmem:[#allocation2 + $0x450] sm:$0x3] %v4224_v0 }
  0x24   :  { %157 = vst [vmem:[#allocation2 + $0x460] sm:$0xff] %v4224_v0  ;;  %159 = vst [vmem:[#allocation2 + $0x470] sm:$0xff] %v4224_v0 }
  0x25   :  { %161 = vst [vmem:[#allocation2 + $0x480] sm:$0xff] %v4224_v0  ;;  %163 = vst [vmem:[#allocation2 + $0x490] sm:$0xff] %v4224_v0 }
  0x26   :  { %165 = vst [vmem:[#allocation2 + $0x4a0] sm:$0x3] %v4224_v0  ;;  %167 = vst [vmem:[#allocation2 + $0x4b0] sm:$0xff] %v4224_v0 }
  0x27   :  { %169 = vst [vmem:[#allocation2 + $0x4c0] sm:$0xff] %v4224_v0  ;;  %171 = vst [vmem:[#allocation2 + $0x4d0] sm:$0xff] %v4224_v0 }
  0x28   :  { %173 = vst [vmem:[#allocation2 + $0x4e0] sm:$0xff] %v4224_v0  ;;  %175 = vst [vmem:[#allocation2 + $0x4f0] sm:$0x3] %v4224_v0 }
  0x29   :  { %177 = vst [vmem:[#allocation2 + $0x500] sm:$0xff] %v4224_v0  ;;  %179 = vst [vmem:[#allocation2 + $0x510] sm:$0xff] %v4224_v0 }
  0x2a   :  { %181 = vst [vmem:[#allocation2 + $0x520] sm:$0xff] %v4224_v0  ;;  %183 = vst [vmem:[#allocation2 + $0x530] sm:$0xff] %v4224_v0 }
  0x2b   :  { %185 = vst [vmem:[#allocation2 + $0x540] sm:$0x3] %v4224_v0  ;;  %187 = vst [vmem:[#allocation2 + $0x550] sm:$0xff] %v4224_v0 }
  0x2c   :  { %189 = vst [vmem:[#allocation2 + $0x560] sm:$0xff] %v4224_v0  ;;  %191 = vst [vmem:[#allocation2 + $0x570] sm:$0xff] %v4224_v0 }
  0x2d   :  { %193 = vst [vmem:[#allocation2 + $0x580] sm:$0xff] %v4224_v0  ;;  %195 = vst [vmem:[#allocation2 + $0x590] sm:$0x3] %v4224_v0 }
  0x2e   :  { %197 = vst [vmem:[#allocation2 + $0x5a0] sm:$0xff] %v4224_v0  ;;  %199 = vst [vmem:[#allocation2 + $0x5b0] sm:$0xff] %v4224_v0 }
  0x2f   :  { %201 = vst [vmem:[#allocation2 + $0x5c0] sm:$0xff] %v4224_v0  ;;  %203 = vst [vmem:[#allocation2 + $0x5d0] sm:$0xff] %v4224_v0 }
  0x30   :  { %205 = vst [vmem:[#allocation2 + $0x5e0] sm:$0x3] %v4224_v0  ;;  %207 = vst [vmem:[#allocation2 + $0x5f0] sm:$0xff] %v4224_v0 }
  0x31   :  { %209 = vst [vmem:[#allocation2 + $0x600] sm:$0xff] %v4224_v0  ;;  %211 = vst [vmem:[#allocation2 + $0x610] sm:$0xff] %v4224_v0 }
  0x32   :  { %213 = vst [vmem:[#allocation2 + $0x620] sm:$0xff] %v4224_v0  ;;  %215 = vst [vmem:[#allocation2 + $0x630] sm:$0x3] %v4224_v0 }
  0x33   :  { %217 = vst [vmem:[#allocation2 + $0x640] sm:$0xff] %v4224_v0  ;;  %219 = vst [vmem:[#allocation2 + $0x650] sm:$0xff] %v4224_v0 }
  0x34   :  { %221 = vst [vmem:[#allocation2 + $0x660] sm:$0xff] %v4224_v0  ;;  %223 = vst [vmem:[#allocation2 + $0x670] sm:$0xff] %v4224_v0 }
  0x35   :  { %225 = vst [vmem:[#allocation2 + $0x680] sm:$0x3] %v4224_v0  ;;  %227 = vst [vmem:[#allocation2 + $0x690] sm:$0xff] %v4224_v0 }
  0x36   :  { %229 = vst [vmem:[#allocation2 + $0x6a0] sm:$0xff] %v4224_v0  ;;  %231 = vst [vmem:[#allocation2 + $0x6b0] sm:$0xff] %v4224_v0 }
  0x37   :  { %233 = vst [vmem:[#allocation2 + $0x6c0] sm:$0xff] %v4224_v0  ;;  %235 = vst [vmem:[#allocation2 + $0x6d0] sm:$0x3] %v4224_v0 }
  0x38   :  { %237 = vst [vmem:[#allocation2 + $0x6e0] sm:$0xff] %v4224_v0  ;;  %239 = vst [vmem:[#allocation2 + $0x6f0] sm:$0xff] %v4224_v0 }
  0x39   :  { %241 = vst [vmem:[#allocation2 + $0x700] sm:$0xff] %v4224_v0  ;;  %243 = vst [vmem:[#allocation2 + $0x710] sm:$0xff] %v4224_v0 }
  0x3a   :  { %245 = vst [vmem:[#allocation2 + $0x720] sm:$0x3] %v4224_v0  ;;  %247 = vst [vmem:[#allocation2 + $0x730] sm:$0xff] %v4224_v0 }
  0x3b   :  { %249 = vst [vmem:[#allocation2 + $0x740] sm:$0xff] %v4224_v0  ;;  %251 = vst [vmem:[#allocation2 + $0x750] sm:$0xff] %v4224_v0 }
  0x3c   :  { %253 = vst [vmem:[#allocation2 + $0x760] sm:$0xff] %v4224_v0  ;;  %255 = vst [vmem:[#allocation2 + $0x770] sm:$0x3] %v4224_v0 }
  0x3d   :  { %257 = vst [vmem:[#allocation2 + $0x780] sm:$0xff] %v4224_v0  ;;  %259 = vst [vmem:[#allocation2 + $0x790] sm:$0xff] %v4224_v0 }
  0x3e   :  { %261 = vst [vmem:[#allocation2 + $0x7a0] sm:$0xff] %v4224_v0  ;;  %263 = vst [vmem:[#allocation2 + $0x7b0] sm:$0xff] %v4224_v0 }
  0x3f   :  { %265 = vst [vmem:[#allocation2 + $0x7c0] sm:$0x3] %v4224_v0  ;;  %267 = vst [vmem:[#allocation2 + $0x7d0] sm:$0xff] %v4224_v0 }
  0x40   :  { %269 = vst [vmem:[#allocation2 + $0x7e0] sm:$0xff] %v4224_v0  ;;  %271 = vst [vmem:[#allocation2 + $0x7f0] sm:$0xff] %v4224_v0 }
  0x41   :  { %273 = vst [vmem:[#allocation2 + $0x800] sm:$0xff] %v4224_v0  ;;  %275 = vst [vmem:[#allocation2 + $0x810] sm:$0x3] %v4224_v0 }
  0x42   :  { %277 = vst [vmem:[#allocation2 + $0x820] sm:$0xff] %v4224_v0  ;;  %279 = vst [vmem:[#allocation2 + $0x830] sm:$0xff] %v4224_v0 }
  0x43   :  { %281 = vst [vmem:[#allocation2 + $0x840] sm:$0xff] %v4224_v0  ;;  %283 = vst [vmem:[#allocation2 + $0x850] sm:$0xff] %v4224_v0 }
  0x44   :  { %285 = vst [vmem:[#allocation2 + $0x860] sm:$0x3] %v4224_v0  ;;  %287 = vst [vmem:[#allocation2 + $0x870] sm:$0xff] %v4224_v0 }
  0x45   :  { %289 = vst [vmem:[#allocation2 + $0x880] sm:$0xff] %v4224_v0  ;;  %291 = vst [vmem:[#allocation2 + $0x890] sm:$0xff] %v4224_v0 }
  0x46   :  { %293 = vst [vmem:[#allocation2 + $0x8a0] sm:$0xff] %v4224_v0  ;;  %295 = vst [vmem:[#allocation2 + $0x8b0] sm:$0x3] %v4224_v0 }
  0x47   :  { %297 = vst [vmem:[#allocation2 + $0x8c0] sm:$0xff] %v4224_v0  ;;  %299 = vst [vmem:[#allocation2 + $0x8d0] sm:$0xff] %v4224_v0 }
  0x48   :  { %301 = vst [vmem:[#allocation2 + $0x8e0] sm:$0xff] %v4224_v0  ;;  %303 = vst [vmem:[#allocation2 + $0x8f0] sm:$0xff] %v4224_v0 }
  0x49   :  { %305 = vst [vmem:[#allocation2 + $0x900] sm:$0x3] %v4224_v0  ;;  %307 = vst [vmem:[#allocation2 + $0x910] sm:$0xff] %v4224_v0 }
  0x4a   :  { %309 = vst [vmem:[#allocation2 + $0x920] sm:$0xff] %v4224_v0  ;;  %311 = vst [vmem:[#allocation2 + $0x930] sm:$0xff] %v4224_v0 }
  0x4b   :  { %313 = vst [vmem:[#allocation2 + $0x940] sm:$0xff] %v4224_v0  ;;  %315 = vst [vmem:[#allocation2 + $0x950] sm:$0x3] %v4224_v0 }
  0x4c   :  { %17 = vst.msk [vmem:[#allocation2 + $0x8] sm:$0xff] %vm16_vm0, %v4224_v0  ;;  %19 = vst.msk [vmem:[#allocation2 + $0x18] sm:$0xff] %vm16_vm0, %v4224_v0 }
  0x4d   :  { %21 = vst.msk [vmem:[#allocation2 + $0x28] sm:$0xff] %vm16_vm0, %v4224_v0  ;;  %23 = vst.msk [vmem:[#allocation2 + $0x38] sm:$0xff] %vm16_vm0, %v4224_v0 }
  0x4e   :  { %28 = vst.msk [vmem:[#allocation2 + $0x58] sm:$0xff] %vm16_vm0, %v4224_v0  ;;  %30 = vst.msk [vmem:[#allocation2 + $0x68] sm:$0xff] %vm16_vm0, %v4224_v0 }
  0x4f   :  { %32 = vst.msk [vmem:[#allocation2 + $0x78] sm:$0xff] %vm16_vm0, %v4224_v0  ;;  %34 = vst.msk [vmem:[#allocation2 + $0x88] sm:$0xff] %vm16_vm0, %v4224_v0 }
  0x50   :  { %38 = vst.msk [vmem:[#allocation2 + $0xa8] sm:$0xff] %vm16_vm0, %v4224_v0  ;;  %40 = vst.msk [vmem:[#allocation2 + $0xb8] sm:$0xff] %vm16_vm0, %v4224_v0 }
  0x51   :  { %42 = vst.msk [vmem:[#allocation2 + $0xc8] sm:$0xff] %vm16_vm0, %v4224_v0  ;;  %44 = vst.msk [vmem:[#allocation2 + $0xd8] sm:$0xff] %vm16_vm0, %v4224_v0 }
  0x52   :  { %48 = vst.msk [vmem:[#allocation2 + $0xf8] sm:$0xff] %vm16_vm0, %v4224_v0  ;;  %50 = vst.msk [vmem:[#allocation2 + $0x108] sm:$0xff] %vm16_vm0, %v4224_v0 }
  0x53   :  { %52 = vst.msk [vmem:[#allocation2 + $0x118] sm:$0xff] %vm16_vm0, %v4224_v0  ;;  %54 = vst.msk [vmem:[#allocation2 + $0x128] sm:$0xff] %vm16_vm0, %v4224_v0 }
  0x54   :  { %58 = vst.msk [vmem:[#allocation2 + $0x148] sm:$0xff] %vm16_vm0, %v4224_v0  ;;  %60 = vst.msk [vmem:[#allocation2 + $0x158] sm:$0xff] %vm16_vm0, %v4224_v0 }
  0x55   :  { %62 = vst.msk [vmem:[#allocation2 + $0x168] sm:$0xff] %vm16_vm0, %v4224_v0  ;;  %64 = vst.msk [vmem:[#allocation2 + $0x178] sm:$0xff] %vm16_vm0, %v4224_v0 }
  0x56   :  { %68 = vst.msk [vmem:[#allocation2 + $0x198] sm:$0xff] %vm16_vm0, %v4224_v0  ;;  %70 = vst.msk [vmem:[#allocation2 + $0x1a8] sm:$0xff] %vm16_vm0, %v4224_v0 }
  0x57   :  { %72 = vst.msk [vmem:[#allocation2 + $0x1b8] sm:$0xff] %vm16_vm0, %v4224_v0  ;;  %74 = vst.msk [vmem:[#allocation2 + $0x1c8] sm:$0xff] %vm16_vm0, %v4224_v0 }
  0x58   :  { %78 = vst.msk [vmem:[#allocation2 + $0x1e8] sm:$0xff] %vm16_vm0, %v4224_v0  ;;  %80 = vst.msk [vmem:[#allocation2 + $0x1f8] sm:$0xff] %vm16_vm0, %v4224_v0 }
  0x59   :  { %82 = vst.msk [vmem:[#allocation2 + $0x208] sm:$0xff] %vm16_vm0, %v4224_v0  ;;  %84 = vst.msk [vmem:[#allocation2 + $0x218] sm:$0xff] %vm16_vm0, %v4224_v0 }
  0x5a   :  { %88 = vst.msk [vmem:[#allocation2 + $0x238] sm:$0xff] %vm16_vm0, %v4224_v0  ;;  %90 = vst.msk [vmem:[#allocation2 + $0x248] sm:$0xff] %vm16_vm0, %v4224_v0 }
  0x5b   :  { %92 = vst.msk [vmem:[#allocation2 + $0x258] sm:$0xff] %vm16_vm0, %v4224_v0  ;;  %94 = vst.msk [vmem:[#allocation2 + $0x268] sm:$0xff] %vm16_vm0, %v4224_v0 }
  0x5c   :  { %98 = vst.msk [vmem:[#allocation2 + $0x288] sm:$0xff] %vm16_vm0, %v4224_v0  ;;  %100 = vst.msk [vmem:[#allocation2 + $0x298] sm:$0xff] %vm16_vm0, %v4224_v0 }
  0x5d   :  { %102 = vst.msk [vmem:[#allocation2 + $0x2a8] sm:$0xff] %vm16_vm0, %v4224_v0  ;;  %104 = vst.msk [vmem:[#allocation2 + $0x2b8] sm:$0xff] %vm16_vm0, %v4224_v0 }
  0x5e   :  { %108 = vst.msk [vmem:[#allocation2 + $0x2d8] sm:$0xff] %vm16_vm0, %v4224_v0  ;;  %110 = vst.msk [vmem:[#allocation2 + $0x2e8] sm:$0xff] %vm16_vm0, %v4224_v0 }
  0x5f   :  { %112 = vst.msk [vmem:[#allocation2 + $0x2f8] sm:$0xff] %vm16_vm0, %v4224_v0  ;;  %114 = vst.msk [vmem:[#allocation2 + $0x308] sm:$0xff] %vm16_vm0, %v4224_v0 }
  0x60   :  { %118 = vst.msk [vmem:[#allocation2 + $0x328] sm:$0xff] %vm16_vm0, %v4224_v0  ;;  %120 = vst.msk [vmem:[#allocation2 + $0x338] sm:$0xff] %vm16_vm0, %v4224_v0 }
  0x61   :  { %122 = vst.msk [vmem:[#allocation2 + $0x348] sm:$0xff] %vm16_vm0, %v4224_v0  ;;  %124 = vst.msk [vmem:[#allocation2 + $0x358] sm:$0xff] %vm16_vm0, %v4224_v0 }
  0x62   :  { %128 = vst.msk [vmem:[#allocation2 + $0x378] sm:$0xff] %vm16_vm0, %v4224_v0  ;;  %130 = vst.msk [vmem:[#allocation2 + $0x388] sm:$0xff] %vm16_vm0, %v4224_v0 }
  0x63   :  { %132 = vst.msk [vmem:[#allocation2 + $0x398] sm:$0xff] %vm16_vm0, %v4224_v0  ;;  %134 = vst.msk [vmem:[#allocation2 + $0x3a8] sm:$0xff] %vm16_vm0, %v4224_v0 }
  0x64   :  { %138 = vst.msk [vmem:[#allocation2 + $0x3c8] sm:$0xff] %vm16_vm0, %v4224_v0  ;;  %140 = vst.msk [vmem:[#allocation2 + $0x3d8] sm:$0xff] %vm16_vm0, %v4224_v0 }
  0x65   :  { %142 = vst.msk [vmem:[#allocation2 + $0x3e8] sm:$0xff] %vm16_vm0, %v4224_v0  ;;  %144 = vst.msk [vmem:[#allocation2 + $0x3f8] sm:$0xff] %vm16_vm0, %v4224_v0 }
  0x66   :  { %148 = vst.msk [vmem:[#allocation2 + $0x418] sm:$0xff] %vm16_vm0, %v4224_v0  ;;  %150 = vst.msk [vmem:[#allocation2 + $0x428] sm:$0xff] %vm16_vm0, %v4224_v0 }
  0x67   :  { %152 = vst.msk [vmem:[#allocation2 + $0x438] sm:$0xff] %vm16_vm0, %v4224_v0  ;;  %154 = vst.msk [vmem:[#allocation2 + $0x448] sm:$0xff] %vm16_vm0, %v4224_v0 }
  0x68   :  { %158 = vst.msk [vmem:[#allocation2 + $0x468] sm:$0xff] %vm16_vm0, %v4224_v0  ;;  %160 = vst.msk [vmem:[#allocation2 + $0x478] sm:$0xff] %vm16_vm0, %v4224_v0 }
  0x69   :  { %162 = vst.msk [vmem:[#allocation2 + $0x488] sm:$0xff] %vm16_vm0, %v4224_v0  ;;  %164 = vst.msk [vmem:[#allocation2 + $0x498] sm:$0xff] %vm16_vm0, %v4224_v0 }
  0x6a   :  { %168 = vst.msk [vmem:[#allocation2 + $0x4b8] sm:$0xff] %vm16_vm0, %v4224_v0  ;;  %170 = vst.msk [vmem:[#allocation2 + $0x4c8] sm:$0xff] %vm16_vm0, %v4224_v0 }
  0x6b   :  { %172 = vst.msk [vmem:[#allocation2 + $0x4d8] sm:$0xff] %vm16_vm0, %v4224_v0  ;;  %174 = vst.msk [vmem:[#allocation2 + $0x4e8] sm:$0xff] %vm16_vm0, %v4224_v0 }
  0x6c   :  { %178 = vst.msk [vmem:[#allocation2 + $0x508] sm:$0xff] %vm16_vm0, %v4224_v0  ;;  %180 = vst.msk [vmem:[#allocation2 + $0x518] sm:$0xff] %vm16_vm0, %v4224_v0 }
  0x6d   :  { %182 = vst.msk [vmem:[#allocation2 + $0x528] sm:$0xff] %vm16_vm0, %v4224_v0  ;;  %184 = vst.msk [vmem:[#allocation2 + $0x538] sm:$0xff] %vm16_vm0, %v4224_v0 }
  0x6e   :  { %188 = vst.msk [vmem:[#allocation2 + $0x558] sm:$0xff] %vm16_vm0, %v4224_v0  ;;  %190 = vst.msk [vmem:[#allocation2 + $0x568] sm:$0xff] %vm16_vm0, %v4224_v0 }
  0x6f   :  { %192 = vst.msk [vmem:[#allocation2 + $0x578] sm:$0xff] %vm16_vm0, %v4224_v0  ;;  %194 = vst.msk [vmem:[#allocation2 + $0x588] sm:$0xff] %vm16_vm0, %v4224_v0 }
  0x70   :  { %198 = vst.msk [vmem:[#allocation2 + $0x5a8] sm:$0xff] %vm16_vm0, %v4224_v0  ;;  %200 = vst.msk [vmem:[#allocation2 + $0x5b8] sm:$0xff] %vm16_vm0, %v4224_v0 }
  0x71   :  { %202 = vst.msk [vmem:[#allocation2 + $0x5c8] sm:$0xff] %vm16_vm0, %v4224_v0  ;;  %204 = vst.msk [vmem:[#allocation2 + $0x5d8] sm:$0xff] %vm16_vm0, %v4224_v0 }
  0x72   :  { %208 = vst.msk [vmem:[#allocation2 + $0x5f8] sm:$0xff] %vm16_vm0, %v4224_v0  ;;  %210 = vst.msk [vmem:[#allocation2 + $0x608] sm:$0xff] %vm16_vm0, %v4224_v0 }
  0x73   :  { %212 = vst.msk [vmem:[#allocation2 + $0x618] sm:$0xff] %vm16_vm0, %v4224_v0  ;;  %214 = vst.msk [vmem:[#allocation2 + $0x628] sm:$0xff] %vm16_vm0, %v4224_v0 }
  0x74   :  { %218 = vst.msk [vmem:[#allocation2 + $0x648] sm:$0xff] %vm16_vm0, %v4224_v0  ;;  %220 = vst.msk [vmem:[#allocation2 + $0x658] sm:$0xff] %vm16_vm0, %v4224_v0 }
  0x75   :  { %222 = vst.msk [vmem:[#allocation2 + $0x668] sm:$0xff] %vm16_vm0, %v4224_v0  ;;  %224 = vst.msk [vmem:[#allocation2 + $0x678] sm:$0xff] %vm16_vm0, %v4224_v0 }
  0x76   :  { %228 = vst.msk [vmem:[#allocation2 + $0x698] sm:$0xff] %vm16_vm0, %v4224_v0  ;;  %230 = vst.msk [vmem:[#allocation2 + $0x6a8] sm:$0xff] %vm16_vm0, %v4224_v0 }
  0x77   :  { %232 = vst.msk [vmem:[#allocation2 + $0x6b8] sm:$0xff] %vm16_vm0, %v4224_v0  ;;  %234 = vst.msk [vmem:[#allocation2 + $0x6c8] sm:$0xff] %vm16_vm0, %v4224_v0 }
  0x78   :  { %238 = vst.msk [vmem:[#allocation2 + $0x6e8] sm:$0xff] %vm16_vm0, %v4224_v0  ;;  %240 = vst.msk [vmem:[#allocation2 + $0x6f8] sm:$0xff] %vm16_vm0, %v4224_v0 }
  0x79   :  { %242 = vst.msk [vmem:[#allocation2 + $0x708] sm:$0xff] %vm16_vm0, %v4224_v0  ;;  %244 = vst.msk [vmem:[#allocation2 + $0x718] sm:$0xff] %vm16_vm0, %v4224_v0 }
  0x7a   :  { %248 = vst.msk [vmem:[#allocation2 + $0x738] sm:$0xff] %vm16_vm0, %v4224_v0  ;;  %250 = vst.msk [vmem:[#allocation2 + $0x748] sm:$0xff] %vm16_vm0, %v4224_v0 }
  0x7b   :  { %252 = vst.msk [vmem:[#allocation2 + $0x758] sm:$0xff] %vm16_vm0, %v4224_v0  ;;  %254 = vst.msk [vmem:[#allocation2 + $0x768] sm:$0xff] %vm16_vm0, %v4224_v0 }
  0x7c   :  { %258 = vst.msk [vmem:[#allocation2 + $0x788] sm:$0xff] %vm16_vm0, %v4224_v0  ;;  %260 = vst.msk [vmem:[#allocation2 + $0x798] sm:$0xff] %vm16_vm0, %v4224_v0 }
  0x7d   :  { %262 = vst.msk [vmem:[#allocation2 + $0x7a8] sm:$0xff] %vm16_vm0, %v4224_v0  ;;  %264 = vst.msk [vmem:[#allocation2 + $0x7b8] sm:$0xff] %vm16_vm0, %v4224_v0 }
  0x7e   :  { %268 = vst.msk [vmem:[#allocation2 + $0x7d8] sm:$0xff] %vm16_vm0, %v4224_v0  ;;  %270 = vst.msk [vmem:[#allocation2 + $0x7e8] sm:$0xff] %vm16_vm0, %v4224_v0 }
  0x7f   :  { %272 = vst.msk [vmem:[#allocation2 + $0x7f8] sm:$0xff] %vm16_vm0, %v4224_v0  ;;  %274 = vst.msk [vmem:[#allocation2 + $0x808] sm:$0xff] %vm16_vm0, %v4224_v0 }
  0x80   :  { %278 = vst.msk [vmem:[#allocation2 + $0x828] sm:$0xff] %vm16_vm0, %v4224_v0  ;;  %280 = vst.msk [vmem:[#allocation2 + $0x838] sm:$0xff] %vm16_vm0, %v4224_v0 }
  0x81   :  { %282 = vst.msk [vmem:[#allocation2 + $0x848] sm:$0xff] %vm16_vm0, %v4224_v0  ;;  %284 = vst.msk [vmem:[#allocation2 + $0x858] sm:$0xff] %vm16_vm0, %v4224_v0 }
  0x82   :  { %288 = vst.msk [vmem:[#allocation2 + $0x878] sm:$0xff] %vm16_vm0, %v4224_v0  ;;  %290 = vst.msk [vmem:[#allocation2 + $0x888] sm:$0xff] %vm16_vm0, %v4224_v0 }
  0x83   :  { %292 = vst.msk [vmem:[#allocation2 + $0x898] sm:$0xff] %vm16_vm0, %v4224_v0  ;;  %294 = vst.msk [vmem:[#allocation2 + $0x8a8] sm:$0xff] %vm16_vm0, %v4224_v0 }
  0x84   :  { %298 = vst.msk [vmem:[#allocation2 + $0x8c8] sm:$0xff] %vm16_vm0, %v4224_v0  ;;  %300 = vst.msk [vmem:[#allocation2 + $0x8d8] sm:$0xff] %vm16_vm0, %v4224_v0 }
  0x85   :  { %302 = vst.msk [vmem:[#allocation2 + $0x8e8] sm:$0xff] %vm16_vm0, %v4224_v0  ;;  %304 = vst.msk [vmem:[#allocation2 + $0x8f8] sm:$0xff] %vm16_vm0, %v4224_v0 }
  0x86   :  { %308 = vst.msk [vmem:[#allocation2 + $0x918] sm:$0xff] %vm16_vm0, %v4224_v0  ;;  %310 = vst.msk [vmem:[#allocation2 + $0x928] sm:$0xff] %vm16_vm0, %v4224_v0 }
  0x87   :  { %312 = vst.msk [vmem:[#allocation2 + $0x938] sm:$0xff] %vm16_vm0, %v4224_v0  ;;  %314 = vst.msk [vmem:[#allocation2 + $0x948] sm:$0xff] %vm16_vm0, %v4224_v0 }
  0x88   :  { %6727 = vst [vmem:[#allocation3_spill] sm:$0xff] %v4641_v1  ;;  %26 = vst.msk [vmem:[#allocation2 + $0x48] sm:$0x3] %vm25_vm1, %v4224_v0 }
  0x89   :  { %36 = vst.msk [vmem:[#allocation2 + $0x98] sm:$0x3] %vm25_vm1, %v4224_v0  ;;  %46 = vst.msk [vmem:[#allocation2 + $0xe8] sm:$0x3] %vm25_vm1, %v4224_v0 }
  0x8a   :  { %56 = vst.msk [vmem:[#allocation2 + $0x138] sm:$0x3] %vm25_vm1, %v4224_v0  ;;  %66 = vst.msk [vmem:[#allocation2 + $0x188] sm:$0x3] %vm25_vm1, %v4224_v0 }
  0x8b   :  { %76 = vst.msk [vmem:[#allocation2 + $0x1d8] sm:$0x3] %vm25_vm1, %v4224_v0  ;;  %86 = vst.msk [vmem:[#allocation2 + $0x228] sm:$0x3] %vm25_vm1, %v4224_v0 }
  0x8c   :  { %96 = vst.msk [vmem:[#allocation2 + $0x278] sm:$0x3] %vm25_vm1, %v4224_v0  ;;  %106 = vst.msk [vmem:[#allocation2 + $0x2c8] sm:$0x3] %vm25_vm1, %v4224_v0 }
  0x8d   :  { %116 = vst.msk [vmem:[#allocation2 + $0x318] sm:$0x3] %vm25_vm1, %v4224_v0  ;;  %126 = vst.msk [vmem:[#allocation2 + $0x368] sm:$0x3] %vm25_vm1, %v4224_v0 }
  0x8e   :  { %136 = vst.msk [vmem:[#allocation2 + $0x3b8] sm:$0x3] %vm25_vm1, %v4224_v0  ;;  %146 = vst.msk [vmem:[#allocation2 + $0x408] sm:$0x3] %vm25_vm1, %v4224_v0 }
  0x8f   :  { %156 = vst.msk [vmem:[#allocation2 + $0x458] sm:$0x3] %vm25_vm1, %v4224_v0  ;;  %166 = vst.msk [vmem:[#allocation2 + $0x4a8] sm:$0x3] %vm25_vm1, %v4224_v0 }
  0x90   :  { %176 = vst.msk [vmem:[#allocation2 + $0x4f8] sm:$0x3] %vm25_vm1, %v4224_v0  ;;  %186 = vst.msk [vmem:[#allocation2 + $0x548] sm:$0x3] %vm25_vm1, %v4224_v0 }
  0x91   :  { %196 = vst.msk [vmem:[#allocation2 + $0x598] sm:$0x3] %vm25_vm1, %v4224_v0  ;;  %206 = vst.msk [vmem:[#allocation2 + $0x5e8] sm:$0x3] %vm25_vm1, %v4224_v0 }
  0x92   :  { %216 = vst.msk [vmem:[#allocation2 + $0x638] sm:$0x3] %vm25_vm1, %v4224_v0  ;;  %226 = vst.msk [vmem:[#allocation2 + $0x688] sm:$0x3] %vm25_vm1, %v4224_v0 }
  0x93   :  { %236 = vst.msk [vmem:[#allocation2 + $0x6d8] sm:$0x3] %vm25_vm1, %v4224_v0  ;;  %246 = vst.msk [vmem:[#allocation2 + $0x728] sm:$0x3] %vm25_vm1, %v4224_v0 }
  0x94   :  { %256 = vst.msk [vmem:[#allocation2 + $0x778] sm:$0x3] %vm25_vm1, %v4224_v0  ;;  %266 = vst.msk [vmem:[#allocation2 + $0x7c8] sm:$0x3] %vm25_vm1, %v4224_v0 }
  0x95   :  { %276 = vst.msk [vmem:[#allocation2 + $0x818] sm:$0x3] %vm25_vm1, %v4224_v0  ;;  %286 = vst.msk [vmem:[#allocation2 + $0x868] sm:$0x3] %vm25_vm1, %v4224_v0 }
  0x96   :  { %296 = vst.msk [vmem:[#allocation2 + $0x8b8] sm:$0x3] %vm25_vm1, %v4224_v0  ;;  %306 = vst.msk [vmem:[#allocation2 + $0x908] sm:$0x3] %vm25_vm1, %v4224_v0 }
  0x97   :  { %316 = vst.msk [vmem:[#allocation2 + $0x958] sm:$0x3] %vm25_vm1, %v4224_v0 }
  0x98 LB: > { %s3638_s14 = smul.u32 448, %s4218_s2  ;;  %vm1537_vm2 = vcmask 1046528   ;;  %vm1849_vm3 = vcmask 518144   ;;  %s4225_s18 = smov 64   ;;  %vm973_vm4 = vcmask 523265   ;;  %vm663_vm5 = vcmask 1040384   ;;  %s4218_s2 = sphi %s4703_s2, %s323_s2  }
  0x99   : > { %vm977_vm6 = vcmask 520192   ;;  %vm1423_vm7 = vcmask 1048064   ;;  %vm1427_vm8 = vcmask 1043968   ;;  %s6174_s19 = smov 0  }
  0x9a   : > { %s4712_s17 = scalar_lea.vmem %s6630_s0, %s3638_s14 }
  0x9b   : > { %v3781_v2 = vld [vmem:[%s4712_s17 + $0x10] sm:$0xff]   ;;  %v3670_v3 = vld [vmem:[%s4712_s17] sm:$0xff]   ;;  %v333_v4 = vld [vmem:[%s4712_s17 + $0x8] ss:$16 sps:$4 sm:$0xff]  }
  0x9c   : > { %v4717_v5 = vunpack.c.l.bf16 %v3781_v2  ;;  %v4719_v6 = vunpack.c.h.bf16 %v3781_v2  ;;  %v4721_v7 = vunpack.c.l.bf16 %v3670_v3  ;;  %v4723_v8 = vunpack.c.h.bf16 %v3670_v3  ;;  %v334_v9 = vld [vmem:[%s4712_s17 + $0x1c] sm:$0x3]  ;;  %v330_v10 = vld [vmem:[%s4712_s17 + $0xc] sm:$0x3]  ;;  %v337_v27 = vld [vmem:[%s4712_s17 + $0x28] ss:$16 sps:$4 sm:$0xff]  }
  0x9d   : > { %v4727_v11 = vunpack.c.h.bf16 %v333_v4  ;;  %v4729_v12 = vunpack.c.l.bf16 %v334_v9  ;;  %v4731_v13 = vunpack.c.l.bf16 %v333_v4  ;;  %v4733_v14 = vunpack.c.l.bf16 %v330_v10  ;;  %v338_v28 = vld [vmem:[%s4712_s17 + $0x2c] sm:$0x3]  ;;  %v3782_v33 = vld [vmem:[%s4712_s17 + $0x20] sm:$0xff]   ;;  %v342_v46 = vld [vmem:[%s4712_s17 + $0x3c] sm:$0x3] }
  0x9e   : > { %v1546_v16 = vrot.slane %v4719_v6, 1  ;;  %v3902_v17 = vpack.i.bf16 %v4719_v6, %v4717_v5  ;;  %v1545_v18 = vrot.slane %v4717_v5, 1  ;;  %v1539_v20 = vrot.slane %v4723_v8, 1  ;;  %v3783_v47 = vld [vmem:[%s4712_s17 + $0x30] sm:$0xff]   ;;  %v345_v52 = vld [vmem:[%s4712_s17 + $0x48] ss:$16 sps:$4 sm:$0xff]  }
  0x9f   : > { %v3892_v21 = vpack.i.bf16 %v4723_v8, %v4721_v7  ;;  %v1538_v22 = vrot.slane %v4721_v7, 1  ;;  %v1550_v25 = vrot.slane %v4729_v12, 1  ;;  %v3907_v26 = vpack.i.bf16 %v4729_v12, %v4727_v11  ;;  %v346_v0 = vld [vmem:[%s4712_s17 + $0x4c] sm:$0x3]  ;;  %v377_v32 = vld [vmem:[%s4712_s17 + $0xc8] ss:$16 sps:$4 sm:$0xff]  }
  0xa0   : > { %3903 = vrot.lane.b32.xlu1 %v3902_v17, %s4225_s18  ;;  %v1547_v23 = vsel %vm1537_vm2, %v1545_v18, %v1546_v16  ;;  %v1548_v31 = vrot.slane %v4727_v11, 1  ;;  %v1543_v34 = vrot.slane %v4733_v14, 1  ;;  %v3897_v35 = vpack.i.bf16 %v4733_v14, %v4731_v13  ;;  %v3790_v17 = vld [vmem:[%s4712_s17 + $0xa0] sm:$0xff]  }
  0xa1   : > { %1851 = vst.msk [vmem:[#allocation2 + $0xa8] sm:$0xff] %vm16_vm0, %v1547_v23  ;;  %3893 = vrot.lane.b32.xlu0 %v3892_v21, %s4225_s18  ;;  %v1540_v29 = vsel %vm1537_vm2, %v1538_v22, %v1539_v20  ;;  %v1541_v37 = vrot.slane %v4731_v13, 1  ;;  %v4769_v40 = vunpack.c.l.bf16 %v337_v27  ;;  %v4771_v41 = vunpack.c.l.bf16 %v338_v28  ;;  %v3792_v30 = vld [vmem:[%s4712_s17 + $0xc0] sm:$0xff]  }
  0xa2   : > { %1846 = vst.msk [vmem:[#allocation2 + $0x58] sm:$0xff] %vm16_vm0, %v1540_v29  ;;  %v1549_v38 = vsel %vm1537_vm2, %v1546_v16, %v1548_v31  ;;  %v1551_v39 = vsel %vm1537_vm2, %v1548_v31, %v1550_v25  ;;  %v4779_v44 = vunpack.c.l.bf16 %v3782_v33  ;;  %v4781_v45 = vunpack.c.h.bf16 %v3782_v33  ;;  %v3784_v16 = vld [vmem:[%s4712_s17 + $0x40] sm:$0xff]  }
  0xa3   : > { %1854 = vst.msk [vmem:[#allocation2 + $0xd8] sm:$0x7] %vm1849_vm3, %v1550_v25  ;;  %1850 = vst.msk [vmem:[#allocation2 + $0x88] sm:$0x7] %vm1849_vm3, %v1543_v34  ;;  %v1542_v42 = vsel %vm1537_vm2, %v1539_v20, %v1541_v37  ;;  %v1544_v43 = vsel %vm1537_vm2, %v1541_v37, %v1543_v34  ;;  %v1557_v49 = vrot.slane %v4771_v41, 1  ;;  %v3917_v50 = vpack.i.bf16 %v4771_v41, %v4769_v40  ;;  %v3785_v34 = vld [vmem:[%s4712_s17 + $0x50] sm:$0xff]  }
  0xa4   : > { %1852 = vst.msk [vmem:[#allocation2 + $0xb8] sm:$0xff] %vm16_vm0, %v1549_v38  ;;  %1853 = vst.msk [vmem:[#allocation2 + $0xc8] sm:$0xff] %vm16_vm0, %v1551_v39  ;;  %3908 = vrot.lane.b32.xlu1 %v3907_v26, %s4225_s18  ;;  %v1555_v53 = vrot.slane %v4769_v40, 1  ;;  %v1553_v55 = vrot.slane %v4781_v45, 1  ;;  %v3912_v56 = vpack.i.bf16 %v4781_v45, %v4779_v44  ;;  %v1552_v57 = vrot.slane %v4779_v44, 1 }
  0xa5   : > { %1847 = vst.msk [vmem:[#allocation2 + $0x68] sm:$0xff] %vm16_vm0, %v1542_v42  ;;  %1848 = vst.msk [vmem:[#allocation2 + $0x78] sm:$0xff] %vm16_vm0, %v1544_v43  ;;  %3898 = vrot.lane.b32.xlu0 %v3897_v35, %s4225_s18  ;;  %v4801_v58 = vunpack.c.h.bf16 %v337_v27  ;;  %v4803_v59 = vunpack.c.l.bf16 %v342_v46  ;;  %v4805_v60 = vunpack.c.l.bf16 %v3783_v47  ;;  %v4810_v63 = vunpack.c.h.bf16 %v3783_v47  ;;  %v350_v27 = vld [vmem:[%s4712_s17 + $0x5c] sm:$0x3]  ;;  %v353_v35 = vld [vmem:[%s4712_s17 + $0x68] ss:$16 sps:$4 sm:$0xff]  }
  0xa6   : > { %1858 = vst.msk [vmem:[#allocation2 + $0x128] sm:$0x7] %vm1849_vm3, %v1557_v49  ;;  %v1558_v61 = vsel %vm1537_vm2, %v1555_v53, %v1557_v49  ;;  %v1556_v62 = vsel %vm1537_vm2, %v1553_v55, %v1555_v53  ;;  %v4813_v2 = vunpack.c.l.bf16 %v345_v52  ;;  %v1554_v3 = vsel %vm1537_vm2, %v1552_v57, %v1553_v55 }
  0xa7   : > { %1857 = vst.msk [vmem:[#allocation2 + $0x118] sm:$0xff] %vm16_vm0, %v1558_v61  ;;  %1856 = vst.msk [vmem:[#allocation2 + $0x108] sm:$0xff] %vm16_vm0, %v1556_v62  ;;  %v1564_v9 = vrot.slane %v4803_v59, 1  ;;  %v3927_v10 = vpack.i.bf16 %v4803_v59, %v4801_v58  ;;  %v1562_v18 = vrot.slane %v4801_v58, 1  ;;  %v1560_v21 = vrot.slane %v4810_v63, 1  ;;  %v3788_v62 = vld [vmem:[%s4712_s17 + $0x80] sm:$0xff]  }
  0xa8   : > { %3918 = vrot.lane.b32.xlu1 %v3917_v50, %s4225_s18  ;;  %1855 = vst.msk [vmem:[#allocation2 + $0xf8] sm:$0xff] %vm16_vm0, %v1554_v3  ;;  %v3922_v22 = vpack.i.bf16 %v4810_v63, %v4805_v60  ;;  %v1559_v23 = vrot.slane %v4805_v60, 1  ;;  %v4833_v25 = vunpack.c.l.bf16 %v346_v0  ;;  %v1569_v31 = vrot.slane %v4813_v2, 1  ;;  %v354_v0 = vld [vmem:[%s4712_s17 + $0x6c] sm:$0x3] }
  0xa9   : > { %3913 = vrot.lane.b32.xlu0 %v3912_v56, %s4225_s18  ;;  %1862 = vst.msk [vmem:[#allocation2 + $0x178] sm:$0x7] %vm1849_vm3, %v1564_v9  ;;  %v1565_v28 = vsel %vm1537_vm2, %v1562_v18, %v1564_v9  ;;  %v1563_v29 = vsel %vm1537_vm2, %v1560_v21, %v1562_v18  ;;  %v4841_v33 = vunpack.c.l.bf16 %v3784_v16  ;;  %v4854_v43 = vunpack.c.h.bf16 %v3784_v16  ;;  %v3786_v18 = vld [vmem:[%s4712_s17 + $0x60] sm:$0xff]  }
  0xaa   : > { %1861 = vst.msk [vmem:[#allocation2 + $0x168] sm:$0xff] %vm16_vm0, %v1565_v28  ;;  %1860 = vst.msk [vmem:[#allocation2 + $0x158] sm:$0xff] %vm16_vm0, %v1563_v29  ;;  %v1561_v37 = vsel %vm1537_vm2, %v1559_v23, %v1560_v21  ;;  %v1571_v39 = vrot.slane %v4833_v25, 1  ;;  %v3937_v42 = vpack.i.bf16 %v4833_v25, %v4813_v2  ;;  %v4857_v47 = vunpack.c.h.bf16 %v345_v52  ;;  %v369_v52 = vld [vmem:[%s4712_s17 + $0xa8] ss:$16 sps:$4 sm:$0xff]  }
  0xab   : > { %1859 = vst.msk [vmem:[#allocation2 + $0x148] sm:$0xff] %vm16_vm0, %v1561_v37  ;;  %v1566_v46 = vrot.slane %v4841_v33, 1  ;;  %v4859_v49 = vunpack.c.l.bf16 %v350_v27  ;;  %v4863_v53 = vunpack.c.l.bf16 %v3785_v34  ;;  %v4865_v55 = vunpack.c.h.bf16 %v3785_v34  ;;  %v358_v37 = vld [vmem:[%s4712_s17 + $0x7c] sm:$0x3] }
  0xac   : > { %3928 = vrot.lane.b32.xlu1 %v3927_v10, %s4225_s18  ;;  %1866 = vst.msk [vmem:[#allocation2 + $0x1c8] sm:$0x7] %vm1849_vm3, %v1571_v39  ;;  %v1572_v50 = vsel %vm1537_vm2, %v1569_v31, %v1571_v39  ;;  %v4867_v56 = vunpack.c.l.bf16 %v353_v35  ;;  %v1567_v57 = vrot.slane %v4854_v43, 1  ;;  %v3932_v61 = vpack.i.bf16 %v4854_v43, %v4841_v33 }
  0xad   : > { %3923 = vrot.lane.b32.xlu0 %v3922_v22, %s4225_s18  ;;  %1865 = vst.msk [vmem:[#allocation2 + $0x1b8] sm:$0xff] %vm16_vm0, %v1572_v50  ;;  %v1578_v3 = vrot.slane %v4859_v49, 1  ;;  %v3947_v9 = vpack.i.bf16 %v4859_v49, %v4857_v47  ;;  %v1576_v16 = vrot.slane %v4857_v47, 1  ;;  %v1574_v27 = vrot.slane %v4865_v55, 1 }
  0xae   : > { %v1570_v21 = vsel %vm1537_vm2, %v1567_v57, %v1569_v31  ;;  %v1568_v22 = vsel %vm1537_vm2, %v1566_v46, %v1567_v57  ;;  %v3942_v29 = vpack.i.bf16 %v4865_v55, %v4863_v53  ;;  %v1573_v31 = vrot.slane %v4863_v53, 1  ;;  %v3787_v57 = vld [vmem:[%s4712_s17 + $0x70] sm:$0xff]  }
  0xaf   : > { %1864 = vst.msk [vmem:[#allocation2 + $0x1a8] sm:$0xff] %vm16_vm0, %v1570_v21  ;;  %1863 = vst.msk [vmem:[#allocation2 + $0x198] sm:$0xff] %vm16_vm0, %v1568_v22  ;;  %v1579_v28 = vsel %vm1537_vm2, %v1576_v16, %v1578_v3  ;;  %v4895_v34 = vunpack.c.l.bf16 %v354_v0  ;;  %v1577_v39 = vsel %vm1537_vm2, %v1574_v27, %v1576_v16  ;;  %v1583_v46 = vrot.slane %v4867_v56, 1 }
  0xb0   : > { %3938 = vrot.lane.b32.xlu1 %v3937_v42, %s4225_s18  ;;  %1870 = vst.msk [vmem:[#allocation2 + $0x218] sm:$0x7] %vm1849_vm3, %v1578_v3  ;;  %v4903_v50 = vunpack.c.l.bf16 %v3786_v18  ;;  %v1575_v0 = vsel %vm1537_vm2, %v1573_v31, %v1574_v27  ;;  %v4915_v16 = vunpack.c.h.bf16 %v3786_v18  ;;  %v4924_v31 = vunpack.c.l.bf16 %v3787_v57 }
  0xb1   : > { %3933 = vrot.lane.b32.xlu0 %v3932_v61, %s4225_s18  ;;  %1869 = vst.msk [vmem:[#allocation2 + $0x208] sm:$0xff] %vm16_vm0, %v1579_v28  ;;  %v361_v61 = vld [vmem:[%s4712_s17 + $0x88] ss:$16 sps:$4 sm:$0xff]   ;;  %1868 = vst.msk [vmem:[#allocation2 + $0x1f8] sm:$0xff] %vm16_vm0, %v1577_v39  ;;  %v1585_v21 = vrot.slane %v4895_v34, 1  ;;  %v4918_v28 = vunpack.c.h.bf16 %v353_v35  ;;  %v4920_v39 = vunpack.c.l.bf16 %v358_v37  ;;  %v4926_v3 = vunpack.c.h.bf16 %v3787_v57 }
  0xb2   : > { %1867 = vst.msk [vmem:[#allocation2 + $0x1e8] sm:$0xff] %vm16_vm0, %v1575_v0  ;;  %v1580_v22 = vrot.slane %v4903_v50, 1  ;;  %v4928_v0 = vunpack.c.l.bf16 %v361_v61  ;;  %v1581_v18 = vrot.slane %v4915_v16, 1  ;;  %v4964_v38 = vunpack.c.l.bf16 %v3788_v62 }
  0xb3   : > { %1874 = vst.msk [vmem:[#allocation2 + $0x268] sm:$0x7] %vm1849_vm3, %v1585_v21  ;;  %v1586_v27 = vsel %vm1537_vm2, %v1583_v46, %v1585_v21  ;;  %v362_v21 = vld [vmem:[%s4712_s17 + $0x8c] sm:$0x3]  ;;  %v1592_v42 = vrot.slane %v4920_v39, 1  ;;  %v3967_v57 = vpack.i.bf16 %v4920_v39, %v4918_v28  ;;  %v1588_v10 = vrot.slane %v4926_v3, 1 }
  0xb4   : > { %3948 = vrot.lane.b32.xlu1 %v3947_v9, %s4225_s18  ;;  %v3957_v9 = vpack.i.bf16 %v4895_v34, %v4867_v56  ;;  %1873 = vst.msk [vmem:[#allocation2 + $0x258] sm:$0xff] %vm16_vm0, %v1586_v27  ;;  %v1584_v35 = vsel %vm1537_vm2, %v1581_v18, %v1583_v46  ;;  %v1582_v23 = vsel %vm1537_vm2, %v1580_v22, %v1581_v18  ;;  %v1587_v22 = vrot.slane %v4924_v31, 1 }
  0xb5   : > { %3943 = vrot.lane.b32.xlu0 %v3942_v29, %s4225_s18  ;;  %v3952_v29 = vpack.i.bf16 %v4915_v16, %v4903_v50  ;;  %1872 = vst.msk [vmem:[#allocation2 + $0x248] sm:$0xff] %vm16_vm0, %v1584_v35  ;;  %1871 = vst.msk [vmem:[#allocation2 + $0x238] sm:$0xff] %vm16_vm0, %v1582_v23  ;;  %v3962_v46 = vpack.i.bf16 %v4926_v3, %v4924_v31  ;;  %v4956_v18 = vunpack.c.l.bf16 %v362_v21  ;;  %v1597_v37 = vrot.slane %v4928_v0, 1 }
  0xb6   : > { %1878 = vst.msk [vmem:[#allocation2 + $0x2b8] sm:$0x7] %vm1849_vm3, %v1592_v42  ;;  %v1589_v21 = vsel %vm1537_vm2, %v1587_v22, %v1588_v10  ;;  %v1594_v23 = vrot.slane %v4964_v38, 1  ;;  %v4979_v4 = vunpack.c.h.bf16 %v361_v61  ;;  %v5025_v51 = vunpack.c.l.bf16 %v3790_v17 }
  0xb7   : > { %1875 = vst.msk [vmem:[#allocation2 + $0x288] sm:$0xff] %vm16_vm0, %v1589_v21  ;;  %v4989_v21 = vunpack.c.l.bf16 %v369_v52  ;;  %v5040_v36 = vunpack.c.h.bf16 %v369_v52 }
  0xb8   : > { %3958 = vrot.lane.b32.xlu1 %v3957_v9, %s4225_s18  ;;  %v1590_v9 = vrot.slane %v4918_v28, 1  ;;  %6728 = vst [vmem:[#allocation4_spill] sm:$0xff] %v5025_v51 }
  0xb9   : > { %3953 = vrot.lane.b32.xlu0 %v3952_v29, %s4225_s18  ;;  %v366_v29 = vld [vmem:[%s4712_s17 + $0x9c] sm:$0x3]  ;;  %6729 = vst [vmem:[#allocation5_spill] sm:$0xff] %v5040_v36 }
  0xba   : > { %v1593_v27 = vsel %vm1537_vm2, %v1590_v9, %v1592_v42  ;;  %v1591_v35 = vsel %vm1537_vm2, %v1588_v10, %v1590_v9  ;;  %v3789_v42 = vld [vmem:[%s4712_s17 + $0x90] sm:$0xff]   ;;  %v4976_v9 = vunpack.c.h.bf16 %v3788_v62 }
  0xbb   : > { %1877 = vst.msk [vmem:[#allocation2 + $0x2a8] sm:$0xff] %vm16_vm0, %v1593_v27  ;;  %1876 = vst.msk [vmem:[#allocation2 + $0x298] sm:$0xff] %vm16_vm0, %v1591_v35  ;;  %v1599_v27 = vrot.slane %v4956_v18, 1  ;;  %v4981_v35 = vunpack.c.l.bf16 %v366_v29  ;;  %v4985_v22 = vunpack.c.l.bf16 %v3789_v42  ;;  %v4987_v26 = vunpack.c.h.bf16 %v3789_v42 }
  0xbc   : > { %3968 = vrot.lane.b32.xlu1 %v3967_v57, %s4225_s18  ;;  %v3977_v57 = vpack.i.bf16 %v4956_v18, %v4928_v0  ;;  %v1595_v61 = vrot.slane %v4976_v9, 1  ;;  %v1611_v29 = vrot.slane %v4989_v21, 1 }
  0xbd   : > { %3963 = vrot.lane.b32.xlu0 %v3962_v46, %s4225_s18  ;;  %1882 = vst.msk [vmem:[#allocation2 + $0x308] sm:$0x7] %vm1849_vm3, %v1599_v27  ;;  %v1600_v10 = vsel %vm1537_vm2, %v1597_v37, %v1599_v27  ;;  %v3972_v46 = vpack.i.bf16 %v4976_v9, %v4964_v38  ;;  %v370_v27 = vld [vmem:[%s4712_s17 + $0xac] sm:$0x3]  ;;  %v1606_v20 = vrot.slane %v4981_v35, 1  ;;  %v3987_v42 = vpack.i.bf16 %v4981_v35, %v4979_v4 }
  0xbe   : > { %1881 = vst.msk [vmem:[#allocation2 + $0x2f8] sm:$0xff] %vm16_vm0, %v1600_v10  ;;  %v1598_v62 = vsel %vm1537_vm2, %v1595_v61, %v1597_v37  ;;  %v1596_v48 = vsel %vm1537_vm2, %v1594_v23, %v1595_v61  ;;  %v1602_v54 = vrot.slane %v4987_v26, 1  ;;  %v3982_v37 = vpack.i.bf16 %v4987_v26, %v4985_v22 }
  0xbf   : > { %1880 = vst.msk [vmem:[#allocation2 + $0x2e8] sm:$0xff] %vm16_vm0, %v1598_v62  ;;  %1879 = vst.msk [vmem:[#allocation2 + $0x2d8] sm:$0xff] %vm16_vm0, %v1596_v48  ;;  %v1601_v23 = vrot.slane %v4985_v22, 1  ;;  %v5017_v61 = vunpack.c.l.bf16 %v370_v27  ;;  %v1608_v48 = vrot.slane %v5025_v51, 1 }
  0xc0   : > { %3978 = vrot.lane.b32.xlu1 %v3977_v57, %s4225_s18  ;;  %v1604_v57 = vrot.slane %v4979_v4, 1  ;;  %1886 = vst.msk [vmem:[#allocation2 + $0x358] sm:$0x7] %vm1849_vm3, %v1606_v20 }
  0xc1   : > { %3973 = vrot.lane.b32.xlu0 %v3972_v46, %s4225_s18  ;;  %v374_v46 = vld [vmem:[%s4712_s17 + $0xbc] sm:$0x3]  ;;  %v1603_v27 = vsel %vm1537_vm2, %v1601_v23, %v1602_v54 }
  0xc2   : > { %v1607_v10 = vsel %vm1537_vm2, %v1604_v57, %v1606_v20  ;;  %v1605_v62 = vsel %vm1537_vm2, %v1602_v54, %v1604_v57  ;;  %v3791_v20 = vld [vmem:[%s4712_s17 + $0xb0] sm:$0xff]   ;;  %1883 = vst.msk [vmem:[#allocation2 + $0x328] sm:$0xff] %vm16_vm0, %v1603_v27  ;;  %v5037_v57 = vunpack.c.h.bf16 %v3790_v17  ;;  %v5050_v27 = vunpack.c.l.bf16 %v377_v32 }
  0xc3   : > { %1885 = vst.msk [vmem:[#allocation2 + $0x348] sm:$0xff] %vm16_vm0, %v1607_v10  ;;  %1884 = vst.msk [vmem:[#allocation2 + $0x338] sm:$0xff] %vm16_vm0, %v1605_v62  ;;  %v1613_v10 = vrot.slane %v5017_v61, 1  ;;  %v5042_v62 = vunpack.c.l.bf16 %v374_v46  ;;  %v5046_v23 = vunpack.c.l.bf16 %v3791_v20  ;;  %v5048_v19 = vunpack.c.h.bf16 %v3791_v20 }
  0xc4   : > { %3988 = vrot.lane.b32.xlu1 %v3987_v42, %s4225_s18  ;;  %v3997_v42 = vpack.i.bf16 %v5017_v61, %v4989_v21  ;;  %6733 = vst [vmem:[#allocation9_spill] sm:$0xff] %v5050_v27  ;;  %v1609_v52 = vrot.slane %v5037_v57, 1  ;;  %v1625_v46 = vrot.slane %v5050_v27, 1 }
  0xc5   : > { %3983 = vrot.lane.b32.xlu0 %v3982_v37, %s4225_s18  ;;  %6730 = vst [vmem:[#allocation6_spill] sm:$0xff] %v5042_v62  ;;  %1890 = vst.msk [vmem:[#allocation2 + $0x3a8] sm:$0x7] %vm1849_vm3, %v1613_v10  ;;  %v1614_v54 = vsel %vm1537_vm2, %v1611_v29, %v1613_v10  ;;  %v3992_v37 = vpack.i.bf16 %v5037_v57, %v5025_v51  ;;  %v378_v10 = vld [vmem:[%s4712_s17 + $0xcc] sm:$0x3]  ;;  %v1620_v24 = vrot.slane %v5042_v62, 1 }
  0xc6   : > { %6731 = vst [vmem:[#allocation7_spill] sm:$0xff] %v5046_v23  ;;  %6732 = vst [vmem:[#allocation8_spill] sm:$0xff] %v5048_v19  ;;  %v4007_v20 = vpack.i.bf16 %v5042_v62, %v5040_v36  ;;  %v1612_v17 = vsel %vm1537_vm2, %v1609_v52, %v1611_v29  ;;  %v1610_v15 = vsel %vm1537_vm2, %v1608_v48, %v1609_v52  ;;  %v1616_v1 = vrot.slane %v5048_v19, 1 }
  0xc7   : > { %1889 = vst.msk [vmem:[#allocation2 + $0x398] sm:$0xff] %vm16_vm0, %v1614_v54  ;;  %1888 = vst.msk [vmem:[#allocation2 + $0x388] sm:$0xff] %vm16_vm0, %v1612_v17  ;;  %v4002_v29 = vpack.i.bf16 %v5048_v19, %v5046_v23  ;;  %v1615_v48 = vrot.slane %v5046_v23, 1  ;;  %v5078_v52 = vunpack.c.l.bf16 %v378_v10  ;;  %v5086_v62 = vunpack.c.l.bf16 %v3792_v30 }
  0xc8   : > { %3998 = vrot.lane.b32.xlu1 %v3997_v42, %s4225_s18  ;;  %v1618_v42 = vrot.slane %v5040_v36, 1  ;;  %1887 = vst.msk [vmem:[#allocation2 + $0x378] sm:$0xff] %vm16_vm0, %v1610_v15  ;;  %v385_v36 = vld [vmem:[%s4712_s17 + $0xe8] ss:$16 sps:$4 sm:$0xff]   ;;  %v5101_v19 = vunpack.c.h.bf16 %v377_v32 }
  0xc9   : > { %3993 = vrot.lane.b32.xlu0 %v3992_v37, %s4225_s18  ;;  %1894 = vst.msk [vmem:[#allocation2 + $0x3f8] sm:$0x7] %vm1849_vm3, %v1620_v24  ;;  %6734 = vst [vmem:[#allocation10_spill] sm:$0xff] %v5078_v52  ;;  %v382_v37 = vld [vmem:[%s4712_s17 + $0xdc] sm:$0x3]  ;;  %v1617_v10 = vsel %vm1537_vm2, %v1615_v48, %v1616_v1  ;;  %v1622_v15 = vrot.slane %v5086_v62, 1 }
  0xca   : > { %v1621_v54 = vsel %vm1537_vm2, %v1618_v42, %v1620_v24  ;;  %v1619_v17 = vsel %vm1537_vm2, %v1616_v1, %v1618_v42  ;;  %6735 = vst [vmem:[#allocation11_spill] sm:$0xff] %v5086_v62  ;;  %v3793_v24 = vld [vmem:[%s4712_s17 + $0xd0] sm:$0xff]   ;;  %1891 = vst.msk [vmem:[#allocation2 + $0x3c8] sm:$0xff] %vm16_vm0, %v1617_v10  ;;  %v5098_v42 = vunpack.c.h.bf16 %v3792_v30  ;;  %v5111_v10 = vunpack.c.l.bf16 %v385_v36 }
  0xcb   : > { %1893 = vst.msk [vmem:[#allocation2 + $0x3e8] sm:$0xff] %vm16_vm0, %v1621_v54  ;;  %1892 = vst.msk [vmem:[#allocation2 + $0x3d8] sm:$0xff] %vm16_vm0, %v1619_v17  ;;  %v1627_v54 = vrot.slane %v5078_v52, 1  ;;  %v5103_v17 = vunpack.c.l.bf16 %v382_v37  ;;  %v5107_v48 = vunpack.c.l.bf16 %v3793_v24  ;;  %v5109_v23 = vunpack.c.h.bf16 %v3793_v24 }
  0xcc   : > { %4008 = vrot.lane.b32.xlu1 %v4007_v20, %s4225_s18  ;;  %v4017_v20 = vpack.i.bf16 %v5078_v52, %v5050_v27  ;;  %6736 = vst [vmem:[#allocation12_spill] sm:$0xff] %v5098_v42  ;;  %6737 = vst [vmem:[#allocation13_spill] sm:$0xff] %v5101_v19  ;;  %v1623_v32 = vrot.slane %v5098_v42, 1  ;;  %v3794_v27 = vld [vmem:[%s4712_s17 + $0xe0] sm:$0xff]   ;;  %v1639_v37 = vrot.slane %v5111_v10, 1 }
  0xcd   : > { %4003 = vrot.lane.b32.xlu0 %v4002_v29, %s4225_s18  ;;  %6738 = vst [vmem:[#allocation14_spill] sm:$0xff] %v5103_v17  ;;  %1898 = vst.msk [vmem:[#allocation2 + $0x448] sm:$0x7] %vm1849_vm3, %v1627_v54  ;;  %v1628_v1 = vsel %vm1537_vm2, %v1625_v46, %v1627_v54  ;;  %v4012_v29 = vpack.i.bf16 %v5098_v42, %v5086_v62  ;;  %v386_v54 = vld [vmem:[%s4712_s17 + $0xec] sm:$0x3]  ;;  %v1634_v52 = vrot.slane %v5103_v17, 1 }
  0xce   : > { %6739 = vst [vmem:[#allocation15_spill] sm:$0xff] %v5107_v48  ;;  %6740 = vst [vmem:[#allocation16_spill] sm:$0xff] %v5109_v23  ;;  %v4027_v24 = vpack.i.bf16 %v5103_v17, %v5101_v19  ;;  %v1626_v30 = vsel %vm1537_vm2, %v1623_v32, %v1625_v46  ;;  %v1624_v51 = vsel %vm1537_vm2, %v1622_v15, %v1623_v32  ;;  %v1630_v62 = vrot.slane %v5109_v23, 1 }
  0xcf   : > { %6741 = vst [vmem:[#allocation17_spill] sm:$0xff] %v5111_v10  ;;  %1897 = vst.msk [vmem:[#allocation2 + $0x438] sm:$0xff] %vm16_vm0, %v1628_v1  ;;  %v4022_v46 = vpack.i.bf16 %v5109_v23, %v5107_v48  ;;  %v1629_v15 = vrot.slane %v5107_v48, 1  ;;  %v5139_v32 = vunpack.c.l.bf16 %v386_v54  ;;  %v5147_v17 = vunpack.c.l.bf16 %v3794_v27 }
  0xd0   : > { %4018 = vrot.lane.b32.xlu1 %v4017_v20, %s4225_s18  ;;  %v1632_v20 = vrot.slane %v5101_v19, 1  ;;  %1896 = vst.msk [vmem:[#allocation2 + $0x428] sm:$0xff] %vm16_vm0, %v1626_v30  ;;  %1895 = vst.msk [vmem:[#allocation2 + $0x418] sm:$0xff] %vm16_vm0, %v1624_v51  ;;  %v393_v19 = vld [vmem:[%s4712_s17 + $0x108] ss:$16 sps:$4 sm:$0xff]   ;;  %v5162_v23 = vunpack.c.h.bf16 %v385_v36 }
  0xd1   : > { %4013 = vrot.lane.b32.xlu0 %v4012_v29, %s4225_s18  ;;  %1902 = vst.msk [vmem:[#allocation2 + $0x498] sm:$0x7] %vm1849_vm3, %v1634_v52  ;;  %6742 = vst [vmem:[#allocation18_spill] sm:$0xff] %v5139_v32  ;;  %v390_v29 = vld [vmem:[%s4712_s17 + $0xfc] sm:$0x3]  ;;  %v1631_v54 = vsel %vm1537_vm2, %v1629_v15, %v1630_v62  ;;  %v1636_v51 = vrot.slane %v5147_v17, 1 }
  0xd2   : > { %v1635_v1 = vsel %vm1537_vm2, %v1632_v20, %v1634_v52  ;;  %v1633_v30 = vsel %vm1537_vm2, %v1630_v62, %v1632_v20  ;;  %6743 = vst [vmem:[#allocation19_spill] sm:$0xff] %v5147_v17  ;;  %v3795_v52 = vld [vmem:[%s4712_s17 + $0xf0] sm:$0xff]   ;;  %1899 = vst.msk [vmem:[#allocation2 + $0x468] sm:$0xff] %vm16_vm0, %v1631_v54  ;;  %v5159_v20 = vunpack.c.h.bf16 %v3794_v27  ;;  %v5172_v54 = vunpack.c.l.bf16 %v393_v19 }
  0xd3   : > { %1901 = vst.msk [vmem:[#allocation2 + $0x488] sm:$0xff] %vm16_vm0, %v1635_v1  ;;  %1900 = vst.msk [vmem:[#allocation2 + $0x478] sm:$0xff] %vm16_vm0, %v1633_v30  ;;  %v1641_v1 = vrot.slane %v5139_v32, 1  ;;  %v5164_v30 = vunpack.c.l.bf16 %v390_v29  ;;  %v5168_v15 = vunpack.c.l.bf16 %v3795_v52  ;;  %v5170_v48 = vunpack.c.h.bf16 %v3795_v52 }
  0xd4   : > { %4028 = vrot.lane.b32.xlu1 %v4027_v24, %s4225_s18  ;;  %v4037_v24 = vpack.i.bf16 %v5139_v32, %v5111_v10  ;;  %6744 = vst [vmem:[#allocation20_spill] sm:$0xff] %v5159_v20  ;;  %6745 = vst [vmem:[#allocation21_spill] sm:$0xff] %v5162_v23  ;;  %v1637_v27 = vrot.slane %v5159_v20, 1  ;;  %v3796_v10 = vld [vmem:[%s4712_s17 + $0x100] sm:$0xff]   ;;  %v1653_v29 = vrot.slane %v5172_v54, 1 }
  0xd5   : > { %4023 = vrot.lane.b32.xlu0 %v4022_v46, %s4225_s18  ;;  %6746 = vst [vmem:[#allocation22_spill] sm:$0xff] %v5164_v30  ;;  %1906 = vst.msk [vmem:[#allocation2 + $0x4e8] sm:$0x7] %vm1849_vm3, %v1641_v1  ;;  %v1642_v62 = vsel %vm1537_vm2, %v1639_v37, %v1641_v1  ;;  %v4032_v46 = vpack.i.bf16 %v5159_v20, %v5147_v17  ;;  %v394_v1 = vld [vmem:[%s4712_s17 + $0x10c] sm:$0x3]  ;;  %v1648_v32 = vrot.slane %v5164_v30, 1 }
  0xd6   : > { %6747 = vst [vmem:[#allocation23_spill] sm:$0xff] %v5168_v15  ;;  %6748 = vst [vmem:[#allocation24_spill] sm:$0xff] %v5170_v48  ;;  %v4047_v52 = vpack.i.bf16 %v5164_v30, %v5162_v23  ;;  %v1640_v36 = vsel %vm1537_vm2, %v1637_v27, %v1639_v37  ;;  %v1638_v42 = vsel %vm1537_vm2, %v1636_v51, %v1637_v27  ;;  %v1644_v17 = vrot.slane %v5170_v48, 1 }
  0xd7   : > { %6749 = vst [vmem:[#allocation25_spill] sm:$0xff] %v5172_v54  ;;  %1905 = vst.msk [vmem:[#allocation2 + $0x4d8] sm:$0xff] %vm16_vm0, %v1642_v62  ;;  %v4042_v37 = vpack.i.bf16 %v5170_v48, %v5168_v15  ;;  %v1643_v51 = vrot.slane %v5168_v15, 1  ;;  %v5200_v27 = vunpack.c.l.bf16 %v394_v1  ;;  %v5208_v30 = vunpack.c.l.bf16 %v3796_v10 }
  0xd8   : > { %4038 = vrot.lane.b32.xlu1 %v4037_v24, %s4225_s18  ;;  %v1646_v24 = vrot.slane %v5162_v23, 1  ;;  %1904 = vst.msk [vmem:[#allocation2 + $0x4c8] sm:$0xff] %vm16_vm0, %v1640_v36  ;;  %1903 = vst.msk [vmem:[#allocation2 + $0x4b8] sm:$0xff] %vm16_vm0, %v1638_v42  ;;  %v401_v23 = vld [vmem:[%s4712_s17 + $0x128] ss:$16 sps:$4 sm:$0xff]   ;;  %v5223_v48 = vunpack.c.h.bf16 %v393_v19 }
  0xd9   : > { %4033 = vrot.lane.b32.xlu0 %v4032_v46, %s4225_s18  ;;  %1910 = vst.msk [vmem:[#allocation2 + $0x538] sm:$0x7] %vm1849_vm3, %v1648_v32  ;;  %6750 = vst [vmem:[#allocation26_spill] sm:$0xff] %v5200_v27  ;;  %v398_v46 = vld [vmem:[%s4712_s17 + $0x11c] sm:$0x3]  ;;  %v1645_v1 = vsel %vm1537_vm2, %v1643_v51, %v1644_v17  ;;  %v1650_v42 = vrot.slane %v5208_v30, 1 }
  0xda   : > { %v1649_v62 = vsel %vm1537_vm2, %v1646_v24, %v1648_v32  ;;  %v1647_v36 = vsel %vm1537_vm2, %v1644_v17, %v1646_v24  ;;  %6751 = vst [vmem:[#allocation27_spill] sm:$0xff] %v5208_v30  ;;  %v3797_v32 = vld [vmem:[%s4712_s17 + $0x110] sm:$0xff]   ;;  %1907 = vst.msk [vmem:[#allocation2 + $0x508] sm:$0xff] %vm16_vm0, %v1645_v1  ;;  %v5220_v24 = vunpack.c.h.bf16 %v3796_v10  ;;  %v5233_v1 = vunpack.c.l.bf16 %v401_v23 }
  0xdb   : > { %1909 = vst.msk [vmem:[#allocation2 + $0x528] sm:$0xff] %vm16_vm0, %v1649_v62  ;;  %1908 = vst.msk [vmem:[#allocation2 + $0x518] sm:$0xff] %vm16_vm0, %v1647_v36  ;;  %v1655_v62 = vrot.slane %v5200_v27, 1  ;;  %v5225_v36 = vunpack.c.l.bf16 %v398_v46  ;;  %v5229_v51 = vunpack.c.l.bf16 %v3797_v32  ;;  %v5231_v15 = vunpack.c.h.bf16 %v3797_v32 }
  0xdc   : > { %4048 = vrot.lane.b32.xlu1 %v4047_v52, %s4225_s18  ;;  %v4057_v52 = vpack.i.bf16 %v5200_v27, %v5172_v54  ;;  %6752 = vst [vmem:[#allocation28_spill] sm:$0xff] %v5220_v24  ;;  %6753 = vst [vmem:[#allocation29_spill] sm:$0xff] %v5223_v48  ;;  %v1651_v10 = vrot.slane %v5220_v24, 1  ;;  %v3798_v54 = vld [vmem:[%s4712_s17 + $0x120] sm:$0xff]   ;;  %v1667_v46 = vrot.slane %v5233_v1, 1 }
  0xdd   : > { %4043 = vrot.lane.b32.xlu0 %v4042_v37, %s4225_s18  ;;  %6754 = vst [vmem:[#allocation30_spill] sm:$0xff] %v5225_v36  ;;  %1914 = vst.msk [vmem:[#allocation2 + $0x588] sm:$0x7] %vm1849_vm3, %v1655_v62  ;;  %v1656_v17 = vsel %vm1537_vm2, %v1653_v29, %v1655_v62  ;;  %v4052_v37 = vpack.i.bf16 %v5220_v24, %v5208_v30  ;;  %v402_v62 = vld [vmem:[%s4712_s17 + $0x12c] sm:$0x3]  ;;  %v1662_v27 = vrot.slane %v5225_v36, 1 }
  0xde   : > { %6755 = vst [vmem:[#allocation31_spill] sm:$0xff] %v5229_v51  ;;  %6756 = vst [vmem:[#allocation32_spill] sm:$0xff] %v5231_v15  ;;  %v4067_v32 = vpack.i.bf16 %v5225_v36, %v5223_v48  ;;  %v1654_v19 = vsel %vm1537_vm2, %v1651_v10, %v1653_v29  ;;  %v1652_v20 = vsel %vm1537_vm2, %v1650_v42, %v1651_v10  ;;  %v1658_v30 = vrot.slane %v5231_v15, 1 }
  0xdf   : > { %6757 = vst [vmem:[#allocation33_spill] sm:$0xff] %v5233_v1  ;;  %1913 = vst.msk [vmem:[#allocation2 + $0x578] sm:$0xff] %vm16_vm0, %v1656_v17  ;;  %v4062_v29 = vpack.i.bf16 %v5231_v15, %v5229_v51  ;;  %v1657_v42 = vrot.slane %v5229_v51, 1  ;;  %v5261_v10 = vunpack.c.l.bf16 %v402_v62  ;;  %v5269_v36 = vunpack.c.l.bf16 %v3798_v54 }
  0xe0   : > { %4058 = vrot.lane.b32.xlu1 %v4057_v52, %s4225_s18  ;;  %v1660_v52 = vrot.slane %v5223_v48, 1  ;;  %1912 = vst.msk [vmem:[#allocation2 + $0x568] sm:$0xff] %vm16_vm0, %v1654_v19  ;;  %1911 = vst.msk [vmem:[#allocation2 + $0x558] sm:$0xff] %vm16_vm0, %v1652_v20  ;;  %v409_v48 = vld [vmem:[%s4712_s17 + $0x148] ss:$16 sps:$4 sm:$0xff]   ;;  %v5284_v15 = vunpack.c.h.bf16 %v401_v23 }
  0xe1   : > { %4053 = vrot.lane.b32.xlu0 %v4052_v37, %s4225_s18  ;;  %1918 = vst.msk [vmem:[#allocation2 + $0x5d8] sm:$0x7] %vm1849_vm3, %v1662_v27  ;;  %6758 = vst [vmem:[#allocation34_spill] sm:$0xff] %v5261_v10  ;;  %v406_v37 = vld [vmem:[%s4712_s17 + $0x13c] sm:$0x3]  ;;  %v1659_v62 = vsel %vm1537_vm2, %v1657_v42, %v1658_v30  ;;  %v1664_v20 = vrot.slane %v5269_v36, 1 }
  0xe2   : > { %v1663_v17 = vsel %vm1537_vm2, %v1660_v52, %v1662_v27  ;;  %v1661_v19 = vsel %vm1537_vm2, %v1658_v30, %v1660_v52  ;;  %6759 = vst [vmem:[#allocation35_spill] sm:$0xff] %v5269_v36  ;;  %v3799_v27 = vld [vmem:[%s4712_s17 + $0x130] sm:$0xff]   ;;  %1915 = vst.msk [vmem:[#allocation2 + $0x5a8] sm:$0xff] %vm16_vm0, %v1659_v62  ;;  %v5281_v52 = vunpack.c.h.bf16 %v3798_v54  ;;  %v5294_v62 = vunpack.c.l.bf16 %v409_v48 }
  0xe3   : > { %1917 = vst.msk [vmem:[#allocation2 + $0x5c8] sm:$0xff] %vm16_vm0, %v1663_v17  ;;  %1916 = vst.msk [vmem:[#allocation2 + $0x5b8] sm:$0xff] %vm16_vm0, %v1661_v19  ;;  %v1669_v17 = vrot.slane %v5261_v10, 1  ;;  %v5286_v19 = vunpack.c.l.bf16 %v406_v37  ;;  %v5290_v42 = vunpack.c.l.bf16 %v3799_v27  ;;  %v5292_v51 = vunpack.c.h.bf16 %v3799_v27 }
  0xe4   : > { %4068 = vrot.lane.b32.xlu1 %v4067_v32, %s4225_s18  ;;  %v4077_v32 = vpack.i.bf16 %v5261_v10, %v5233_v1  ;;  %6760 = vst [vmem:[#allocation36_spill] sm:$0xff] %v5281_v52  ;;  %6761 = vst [vmem:[#allocation37_spill] sm:$0xff] %v5284_v15  ;;  %v1665_v54 = vrot.slane %v5281_v52, 1  ;;  %v3800_v1 = vld [vmem:[%s4712_s17 + $0x140] sm:$0xff]   ;;  %v1681_v37 = vrot.slane %v5294_v62, 1 }
  0xe5   : > { %4063 = vrot.lane.b32.xlu0 %v4062_v29, %s4225_s18  ;;  %6762 = vst [vmem:[#allocation38_spill] sm:$0xff] %v5286_v19  ;;  %1922 = vst.msk [vmem:[#allocation2 + $0x628] sm:$0x7] %vm1849_vm3, %v1669_v17  ;;  %v1670_v30 = vsel %vm1537_vm2, %v1667_v46, %v1669_v17  ;;  %v4072_v29 = vpack.i.bf16 %v5281_v52, %v5269_v36  ;;  %v410_v17 = vld [vmem:[%s4712_s17 + $0x14c] sm:$0x3]  ;;  %v1676_v10 = vrot.slane %v5286_v19, 1 }
  0xe6   : > { %6763 = vst [vmem:[#allocation39_spill] sm:$0xff] %v5290_v42  ;;  %6764 = vst [vmem:[#allocation40_spill] sm:$0xff] %v5292_v51  ;;  %v4087_v27 = vpack.i.bf16 %v5286_v19, %v5284_v15  ;;  %v1668_v23 = vsel %vm1537_vm2, %v1665_v54, %v1667_v46  ;;  %v1666_v24 = vsel %vm1537_vm2, %v1664_v20, %v1665_v54  ;;  %v1672_v36 = vrot.slane %v5292_v51, 1 }
  0xe7   : > { %6765 = vst [vmem:[#allocation41_spill] sm:$0xff] %v5294_v62  ;;  %1921 = vst.msk [vmem:[#allocation2 + $0x618] sm:$0xff] %vm16_vm0, %v1670_v30  ;;  %v4082_v46 = vpack.i.bf16 %v5292_v51, %v5290_v42  ;;  %v1671_v20 = vrot.slane %v5290_v42, 1  ;;  %v5322_v54 = vunpack.c.l.bf16 %v410_v17  ;;  %v5330_v19 = vunpack.c.l.bf16 %v3800_v1 }
  0xe8   : > { %4078 = vrot.lane.b32.xlu1 %v4077_v32, %s4225_s18  ;;  %v1674_v32 = vrot.slane %v5284_v15, 1  ;;  %1920 = vst.msk [vmem:[#allocation2 + $0x608] sm:$0xff] %vm16_vm0, %v1668_v23  ;;  %1919 = vst.msk [vmem:[#allocation2 + $0x5f8] sm:$0xff] %vm16_vm0, %v1666_v24  ;;  %v417_v15 = vld [vmem:[%s4712_s17 + $0x168] ss:$16 sps:$4 sm:$0xff]   ;;  %v5345_v51 = vunpack.c.h.bf16 %v409_v48 }
  0xe9   : > { %4073 = vrot.lane.b32.xlu0 %v4072_v29, %s4225_s18  ;;  %1926 = vst.msk [vmem:[#allocation2 + $0x678] sm:$0x7] %vm1849_vm3, %v1676_v10  ;;  %6766 = vst [vmem:[#allocation42_spill] sm:$0xff] %v5322_v54  ;;  %v414_v29 = vld [vmem:[%s4712_s17 + $0x15c] sm:$0x3]  ;;  %v1673_v17 = vsel %vm1537_vm2, %v1671_v20, %v1672_v36  ;;  %v1678_v24 = vrot.slane %v5330_v19, 1 }
  0xea   : > { %v1677_v30 = vsel %vm1537_vm2, %v1674_v32, %v1676_v10  ;;  %v1675_v23 = vsel %vm1537_vm2, %v1672_v36, %v1674_v32  ;;  %6767 = vst [vmem:[#allocation43_spill] sm:$0xff] %v5330_v19  ;;  %v3801_v10 = vld [vmem:[%s4712_s17 + $0x150] sm:$0xff]   ;;  %1923 = vst.msk [vmem:[#allocation2 + $0x648] sm:$0xff] %vm16_vm0, %v1673_v17  ;;  %v5342_v32 = vunpack.c.h.bf16 %v3800_v1  ;;  %v5355_v17 = vunpack.c.l.bf16 %v417_v15 }
  0xeb   : > { %1925 = vst.msk [vmem:[#allocation2 + $0x668] sm:$0xff] %vm16_vm0, %v1677_v30  ;;  %1924 = vst.msk [vmem:[#allocation2 + $0x658] sm:$0xff] %vm16_vm0, %v1675_v23  ;;  %v1683_v30 = vrot.slane %v5322_v54, 1  ;;  %v5347_v23 = vunpack.c.l.bf16 %v414_v29  ;;  %v5351_v20 = vunpack.c.l.bf16 %v3801_v10  ;;  %v5353_v42 = vunpack.c.h.bf16 %v3801_v10 }
  0xec   : > { %4088 = vrot.lane.b32.xlu1 %v4087_v27, %s4225_s18  ;;  %v4097_v27 = vpack.i.bf16 %v5322_v54, %v5294_v62  ;;  %6768 = vst [vmem:[#allocation44_spill] sm:$0xff] %v5342_v32  ;;  %6769 = vst [vmem:[#allocation45_spill] sm:$0xff] %v5345_v51  ;;  %v1679_v1 = vrot.slane %v5342_v32, 1  ;;  %v3802_v62 = vld [vmem:[%s4712_s17 + $0x160] sm:$0xff]   ;;  %v1695_v29 = vrot.slane %v5355_v17, 1 }
  0xed   : > { %4083 = vrot.lane.b32.xlu0 %v4082_v46, %s4225_s18  ;;  %6770 = vst [vmem:[#allocation46_spill] sm:$0xff] %v5347_v23  ;;  %1930 = vst.msk [vmem:[#allocation2 + $0x6c8] sm:$0x7] %vm1849_vm3, %v1683_v30  ;;  %v1684_v36 = vsel %vm1537_vm2, %v1681_v37, %v1683_v30  ;;  %v4092_v46 = vpack.i.bf16 %v5342_v32, %v5330_v19  ;;  %v418_v30 = vld [vmem:[%s4712_s17 + $0x16c] sm:$0x3]  ;;  %v1690_v54 = vrot.slane %v5347_v23, 1 }
  0xee   : > { %6771 = vst [vmem:[#allocation47_spill] sm:$0xff] %v5351_v20  ;;  %6772 = vst [vmem:[#allocation48_spill] sm:$0xff] %v5353_v42  ;;  %v4107_v10 = vpack.i.bf16 %v5347_v23, %v5345_v51  ;;  %v1682_v48 = vsel %vm1537_vm2, %v1679_v1, %v1681_v37  ;;  %v1680_v52 = vsel %vm1537_vm2, %v1678_v24, %v1679_v1  ;;  %v1686_v19 = vrot.slane %v5353_v42, 1 }
  0xef   : > { %6773 = vst [vmem:[#allocation49_spill] sm:$0xff] %v5355_v17  ;;  %1929 = vst.msk [vmem:[#allocation2 + $0x6b8] sm:$0xff] %vm16_vm0, %v1684_v36  ;;  %v4102_v37 = vpack.i.bf16 %v5353_v42, %v5351_v20  ;;  %v1685_v24 = vrot.slane %v5351_v20, 1  ;;  %v5383_v1 = vunpack.c.l.bf16 %v418_v30  ;;  %v5391_v23 = vunpack.c.l.bf16 %v3802_v62 }
  0xf0   : > { %4098 = vrot.lane.b32.xlu1 %v4097_v27, %s4225_s18  ;;  %v1688_v27 = vrot.slane %v5345_v51, 1  ;;  %1928 = vst.msk [vmem:[#allocation2 + $0x6a8] sm:$0xff] %vm16_vm0, %v1682_v48  ;;  %1927 = vst.msk [vmem:[#allocation2 + $0x698] sm:$0xff] %vm16_vm0, %v1680_v52  ;;  %v425_v51 = vld [vmem:[%s4712_s17 + $0x188] ss:$16 sps:$4 sm:$0xff]   ;;  %v5406_v42 = vunpack.c.h.bf16 %v417_v15 }
  0xf1   : > { %4093 = vrot.lane.b32.xlu0 %v4092_v46, %s4225_s18  ;;  %1934 = vst.msk [vmem:[#allocation2 + $0x718] sm:$0x7] %vm1849_vm3, %v1690_v54  ;;  %6774 = vst [vmem:[#allocation50_spill] sm:$0xff] %v5383_v1  ;;  %v422_v46 = vld [vmem:[%s4712_s17 + $0x17c] sm:$0x3]  ;;  %v1687_v30 = vsel %vm1537_vm2, %v1685_v24, %v1686_v19  ;;  %v1692_v52 = vrot.slane %v5391_v23, 1 }
  0xf2   : > { %v1691_v36 = vsel %vm1537_vm2, %v1688_v27, %v1690_v54  ;;  %v1689_v48 = vsel %vm1537_vm2, %v1686_v19, %v1688_v27  ;;  %6775 = vst [vmem:[#allocation51_spill] sm:$0xff] %v5391_v23  ;;  %v3803_v54 = vld [vmem:[%s4712_s17 + $0x170] sm:$0xff]   ;;  %1931 = vst.msk [vmem:[#allocation2 + $0x6e8] sm:$0xff] %vm16_vm0, %v1687_v30  ;;  %v5403_v27 = vunpack.c.h.bf16 %v3802_v62  ;;  %v5416_v30 = vunpack.c.l.bf16 %v425_v51 }
  0xf3   : > { %1933 = vst.msk [vmem:[#allocation2 + $0x708] sm:$0xff] %vm16_vm0, %v1691_v36  ;;  %1932 = vst.msk [vmem:[#allocation2 + $0x6f8] sm:$0xff] %vm16_vm0, %v1689_v48  ;;  %v1697_v36 = vrot.slane %v5383_v1, 1  ;;  %v5408_v48 = vunpack.c.l.bf16 %v422_v46  ;;  %v5412_v24 = vunpack.c.l.bf16 %v3803_v54  ;;  %v5414_v20 = vunpack.c.h.bf16 %v3803_v54 }
  0xf4   : > { %4108 = vrot.lane.b32.xlu1 %v4107_v10, %s4225_s18  ;;  %v4117_v10 = vpack.i.bf16 %v5383_v1, %v5355_v17  ;;  %6776 = vst [vmem:[#allocation52_spill] sm:$0xff] %v5403_v27  ;;  %6777 = vst [vmem:[#allocation53_spill] sm:$0xff] %v5406_v42  ;;  %v1693_v62 = vrot.slane %v5403_v27, 1  ;;  %v3804_v17 = vld [vmem:[%s4712_s17 + $0x180] sm:$0xff]   ;;  %v1709_v46 = vrot.slane %v5416_v30, 1 }
  0xf5   : > { %4103 = vrot.lane.b32.xlu0 %v4102_v37, %s4225_s18  ;;  %6778 = vst [vmem:[#allocation54_spill] sm:$0xff] %v5408_v48  ;;  %1938 = vst.msk [vmem:[#allocation2 + $0x768] sm:$0x7] %vm1849_vm3, %v1697_v36  ;;  %v1698_v19 = vsel %vm1537_vm2, %v1695_v29, %v1697_v36  ;;  %v4112_v37 = vpack.i.bf16 %v5403_v27, %v5391_v23  ;;  %v426_v36 = vld [vmem:[%s4712_s17 + $0x18c] sm:$0x3]  ;;  %v1704_v1 = vrot.slane %v5408_v48, 1 }
  0xf6   : > { %6779 = vst [vmem:[#allocation55_spill] sm:$0xff] %v5412_v24  ;;  %6780 = vst [vmem:[#allocation56_spill] sm:$0xff] %v5414_v20  ;;  %v4127_v54 = vpack.i.bf16 %v5408_v48, %v5406_v42  ;;  %v1696_v15 = vsel %vm1537_vm2, %v1693_v62, %v1695_v29  ;;  %v1694_v32 = vsel %vm1537_vm2, %v1692_v52, %v1693_v62  ;;  %v1700_v23 = vrot.slane %v5414_v20, 1 }
  0xf7   : > { %6781 = vst [vmem:[#allocation57_spill] sm:$0xff] %v5416_v30  ;;  %1937 = vst.msk [vmem:[#allocation2 + $0x758] sm:$0xff] %vm16_vm0, %v1698_v19  ;;  %v4122_v29 = vpack.i.bf16 %v5414_v20, %v5412_v24  ;;  %v1699_v52 = vrot.slane %v5412_v24, 1  ;;  %v5444_v62 = vunpack.c.l.bf16 %v426_v36  ;;  %v5452_v48 = vunpack.c.l.bf16 %v3804_v17  ;;  %v434_v24 = vld [vmem:[%s4712_s17 + $0x1ac] sm:$0x3] }
  0xf8   : > { %4118 = vrot.lane.b32.xlu1 %v4117_v10, %s4225_s18  ;;  %v1702_v10 = vrot.slane %v5406_v42, 1  ;;  %1936 = vst.msk [vmem:[#allocation2 + $0x748] sm:$0xff] %vm16_vm0, %v1696_v15  ;;  %1935 = vst.msk [vmem:[#allocation2 + $0x738] sm:$0xff] %vm16_vm0, %v1694_v32  ;;  %v433_v42 = vld [vmem:[%s4712_s17 + $0x1a8] ss:$16 sps:$4 sm:$0xff]   ;;  %v5467_v20 = vunpack.c.h.bf16 %v425_v51 }
  0xf9   : > { %4113 = vrot.lane.b32.xlu0 %v4112_v37, %s4225_s18  ;;  %1942 = vst.msk [vmem:[#allocation2 + $0x7b8] sm:$0x7] %vm1849_vm3, %v1704_v1  ;;  %6782 = vst [vmem:[#allocation58_spill] sm:$0xff] %v5444_v62  ;;  %v430_v37 = vld [vmem:[%s4712_s17 + $0x19c] sm:$0x3]  ;;  %v1701_v36 = vsel %vm1537_vm2, %v1699_v52, %v1700_v23  ;;  %v1706_v32 = vrot.slane %v5452_v48, 1 }
  0xfa   : > { %v1705_v19 = vsel %vm1537_vm2, %v1702_v10, %v1704_v1  ;;  %v1703_v15 = vsel %vm1537_vm2, %v1700_v23, %v1702_v10  ;;  %6783 = vst [vmem:[#allocation59_spill] sm:$0xff] %v5452_v48  ;;  %v3805_v1 = vld [vmem:[%s4712_s17 + $0x190] sm:$0xff]   ;;  %1939 = vst.msk [vmem:[#allocation2 + $0x788] sm:$0xff] %vm16_vm0, %v1701_v36  ;;  %v5464_v10 = vunpack.c.h.bf16 %v3804_v17 }
  0xfb   : > { %1941 = vst.msk [vmem:[#allocation2 + $0x7a8] sm:$0xff] %vm16_vm0, %v1705_v19  ;;  %1940 = vst.msk [vmem:[#allocation2 + $0x798] sm:$0xff] %vm16_vm0, %v1703_v15  ;;  %v1711_v19 = vrot.slane %v5444_v62, 1  ;;  %v5469_v15 = vunpack.c.l.bf16 %v430_v37  ;;  %v5473_v52 = vunpack.c.l.bf16 %v3805_v1  ;;  %v5475_v36 = vunpack.c.h.bf16 %v3805_v1 }
  0xfc   : > { %4128 = vrot.lane.b32.xlu1 %v4127_v54, %s4225_s18  ;;  %v4137_v54 = vpack.i.bf16 %v5444_v62, %v5416_v30  ;;  %v1707_v17 = vrot.slane %v5464_v10, 1  ;;  %v4132_v37 = vpack.i.bf16 %v5464_v10, %v5452_v48 }
  0xfd   : > { %4123 = vrot.lane.b32.xlu0 %v4122_v29, %s4225_s18  ;;  %6784 = vst [vmem:[#allocation60_spill] sm:$0xff] %v5469_v15  ;;  %1946 = vst.msk [vmem:[#allocation2 + $0x808] sm:$0x7] %vm1849_vm3, %v1711_v19  ;;  %v1712_v23 = vsel %vm1537_vm2, %v1709_v46, %v1711_v19  ;;  %v5477_v29 = vunpack.c.l.bf16 %v433_v42  ;;  %v1718_v1 = vrot.slane %v5469_v15, 1  ;;  %v4147_v62 = vpack.i.bf16 %v5469_v15, %v5467_v20 }
  0xfe   : > { %6785 = vst [vmem:[#allocation61_spill] sm:$0xff] %v5473_v52  ;;  %6786 = vst [vmem:[#allocation62_spill] sm:$0xff] %v5475_v36  ;;  %v1710_v51 = vsel %vm1537_vm2, %v1707_v17, %v1709_v46  ;;  %v1708_v27 = vsel %vm1537_vm2, %v1706_v32, %v1707_v17  ;;  %v1714_v48 = vrot.slane %v5475_v36, 1  ;;  %v4142_v46 = vpack.i.bf16 %v5475_v36, %v5473_v52 }
  0xff   : > { %1945 = vst.msk [vmem:[#allocation2 + $0x7f8] sm:$0xff] %vm16_vm0, %v1712_v23  ;;  %v3806_v23 = vld [vmem:[%s4712_s17 + $0x1a0] sm:$0xff]   ;;  %1944 = vst.msk [vmem:[#allocation2 + $0x7e8] sm:$0xff] %vm16_vm0, %v1710_v51  ;;  %v1713_v32 = vrot.slane %v5473_v52, 1  ;;  %v5505_v17 = vunpack.c.l.bf16 %v434_v24  ;;  %v1723_v19 = vrot.slane %v5477_v29, 1 }
 0x100   : > { %4138 = vrot.lane.b32.xlu1 %v4137_v54, %s4225_s18  ;;  %v1716_v54 = vrot.slane %v5467_v20, 1  ;;  %1943 = vst.msk [vmem:[#allocation2 + $0x7d8] sm:$0xff] %vm16_vm0, %v1708_v27  ;;  %v5513_v15 = vunpack.c.l.bf16 %v3806_v23  ;;  %v5527_v27 = vunpack.c.h.bf16 %v433_v42 }
 0x101   : > { %4133 = vrot.lane.b32.xlu0 %v4132_v37, %s4225_s18  ;;  %1950 = vst.msk [vmem:[#allocation2 + $0x858] sm:$0x7] %vm1849_vm3, %v1718_v1  ;;  %v438_v37 = vld [vmem:[%s4712_s17 + $0x1bc] sm:$0x3]  ;;  %v1715_v52 = vsel %vm1537_vm2, %v1713_v32, %v1714_v48  ;;  %v1725_v36 = vrot.slane %v5505_v17, 1 }
 0x102   : > { %v1719_v30 = vsel %vm1537_vm2, %v1716_v54, %v1718_v1  ;;  %v1717_v51 = vsel %vm1537_vm2, %v1714_v48, %v1716_v54  ;;  %6787 = vst [vmem:[#allocation63_spill] sm:$0xff] %v5513_v15  ;;  %v3807_v1 = vld [vmem:[%s4712_s17 + $0x1b0] sm:$0xff]   ;;  %1947 = vst.msk [vmem:[#allocation2 + $0x828] sm:$0xff] %vm16_vm0, %v1715_v52  ;;  %v1720_v54 = vrot.slane %v5513_v15, 1  ;;  %v671_v52 = vrot.slane %v4717_v5, 7 }
 0x103   : > { %1949 = vst.msk [vmem:[#allocation2 + $0x848] sm:$0xff] %vm16_vm0, %v1719_v30  ;;  %1948 = vst.msk [vmem:[#allocation2 + $0x838] sm:$0xff] %vm16_vm0, %v1717_v51  ;;  %v4157_v30 = vpack.i.bf16 %v5505_v17, %v5477_v29  ;;  %v5529_v51 = vunpack.c.l.bf16 %v438_v37  ;;  %v1726_v48 = vsel %vm1537_vm2, %v1723_v19, %v1725_v36  ;;  %v5533_v32 = vunpack.c.l.bf16 %v3807_v1 }
 0x104   : > { %4148 = vrot.lane.b32.xlu1 %v4147_v62, %s4225_s18  ;;  %v5524_v62 = vunpack.c.h.bf16 %v3806_v23  ;;  %6788 = vst [vmem:[#allocation64_spill] sm:$0xff] %v5527_v27  ;;  %1954 = vst.msk [vmem:[#allocation2 + $0x8a8] sm:$0x7] %vm1849_vm3, %v1725_v36  ;;  %v5535_v24 = vunpack.c.h.bf16 %v3807_v1  ;;  %v1730_v1 = vrot.slane %v5527_v27, 1 }
 0x105   : > { %4143 = vrot.lane.b32.xlu0 %v4142_v46, %s4225_s18  ;;  %6789 = vst [vmem:[#allocation65_spill] sm:$0xff] %v5529_v51  ;;  %6790 = vst [vmem:[#allocation66_spill] sm:$0xff] %v5533_v32  ;;  %v1732_v37 = vrot.slane %v5529_v51, 1  ;;  %v4167_v36 = vpack.i.bf16 %v5529_v51, %v5527_v27  ;;  %v6792_v51 = vrot.slane %v4719_v6, 7  ;;  %v6797_v6 = vrot.slane %v4731_v13, 7 }
 0x106   : > { %6791 = vst [vmem:[#allocation67_spill] sm:$0xff] %v5535_v24  ;;  %1953 = vst.msk [vmem:[#allocation2 + $0x898] sm:$0xff] %vm16_vm0, %v1726_v48  ;;  %v1721_v42 = vrot.slane %v5524_v62, 1  ;;  %v4152_v46 = vpack.i.bf16 %v5524_v62, %v5513_v15  ;;  %v1728_v5 = vrot.slane %v5535_v24, 1  ;;  %v4162_v48 = vpack.i.bf16 %v5535_v24, %v5533_v32 }
 0x107   : > { %979 = vst.msk [vmem:[#allocation2 + $0xa0] sm:$0xfe] %vm973_vm4, %v671_v52  ;;  %v1727_v15 = vrot.slane %v5533_v32, 1  ;;  %v673_v27 = vsel %vm663_vm5, %v671_v52, %v6792_v51  ;;  %v1733_v24 = vsel %vm1537_vm2, %v1730_v1, %v1732_v37  ;;  %v6795_v52 = vrot.slane %v4729_v12, 7 }
 0x108   : > { %4158 = vrot.lane.b32.xlu1 %v4157_v30, %s4225_s18  ;;  %v1724_v30 = vsel %vm1537_vm2, %v1721_v42, %v1723_v19  ;;  %v1722_v23 = vsel %vm1537_vm2, %v1720_v54, %v1721_v42  ;;  %1958 = vst.msk [vmem:[#allocation2 + $0x8f8] sm:$0x7] %vm1849_vm3, %v1732_v37  ;;  %v1731_v19 = vsel %vm1537_vm2, %v1728_v5, %v1730_v1  ;;  %v664_v54 = vrot.slane %v4721_v7, 7 }
 0x109   : > { %4153 = vrot.lane.b32.xlu0 %v4152_v46, %s4225_s18  ;;  %1952 = vst.msk [vmem:[#allocation2 + $0x888] sm:$0xff] %vm16_vm0, %v1724_v30  ;;  %1951 = vst.msk [vmem:[#allocation2 + $0x878] sm:$0xff] %vm16_vm0, %v1722_v23  ;;  %v6793_v42 = vrot.slane %v4727_v11, 7  ;;  %v6794_v46 = vmov %v6792_v51  ;;  %v1729_v51 = vsel %vm1537_vm2, %v1727_v15, %v1728_v5  ;;  %v6798_v23 = vrot.slane %v4723_v8, 7 }
 0x10a   : > { %980 = vst.msk [vmem:[#allocation2 + $0xb0] sm:$0xff] %vm16_vm0, %v673_v27  ;;  %1957 = vst.msk [vmem:[#allocation2 + $0x8e8] sm:$0xff] %vm16_vm0, %v1733_v24  ;;  %v6799_v37 = vrot.slane %v4733_v14, 7  ;;  %v6802_v14 = vrot.slane %v4769_v40, 7  ;;  %v6803_v13 = vrot.slane %v4781_v45, 7  ;;  %v6804_v1 = vrot.slane %v4771_v41, 7 }
 0x10b   : > { %v675_v32 = vsel %vm663_vm5, %v6794_v46, %v6793_v42  ;;  %1956 = vst.msk [vmem:[#allocation2 + $0x8d8] sm:$0xff] %vm16_vm0, %v1731_v19  ;;  %v6796_v27 = vmov %v6793_v42  ;;  %v668_v24 = vsel %vm663_vm5, %v6798_v23, %v6797_v6  ;;  %1955 = vst.msk [vmem:[#allocation2 + $0x8c8] sm:$0xff] %vm16_vm0, %v1729_v51  ;;  %v6801_v11 = vmov %v6798_v23 }
 0x10c   : > { %4168 = vrot.lane.b32.xlu1 %v4167_v36, %s4225_s18  ;;  %v677_v7 = vsel %vm663_vm5, %v6796_v27, %v6795_v52  ;;  %981 = vst.msk [vmem:[#allocation2 + $0xc0] sm:$0xff] %vm16_vm0, %v675_v32  ;;  %v6800_v36 = vmov %v6797_v6  ;;  %v666_v12 = vsel %vm663_vm5, %v664_v54, %v6801_v11  ;;  %976 = vst.msk [vmem:[#allocation2 + $0x70] sm:$0xff] %vm16_vm0, %v668_v24  ;;  %v6805_v8 = vmov %v6802_v14 }
 0x10d   : > { %v670_v15 = vsel %vm663_vm5, %v6800_v36, %v6799_v37  ;;  %974 = vst.msk [vmem:[#allocation2 + $0x50] sm:$0xfe] %vm973_vm4, %v664_v54  ;;  %v682_v32 = vsel %vm663_vm5, %v6803_v13, %v6802_v14  ;;  %v684_v5 = vsel %vm663_vm5, %v6805_v8, %v6804_v1  ;;  %v678_v30 = vrot.slane %v4779_v44, 7  ;;  %4163 = vrot.lane.b32.xlu0 %v4162_v48, %s4225_s18 }
 0x10e   : > { %982 = vst.msk [vmem:[#allocation2 + $0xd0] sm:$0x1f] %vm977_vm6, %v677_v7  ;;  %978 = vst.msk [vmem:[#allocation2 + $0x80] sm:$0x1f] %vm977_vm6, %v670_v15  ;;  %v6806_v19 = vrot.slane %v4801_v58, 7  ;;  %v6807_v54 = vrot.slane %v4810_v63, 7  ;;  %v6812_v27 = vmov %v6803_v13 }
 0x10f   : > { %975 = vst.msk [vmem:[#allocation2 + $0x60] sm:$0xff] %vm16_vm0, %v666_v12  ;;  %985 = vst.msk [vmem:[#allocation2 + $0x110] sm:$0xff] %vm16_vm0, %v682_v32  ;;  %v6808_v40 = vrot.slane %v4803_v59, 7  ;;  %v685_v48 = vrot.slane %v4805_v60, 7  ;;  %v6810_v46 = vrot.slane %v4813_v2, 7  ;;  %v6811_v51 = vrot.slane %v4854_v43, 7 }
 0x110   : > { %986 = vst.msk [vmem:[#allocation2 + $0x120] sm:$0x1f] %vm977_vm6, %v684_v5  ;;  %v689_v41 = vsel %vm663_vm5, %v6807_v54, %v6806_v19  ;;  %v6809_v42 = vmov %v6806_v19  ;;  %v680_v7 = vsel %vm663_vm5, %v678_v30, %v6812_v27  ;;  %v6813_v58 = vrot.slane %v4833_v25, 7 }
 0x111   : > { %v691_v44 = vsel %vm663_vm5, %v6809_v42, %v6808_v40  ;;  %v696_v52 = vsel %vm663_vm5, %v6811_v51, %v6810_v46  ;;  %983 = vst.msk [vmem:[#allocation2 + $0xf0] sm:$0xfe] %vm973_vm4, %v678_v30  ;;  %v6814_v59 = vmov %v6810_v46  ;;  %v692_v6 = vrot.slane %v4841_v33, 7  ;;  %987 = vst.msk [vmem:[#allocation2 + $0x140] sm:$0xfe] %vm973_vm4, %v685_v48 }
 0x112   : > { %989 = vst.msk [vmem:[#allocation2 + $0x160] sm:$0xff] %vm16_vm0, %v689_v41  ;;  %v698_v60 = vsel %vm663_vm5, %v6814_v59, %v6813_v58  ;;  %993 = vst.msk [vmem:[#allocation2 + $0x1b0] sm:$0xff] %vm16_vm0, %v696_v52  ;;  %v6815_v45 = vrot.slane %v4857_v47, 7  ;;  %v6816_v23 = vrot.slane %v4865_v55, 7  ;;  %v6817_v37 = vmov %v6807_v54  ;;  %v3904_v5 = vpop.permute.xlu1 %3903 }
 0x113   : > { %990 = vst.msk [vmem:[#allocation2 + $0x170] sm:$0x1f] %vm977_vm6, %v691_v44  ;;  %v687_v25 = vsel %vm663_vm5, %v685_v48, %v6817_v37  ;;  %994 = vst.msk [vmem:[#allocation2 + $0x1c0] sm:$0x1f] %vm977_vm6, %v698_v60  ;;  %v6818_v2 = vrot.slane %v4859_v49, 7  ;;  %v699_v15 = vrot.slane %v4863_v53, 7  ;;  %v6822_v14 = vmov %v6811_v51  ;;  %v3894_v48 = vpop.permute.xlu0 %3893 }
 0x114   : > { %v703_v24 = vsel %vm663_vm5, %v6816_v23, %v6815_v45  ;;  %984 = vst.msk [vmem:[#allocation2 + $0x100] sm:$0xff] %vm16_vm0, %v680_v7  ;;  %v6819_v33 = vmov %v6815_v45  ;;  %v6820_v11 = vrot.slane %v4867_v56, 7  ;;  %v6821_v63 = vrot.slane %v4915_v16, 7  ;;  %988 = vst.msk [vmem:[#allocation2 + $0x150] sm:$0xff] %vm16_vm0, %v687_v25 }
 0x115   : > { %v705_v36 = vsel %vm663_vm5, %v6819_v33, %v6818_v2  ;;  %997 = vst.msk [vmem:[#allocation2 + $0x200] sm:$0xff] %vm16_vm0, %v703_v24  ;;  %v694_v49 = vsel %vm663_vm5, %v692_v6, %v6822_v14  ;;  %v6823_v47 = vrot.slane %v4895_v34, 7  ;;  %v706_v32 = vrot.slane %v4903_v50, 7  ;;  %v6845_v33 = vld [vmem:[#allocation4_spill] sm:$0xff] }
 0x116   : > { %v710_v12 = vsel %vm663_vm5, %v6821_v63, %v6820_v11  ;;  %991 = vst.msk [vmem:[#allocation2 + $0x190] sm:$0xfe] %vm973_vm4, %v692_v6  ;;  %v6824_v53 = vmov %v6820_v11  ;;  %v6825_v1 = vrot.slane %v4918_v28, 7  ;;  %v6826_v43 = vrot.slane %v4926_v3, 7  ;;  %995 = vst.msk [vmem:[#allocation2 + $0x1e0] sm:$0xfe] %vm973_vm4, %v699_v15  ;;  %v3909_v37 = vpop.permute.xlu1 %3908 }
 0x117   : > { %998 = vst.msk [vmem:[#allocation2 + $0x210] sm:$0x1f] %vm977_vm6, %v705_v36  ;;  %v712_v13 = vsel %vm663_vm5, %v6824_v53, %v6823_v47  ;;  %v6827_v30 = vmov %v6816_v23  ;;  %v6828_v56 = vrot.slane %v4920_v39, 7  ;;  %v713_v54 = vrot.slane %v4924_v31, 7  ;;  %v6848_v11 = vld [vmem:[#allocation8_spill] sm:$0xff]  ;;  %v3899_v47 = vpop.permute.xlu0 %3898  ;;  %v6851_v53 = vld [vmem:[#allocation6_spill] sm:$0xff] }
 0x118   : > { %1001 = vst.msk [vmem:[#allocation2 + $0x250] sm:$0xff] %vm16_vm0, %v710_v12  ;;  %v717_v8 = vsel %vm663_vm5, %v6826_v43, %v6825_v1  ;;  %992 = vst.msk [vmem:[#allocation2 + $0x1a0] sm:$0xff] %vm16_vm0, %v694_v49  ;;  %v701_v34 = vsel %vm663_vm5, %v699_v15, %v6827_v30  ;;  %v6829_v50 = vmov %v6825_v1  ;;  %v6830_v41 = vrot.slane %v4928_v0, 7  ;;  %v6846_v15 = vld [vmem:[#allocation5_spill] sm:$0xff]  ;;  %v6855_v30 = vld [vmem:[#allocation7_spill] sm:$0xff] }
 0x119   : > { %1002 = vst.msk [vmem:[#allocation2 + $0x260] sm:$0x1f] %vm977_vm6, %v712_v13  ;;  %v719_v19 = vsel %vm663_vm5, %v6829_v50, %v6828_v56  ;;  %v6831_v55 = vrot.slane %v4976_v9, 7  ;;  %v3906_v42 = vunpack.i.h.bf16 %v3904_v5  ;;  %v3905_v44 = vunpack.i.l.bf16 %v3904_v5  ;;  %v6856_v56 = vld [vmem:[#allocation9_spill] sm:$0xff] }
 0x11a   : > { %1005 = vst.msk [vmem:[#allocation2 + $0x2a0] sm:$0xff] %vm16_vm0, %v717_v8  ;;  %996 = vst.msk [vmem:[#allocation2 + $0x1f0] sm:$0xff] %vm16_vm0, %v701_v34  ;;  %v6832_v39 = vmov %v6821_v63  ;;  %v6833_v31 = vrot.slane %v4956_v18, 7  ;;  %v6834_v46 = vmov %v6830_v41  ;;  %v3896_v52 = vunpack.i.h.bf16 %v3894_v48 }
 0x11b   : > { %v724_v40 = vsel %vm663_vm5, %v6831_v55, %v6830_v41  ;;  %v708_v28 = vsel %vm663_vm5, %v706_v32, %v6832_v39  ;;  %999 = vst.msk [vmem:[#allocation2 + $0x230] sm:$0xfe] %vm973_vm4, %v706_v32  ;;  %v3895_v27 = vunpack.i.l.bf16 %v3894_v48  ;;  %v6835_v16 = vmov %v6826_v43  ;;  %1003 = vst.msk [vmem:[#allocation2 + $0x280] sm:$0xfe] %vm973_vm4, %v713_v54  ;;  %v6860_v41 = vld [vmem:[#allocation10_spill] sm:$0xff]  ;;  %v6864_v39 = vld [vmem:[#allocation13_spill] sm:$0xff] }
 0x11c   : > { %1006 = vst.msk [vmem:[#allocation2 + $0x2b0] sm:$0x1f] %vm977_vm6, %v719_v19  ;;  %v726_v51 = vsel %vm663_vm5, %v6834_v46, %v6833_v31  ;;  %v715_v7 = vsel %vm663_vm5, %v713_v54, %v6835_v16  ;;  %v720_v18 = vrot.slane %v4964_v38, 7  ;;  %v6836_v0 = vrot.slane %v4979_v4, 7  ;;  %v6858_v19 = vld [vmem:[#allocation12_spill] sm:$0xff] }
 0x11d   : > { %1009 = vst.msk [vmem:[#allocation2 + $0x2f0] sm:$0xff] %vm16_vm0, %v724_v40  ;;  %1000 = vst.msk [vmem:[#allocation2 + $0x240] sm:$0xff] %vm16_vm0, %v708_v28  ;;  %v6837_v58 = vrot.slane %v4987_v26, 7  ;;  %v6838_v59 = vrot.slane %v4981_v35, 7  ;;  %v727_v38 = vrot.slane %v4985_v22, 7  ;;  %v6840_v45 = vrot.slane %v4989_v21, 7 }
 0x11e   : > { %1010 = vst.msk [vmem:[#allocation2 + $0x300] sm:$0x1f] %vm977_vm6, %v726_v51  ;;  %v6839_v60 = vmov %v6836_v0  ;;  %v6841_v23 = vrot.slane %v5037_v57, 7  ;;  %v6842_v25 = vmov %v6831_v55  ;;  %v6843_v4 = vrot.slane %v5017_v61, 7  ;;  %v6866_v31 = vld [vmem:[#allocation16_spill] sm:$0xff] }
 0x11f   : > { %1429 = vst.msk [vmem:[#allocation2 + $0xa0] sm:$0xff] %vm1423_vm7, %v3905_v44  ;;  %1430 = vst.msk [vmem:[#allocation2 + $0xb0] sm:$0xff] %vm1423_vm7, %v3906_v42  ;;  %v731_v3 = vsel %vm663_vm5, %v6837_v58, %v6836_v0  ;;  %v733_v6 = vsel %vm663_vm5, %v6839_v60, %v6838_v59  ;;  %v722_v35 = vsel %vm663_vm5, %v720_v18, %v6842_v25  ;;  %v6844_v22 = vmov %v6840_v45  ;;  %v6863_v44 = vld [vmem:[#allocation11_spill] sm:$0xff]  ;;  %v6873_v60 = vld [vmem:[#allocation17_spill] sm:$0xff]  ;;  %v3914_v25 = vpop.permute.xlu0 %3913 }
 0x120   : > { %1004 = vst.msk [vmem:[#allocation2 + $0x290] sm:$0xff] %vm16_vm0, %v715_v7  ;;  %v738_v24 = vsel %vm663_vm5, %v6841_v23, %v6840_v45  ;;  %1013 = vst.msk [vmem:[#allocation2 + $0x340] sm:$0xff] %vm16_vm0, %v731_v3  ;;  %v740_v2 = vsel %vm663_vm5, %v6844_v22, %v6843_v4  ;;  %v734_v36 = vrot.slane %v6845_v33, 7  ;;  %v6847_v9 = vrot.slane %v6846_v15, 7  ;;  %v6869_v7 = vld [vmem:[#allocation14_spill] sm:$0xff]  ;;  %v6872_v3 = vld [vmem:[#allocation15_spill] sm:$0xff] }
 0x121   : > { %1424 = vst.msk [vmem:[#allocation2 + $0x50] sm:$0xff] %vm1423_vm7, %v3895_v27  ;;  %1425 = vst.msk [vmem:[#allocation2 + $0x60] sm:$0xff] %vm1423_vm7, %v3896_v52  ;;  %v6849_v63 = vrot.slane %v6848_v11, 7  ;;  %v3911_v14 = vunpack.i.h.bf16 %v3909_v37  ;;  %v3910_v49 = vunpack.i.l.bf16 %v3909_v37  ;;  %v6850_v61 = vmov %v6837_v58  ;;  %v3919_v52 = vpop.permute.xlu1 %3918  ;;  %v6878_v22 = vld [vmem:[#allocation18_spill] sm:$0xff] }
 0x122   : > { %1007 = vst.msk [vmem:[#allocation2 + $0x2d0] sm:$0xfe] %vm973_vm4, %v720_v18  ;;  %v729_v21 = vsel %vm663_vm5, %v727_v38, %v6850_v61  ;;  %1011 = vst.msk [vmem:[#allocation2 + $0x320] sm:$0xfe] %vm973_vm4, %v727_v38  ;;  %v6852_v13 = vrot.slane %v6851_v53, 7  ;;  %v6853_v32 = vmov %v6847_v9  ;;  %v3901_v43 = vunpack.i.h.bf16 %v3899_v47  ;;  %v6875_v38 = vld [vmem:[#allocation20_spill] sm:$0xff] }
 0x123   : > { %1014 = vst.msk [vmem:[#allocation2 + $0x350] sm:$0x1f] %vm977_vm6, %v733_v6  ;;  %v745_v12 = vsel %vm663_vm5, %v6849_v63, %v6847_v9  ;;  %1018 = vst.msk [vmem:[#allocation2 + $0x3a0] sm:$0x1f] %vm977_vm6, %v740_v2  ;;  %v3900_v8 = vunpack.i.l.bf16 %v3899_v47  ;;  %v6854_v26 = vmov %v6841_v23  ;;  %v741_v34 = vrot.slane %v6855_v30, 7  ;;  %v6885_v61 = vld [vmem:[#allocation24_spill] sm:$0xff] }
 0x124   : > { %1017 = vst.msk [vmem:[#allocation2 + $0x390] sm:$0xff] %vm16_vm0, %v738_v24  ;;  %1008 = vst.msk [vmem:[#allocation2 + $0x2e0] sm:$0xff] %vm16_vm0, %v722_v35  ;;  %v747_v1 = vsel %vm663_vm5, %v6853_v32, %v6852_v13  ;;  %v736_v5 = vsel %vm663_vm5, %v734_v36, %v6854_v26  ;;  %v6857_v50 = vrot.slane %v6856_v56, 7  ;;  %v6859_v54 = vrot.slane %v6858_v19, 7  ;;  %v6887_v13 = vld [vmem:[#allocation22_spill] sm:$0xff] }
 0x125   : > { %1021 = vst.msk [vmem:[#allocation2 + $0x3e0] sm:$0xff] %vm16_vm0, %v745_v12  ;;  %1012 = vst.msk [vmem:[#allocation2 + $0x330] sm:$0xff] %vm16_vm0, %v729_v21  ;;  %v6861_v55 = vrot.slane %v6860_v41, 7  ;;  %v748_v48 = vrot.slane %v6863_v44, 7  ;;  %v6865_v28 = vrot.slane %v6864_v39, 7  ;;  %v6867_v46 = vrot.slane %v6866_v31, 7  ;;  %v3929_v19 = vpop.permute.xlu1 %3928 }
 0x126   : > { %1015 = vst.msk [vmem:[#allocation2 + $0x370] sm:$0xfe] %vm973_vm4, %v734_v36  ;;  %v752_v57 = vsel %vm663_vm5, %v6859_v54, %v6857_v50  ;;  %v6862_v40 = vmov %v6857_v50  ;;  %v6868_v27 = vmov %v6849_v63  ;;  %1019 = vst.msk [vmem:[#allocation2 + $0x3c0] sm:$0xfe] %vm973_vm4, %v741_v34  ;;  %v6870_v18 = vrot.slane %v6869_v7, 7  ;;  %v6882_v12 = vld [vmem:[#allocation19_spill] sm:$0xff] }
 0x127   : > { %1022 = vst.msk [vmem:[#allocation2 + $0x3f0] sm:$0x1f] %vm977_vm6, %v747_v1  ;;  %v754_v42 = vsel %vm663_vm5, %v6862_v40, %v6861_v55  ;;  %v759_v51 = vsel %vm663_vm5, %v6867_v46, %v6865_v28  ;;  %v743_v16 = vsel %vm663_vm5, %v741_v34, %v6868_v27  ;;  %v6871_v0 = vmov %v6865_v28  ;;  %v6893_v34 = vld [vmem:[#allocation28_spill] sm:$0xff]  ;;  %v6896_v41 = vld [vmem:[#allocation26_spill] sm:$0xff]  ;;  %v6899_v44 = vld [vmem:[#allocation27_spill] sm:$0xff] }
 0x128   : > { %1432 = vst.msk [vmem:[#allocation2 + $0xd0] sm:$0xf] %vm1427_vm8, %v3911_v14  ;;  %1428 = vst.msk [vmem:[#allocation2 + $0x80] sm:$0xf] %vm1427_vm8, %v3901_v43  ;;  %v761_v58 = vsel %vm663_vm5, %v6871_v0, %v6870_v18  ;;  %v755_v59 = vrot.slane %v6872_v3, 7  ;;  %v6874_v6 = vrot.slane %v6873_v60, 7  ;;  %v3921_v24 = vunpack.i.h.bf16 %v3919_v52 }
 0x129   : > { %1431 = vst.msk [vmem:[#allocation2 + $0xc0] sm:$0xff] %vm1423_vm7, %v3910_v49  ;;  %1426 = vst.msk [vmem:[#allocation2 + $0x70] sm:$0xff] %vm1423_vm7, %v3900_v8  ;;  %v6876_v45 = vrot.slane %v6875_v38, 7  ;;  %v3920_v37 = vunpack.i.l.bf16 %v3919_v52  ;;  %v6877_v35 = vmov %v6859_v54  ;;  %v6879_v2 = vrot.slane %v6878_v22, 7  ;;  %v6883_v49 = vld [vmem:[#allocation21_spill] sm:$0xff]  ;;  %v6890_v8 = vld [vmem:[#allocation23_spill] sm:$0xff] }
 0x12a   : > { %1016 = vst.msk [vmem:[#allocation2 + $0x380] sm:$0xff] %vm16_vm0, %v736_v5  ;;  %1025 = vst.msk [vmem:[#allocation2 + $0x430] sm:$0xff] %vm16_vm0, %v752_v57  ;;  %v750_v4 = vsel %vm663_vm5, %v748_v48, %v6877_v35  ;;  %v6880_v33 = vmov %v6874_v6  ;;  %v3916_v15 = vunpack.i.h.bf16 %v3914_v25  ;;  %v3915_v9 = vunpack.i.l.bf16 %v3914_v25  ;;  %v6891_v5 = vld [vmem:[#allocation25_spill] sm:$0xff]  ;;  %v6902_v31 = vld [vmem:[#allocation32_spill] sm:$0xff] }
 0x12b   : > { %1026 = vst.msk [vmem:[#allocation2 + $0x440] sm:$0x1f] %vm977_vm6, %v754_v42  ;;  %v766_v23 = vsel %vm663_vm5, %v6876_v45, %v6874_v6  ;;  %1030 = vst.msk [vmem:[#allocation2 + $0x490] sm:$0x1f] %vm977_vm6, %v761_v58  ;;  %v768_v36 = vsel %vm663_vm5, %v6880_v33, %v6879_v2  ;;  %v6881_v11 = vmov %v6867_v46  ;;  %v762_v14 = vrot.slane %v6882_v12, 7  ;;  %v6900_v39 = vld [vmem:[#allocation29_spill] sm:$0xff] }
 0x12c   : > { %1029 = vst.msk [vmem:[#allocation2 + $0x480] sm:$0xff] %vm16_vm0, %v759_v51  ;;  %1020 = vst.msk [vmem:[#allocation2 + $0x3d0] sm:$0xff] %vm16_vm0, %v743_v16  ;;  %v757_v63 = vsel %vm663_vm5, %v755_v59, %v6881_v11  ;;  %v6884_v47 = vrot.slane %v6883_v49, 7  ;;  %v6886_v21 = vrot.slane %v6885_v61, 7  ;;  %v6888_v32 = vrot.slane %v6887_v13, 7  ;;  %v3924_v16 = vpop.permute.xlu0 %3923  ;;  %v6905_v0 = vld [vmem:[#allocation30_spill] sm:$0xff]  ;;  %v3939_v61 = vpop.permute.xlu1 %3938 }
 0x12d   : > { %1023 = vst.msk [vmem:[#allocation2 + $0x410] sm:$0xfe] %vm973_vm4, %v748_v48  ;;  %1027 = vst.msk [vmem:[#allocation2 + $0x460] sm:$0xfe] %vm973_vm4, %v755_v59  ;;  %v769_v26 = vrot.slane %v6890_v8, 7  ;;  %v6892_v30 = vrot.slane %v6891_v5, 7  ;;  %v6895_v54 = vmov %v6876_v45  ;;  %v3931_v52 = vunpack.i.h.bf16 %v3929_v19 }
 0x12e   : > { %1033 = vst.msk [vmem:[#allocation2 + $0x4d0] sm:$0xff] %vm16_vm0, %v766_v23  ;;  %1024 = vst.msk [vmem:[#allocation2 + $0x420] sm:$0xff] %vm16_vm0, %v750_v4  ;;  %v773_v53 = vsel %vm663_vm5, %v6886_v21, %v6884_v47  ;;  %v6889_v1 = vmov %v6884_v47  ;;  %v6894_v56 = vrot.slane %v6893_v34, 7  ;;  %v764_v57 = vsel %vm663_vm5, %v762_v14, %v6895_v54  ;;  %v6909_v23 = vld [vmem:[#allocation31_spill] sm:$0xff]  ;;  %v6912_v35 = vld [vmem:[#allocation36_spill] sm:$0xff] }
 0x12f   : > { %1034 = vst.msk [vmem:[#allocation2 + $0x4e0] sm:$0x1f] %vm977_vm6, %v768_v36  ;;  %v775_v43 = vsel %vm663_vm5, %v6889_v1, %v6888_v32  ;;  %v6897_v55 = vrot.slane %v6896_v41, 7  ;;  %v6898_v40 = vmov %v6892_v30  ;;  %v776_v48 = vrot.slane %v6899_v44, 7  ;;  %v6914_v2 = vld [vmem:[#allocation34_spill] sm:$0xff]  ;;  %v6926_v8 = vld [vmem:[#allocation39_spill] sm:$0xff] }
 0x130   : > { %1436 = vst.msk [vmem:[#allocation2 + $0x120] sm:$0xf] %vm1427_vm8, %v3921_v24  ;;  %v780_v50 = vsel %vm663_vm5, %v6894_v56, %v6892_v30  ;;  %v6901_v28 = vrot.slane %v6900_v39, 7  ;;  %v6903_v46 = vrot.slane %v6902_v31, 7  ;;  %v3930_v27 = vunpack.i.l.bf16 %v3929_v19  ;;  %1440 = vst.msk [vmem:[#allocation2 + $0x170] sm:$0xf] %vm1427_vm8, %v3931_v52 }
 0x131   : > { %1435 = vst.msk [vmem:[#allocation2 + $0x110] sm:$0xff] %vm1423_vm7, %v3920_v37  ;;  %1434 = vst.msk [vmem:[#allocation2 + $0x100] sm:$0xff] %vm1423_vm7, %v3916_v15  ;;  %v782_v42 = vsel %vm663_vm5, %v6898_v40, %v6897_v55  ;;  %v6904_v7 = vmov %v6886_v21  ;;  %v6906_v58 = vrot.slane %v6905_v0, 7  ;;  %v3926_v60 = vunpack.i.h.bf16 %v3924_v16  ;;  %v6910_v37 = vld [vmem:[#allocation33_spill] sm:$0xff]  ;;  %v6923_v13 = vld [vmem:[#allocation38_spill] sm:$0xff] }
 0x132   : > { %1028 = vst.msk [vmem:[#allocation2 + $0x470] sm:$0xff] %vm16_vm0, %v757_v63  ;;  %1037 = vst.msk [vmem:[#allocation2 + $0x520] sm:$0xff] %vm16_vm0, %v773_v53  ;;  %v787_v51 = vsel %vm663_vm5, %v6903_v46, %v6901_v28  ;;  %v771_v18 = vsel %vm663_vm5, %v769_v26, %v6904_v7  ;;  %v6907_v3 = vmov %v6901_v28  ;;  %v3925_v6 = vunpack.i.l.bf16 %v3924_v16  ;;  %v6918_v63 = vld [vmem:[#allocation37_spill] sm:$0xff]  ;;  %v6929_v34 = vld [vmem:[#allocation44_spill] sm:$0xff] }
 0x133   : > { %1433 = vst.msk [vmem:[#allocation2 + $0xf0] sm:$0xff] %vm1423_vm7, %v3915_v9  ;;  %v789_v59 = vsel %vm663_vm5, %v6907_v3, %v6906_v58  ;;  %v6908_v38 = vmov %v6894_v56  ;;  %v783_v24 = vrot.slane %v6909_v23, 7  ;;  %1439 = vst.msk [vmem:[#allocation2 + $0x160] sm:$0xff] %vm1423_vm7, %v3930_v27  ;;  %v6911_v25 = vrot.slane %v6910_v37, 7  ;;  %v6917_v9 = vld [vmem:[#allocation35_spill] sm:$0xff]  ;;  %v6927_v5 = vld [vmem:[#allocation41_spill] sm:$0xff] }
 0x134   : > { %1031 = vst.msk [vmem:[#allocation2 + $0x4b0] sm:$0xfe] %vm973_vm4, %v762_v14  ;;  %1035 = vst.msk [vmem:[#allocation2 + $0x500] sm:$0xfe] %vm973_vm4, %v769_v26  ;;  %v778_v45 = vsel %vm663_vm5, %v776_v48, %v6908_v38  ;;  %v6913_v4 = vrot.slane %v6912_v35, 7  ;;  %v6915_v33 = vrot.slane %v6914_v2, 7  ;;  %v6922_v21 = vmov %v6903_v46  ;;  %v3949_v35 = vpop.permute.xlu1 %3948 }
 0x135   : > { %1038 = vst.msk [vmem:[#allocation2 + $0x530] sm:$0x1f] %vm977_vm6, %v775_v43  ;;  %1042 = vst.msk [vmem:[#allocation2 + $0x580] sm:$0x1f] %vm977_vm6, %v782_v42  ;;  %v6916_v36 = vmov %v6911_v25  ;;  %v790_v11 = vrot.slane %v6917_v9, 7  ;;  %v6919_v12 = vrot.slane %v6918_v63, 7  ;;  %v785_v53 = vsel %vm663_vm5, %v783_v24, %v6922_v21 }
 0x136   : > { %1041 = vst.msk [vmem:[#allocation2 + $0x570] sm:$0xff] %vm16_vm0, %v780_v50  ;;  %1032 = vst.msk [vmem:[#allocation2 + $0x4c0] sm:$0xff] %vm16_vm0, %v764_v57  ;;  %v794_v22 = vsel %vm663_vm5, %v6913_v4, %v6911_v25  ;;  %v796_v15 = vsel %vm663_vm5, %v6916_v36, %v6915_v33  ;;  %v6920_v14 = vld [vmem:[#allocation40_spill] sm:$0xff]  ;;  %v6924_v32 = vrot.slane %v6923_v13, 7  ;;  %v797_v26 = vrot.slane %v6926_v8, 7  ;;  %v6932_v55 = vld [vmem:[#allocation42_spill] sm:$0xff] }
 0x137   : > { %1045 = vst.msk [vmem:[#allocation2 + $0x5c0] sm:$0xff] %vm16_vm0, %v787_v51  ;;  %1036 = vst.msk [vmem:[#allocation2 + $0x510] sm:$0xff] %vm16_vm0, %v771_v18  ;;  %v6921_v49 = vrot.slane %v6920_v14, 7  ;;  %v6925_v1 = vmov %v6919_v12  ;;  %v6928_v30 = vrot.slane %v6927_v5, 7  ;;  %v6930_v56 = vrot.slane %v6929_v34, 7  ;;  %v6936_v31 = vld [vmem:[#allocation43_spill] sm:$0xff] }
 0x138   : > { %1039 = vst.msk [vmem:[#allocation2 + $0x550] sm:$0xfe] %vm973_vm4, %v776_v48  ;;  %1043 = vst.msk [vmem:[#allocation2 + $0x5a0] sm:$0xfe] %vm973_vm4, %v783_v24  ;;  %v803_v43 = vsel %vm663_vm5, %v6925_v1, %v6924_v32  ;;  %v3941_v19 = vunpack.i.h.bf16 %v3939_v61  ;;  %v3940_v54 = vunpack.i.l.bf16 %v3939_v61  ;;  %v6931_v57 = vmov %v6913_v4  ;;  %v3934_v48 = vpop.permute.xlu0 %3933  ;;  %v6937_v51 = vld [vmem:[#allocation45_spill] sm:$0xff]  ;;  %v6939_v27 = vld [vmem:[#allocation48_spill] sm:$0xff] }
 0x139   : > { %1046 = vst.msk [vmem:[#allocation2 + $0x5d0] sm:$0x1f] %vm977_vm6, %v789_v59  ;;  %v801_v47 = vsel %vm663_vm5, %v6921_v49, %v6919_v12  ;;  %1050 = vst.msk [vmem:[#allocation2 + $0x620] sm:$0x1f] %vm977_vm6, %v796_v15  ;;  %v808_v50 = vsel %vm663_vm5, %v6930_v56, %v6928_v30  ;;  %v792_v41 = vsel %vm663_vm5, %v790_v11, %v6931_v57  ;;  %v6933_v40 = vrot.slane %v6932_v55, 7  ;;  %v6941_v18 = vld [vmem:[#allocation46_spill] sm:$0xff] }
 0x13a   : > { %1040 = vst.msk [vmem:[#allocation2 + $0x560] sm:$0xff] %vm16_vm0, %v778_v45  ;;  %1049 = vst.msk [vmem:[#allocation2 + $0x610] sm:$0xff] %vm16_vm0, %v794_v22  ;;  %v6934_v42 = vmov %v6928_v30  ;;  %v6935_v39 = vmov %v6921_v49  ;;  %v804_v46 = vrot.slane %v6936_v31, 7  ;;  %v6938_v52 = vrot.slane %v6937_v51, 7  ;;  %v6945_v45 = vld [vmem:[#allocation49_spill] sm:$0xff]  ;;  %v6947_v24 = vld [vmem:[#allocation52_spill] sm:$0xff] }
 0x13b   : > { %1438 = vst.msk [vmem:[#allocation2 + $0x150] sm:$0xff] %vm1423_vm7, %v3926_v60  ;;  %1437 = vst.msk [vmem:[#allocation2 + $0x140] sm:$0xff] %vm1423_vm7, %v3925_v6  ;;  %v810_v44 = vsel %vm663_vm5, %v6934_v42, %v6933_v40  ;;  %v799_v28 = vsel %vm663_vm5, %v797_v26, %v6935_v39  ;;  %v6940_v16 = vrot.slane %v6939_v27, 7  ;;  %v6942_v0 = vrot.slane %v6941_v18, 7  ;;  %v6944_v6 = vld [vmem:[#allocation47_spill] sm:$0xff]  ;;  %v6950_v2 = vld [vmem:[#allocation50_spill] sm:$0xff]  ;;  %v3959_v27 = vpop.permute.xlu1 %3958 }
 0x13c   : > { %1053 = vst.msk [vmem:[#allocation2 + $0x660] sm:$0xff] %vm16_vm0, %v801_v47  ;;  %1044 = vst.msk [vmem:[#allocation2 + $0x5b0] sm:$0xff] %vm16_vm0, %v785_v53  ;;  %v6943_v58 = vmov %v6938_v52  ;;  %v3936_v59 = vunpack.i.h.bf16 %v3934_v48  ;;  %v3935_v60 = vunpack.i.l.bf16 %v3934_v48  ;;  %v811_v38 = vrot.slane %v6944_v6, 7  ;;  %v6953_v9 = vld [vmem:[#allocation51_spill] sm:$0xff]  ;;  %v6954_v63 = vld [vmem:[#allocation53_spill] sm:$0xff] }
 0x13d   : > { %1047 = vst.msk [vmem:[#allocation2 + $0x5f0] sm:$0xfe] %vm973_vm4, %v790_v11  ;;  %1051 = vst.msk [vmem:[#allocation2 + $0x640] sm:$0xfe] %vm973_vm4, %v797_v26  ;;  %v815_v7 = vsel %vm663_vm5, %v6940_v16, %v6938_v52  ;;  %v817_v3 = vsel %vm663_vm5, %v6943_v58, %v6942_v0  ;;  %v6946_v23 = vrot.slane %v6945_v45, 7  ;;  %v6948_v37 = vrot.slane %v6947_v24, 7  ;;  %v3944_v26 = vpop.permute.xlu0 %3943 }
 0x13e   : > { %1054 = vst.msk [vmem:[#allocation2 + $0x670] sm:$0x1f] %vm977_vm6, %v803_v43  ;;  %1058 = vst.msk [vmem:[#allocation2 + $0x6c0] sm:$0x1f] %vm977_vm6, %v810_v44  ;;  %v6949_v4 = vmov %v6930_v56  ;;  %v6951_v33 = vrot.slane %v6950_v2, 7  ;;  %v818_v11 = vrot.slane %v6953_v9, 7  ;;  %v3951_v61 = vunpack.i.h.bf16 %v3949_v35 }
 0x13f   : > { %1057 = vst.msk [vmem:[#allocation2 + $0x6b0] sm:$0xff] %vm16_vm0, %v808_v50  ;;  %1048 = vst.msk [vmem:[#allocation2 + $0x600] sm:$0xff] %vm16_vm0, %v792_v41  ;;  %v822_v25 = vsel %vm663_vm5, %v6948_v37, %v6946_v23  ;;  %v806_v22 = vsel %vm663_vm5, %v804_v46, %v6949_v4  ;;  %v6952_v36 = vmov %v6946_v23  ;;  %v6955_v12 = vrot.slane %v6954_v63, 7  ;;  %v6956_v14 = vld [vmem:[#allocation56_spill] sm:$0xff]  ;;  %v6959_v32 = vld [vmem:[#allocation54_spill] sm:$0xff] }
 0x140   : > { %1444 = vst.msk [vmem:[#allocation2 + $0x1c0] sm:$0xf] %vm1427_vm8, %v3941_v19  ;;  %v824_v15 = vsel %vm663_vm5, %v6952_v36, %v6951_v33  ;;  %v6957_v49 = vrot.slane %v6956_v14, 7  ;;  %v3950_v21 = vunpack.i.l.bf16 %v3949_v35  ;;  %v6958_v53 = vmov %v6940_v16  ;;  %v6963_v34 = vld [vmem:[#allocation55_spill] sm:$0xff]  ;;  %v6964_v50 = vld [vmem:[#allocation57_spill] sm:$0xff]  ;;  %v6967_v41 = vld [vmem:[#allocation58_spill] sm:$0xff] }
 0x141   : > { %1443 = vst.msk [vmem:[#allocation2 + $0x1b0] sm:$0xff] %vm1423_vm7, %v3940_v54  ;;  %1442 = vst.msk [vmem:[#allocation2 + $0x1a0] sm:$0xff] %vm1423_vm7, %v3936_v59  ;;  %v813_v13 = vsel %vm663_vm5, %v811_v38, %v6958_v53  ;;  %v6960_v1 = vrot.slane %v6959_v32, 7  ;;  %v6961_v43 = vmov %v6955_v12  ;;  %v6962_v5 = vmov %v6948_v37  ;;  %v6970_v39 = vld [vmem:[#allocation59_spill] sm:$0xff]  ;;  %v6975_v18 = vld [vmem:[#allocation60_spill] sm:$0xff] }
 0x142   : > { %1052 = vst.msk [vmem:[#allocation2 + $0x650] sm:$0xff] %vm16_vm0, %v799_v28  ;;  %1061 = vst.msk [vmem:[#allocation2 + $0x700] sm:$0xff] %vm16_vm0, %v815_v7  ;;  %v829_v47 = vsel %vm663_vm5, %v6957_v49, %v6955_v12  ;;  %v820_v30 = vsel %vm663_vm5, %v818_v11, %v6962_v5  ;;  %v825_v56 = vrot.slane %v6963_v34, 7  ;;  %v6965_v19 = vrot.slane %v6964_v50, 7  ;;  %v6978_v59 = vld [vmem:[#allocation61_spill] sm:$0xff]  ;;  %v6985_v33 = vld [vmem:[#allocation63_spill] sm:$0xff] }
 0x143   : > { %1062 = vst.msk [vmem:[#allocation2 + $0x710] sm:$0x1f] %vm977_vm6, %v817_v3  ;;  %1066 = vst.msk [vmem:[#allocation2 + $0x760] sm:$0x1f] %vm977_vm6, %v824_v15  ;;  %v831_v8 = vsel %vm663_vm5, %v6961_v43, %v6960_v1  ;;  %v6966_v54 = vrot.slane %v5464_v10, 7  ;;  %v6968_v55 = vrot.slane %v6967_v41, 7  ;;  %v3946_v44 = vunpack.i.h.bf16 %v3944_v26 }
 0x144   : > { %1055 = vst.msk [vmem:[#allocation2 + $0x690] sm:$0xfe] %vm973_vm4, %v804_v46  ;;  %1059 = vst.msk [vmem:[#allocation2 + $0x6e0] sm:$0xfe] %vm973_vm4, %v811_v38  ;;  %v6969_v40 = vmov %v6965_v19  ;;  %v3945_v48 = vunpack.i.l.bf16 %v3944_v26  ;;  %v832_v28 = vrot.slane %v6970_v39, 7  ;;  %v6971_v31 = vrot.slane %v5467_v20, 7 }
 0x145   : > { %1065 = vst.msk [vmem:[#allocation2 + $0x750] sm:$0xff] %vm16_vm0, %v822_v25  ;;  %1056 = vst.msk [vmem:[#allocation2 + $0x6a0] sm:$0xff] %vm16_vm0, %v806_v22  ;;  %v836_v57 = vsel %vm663_vm5, %v6966_v54, %v6965_v19  ;;  %v838_v42 = vsel %vm663_vm5, %v6969_v40, %v6968_v55  ;;  %v6972_v46 = vld [vmem:[#allocation62_spill] sm:$0xff]  ;;  %v6974_v16 = vmov %v6957_v49  ;;  %v6976_v0 = vrot.slane %v6975_v18, 7  ;;  %v3954_v22 = vpop.permute.xlu0 %3953  ;;  %v6988_v12 = vld [vmem:[#allocation65_spill] sm:$0xff] }
 0x146   : > { %1441 = vst.msk [vmem:[#allocation2 + $0x190] sm:$0xff] %vm1423_vm7, %v3935_v60  ;;  %1447 = vst.msk [vmem:[#allocation2 + $0x200] sm:$0xff] %vm1423_vm7, %v3950_v21  ;;  %v6973_v51 = vrot.slane %v6972_v46, 7  ;;  %v827_v7 = vsel %vm663_vm5, %v825_v56, %v6974_v16  ;;  %v6977_v58 = vmov %v6971_v31  ;;  %v839_v60 = vrot.slane %v6978_v59, 7  ;;  %v6989_v49 = vld [vmem:[#allocation66_spill] sm:$0xff] }
 0x147   : > { %1069 = vst.msk [vmem:[#allocation2 + $0x7a0] sm:$0xff] %vm16_vm0, %v829_v47  ;;  %1060 = vst.msk [vmem:[#allocation2 + $0x6f0] sm:$0xff] %vm16_vm0, %v813_v13  ;;  %v845_v3 = vsel %vm663_vm5, %v6977_v58, %v6976_v0  ;;  %v6979_v6 = vrot.slane %v5477_v29, 7  ;;  %v6980_v38 = vrot.slane %v5524_v62, 7  ;;  %v3961_v23 = vunpack.i.h.bf16 %v3959_v27  ;;  %v6987_v29 = vld [vmem:[#allocation64_spill] sm:$0xff] }
 0x148   : > { %1063 = vst.msk [vmem:[#allocation2 + $0x730] sm:$0xfe] %vm973_vm4, %v818_v11  ;;  %v843_v52 = vsel %vm663_vm5, %v6973_v51, %v6971_v31  ;;  %1067 = vst.msk [vmem:[#allocation2 + $0x780] sm:$0xfe] %vm973_vm4, %v825_v56  ;;  %v3960_v24 = vunpack.i.l.bf16 %v3959_v27  ;;  %v6981_v20 = vmov %v6966_v54  ;;  %v6982_v25 = vrot.slane %v5505_v17, 7  ;;  %v6986_v17 = vld [vmem:[#allocation67_spill] sm:$0xff] }
 0x149   : > { %1070 = vst.msk [vmem:[#allocation2 + $0x7b0] sm:$0x1f] %vm977_vm6, %v831_v8  ;;  %1074 = vst.msk [vmem:[#allocation2 + $0x800] sm:$0x1f] %vm977_vm6, %v838_v42  ;;  %v850_v45 = vsel %vm663_vm5, %v6980_v38, %v6979_v6  ;;  %v834_v37 = vsel %vm663_vm5, %v832_v28, %v6981_v20  ;;  %v6983_v35 = vmov %v6979_v6  ;;  %v6984_v2 = vmov %v6973_v51  ;;  %v3964_v8 = vpop.permute.xlu0 %3963 }
 0x14a   : > { %1448 = vst.msk [vmem:[#allocation2 + $0x210] sm:$0xf] %vm1427_vm8, %v3951_v61  ;;  %v852_v4 = vsel %vm663_vm5, %v6983_v35, %v6982_v25  ;;  %v841_v10 = vsel %vm663_vm5, %v839_v60, %v6984_v2  ;;  %v846_v36 = vrot.slane %v6985_v33, 7  ;;  %v854_v15 = vrot.slane %v6986_v17, 7  ;;  %1452 = vst.msk [vmem:[#allocation2 + $0x260] sm:$0xf] %vm1427_vm8, %v3961_v23  ;;  %v3969_v61 = vpop.permute.xlu1 %3968 }
 0x14b   : > { %1064 = vst.msk [vmem:[#allocation2 + $0x740] sm:$0xff] %vm16_vm0, %v820_v30  ;;  %1073 = vst.msk [vmem:[#allocation2 + $0x7f0] sm:$0xff] %vm16_vm0, %v836_v57  ;;  %v856_v9 = vrot.slane %v6987_v29, 7  ;;  %v3956_v11 = vunpack.i.h.bf16 %v3954_v22  ;;  %v3955_v63 = vunpack.i.l.bf16 %v3954_v22  ;;  %v858_v14 = vrot.slane %v6988_v12, 7 }
 0x14c   : > { %1077 = vst.msk [vmem:[#allocation2 + $0x840] sm:$0xff] %vm16_vm0, %v843_v52  ;;  %1068 = vst.msk [vmem:[#allocation2 + $0x790] sm:$0xff] %vm16_vm0, %v827_v7  ;;  %v853_v47 = vrot.slane %v6989_v49, 7  ;;  %v6990_v21 = vmov %v6980_v38  ;;  %v3971_v32 = vunpack.i.h.bf16 %v3969_v61  ;;  %v3970_v1 = vunpack.i.l.bf16 %v3969_v61 }
 0x14d   : > { %1446 = vst.msk [vmem:[#allocation2 + $0x1f0] sm:$0xff] %vm1423_vm7, %v3946_v44  ;;  %1445 = vst.msk [vmem:[#allocation2 + $0x1e0] sm:$0xff] %vm1423_vm7, %v3945_v48  ;;  %v848_v53 = vsel %vm663_vm5, %v846_v36, %v6990_v21  ;;  %v857_v13 = vsel %vm663_vm5, %v854_v15, %v856_v9  ;;  %v859_v43 = vsel %vm663_vm5, %v856_v9, %v858_v14  ;;  %v3966_v26 = vunpack.i.h.bf16 %v3964_v8  ;;  %v3974_v50 = vpop.permute.xlu0 %3973 }
 0x14e   : > { %1071 = vst.msk [vmem:[#allocation2 + $0x7d0] sm:$0xfe] %vm973_vm4, %v832_v28  ;;  %1075 = vst.msk [vmem:[#allocation2 + $0x820] sm:$0xfe] %vm973_vm4, %v839_v60  ;;  %v855_v62 = vsel %vm663_vm5, %v853_v47, %v854_v15  ;;  %v3965_v5 = vunpack.i.l.bf16 %v3964_v8  ;;  %v3979_v30 = vpop.permute.xlu1 %3978  ;;  %v3976_v19 = vunpack.i.h.bf16 %v3974_v50  ;;  %v3975_v54 = vunpack.i.l.bf16 %v3974_v50 }
 0x14f   : > { %1078 = vst.msk [vmem:[#allocation2 + $0x850] sm:$0x1f] %vm977_vm6, %v845_v3  ;;  %1082 = vst.msk [vmem:[#allocation2 + $0x8a0] sm:$0x1f] %vm977_vm6, %v852_v4  ;;  %v3981_v34 = vunpack.i.h.bf16 %v3979_v30  ;;  %v3980_v56 = vunpack.i.l.bf16 %v3979_v30 }
 0x150   : > { %1081 = vst.msk [vmem:[#allocation2 + $0x890] sm:$0xff] %vm16_vm0, %v850_v45  ;;  %1072 = vst.msk [vmem:[#allocation2 + $0x7e0] sm:$0xff] %vm16_vm0, %v834_v37 }
 0x151   : > { %1451 = vst.msk [vmem:[#allocation2 + $0x250] sm:$0xff] %vm1423_vm7, %v3960_v24  ;;  %1450 = vst.msk [vmem:[#allocation2 + $0x240] sm:$0xff] %vm1423_vm7, %v3956_v11  ;;  %v3984_v40 = vpop.permute.xlu0 %3983 }
 0x152   : > { %1076 = vst.msk [vmem:[#allocation2 + $0x830] sm:$0xff] %vm16_vm0, %v841_v10  ;;  %1080 = vst.msk [vmem:[#allocation2 + $0x880] sm:$0xff] %vm16_vm0, %v848_v53  ;;  %v3989_v57 = vpop.permute.xlu1 %3988  ;;  %v3986_v42 = vunpack.i.h.bf16 %v3984_v40  ;;  %v3985_v44 = vunpack.i.l.bf16 %v3984_v40 }
 0x153   : > { %1079 = vst.msk [vmem:[#allocation2 + $0x870] sm:$0xfe] %vm973_vm4, %v846_v36  ;;  %1083 = vst.msk [vmem:[#allocation2 + $0x8c0] sm:$0xfe] %vm973_vm4, %v853_v47  ;;  %v3991_v41 = vunpack.i.h.bf16 %v3989_v57  ;;  %v3990_v55 = vunpack.i.l.bf16 %v3989_v57 }
 0x154   : > { %1449 = vst.msk [vmem:[#allocation2 + $0x230] sm:$0xff] %vm1423_vm7, %v3955_v63  ;;  %1455 = vst.msk [vmem:[#allocation2 + $0x2a0] sm:$0xff] %vm1423_vm7, %v3970_v1 }
 0x155   : > { %1085 = vst.msk [vmem:[#allocation2 + $0x8e0] sm:$0xff] %vm16_vm0, %v857_v13  ;;  %1084 = vst.msk [vmem:[#allocation2 + $0x8d0] sm:$0xff] %vm16_vm0, %v855_v62  ;;  %v3994_v31 = vpop.permute.xlu0 %3993 }
 0x156   : > { %1086 = vst.msk [vmem:[#allocation2 + $0x8f0] sm:$0x1f] %vm977_vm6, %v859_v43  ;;  %v3999_v48 = vpop.permute.xlu1 %3998  ;;  %v3996_v46 = vunpack.i.h.bf16 %v3994_v31  ;;  %v3995_v51 = vunpack.i.l.bf16 %v3994_v31 }
 0x157   : > { %1456 = vst.msk [vmem:[#allocation2 + $0x2b0] sm:$0xf] %vm1427_vm8, %v3971_v32  ;;  %1460 = vst.msk [vmem:[#allocation2 + $0x300] sm:$0xf] %vm1427_vm8, %v3981_v34  ;;  %v4001_v39 = vunpack.i.h.bf16 %v3999_v48  ;;  %v4000_v28 = vunpack.i.l.bf16 %v3999_v48 }
 0x158   : > { %1454 = vst.msk [vmem:[#allocation2 + $0x290] sm:$0xff] %vm1423_vm7, %v3966_v26  ;;  %1453 = vst.msk [vmem:[#allocation2 + $0x280] sm:$0xff] %vm1423_vm7, %v3965_v5 }
 0x159   : > { %1459 = vst.msk [vmem:[#allocation2 + $0x2f0] sm:$0xff] %vm1423_vm7, %v3980_v56  ;;  %1458 = vst.msk [vmem:[#allocation2 + $0x2e0] sm:$0xff] %vm1423_vm7, %v3976_v19  ;;  %v4004_v7 = vpop.permute.xlu0 %4003 }
 0x15a   : > { %1457 = vst.msk [vmem:[#allocation2 + $0x2d0] sm:$0xff] %vm1423_vm7, %v3975_v54  ;;  %1463 = vst.msk [vmem:[#allocation2 + $0x340] sm:$0xff] %vm1423_vm7, %v3990_v55  ;;  %v4009_v52 = vpop.permute.xlu1 %4008  ;;  %v4006_v18 = vunpack.i.h.bf16 %v4004_v7  ;;  %v4005_v0 = vunpack.i.l.bf16 %v4004_v7 }
 0x15b   : > { %1464 = vst.msk [vmem:[#allocation2 + $0x350] sm:$0xf] %vm1427_vm8, %v3991_v41  ;;  %1468 = vst.msk [vmem:[#allocation2 + $0x3a0] sm:$0xf] %vm1427_vm8, %v4001_v39  ;;  %v4011_v27 = vunpack.i.h.bf16 %v4009_v52  ;;  %v4010_v16 = vunpack.i.l.bf16 %v4009_v52 }
 0x15c   : > { %1462 = vst.msk [vmem:[#allocation2 + $0x330] sm:$0xff] %vm1423_vm7, %v3986_v42  ;;  %1461 = vst.msk [vmem:[#allocation2 + $0x320] sm:$0xff] %vm1423_vm7, %v3985_v44 }
 0x15d   : > { %1467 = vst.msk [vmem:[#allocation2 + $0x390] sm:$0xff] %vm1423_vm7, %v4000_v28  ;;  %1466 = vst.msk [vmem:[#allocation2 + $0x380] sm:$0xff] %vm1423_vm7, %v3996_v46  ;;  %v4014_v60 = vpop.permute.xlu0 %4013 }
 0x15e   : > { %1465 = vst.msk [vmem:[#allocation2 + $0x370] sm:$0xff] %vm1423_vm7, %v3995_v51  ;;  %1471 = vst.msk [vmem:[#allocation2 + $0x3e0] sm:$0xff] %vm1423_vm7, %v4010_v16  ;;  %v4019_v58 = vpop.permute.xlu1 %4018  ;;  %v4016_v6 = vunpack.i.h.bf16 %v4014_v60  ;;  %v4015_v38 = vunpack.i.l.bf16 %v4014_v60 }
 0x15f   : > { %1472 = vst.msk [vmem:[#allocation2 + $0x3f0] sm:$0xf] %vm1427_vm8, %v4011_v27  ;;  %v4021_v3 = vunpack.i.h.bf16 %v4019_v58  ;;  %v4020_v59 = vunpack.i.l.bf16 %v4019_v58 }
 0x160   : > { %1470 = vst.msk [vmem:[#allocation2 + $0x3d0] sm:$0xff] %vm1423_vm7, %v4006_v18  ;;  %1469 = vst.msk [vmem:[#allocation2 + $0x3c0] sm:$0xff] %vm1423_vm7, %v4005_v0 }
 0x161   : > { %1476 = vst.msk [vmem:[#allocation2 + $0x440] sm:$0xf] %vm1427_vm8, %v4021_v3  ;;  %v4024_v20 = vpop.permute.xlu0 %4023 }
 0x162   : > { %1475 = vst.msk [vmem:[#allocation2 + $0x430] sm:$0xff] %vm1423_vm7, %v4020_v59  ;;  %v4029_v45 = vpop.permute.xlu1 %4028  ;;  %1474 = vst.msk [vmem:[#allocation2 + $0x420] sm:$0xff] %vm1423_vm7, %v4016_v6  ;;  %v4026_v37 = vunpack.i.h.bf16 %v4024_v20  ;;  %v4025_v25 = vunpack.i.l.bf16 %v4024_v20 }
 0x163   : > { %1473 = vst.msk [vmem:[#allocation2 + $0x410] sm:$0xff] %vm1423_vm7, %v4015_v38  ;;  %v4031_v23 = vunpack.i.h.bf16 %v4029_v45  ;;  %v4030_v24 = vunpack.i.l.bf16 %v4029_v45 }
 0x164   : > { %1478 = vst.msk [vmem:[#allocation2 + $0x470] sm:$0xff] %vm1423_vm7, %v4026_v37  ;;  %1477 = vst.msk [vmem:[#allocation2 + $0x460] sm:$0xff] %vm1423_vm7, %v4025_v25 }
 0x165   : > { %1480 = vst.msk [vmem:[#allocation2 + $0x490] sm:$0xf] %vm1427_vm8, %v4031_v23  ;;  %v4034_v2 = vpop.permute.xlu0 %4033 }
 0x166   : > { %1479 = vst.msk [vmem:[#allocation2 + $0x480] sm:$0xff] %vm1423_vm7, %v4030_v24  ;;  %v4039_v35 = vpop.permute.xlu1 %4038  ;;  %v4036_v10 = vunpack.i.h.bf16 %v4034_v2  ;;  %v4035_v33 = vunpack.i.l.bf16 %v4034_v2 }
 0x167   : > { %v4041_v4 = vunpack.i.h.bf16 %v4039_v35  ;;  %v4040_v22 = vunpack.i.l.bf16 %v4039_v35 }
 0x168   : > { %1482 = vst.msk [vmem:[#allocation2 + $0x4c0] sm:$0xff] %vm1423_vm7, %v4036_v10  ;;  %1481 = vst.msk [vmem:[#allocation2 + $0x4b0] sm:$0xff] %vm1423_vm7, %v4035_v33 }
 0x169   : > { %1484 = vst.msk [vmem:[#allocation2 + $0x4e0] sm:$0xf] %vm1427_vm8, %v4041_v4  ;;  %v4044_v29 = vpop.permute.xlu0 %4043 }
 0x16a   : > { %1483 = vst.msk [vmem:[#allocation2 + $0x4d0] sm:$0xff] %vm1423_vm7, %v4040_v22  ;;  %v4049_v36 = vpop.permute.xlu1 %4048  ;;  %v4046_v9 = vunpack.i.h.bf16 %v4044_v29  ;;  %v4045_v11 = vunpack.i.l.bf16 %v4044_v29 }
 0x16b   : > { %v4051_v17 = vunpack.i.h.bf16 %v4049_v36  ;;  %v4050_v15 = vunpack.i.l.bf16 %v4049_v36 }
 0x16c   : > { %1486 = vst.msk [vmem:[#allocation2 + $0x510] sm:$0xff] %vm1423_vm7, %v4046_v9  ;;  %1485 = vst.msk [vmem:[#allocation2 + $0x500] sm:$0xff] %vm1423_vm7, %v4045_v11 }
 0x16d   : > { %1488 = vst.msk [vmem:[#allocation2 + $0x530] sm:$0xf] %vm1427_vm8, %v4051_v17  ;;  %v4054_v49 = vpop.permute.xlu0 %4053 }
 0x16e   : > { %1487 = vst.msk [vmem:[#allocation2 + $0x520] sm:$0xff] %vm1423_vm7, %v4050_v15  ;;  %v4059_v63 = vpop.permute.xlu1 %4058  ;;  %v4056_v47 = vunpack.i.h.bf16 %v4054_v49  ;;  %v4055_v61 = vunpack.i.l.bf16 %v4054_v49 }
 0x16f   : > { %v4061_v12 = vunpack.i.h.bf16 %v4059_v63  ;;  %v4060_v14 = vunpack.i.l.bf16 %v4059_v63 }
 0x170   : > { %1490 = vst.msk [vmem:[#allocation2 + $0x560] sm:$0xff] %vm1423_vm7, %v4056_v47  ;;  %1489 = vst.msk [vmem:[#allocation2 + $0x550] sm:$0xff] %vm1423_vm7, %v4055_v61 }
 0x171   : > { %1492 = vst.msk [vmem:[#allocation2 + $0x580] sm:$0xf] %vm1427_vm8, %v4061_v12  ;;  %v4064_v32 = vpop.permute.xlu0 %4063 }
 0x172   : > { %1491 = vst.msk [vmem:[#allocation2 + $0x570] sm:$0xff] %vm1423_vm7, %v4060_v14  ;;  %v4069_v21 = vpop.permute.xlu1 %4068  ;;  %v4066_v1 = vunpack.i.h.bf16 %v4064_v32  ;;  %v4065_v43 = vunpack.i.l.bf16 %v4064_v32 }
 0x173   : > { %v4071_v53 = vunpack.i.h.bf16 %v4069_v21  ;;  %v4070_v13 = vunpack.i.l.bf16 %v4069_v21 }
 0x174   : > { %1494 = vst.msk [vmem:[#allocation2 + $0x5b0] sm:$0xff] %vm1423_vm7, %v4066_v1  ;;  %1493 = vst.msk [vmem:[#allocation2 + $0x5a0] sm:$0xff] %vm1423_vm7, %v4065_v43 }
 0x175   : > { %1496 = vst.msk [vmem:[#allocation2 + $0x5d0] sm:$0xf] %vm1427_vm8, %v4071_v53  ;;  %v4074_v5 = vpop.permute.xlu0 %4073 }
 0x176   : > { %1495 = vst.msk [vmem:[#allocation2 + $0x5c0] sm:$0xff] %vm1423_vm7, %v4070_v13  ;;  %v4079_v62 = vpop.permute.xlu1 %4078  ;;  %v4076_v30 = vunpack.i.h.bf16 %v4074_v5  ;;  %v4075_v34 = vunpack.i.l.bf16 %v4074_v5 }
 0x177   : > { %v4081_v8 = vunpack.i.h.bf16 %v4079_v62  ;;  %v4080_v26 = vunpack.i.l.bf16 %v4079_v62 }
 0x178   : > { %1498 = vst.msk [vmem:[#allocation2 + $0x600] sm:$0xff] %vm1423_vm7, %v4076_v30  ;;  %1497 = vst.msk [vmem:[#allocation2 + $0x5f0] sm:$0xff] %vm1423_vm7, %v4075_v34 }
 0x179   : > { %1500 = vst.msk [vmem:[#allocation2 + $0x620] sm:$0xf] %vm1427_vm8, %v4081_v8  ;;  %v4084_v54 = vpop.permute.xlu0 %4083 }
 0x17a   : > { %1499 = vst.msk [vmem:[#allocation2 + $0x610] sm:$0xff] %vm1423_vm7, %v4080_v26  ;;  %v4089_v56 = vpop.permute.xlu1 %4088  ;;  %v4086_v57 = vunpack.i.h.bf16 %v4084_v54  ;;  %v4085_v41 = vunpack.i.l.bf16 %v4084_v54 }
 0x17b   : > { %v4091_v50 = vunpack.i.h.bf16 %v4089_v56  ;;  %v4090_v19 = vunpack.i.l.bf16 %v4089_v56 }
 0x17c   : > { %1502 = vst.msk [vmem:[#allocation2 + $0x650] sm:$0xff] %vm1423_vm7, %v4086_v57  ;;  %1501 = vst.msk [vmem:[#allocation2 + $0x640] sm:$0xff] %vm1423_vm7, %v4085_v41 }
 0x17d   : > { %1504 = vst.msk [vmem:[#allocation2 + $0x670] sm:$0xf] %vm1427_vm8, %v4091_v50  ;;  %v4094_v44 = vpop.permute.xlu0 %4093 }
 0x17e   : > { %1503 = vst.msk [vmem:[#allocation2 + $0x660] sm:$0xff] %vm1423_vm7, %v4090_v19  ;;  %v4099_v55 = vpop.permute.xlu1 %4098  ;;  %v4096_v48 = vunpack.i.h.bf16 %v4094_v44  ;;  %v4095_v39 = vunpack.i.l.bf16 %v4094_v44 }
 0x17f   : > { %v4101_v40 = vunpack.i.h.bf16 %v4099_v55  ;;  %v4100_v42 = vunpack.i.l.bf16 %v4099_v55 }
 0x180   : > { %1506 = vst.msk [vmem:[#allocation2 + $0x6a0] sm:$0xff] %vm1423_vm7, %v4096_v48  ;;  %1505 = vst.msk [vmem:[#allocation2 + $0x690] sm:$0xff] %vm1423_vm7, %v4095_v39 }
 0x181   : > { %1508 = vst.msk [vmem:[#allocation2 + $0x6c0] sm:$0xf] %vm1427_vm8, %v4101_v40  ;;  %v4104_v51 = vpop.permute.xlu0 %4103 }
 0x182   : > { %1507 = vst.msk [vmem:[#allocation2 + $0x6b0] sm:$0xff] %vm1423_vm7, %v4100_v42  ;;  %v4109_v28 = vpop.permute.xlu1 %4108  ;;  %v4106_v52 = vunpack.i.h.bf16 %v4104_v51  ;;  %v4105_v27 = vunpack.i.l.bf16 %v4104_v51 }
 0x183   : > { %v4111_v31 = vunpack.i.h.bf16 %v4109_v28  ;;  %v4110_v46 = vunpack.i.l.bf16 %v4109_v28 }
 0x184   : > { %1510 = vst.msk [vmem:[#allocation2 + $0x6f0] sm:$0xff] %vm1423_vm7, %v4106_v52  ;;  %1509 = vst.msk [vmem:[#allocation2 + $0x6e0] sm:$0xff] %vm1423_vm7, %v4105_v27 }
 0x185   : > { %1512 = vst.msk [vmem:[#allocation2 + $0x710] sm:$0xf] %vm1427_vm8, %v4111_v31  ;;  %v4114_v0 = vpop.permute.xlu0 %4113 }
 0x186   : > { %1511 = vst.msk [vmem:[#allocation2 + $0x700] sm:$0xff] %vm1423_vm7, %v4110_v46  ;;  %v4119_v16 = vpop.permute.xlu1 %4118  ;;  %v4116_v58 = vunpack.i.h.bf16 %v4114_v0  ;;  %v4115_v3 = vunpack.i.l.bf16 %v4114_v0 }
 0x187   : > { %v4121_v7 = vunpack.i.h.bf16 %v4119_v16  ;;  %v4120_v18 = vunpack.i.l.bf16 %v4119_v16 }
 0x188   : > { %1514 = vst.msk [vmem:[#allocation2 + $0x740] sm:$0xff] %vm1423_vm7, %v4116_v58  ;;  %1513 = vst.msk [vmem:[#allocation2 + $0x730] sm:$0xff] %vm1423_vm7, %v4115_v3 }
 0x189   : > { %1516 = vst.msk [vmem:[#allocation2 + $0x760] sm:$0xf] %vm1427_vm8, %v4121_v7  ;;  %v4124_v38 = vpop.permute.xlu0 %4123 }
 0x18a   : > { %1515 = vst.msk [vmem:[#allocation2 + $0x750] sm:$0xff] %vm1423_vm7, %v4120_v18  ;;  %v4129_v59 = vpop.permute.xlu1 %4128  ;;  %v4126_v45 = vunpack.i.h.bf16 %v4124_v38  ;;  %v4125_v23 = vunpack.i.l.bf16 %v4124_v38 }
 0x18b   : > { %v4131_v60 = vunpack.i.h.bf16 %v4129_v59  ;;  %v4130_v6 = vunpack.i.l.bf16 %v4129_v59 }
 0x18c   : > { %1518 = vst.msk [vmem:[#allocation2 + $0x790] sm:$0xff] %vm1423_vm7, %v4126_v45  ;;  %1517 = vst.msk [vmem:[#allocation2 + $0x780] sm:$0xff] %vm1423_vm7, %v4125_v23 }
 0x18d   : > { %1520 = vst.msk [vmem:[#allocation2 + $0x7b0] sm:$0xf] %vm1427_vm8, %v4131_v60  ;;  %v4134_v25 = vpop.permute.xlu0 %4133 }
 0x18e   : > { %1519 = vst.msk [vmem:[#allocation2 + $0x7a0] sm:$0xff] %vm1423_vm7, %v4130_v6  ;;  %v4139_v24 = vpop.permute.xlu1 %4138  ;;  %v4136_v35 = vunpack.i.h.bf16 %v4134_v25  ;;  %v4135_v4 = vunpack.i.l.bf16 %v4134_v25 }
 0x18f   : > { %v4141_v20 = vunpack.i.h.bf16 %v4139_v24  ;;  %v4140_v37 = vunpack.i.l.bf16 %v4139_v24 }
 0x190   : > { %1522 = vst.msk [vmem:[#allocation2 + $0x7e0] sm:$0xff] %vm1423_vm7, %v4136_v35  ;;  %1521 = vst.msk [vmem:[#allocation2 + $0x7d0] sm:$0xff] %vm1423_vm7, %v4135_v4 }
 0x191   : > { %1524 = vst.msk [vmem:[#allocation2 + $0x800] sm:$0xf] %vm1427_vm8, %v4141_v20  ;;  %v4144_v33 = vpop.permute.xlu0 %4143 }
 0x192   : > { %1523 = vst.msk [vmem:[#allocation2 + $0x7f0] sm:$0xff] %vm1423_vm7, %v4140_v37  ;;  %v4149_v22 = vpop.permute.xlu1 %4148  ;;  %v4146_v36 = vunpack.i.h.bf16 %v4144_v33  ;;  %v4145_v17 = vunpack.i.l.bf16 %v4144_v33 }
 0x193   : > { %v4151_v2 = vunpack.i.h.bf16 %v4149_v22  ;;  %v4150_v10 = vunpack.i.l.bf16 %v4149_v22 }
 0x194   : > { %1526 = vst.msk [vmem:[#allocation2 + $0x830] sm:$0xff] %vm1423_vm7, %v4146_v36  ;;  %1525 = vst.msk [vmem:[#allocation2 + $0x820] sm:$0xff] %vm1423_vm7, %v4145_v17 }
 0x195   : > { %1528 = vst.msk [vmem:[#allocation2 + $0x850] sm:$0xf] %vm1427_vm8, %v4151_v2  ;;  %v4154_v11 = vpop.permute.xlu0 %4153 }
 0x196   : > { %1527 = vst.msk [vmem:[#allocation2 + $0x840] sm:$0xff] %vm1423_vm7, %v4150_v10  ;;  %v4159_v15 = vpop.permute.xlu1 %4158  ;;  %v4156_v63 = vunpack.i.h.bf16 %v4154_v11  ;;  %v4155_v12 = vunpack.i.l.bf16 %v4154_v11 }
 0x197   : > { %v4161_v29 = vunpack.i.h.bf16 %v4159_v15  ;;  %v4160_v9 = vunpack.i.l.bf16 %v4159_v15 }
 0x198   : > { %1530 = vst.msk [vmem:[#allocation2 + $0x880] sm:$0xff] %vm1423_vm7, %v4156_v63  ;;  %1529 = vst.msk [vmem:[#allocation2 + $0x870] sm:$0xff] %vm1423_vm7, %v4155_v12 }
 0x199   : > { %1532 = vst.msk [vmem:[#allocation2 + $0x8a0] sm:$0xf] %vm1427_vm8, %v4161_v29  ;;  %v4164_v61 = vpop.permute.xlu0 %4163 }
 0x19a   : > { %1531 = vst.msk [vmem:[#allocation2 + $0x890] sm:$0xff] %vm1423_vm7, %v4160_v9  ;;  %v4169_v14 = vpop.permute.xlu1 %4168  ;;  %v4166_v21 = vunpack.i.h.bf16 %v4164_v61  ;;  %v4165_v53 = vunpack.i.l.bf16 %v4164_v61 }
 0x19b   : > { %v4171_v49 = vunpack.i.h.bf16 %v4169_v14  ;;  %v4170_v47 = vunpack.i.l.bf16 %v4169_v14 }
 0x19c   : > { %1534 = vst.msk [vmem:[#allocation2 + $0x8d0] sm:$0xff] %vm1423_vm7, %v4166_v21  ;;  %1533 = vst.msk [vmem:[#allocation2 + $0x8c0] sm:$0xff] %vm1423_vm7, %v4165_v53 }
 0x19d   : > { %1536 = vst.msk [vmem:[#allocation2 + $0x8f0] sm:$0xf] %vm1427_vm8, %v4171_v49 }
 0x19e   : > { %1535 = vst.msk [vmem:[#allocation2 + $0x8e0] sm:$0xff] %vm1423_vm7, %v4170_v47 }
 0x19f LB: >> { %v4172_v13 = vld [vmem:[%s6631_s1 + $0x60] sm:$0xff]   ;;  %v4226_v32 = vmov 0   ;;  %v4174_v43 = vld [vmem:[%s6631_s1 + $0x68] sm:$0xff]   ;;  %v4176_v8 = vld [vmem:[%s6631_s1 + $0x70] sm:$0xff]   ;;  %s3639_s13 = smul.u32 320, %s4222_s19  ;;  %vm3296_vm9 = vcmask 1041409   ;;  %s4222_s19 = sphi %s6174_s19, %s1964_s19  }
 0x1a0   : >> { %2214 = vmatprep.subr.bf16.mxu1 %v4226_v32  ;;  %2407 = vmatprep.subr.bf16.mxu0 %v4226_v32  ;;  %v4173_v1 = vld [vmem:[%s6631_s1] sm:$0xff]   ;;  %v4175_v62 = vld [vmem:[%s6631_s1 + $0x8] sm:$0xff]   ;;  %v4177_v26 = vld [vmem:[%s6631_s1 + $0x10] sm:$0xff]   ;;  %vm3299_vm10 = vcmask 1042434   ;;  %vm3302_vm11 = vcmask 1043459   ;;  %vm3305_vm12 = vcmask 1044484  }
 0x1a1   : >> { %2215 = vmatpush1.bf16.msra.mxu1 %v4172_v13  ;;  %2408 = vmatpush1.bf16.msra.mxu0 %v4173_v1  ;;  %v4178_v5 = vld [vmem:[%s6631_s1 + $0x78] sm:$0xff]   ;;  %v4180_v34 = vld [vmem:[%s6631_s1 + $0x80] sm:$0xff]   ;;  %v4182_v50 = vld [vmem:[%s6631_s1 + $0x88] sm:$0xff]   ;;  %s6236_s23 = scalar_lea.vmem [#allocation2], %s3639_s13  ;;  %vm3308_vm13 = vcmask 1045509   ;;  %vm3311_vm14 = vcmask 1046534  }
 0x1a2   : >> { %2216 = vmatprep.subr.bf16.mxu1 %v4226_v32  ;;  %2409 = vmatprep.subr.bf16.mxu0 %v4226_v32  ;;  %v4179_v30 = vld [vmem:[%s6631_s1 + $0x18] sm:$0xff]   ;;  %v4181_v56 = vld [vmem:[%s6631_s1 + $0x20] sm:$0xff]   ;;  %v4183_v19 = vld [vmem:[%s6631_s1 + $0x28] sm:$0xff]   ;;  %vm3314_vm15 = vcmask 1047559   ;;  %s3668_s16 = sshll.u32 %s4222_s19, 2  ;;  %s1964_s19 = sadd.s32 1, %s4222_s19  }
 0x1a3   : >> { %v4184_v54 = vld [vmem:[%s6631_s1 + $0x90] sm:$0xff]   ;;  %v4186_v48 = vld [vmem:[%s6631_s1 + $0x98] sm:$0xff]   ;;  %v4188_v31 = vld [vmem:[%s6631_s1 + $0xa0] sm:$0xff]   ;;  %p1961_p0 = scmp.ge.s32.totalorder %s1964_s19, 7  }
 0x1a4   : >> { %v4185_v57 = vld [vmem:[%s6631_s1 + $0x30] sm:$0xff]   ;;  %v4187_v28 = vld [vmem:[%s6631_s1 + $0x38] sm:$0xff]   ;;  %v4189_v46 = vld [vmem:[%s6631_s1 + $0x40] sm:$0xff]  }
 0x1a5   : >> { %2217 = vmatpush1.bf16.msra.mxu1 %v4174_v43  ;;  %2410 = vmatpush1.bf16.msra.mxu0 %v4175_v62  ;;  %v3405_v41 = vld [vmem:[%s6236_s23 + $0x58] sm:$0xff]  ;;  %v3407_v55 = vld [vmem:[%s6236_s23 + $0x68] sm:$0xff]  ;;  %v4192_v27 = vld [vmem:[%s6631_s1 + $0xb0] sm:$0xff]  }
 0x1a6   : >> { %2218 = vmatprep.subr.bf16.mxu1 %v4226_v32  ;;  %2411 = vmatprep.subr.bf16.mxu0 %v4226_v32  ;;  %v1970_v40 = vld [vmem:[%s6236_s23 + $0x8] sm:$0xff]  ;;  %v6241_v42 = vpack.c.bf16 %v3407_v55, %v3405_v41  ;;  %v1972_v44 = vld [vmem:[%s6236_s23 + $0x18] sm:$0xff]  ;;  %v4193_v16 = vld [vmem:[%s6631_s1 + $0x50] sm:$0xff]  }
 0x1a7   : >> { %v2002_v39 = vpack.c.bf16 %v1972_v44, %v1970_v40  ;;  %v4190_v51 = vld [vmem:[%s6631_s1 + $0xa8] sm:$0xff]   ;;  %v4194_v7 = vld [vmem:[%s6631_s1 + $0xb8] sm:$0xff]   ;;  %v3404_v0 = vld [vmem:[%s6236_s23 + $0x50] sm:$0xff] }
 0x1a8   : >> { %3472 = vmatprep.mubr.msk.bf16.mxu1 %vm16_vm0, %v6241_v42  ;;  %v4191_v52 = vld [vmem:[%s6631_s1 + $0x48] sm:$0xff]   ;;  %v4195_v18 = vld [vmem:[%s6631_s1 + $0x58] sm:$0xff]   ;;  %v3406_v58 = vld [vmem:[%s6236_s23 + $0x60] sm:$0xff] }
 0x1a9   : >> { %2219 = vmatpush1.bf16.msra.mxu1 %v4176_v8  ;;  %2412 = vmatpush1.bf16.msra.mxu0 %v4177_v26  ;;  %v1969_v3 = vld [vmem:[%s6236_s23] sm:$0xff]  ;;  %v1971_v59 = vld [vmem:[%s6236_s23 + $0x10] sm:$0xff]  ;;  %v3409_v6 = vld [vmem:[%s6236_s23 + $0x78] sm:$0xff]  ;;  %v2077_v38 = vpack.c.bf16 %v3406_v58, %v3404_v0 }
 0x1aa   : >> { %2220 = vmatprep.subr.bf16.mxu1 %v4226_v32  ;;  %2413 = vmatprep.subr.bf16.mxu0 %v4226_v32  ;;  %v4196_v60 = vld [vmem:[%s6631_s1 + $0xc0] sm:$0xff]   ;;  %v3411_v45 = vld [vmem:[%s6236_s23 + $0x88] sm:$0xff]  ;;  %v2001_v23 = vpack.c.bf16 %v1971_v59, %v1969_v3  ;;  %v1976_v20 = vld [vmem:[%s6236_s23 + $0x38] sm:$0xff] }
 0x1ab   : >> { %3492 = vmatprep.mubr.msk.bf16.mxu0 %vm16_vm0, %v2002_v39  ;;  %v1974_v24 = vld [vmem:[%s6236_s23 + $0x28] sm:$0xff]  ;;  %v2080_v37 = vpack.c.bf16 %v3411_v45, %v3409_v6  ;;  %v3408_v4 = vld [vmem:[%s6236_s23 + $0x70] sm:$0xff]  ;;  %v3410_v22 = vld [vmem:[%s6236_s23 + $0x80] sm:$0xff] }
 0x1ac   : >> { %v2004_v25 = vpack.c.bf16 %v1976_v20, %v1974_v24  ;;  %v4197_v35 = vld [vmem:[%s6631_s1 + $0xc8] sm:$0xff]   ;;  %v1973_v2 = vld [vmem:[%s6236_s23 + $0x20] sm:$0xff]  ;;  %v1975_v10 = vld [vmem:[%s6236_s23 + $0x30] sm:$0xff]  ;;  %v2079_v17 = vpack.c.bf16 %v3410_v22, %v3408_v4 }
 0x1ad   : >> { %2221 = vmatpush1.bf16.msra.mxu1 %v4178_v5  ;;  %2414 = vmatpush1.bf16.msra.mxu0 %v4179_v30  ;;  %v3413_v33 = vld [vmem:[%s6236_s23 + $0xa8] sm:$0xff]  ;;  %v3415_v36 = vld [vmem:[%s6236_s23 + $0xb8] sm:$0xff]  ;;  %v2003_v15 = vpack.c.bf16 %v1975_v10, %v1973_v2  ;;  %v4198_v29 = vld [vmem:[%s6631_s1 + $0xd0] sm:$0xff]  }
 0x1ae   : >> { %2222 = vmatprep.subr.bf16.mxu1 %v4226_v32  ;;  %2415 = vmatprep.subr.bf16.mxu0 %v4226_v32  ;;  %v6317_v9 = vpack.c.bf16 %v3415_v36, %v3413_v33  ;;  %v3412_v11 = vld [vmem:[%s6236_s23 + $0xa0] sm:$0xff]  ;;  %v3414_v63 = vld [vmem:[%s6236_s23 + $0xb0] sm:$0xff]  ;;  %v4199_v12 = vld [vmem:[%s6631_s1 + $0xd8] sm:$0xff]  }
 0x1af   : >> { %v3417_v14 = vld [vmem:[%s6236_s23 + $0xc8] sm:$0xff]  ;;  %v3419_v49 = vld [vmem:[%s6236_s23 + $0xd8] sm:$0xff]  ;;  %v6332_v47 = vpack.c.bf16 %v3414_v63, %v3412_v11  ;;  %v4200_v21 = vld [vmem:[%s6631_s1 + $0xe0] sm:$0xff]  }
 0x1b0   : >> { %v6335_v61 = vpack.c.bf16 %v3419_v49, %v3417_v14  ;;  %v3416_v53 = vld [vmem:[%s6236_s23 + $0xc0] sm:$0xff]  ;;  %v3418_v13 = vld [vmem:[%s6236_s23 + $0xd0] sm:$0xff]  ;;  %v4201_v1 = vld [vmem:[%s6631_s1 + $0xe8] sm:$0xff]  }
 0x1b1   : >> { %2223 = vmatpush1.bf16.msra.mxu1 %v4180_v34  ;;  %2416 = vmatpush1.bf16.msra.mxu0 %v4181_v56  ;;  %v3421_v43 = vld [vmem:[%s6236_s23 + $0xf8] sm:$0xff]  ;;  %v3423_v62 = vld [vmem:[%s6236_s23 + $0x108] sm:$0xff]  ;;  %v6354_v8 = vpack.c.bf16 %v3418_v13, %v3416_v53  ;;  %v4202_v5 = vld [vmem:[%s6631_s1 + $0xf0] sm:$0xff]  }
 0x1b2   : >> { %2224 = vmatprep.subr.bf16.mxu1 %v4226_v32  ;;  %2417 = vmatprep.subr.bf16.mxu0 %v4226_v32  ;;  %v6357_v26 = vpack.c.bf16 %v3423_v62, %v3421_v43  ;;  %v3420_v30 = vld [vmem:[%s6236_s23 + $0xf0] sm:$0xff]  ;;  %v3422_v34 = vld [vmem:[%s6236_s23 + $0x100] sm:$0xff]  ;;  %v3425_v56 = vld [vmem:[%s6236_s23 + $0x118] sm:$0xff] }
 0x1b3   : >> { %v4204_v41 = vld [vmem:[%s6631_s1 + $0x100] sm:$0xff]   ;;  %v3424_v55 = vld [vmem:[%s6236_s23 + $0x110] sm:$0xff]  ;;  %v3431_v44 = vld [vmem:[%s6236_s23 + $0x158] sm:$0xff] }
 0x1b4   : >> { %v3426_v40 = vld [vmem:[%s6236_s23 + $0x120] sm:$0xff]  ;;  %v3434_v58 = vld [vmem:[%s6236_s23 + $0x170] sm:$0xff]  ;;  %v3529_v59 = vld [vmem:[%s6236_s23 + $0x1a8] sm:$0xff] }
 0x1b5   : >> { %2225 = vmatpush1.bf16.msra.mxu1 %v4182_v50  ;;  %2418 = vmatpush1.bf16.msra.mxu0 %v4183_v19  ;;  %v3427_v50 = vld [vmem:[%s6236_s23 + $0x128] sm:$0xff]  ;;  %v4203_v19 = vld [vmem:[%s6631_s1 + $0xf8] sm:$0xff]   ;;  %v2087_v39 = vpack.c.bf16 %v3426_v40, %v3424_v55  ;;  %v3432_v0 = vld [vmem:[%s6236_s23 + $0x160] sm:$0xff] }
 0x1b6   : >> { %2226 = vmatprep.subr.bf16.mxu1 %v4226_v32  ;;  %2419 = vmatprep.subr.bf16.mxu0 %v4226_v32  ;;  %v2091_v3 = vpack.c.bf16 %v3434_v58, %v3432_v0  ;;  %v3526_v6 = vld [vmem:[%s6236_s23 + $0x190] sm:$0xff]  ;;  %v3531_v45 = vld [vmem:[%s6236_s23 + $0x1b8] sm:$0xff] }
 0x1b9   : >> { %2227 = vmatpush1.bf16.msra.mxu1 %v4184_v54  ;;  %2420 = vmatpush1.bf16.msra.mxu0 %v4185_v57  ;;  %v6377_v54 = vpack.c.bf16 %v3422_v34, %v3420_v30  ;;  %v6380_v57 = vpack.c.bf16 %v3427_v50, %v3425_v56 }
 0x1ba   : >> { %2228 = vmatprep.subr.bf16.mxu1 %v4226_v32  ;;  %2421 = vmatprep.subr.bf16.mxu0 %v4226_v32 }
 0x1bd   : >> { %2229 = vmatpush1.bf16.msra.mxu1 %v4186_v48  ;;  %2422 = vmatpush1.bf16.msra.mxu0 %v4187_v28  ;;  %v4205_v48 = vld [vmem:[%s6631_s1 + $0x108] sm:$0xff]  }
 0x1be   : >> { %2230 = vmatprep.subr.bf16.mxu1 %v4226_v32  ;;  %2423 = vmatprep.subr.bf16.mxu0 %v4226_v32 }
 0x1c1   : >> { %2231 = vmatpush1.bf16.msra.mxu1 %v4188_v31  ;;  %2424 = vmatpush1.bf16.msra.mxu0 %v4189_v46  ;;  %v4206_v31 = vld [vmem:[%s6631_s1 + $0x110] sm:$0xff]   ;;  %v3428_v46 = vld [vmem:[%s6236_s23 + $0x140] sm:$0xff] }
 0x1c2   : >> { %2232 = vmatprep.subr.bf16.mxu1 %v4226_v32  ;;  %2425 = vmatprep.subr.bf16.mxu0 %v4226_v32 }
 0x1c5   : >> { %2233 = vmatpush1.bf16.msra.mxu1 %v4190_v51  ;;  %2426 = vmatpush1.bf16.msra.mxu0 %v4191_v52  ;;  %v3430_v51 = vld [vmem:[%s6236_s23 + $0x150] sm:$0xff]  ;;  %v3433_v52 = vld [vmem:[%s6236_s23 + $0x168] sm:$0xff] }
 0x1c6   : >> { %2234 = vmatprep.subr.bf16.mxu1 %v4226_v32  ;;  %2427 = vmatprep.subr.bf16.mxu0 %v4226_v32 }
 0x1c9   : >> { %2235 = vmatpush1.bf16.msra.mxu1 %v4192_v27  ;;  %2428 = vmatpush1.bf16.msra.mxu0 %v4193_v16  ;;  %v3435_v27 = vld [vmem:[%s6236_s23 + $0x178] sm:$0xff] }
 0x1ca   : >> { %2236 = vmatprep.subr.bf16.mxu1 %v4226_v32  ;;  %2429 = vmatprep.subr.bf16.mxu0 %v4226_v32  ;;  %v4207_v16 = vld [vmem:[%s6631_s1 + $0x118] sm:$0xff]  }
 0x1cd   : >> { %2237 = vmatpush1.bf16.msra.mxu1 %v4194_v7  ;;  %2430 = vmatpush1.bf16.msra.mxu0 %v4195_v18  ;;  %v2089_v7 = vpack.c.bf16 %v3430_v51, %v3428_v46  ;;  %v2092_v18 = vpack.c.bf16 %v3435_v27, %v3433_v52 }
 0x1ce   : >> { %3808 = vmatprep.subr.bf16.mxu1 %v4226_v32  ;;  %2677 = vmatprep.subr.bf16.mxu0 %v4226_v32 }
 0x1d0   : >> { %2247 = vmatmul.mubr.bf16.vlgmr.msra.gmra.mrb[0].mxu1 %v2077_v38  ;;  %2440 = vmatmul.mubr.bf16.vlgmr.msra.gmra.mrb[0].mxu0 %v2001_v23  ;;  %v3533_v23 = vld [vmem:[%s6236_s23 + $0x1c8] sm:$0xff] }
 0x1d1   : >> { %3820 = vmatpush1.bf16.msra.mxu1 %v4196_v60  ;;  %2678 = vmatpush1.bf16.msra.mxu0 %v4196_v60  ;;  %v2555_v20 = vpack.c.bf16 %v3533_v23, %v3531_v45 }
 0x1d2   : >> { %3809 = vmatprep.subr.bf16.mxu1 %v4226_v32  ;;  %2679 = vmatprep.subr.bf16.mxu0 %v4226_v32 }
 0x1d3   : >> { %3473 = vmatprep.mubr.msk.bf16.mxu1 %vm16_vm0, %v2080_v37  ;;  %3493 = vmatprep.mubr.msk.bf16.mxu0 %vm16_vm0, %v2004_v25  ;;  %v3532_v25 = vld [vmem:[%s6236_s23 + $0x1c0] sm:$0xff] }
 0x1d5   : >> { %3821 = vmatpush1.bf16.msra.mxu1 %v4197_v35  ;;  %2680 = vmatpush1.bf16.msra.mxu0 %v4197_v35 }
 0x1d6   : >> { %3810 = vmatprep.subr.bf16.mxu1 %v4226_v32  ;;  %2681 = vmatprep.subr.bf16.mxu0 %v4226_v32 }
 0x1d8   : >> { %2255 = vmatmul.mubr.bf16.gmra.mrb[4].mxu1 %v2079_v17  ;;  %2448 = vmatmul.mubr.bf16.gmra.mrb[4].mxu0 %v2003_v15 }
 0x1d9   : >> { %3822 = vmatpush1.bf16.msra.mxu1 %v4198_v29  ;;  %2682 = vmatpush1.bf16.msra.mxu0 %v4198_v29 }
 0x1da   : >> { %3474 = vmatprep.mubr.msk.bf16.mxu1 %vm16_vm0, %v6317_v9  ;;  %3494 = vmatprep.mubr.msk.bf16.mxu0 %vm16_vm0, %v6241_v42  ;;  %v3429_v42 = vld [vmem:[%s6236_s23 + $0x148] sm:$0xff] }
 0x1db   : >> { %2683 = vmatprep.subr.bf16.mxu0 %v4226_v32  ;;  %3811 = vmatprep.subr.bf16.mxu1 %v4226_v32  ;;  %v2090_v28 = vpack.c.bf16 %v3431_v44, %v3429_v42 }
 0x1dd   : >> { %3823 = vmatpush1.bf16.msra.mxu1 %v4199_v12  ;;  %2684 = vmatpush1.bf16.msra.mxu0 %v4199_v12 }
 0x1de   : >> { %3812 = vmatprep.subr.bf16.mxu1 %v4226_v32  ;;  %2685 = vmatprep.subr.bf16.mxu0 %v4226_v32 }
 0x1e0   : >> { %2263 = vmatmul.mubr.bf16.gmra.mrb[8].mxu1 %v6332_v47  ;;  %2456 = vmatmul.mubr.bf16.gmra.mrb[8].mxu0 %v2077_v38  ;;  %v3528_v38 = vld [vmem:[%s6236_s23 + $0x1a0] sm:$0xff] }
 0x1e1   : >> { %3475 = vmatprep.mubr.msk.bf16.mxu1 %vm16_vm0, %v6335_v61  ;;  %3495 = vmatprep.mubr.msk.bf16.mxu0 %vm16_vm0, %v2080_v37  ;;  %v2552_v24 = vpack.c.bf16 %v3528_v38, %v3526_v6  ;;  %v3530_v37 = vld [vmem:[%s6236_s23 + $0x1b0] sm:$0xff] }
 0x1e2   : >> { %2686 = vmatpush1.bf16.msra.mxu0 %v4200_v21  ;;  %3824 = vmatpush1.bf16.msra.mxu1 %v4200_v21  ;;  %v2554_v35 = vpack.c.bf16 %v3532_v25, %v3530_v37 }
 0x1e3   : >> { %2687 = vmatprep.subr.bf16.mxu0 %v4226_v32  ;;  %3813 = vmatprep.subr.bf16.mxu1 %v4226_v32 }
 0x1e6   : >> { %2688 = vmatpush1.bf16.msra.mxu0 %v4201_v1  ;;  %3825 = vmatpush1.bf16.msra.mxu1 %v4201_v1 }
 0x1e7   : >> { %2689 = vmatprep.subr.bf16.mxu0 %v4226_v32  ;;  %3814 = vmatprep.subr.bf16.mxu1 %v4226_v32 }
 0x1e8   : >> { %2271 = vmatmul.mubr.bf16.gmra.mrb[12].mxu1 %v6354_v8  ;;  %2464 = vmatmul.mubr.bf16.gmra.mrb[12].mxu0 %v2079_v17 }
 0x1e9   : >> { %3476 = vmatprep.mubr.msk.bf16.mxu1 %vm16_vm0, %v6357_v26  ;;  %3496 = vmatprep.mubr.msk.bf16.mxu0 %vm16_vm0, %v6317_v9 }
 0x1ea   : >> { %2690 = vmatpush1.bf16.msra.mxu0 %v4202_v5  ;;  %3826 = vmatpush1.bf16.msra.mxu1 %v4202_v5 }
 0x1eb   : >> { %2691 = vmatprep.subr.bf16.mxu0 %v4226_v32  ;;  %3815 = vmatprep.subr.bf16.mxu1 %v4226_v32 }
 0x1ee   : >> { %2692 = vmatpush1.bf16.msra.mxu0 %v4203_v19  ;;  %3827 = vmatpush1.bf16.msra.mxu1 %v4203_v19 }
 0x1ef   : >> { %2693 = vmatprep.subr.bf16.mxu0 %v4226_v32  ;;  %3816 = vmatprep.subr.bf16.mxu1 %v4226_v32 }
 0x1f0   : >> { %2279 = vmatmul.mubr.bf16.gmra.mrb[16].mxu1 %v6377_v54  ;;  %2472 = vmatmul.mubr.bf16.gmra.mrb[16].mxu0 %v6332_v47 }
 0x1f1   : >> { %3477 = vmatprep.mubr.msk.bf16.mxu1 %vm16_vm0, %v6380_v57  ;;  %3497 = vmatprep.mubr.msk.bf16.mxu0 %vm16_vm0, %v6335_v61 }
 0x1f2   : >> { %2694 = vmatpush1.bf16.msra.mxu0 %v4204_v41  ;;  %3828 = vmatpush1.bf16.msra.mxu1 %v4204_v41 }
 0x1f3   : >> { %2695 = vmatprep.subr.bf16.mxu0 %v4226_v32  ;;  %3817 = vmatprep.subr.bf16.mxu1 %v4226_v32 }
 0x1f6   : >> { %2696 = vmatpush1.bf16.msra.mxu0 %v4205_v48  ;;  %3829 = vmatpush1.bf16.msra.mxu1 %v4205_v48 }
 0x1f7   : >> { %2697 = vmatprep.subr.bf16.mxu0 %v4226_v32  ;;  %3818 = vmatprep.subr.bf16.mxu1 %v4226_v32 }
 0x1f8   : >> { %2287 = vmatmul.mubr.bf16.gmra.mrb[20].mxu1 %v2087_v39  ;;  %2480 = vmatmul.mubr.bf16.gmra.mrb[20].mxu0 %v6354_v8 }
 0x1f9   : >> { %3478 = vmatprep.mubr.msk.bf16.mxu1 %vm16_vm0, %v2090_v28  ;;  %3498 = vmatprep.mubr.msk.bf16.mxu0 %vm16_vm0, %v6357_v26 }
 0x1fa   : >> { %2698 = vmatpush1.bf16.msra.mxu0 %v4206_v31  ;;  %3830 = vmatpush1.bf16.msra.mxu1 %v4206_v31 }
 0x1fb   : >> { %2699 = vmatprep.subr.bf16.mxu0 %v4226_v32  ;;  %3819 = vmatprep.subr.bf16.mxu1 %v4226_v32  ;;  %v3527_v32 = vld [vmem:[%s6236_s23 + $0x198] sm:$0xff]  ;;  %s3359_s23 = smul.u32 28, %s4218_s2  ;;  %s323_s2 = sadd.s32 (%p1961_p0), 1, %s4218_s2  }
 0x1fc   : >> { %v2553_v60 = vpack.c.bf16 %v3529_v59, %v3527_v32  ;;  %p320_p1 = scmp.ge.s32.totalorder (%p1961_p0), %s323_s2, 8  }
 0x1fd   : >> { %s3360_s17 = sadd.s32 %s3668_s16, %s3359_s23 }
 0x1fe   : >> { %2700 = vmatpush1.bf16.msra.mxu0 %v4207_v16  ;;  %3831 = vmatpush1.bf16.msra.mxu1 %v4207_v16  ;;  %s3637_s18 = sshll.u32 %s3360_s17, 2 }
 0x1ff   : >> { %s6578_s22 = scalar_lea.vmem %s6633_s3, %s3637_s18 }
 0x200   : >> { %2295 = vmatmul.mubr.bf16.gmra.mrb[24].mxu1 %v2089_v7  ;;  %2488 = vmatmul.mubr.bf16.gmra.mrb[24].mxu0 %v6377_v54 }
 0x201   : >> { %3479 = vmatprep.mubr.msk.bf16.mxu1 %vm16_vm0, %v2092_v18  ;;  %3499 = vmatprep.mubr.msk.bf16.mxu0 %vm16_vm0, %v6380_v57 }
 0x208   : >> { %2303 = vmatmul.mubr.bf16.gmra.mrb[28].mxu1 %v2091_v3  ;;  %2496 = vmatmul.mubr.bf16.gmra.mrb[28].mxu0 %v2087_v39 }
 0x209   : >> { %3574 = vmatprep.mubr.msk.bf16.mxu1 %vm16_vm0, %v2090_v28  ;;  %3570 = vmatprep.mubr.msk.bf16.mxu0 %vm16_vm0, %v6317_v9 }
 0x210   : >> { %2742 = vmatmul.mubr.bf16.vlgmr.msra.gmra.mrb[32].mxu1 %v2089_v7  ;;  %2710 = vmatmul.mubr.bf16.vlgmr.msra.gmra.mrb[0].mxu0 %v6332_v47 }
 0x211   : >> { %3575 = vmatprep.mubr.msk.bf16.mxu1 %vm16_vm0, %v2092_v18  ;;  %3571 = vmatprep.mubr.msk.bf16.mxu0 %vm16_vm0, %v6335_v61 }
 0x218   : >> { %2750 = vmatmul.mubr.bf16.gmra.mrb[36].mxu1 %v2091_v3  ;;  %2718 = vmatmul.mubr.bf16.gmra.mrb[4].mxu0 %v6354_v8 }
 0x219   : >> { %3576 = vmatprep.mubr.msk.bf16.mxu1 %vm16_vm0, %v2553_v60  ;;  %3572 = vmatprep.mubr.msk.bf16.mxu0 %vm16_vm0, %v6357_v26 }
 0x220   : >> { %2758 = vmatmul.mubr.bf16.gmra.mrb[40].mxu1 %v2552_v24  ;;  %2726 = vmatmul.mubr.bf16.gmra.mrb[8].mxu0 %v6377_v54 }
 0x221   : >> { %3577 = vmatprep.mubr.msk.bf16.mxu1 %vm16_vm0, %v2555_v20  ;;  %3573 = vmatprep.mubr.msk.bf16.mxu0 %vm16_vm0, %v6380_v57 }
 0x228   : >> { %2766 = vmatmul.mubr.bf16.gmra.mrb[44].mxu1 %v2554_v35  ;;  %2734 = vmatmul.mubr.bf16.gmra.mrb[12].mxu0 %v2087_v39  ;;  %v4227_v35 = vmov 1983009808  }
 0x2a3   : >> { %v2248_v4 = vpop.f32.mrb[0].mxu1 }
 0x2a4   : >> { %v2250_v22 = vpop.f32.mrb[1].mxu1 }
 0x2a5   : >> { %v6449_v2 = vpop.f32.mrb[2].mxu1  ;;  %v2808_v22 = vunpack.c.l.s4 %v4227_v35 }
 0x2a6   : >> { %v2253_v10 = vpop.f32.mrb[3].mxu1 }
 0x2a7   : >> { %v2810_v10 = vlaneseq }
 0x2ab   : >> { %v6451_v33 = vpop.f32.mrb[4].mxu1 }
 0x2ac   : >> { %v2258_v36 = vpop.f32.mrb[5].mxu1 }
 0x2ad   : >> { %v6453_v17 = vpop.f32.mrb[6].mxu1 }
 0x2ae   : >> { %v2261_v15 = vpop.f32.mrb[7].mxu1 }
 0x2b3   : >> { %v6455_v29 = vpop.f32.mrb[8].mxu1 }
 0x2b4   : >> { %v2266_v9 = vpop.f32.mrb[9].mxu1 }
 0x2b5   : >> { %v6457_v11 = vpop.f32.mrb[10].mxu1 }
 0x2b6   : >> { %v2269_v63 = vpop.f32.mrb[11].mxu1 }
 0x2bb   : >> { %v6459_v12 = vpop.f32.mrb[12].mxu1 }
 0x2bc   : >> { %v2274_v14 = vpop.f32.mrb[13].mxu1 }
 0x2bd   : >> { %v6461_v49 = vpop.f32.mrb[14].mxu1 }
 0x2be   : >> { %v2277_v47 = vpop.f32.mrb[15].mxu1 }
 0x2bf   : >> { %v2809_v47 = vunpack.c.0.s8 %v2808_v22 }
 0x2c3   : >> { %v2280_v61 = vpop.f32.mrb[16].mxu1  ;;  %v2473_v21 = vpop.f32.mrb[16].mxu0 }
 0x2c4   : >> { %v2282_v53 = vpop.f32.mrb[17].mxu1  ;;  %v2474_v13 = vadd.f32 %v2473_v21, %v2280_v61  ;;  %v2475_v1 = vpop.f32.mrb[17].mxu0  ;;  %v2811_v61 = vshrl.u32 %v2810_v10, 7 }
 0x2c5   : >> { %v2283_v43 = vpop.f32.mrb[18].mxu1  ;;  %v2476_v62 = vpop.f32.mrb[18].mxu0 }
 0x2c6   : >> { %v2285_v8 = vpop.f32.mrb[19].mxu1  ;;  %v2477_v26 = vadd.f32 %v2476_v62, %v2283_v43  ;;  %v2478_v5 = vpop.f32.mrb[19].mxu0 }
 0x2c7   : >> { %v6473_v8 = vsub.s32 %v2809_v47, %v2811_v61  ;;  %v6991_v5 = vld [vmem:[#allocation3_spill] sm:$0xff] }
 0x2cb   : >> { %v2288_v30 = vpop.f32.mrb[20].mxu1  ;;  %v2481_v34 = vpop.f32.mrb[20].mxu0 }
 0x2cc   : >> { %v2290_v56 = vpop.f32.mrb[21].mxu1  ;;  %v2482_v50 = vadd.f32 %v2481_v34, %v2288_v30  ;;  %v2483_v19 = vpop.f32.mrb[21].mxu0 }
 0x2cd   : >> { %v2291_v54 = vpop.f32.mrb[22].mxu1  ;;  %v2484_v57 = vpop.f32.mrb[22].mxu0  ;;  %v6484_v19 = vrot.slane %v6991_v5, %v6473_v8 }
 0x2ce   : >> { %v2293_v41 = vpop.f32.mrb[23].mxu1  ;;  %v2485_v55 = vadd.f32 %v2484_v57, %v2291_v54  ;;  %v2486_v40 = vpop.f32.mrb[23].mxu0 }
 0x2cf   : >> { %v6491_v54 = vcombine.high %v6484_v19, %v6484_v19 }
 0x2d3   : >> { %v2296_v42 = vpop.f32.mrb[24].mxu1  ;;  %v2489_v44 = vpop.f32.mrb[24].mxu0 }
 0x2d4   : >> { %v2298_v48 = vpop.f32.mrb[25].mxu1  ;;  %v2490_v39 = vadd.f32 %v2489_v44, %v2296_v42  ;;  %v2491_v28 = vpop.f32.mrb[25].mxu0 }
 0x2d5   : >> { %v2299_v31 = vpop.f32.mrb[26].mxu1  ;;  %v2492_v46 = vpop.f32.mrb[26].mxu0 }
 0x2d6   : >> { %v2301_v51 = vpop.f32.mrb[27].mxu1  ;;  %v2493_v52 = vadd.f32 %v2492_v46, %v2299_v31  ;;  %v2494_v27 = vpop.f32.mrb[27].mxu0 }
 0x2db   : >> { %v2304_v16 = vpop.f32.mrb[28].mxu1  ;;  %v2497_v7 = vpop.f32.mrb[28].mxu0 }
 0x2dc   : >> { %v2306_v18 = vpop.f32.mrb[29].mxu1  ;;  %v6463_v0 = vadd.f32 %v2497_v7, %v2304_v16  ;;  %v2499_v58 = vpop.f32.mrb[29].mxu0  ;;  %v6499_v16 = vrot.slane %v6484_v19, 1  ;;  %v6502_v7 = vrot.slane %v6491_v54, 1 }
 0x2dd   : >> { %v2307_v3 = vpop.f32.mrb[30].mxu1  ;;  %v2500_v32 = vpop.f32.mrb[30].mxu0 }
 0x2de   : >> { %v2309_v59 = vpop.f32.mrb[31].mxu1  ;;  %v6465_v60 = vadd.f32 %v2500_v32, %v2307_v3  ;;  %v2502_v6 = vpop.f32.mrb[31].mxu0 }
 0x2e3   : >> { %v2743_v38 = vpop.f32.mrb[32].mxu1  ;;  %v2711_v45 = vpop.f32.mrb[0].mxu0 }
 0x2e4   : >> { %v2782_v23 = vadd.f32 %v2743_v38, %v2474_v13  ;;  %v2745_v24 = vpop.f32.mrb[33].mxu1  ;;  %v3832_v20 = vadd.f32 %v2711_v45, %v2248_v4  ;;  %v2713_v37 = vpop.f32.mrb[1].mxu0 }
 0x2e5   : >> { %v2746_v25 = vpop.f32.mrb[34].mxu1  ;;  %v2714_v36 = vpop.f32.mrb[2].mxu0 }
 0x2e6   : >> { %v2783_v15 = vadd.f32 %v2746_v25, %v2477_v26  ;;  %v2748_v9 = vpop.f32.mrb[35].mxu1  ;;  %v3833_v63 = vadd.f32 %v2714_v36, %v6449_v2  ;;  %v2716_v14 = vpop.f32.mrb[3].mxu0  ;;  %v3069_v26 = vcombine.high %v6991_v5, %v6991_v5 }
 0x2eb   : >> { %v2751_v21 = vpop.f32.mrb[36].mxu1  ;;  %v2719_v53 = vpop.f32.mrb[4].mxu0 }
 0x2ec   : >> { %v6468_v1 = vadd.f32 %v2751_v21, %v2482_v50  ;;  %v2753_v13 = vpop.f32.mrb[37].mxu1  ;;  %v6471_v4 = vadd.f32 %v2719_v53, %v6451_v33  ;;  %v2721_v43 = vpop.f32.mrb[5].mxu0  ;;  %v6487_v33 = vrot.slane %v3069_v26, %v6473_v8 }
 0x2ed   : >> { %v2754_v62 = vpop.f32.mrb[38].mxu1  ;;  %v2722_v30 = vpop.f32.mrb[6].mxu0 }
 0x2ee   : >> { %v6477_v2 = vadd.f32 %v2754_v62, %v2485_v55  ;;  %v2756_v34 = vpop.f32.mrb[39].mxu1  ;;  %v6480_v56 = vadd.f32 %v2722_v30, %v6453_v17  ;;  %v2724_v50 = vpop.f32.mrb[7].mxu0  ;;  %v6496_v44 = vcombine.high %v6487_v33, %v6487_v33  ;;  %v6507_v3 = vrot.slane %v6487_v33, 1 }
 0x2f0   : >> { %v3089_v38 = vrot.slane %v6496_v44, 1 }
 0x2f3   : >> { %v2759_v57 = vpop.f32.mrb[40].mxu1  ;;  %v2727_v41 = vpop.f32.mrb[8].mxu0 }
 0x2f4   : >> { %v2786_v55 = vadd.f32 %v2759_v57, %v2490_v39  ;;  %v2761_v40 = vpop.f32.mrb[41].mxu1  ;;  %v3836_v42 = vadd.f32 %v2727_v41, %v6455_v29  ;;  %v2729_v17 = vpop.f32.mrb[9].mxu0 }
 0x2f5   : >> { %v2762_v48 = vpop.f32.mrb[42].mxu1  ;;  %v2730_v31 = vpop.f32.mrb[10].mxu0 }
 0x2f6   : >> { %v2794_v28 = vmax.f32 %v2782_v23, %v2786_v55  ;;  %v2787_v46 = vadd.f32 %v2762_v48, %v2493_v52  ;;  %v2764_v51 = vpop.f32.mrb[43].mxu1  ;;  %v2790_v27 = vmax.f32 %v3832_v20, %v3836_v42  ;;  %v3837_v39 = vadd.f32 %v2730_v31, %v6457_v11  ;;  %v2732_v29 = vpop.f32.mrb[11].mxu0 }
 0x2f8   : >> { %v2865_v18 = vcombine.high %v2794_v28, %v2794_v28  ;;  %v2872_v58 = vrot.slane %v2794_v28, %v6473_v8  ;;  %v6509_v32 = vmax.f32 %v2783_v15, %v2787_v46  ;;  %v2806_v52 = vcombine.high %v2790_v27, %v2790_v27 }
 0x2f9   : >> { %v2813_v59 = vrot.slane %v2790_v27, %v6473_v8  ;;  %v6512_v6 = vmax.f32 %v3833_v63, %v3837_v39 }
 0x2fa   : >> { %v2879_v45 = vrot.slane %v2865_v18, %v6473_v8  ;;  %v2880_v23 = vcombine.high %v2872_v58, %v2872_v58  ;;  %v3592_v11 = vrot.slane %v2872_v58, 9  ;;  %v2882_v24 = vcombine.high %v6509_v32, %v6509_v32 }
 0x2fb   : >> { %v2820_v20 = vrot.slane %v2806_v52, %v6473_v8  ;;  %v2821_v37 = vcombine.high %v2813_v59, %v2813_v59  ;;  %v3578_v25 = vrot.slane %v2813_v59, 9  ;;  %v2823_v35 = vcombine.high %v6512_v6, %v6512_v6  ;;  %v6521_v22 = vpop.f32.mrb[44].mxu1  ;;  %v6523_v63 = vpop.f32.mrb[12].mxu0 }
 0x2fc   : >> { %v2881_v10 = vcombine.high %v2879_v45, %v2879_v45  ;;  %v3593_v36 = vrot.slane %v2880_v23, 9  ;;  %v3594_v15 = vrot.slane %v2879_v45, 9  ;;  %v3050_v9 = vmax.f32 %v2872_v58, %v3592_v11  ;;  %v2769_v14 = vpop.f32.mrb[45].mxu1  ;;  %v2737_v13 = vpop.f32.mrb[13].mxu0 }
 0x2fd   : >> { %v2822_v47 = vcombine.high %v2820_v20, %v2820_v20  ;;  %v3579_v61 = vrot.slane %v2821_v37, 9  ;;  %v3580_v21 = vrot.slane %v2820_v20, 9  ;;  %v3036_v53 = vmax.f32 %v2813_v59, %v3578_v25  ;;  %v6525_v43 = vpop.f32.mrb[46].mxu1  ;;  %v6528_v50 = vpop.f32.mrb[14].mxu0 }
 0x2fe   : >> { %v3595_v62 = vrot.slane %v2881_v10, 9  ;;  %v3051_v26 = vmax.f32 %v2880_v23, %v3593_v36  ;;  %v3052_v30 = vmax.f32 %v2879_v45, %v3594_v15  ;;  %v3112_v34 = vadd.f32 %v6484_v19, %v3050_v9  ;;  %v2772_v57 = vpop.f32.mrb[47].mxu1  ;;  %v2740_v17 = vpop.f32.mrb[15].mxu0 }
 0x2ff   : >> { %v3581_v41 = vrot.slane %v2822_v47, 9  ;;  %v3037_v55 = vmax.f32 %v2821_v37, %v3579_v61  ;;  %v3038_v40 = vmax.f32 %v2820_v20, %v3580_v21  ;;  %v3098_v42 = vadd.f32 %v6484_v19, %v3036_v53 }
 0x300   : >> { %v3053_v48 = vmax.f32 %v2881_v10, %v3595_v62  ;;  %v3113_v28 = vadd.f32 %v6499_v16, %v3051_v26  ;;  %v3114_v31 = vadd.f32 %v6491_v54, %v3052_v30  ;;  %v3140_v46 = vmax.f32 %v3112_v34, 0.0 }
 0x301   : >> { %v3039_v51 = vmax.f32 %v2822_v47, %v3581_v41  ;;  %v3099_v27 = vadd.f32 %v6499_v16, %v3037_v55  ;;  %v3100_v39 = vadd.f32 %v6491_v54, %v3038_v40  ;;  %v3126_v29 = vmax.f32 %v3098_v42, 0.0 }
 0x302   : >> { %v3115_v18 = vadd.f32 %v6502_v7, %v3053_v48  ;;  %v3141_v58 = vmax.f32 %v3113_v28, 0.0  ;;  %v3142_v52 = vmax.f32 %v3114_v31, 0.0  ;;  %v3654_v59 = vpack.c.bf16 %v3140_v46, %v3140_v46 }
 0x303   : >> { %v3101_v45 = vadd.f32 %v6502_v7, %v3039_v51  ;;  %v3127_v23 = vmax.f32 %v3099_v27, 0.0  ;;  %v3128_v11 = vmax.f32 %v3100_v39, 0.0  ;;  %v3640_v20 = vpack.c.bf16 %v3126_v29, %v3126_v29 }
 0x304   : >> { %v3143_v37 = vmax.f32 %v3115_v18, 0.0  ;;  %v3655_v25 = vpack.c.bf16 %v3141_v58, %v3141_v58  ;;  %v3656_v10 = vpack.c.bf16 %v3142_v52, %v3142_v52  ;;  %v3281_v36 = vunpack.c.l.b16 %v3654_v59 }
 0x305   : >> { %v3129_v15 = vmax.f32 %v3101_v45, 0.0  ;;  %v3641_v9 = vpack.c.bf16 %v3127_v23, %v3127_v23  ;;  %v3642_v14 = vpack.c.bf16 %v3128_v11, %v3128_v11  ;;  %v3267_v47 = vunpack.c.l.b16 %v3640_v20 }
 0x306   : >> { %v3657_v61 = vpack.c.bf16 %v3143_v37, %v3143_v37  ;;  %v3282_v21 = vunpack.c.l.b16 %v3655_v25  ;;  %v3283_v53 = vunpack.c.l.b16 %v3656_v10  ;;  %v2830_v13 = vrot.slane %v6512_v6, %v6473_v8 }
 0x307   : >> { %v3643_v62 = vpack.c.bf16 %v3129_v15, %v3129_v15  ;;  %v3268_v26 = vunpack.c.l.b16 %v3641_v9  ;;  %v3269_v30 = vunpack.c.l.b16 %v3642_v14  ;;  %v2837_v34 = vrot.slane %v2823_v35, %v6473_v8 }
 0x308   : >> { %v3284_v57 = vunpack.c.l.b16 %v3657_v61  ;;  %v3326_v41 = vrot.slane %v3282_v21, 7  ;;  %v3328_v55 = vrot.slane %v3283_v53, 6  ;;  %v2838_v40 = vcombine.high %v2830_v13, %v2830_v13 }
 0x309   : >> { %v3270_v42 = vunpack.c.l.b16 %v3643_v62  ;;  %v3295_v17 = vrot.slane %v3268_v26, 7  ;;  %v3298_v48 = vrot.slane %v3269_v30, 6  ;;  %v2839_v28 = vcombine.high %v2837_v34, %v2837_v34 }
 0x30a   : >> { %v3327_v31 = vsel %vm3296_vm9, %v3326_v41, %v3281_v36  ;;  %v3330_v46 = vrot.slane %v3284_v57, 5  ;;  %v3582_v51 = vrot.slane %v2830_v13, 9  ;;  %v3583_v27 = vrot.slane %v2838_v40, 9 }
 0x30b   : >> { %v3297_v6 = vsel %vm3296_vm9, %v3295_v17, %v3267_v47  ;;  %v3301_v39 = vrot.slane %v3270_v42, 5  ;;  %v3329_v29 = vsel %vm3299_vm10, %v3328_v55, %v3327_v31  ;;  %v3584_v18 = vrot.slane %v2837_v34, 9 }
 0x30c   : >> { %v3300_v35 = vsel %vm3299_vm10, %v3298_v48, %v3297_v6  ;;  %v3585_v58 = vrot.slane %v2839_v28, 9  ;;  %v3040_v52 = vmax.f32 %v2830_v13, %v3582_v51  ;;  %v3041_v59 = vmax.f32 %v2838_v40, %v3583_v27 }
 0x30d   : >> { %v3042_v45 = vmax.f32 %v2837_v34, %v3584_v18  ;;  %v3303_v23 = vsel %vm3302_vm11, %v3301_v39, %v3300_v35  ;;  %v2889_v11 = vrot.slane %v6509_v32, %v6473_v8  ;;  %v2896_v20 = vrot.slane %v2882_v24, %v6473_v8 }
 0x30e   : >> { %v3043_v37 = vmax.f32 %v2839_v28, %v3585_v58  ;;  %v3102_v25 = vadd.f32 %v6487_v33, %v3040_v52  ;;  %v3103_v10 = vadd.f32 %v6507_v3, %v3041_v59  ;;  %v6554_v36 = vsel %vm3302_vm11, %v3330_v46, %v3329_v29 }
 0x30f   : >> { %v3104_v15 = vadd.f32 %v6496_v44, %v3042_v45  ;;  %v2897_v9 = vcombine.high %v2889_v11, %v2889_v11  ;;  %v2898_v14 = vcombine.high %v2896_v20, %v2896_v20  ;;  %v3596_v47 = vrot.slane %v2889_v11, 9 }
 0x310   : >> { %v3105_v32 = vadd.f32 %v3089_v38, %v3043_v37  ;;  %v3130_v24 = vmax.f32 %v3102_v25, 0.0  ;;  %v3131_v61 = vmax.f32 %v3103_v10, 0.0  ;;  %v3598_v21 = vrot.slane %v2896_v20, 9 }
 0x311   : >> { %v3132_v53 = vmax.f32 %v3104_v15, 0.0  ;;  %v3597_v13 = vrot.slane %v2897_v9, 9  ;;  %v3599_v62 = vrot.slane %v2898_v14, 9  ;;  %v3054_v26 = vmax.f32 %v2889_v11, %v3596_v47 }
 0x312   : >> { %v3133_v30 = vmax.f32 %v3105_v32, 0.0  ;;  %v3644_v34 = vpack.c.bf16 %v3130_v24, %v3130_v24  ;;  %v3645_v57 = vpack.c.bf16 %v3131_v61, %v3131_v61  ;;  %v3056_v41 = vmax.f32 %v2896_v20, %v3598_v21 }
 0x313   : >> { %v3646_v55 = vpack.c.bf16 %v3132_v53, %v3132_v53  ;;  %v3055_v40 = vmax.f32 %v2897_v9, %v3597_v13  ;;  %v3057_v42 = vmax.f32 %v2898_v14, %v3599_v62  ;;  %v3116_v17 = vadd.f32 %v6487_v33, %v3054_v26 }
 0x314   : >> { %v3647_v48 = vpack.c.bf16 %v3133_v30, %v3133_v30  ;;  %v3271_v28 = vunpack.c.l.b16 %v3644_v34  ;;  %v3272_v31 = vunpack.c.l.b16 %v3645_v57  ;;  %v3118_v46 = vadd.f32 %v6496_v44, %v3056_v41 }
 0x315   : >> { %v3273_v51 = vunpack.c.l.b16 %v3646_v55  ;;  %v3117_v27 = vadd.f32 %v6507_v3, %v3055_v40  ;;  %v3119_v6 = vadd.f32 %v3089_v38, %v3057_v42  ;;  %v3144_v39 = vmax.f32 %v3116_v17, 0.0 }
 0x316   : >> { %v3274_v29 = vunpack.c.l.b16 %v3647_v48  ;;  %v3304_v18 = vrot.slane %v3271_v28, 4  ;;  %v3307_v35 = vrot.slane %v3272_v31, 3  ;;  %v3146_v58 = vmax.f32 %v3118_v46, 0.0 }
 0x317   : >> { %v3310_v52 = vrot.slane %v3273_v51, 2  ;;  %v3145_v59 = vmax.f32 %v3117_v27, 0.0  ;;  %v3147_v45 = vmax.f32 %v3119_v6, 0.0  ;;  %v3658_v11 = vpack.c.bf16 %v3144_v39, %v3144_v39 }
 0x318   : >> { %v3306_v20 = vsel %vm3305_vm12, %v3304_v18, %v3303_v23  ;;  %v3313_v37 = vrot.slane %v3274_v29, 1  ;;  %v3660_v25 = vpack.c.bf16 %v3146_v58, %v3146_v58  ;;  %v3838_v10 = vadd.f32 %v6523_v63, %v6459_v12 }
 0x319   : >> { %v3309_v44 = vsel %vm3308_vm13, %v3307_v35, %v3306_v20  ;;  %v3659_v38 = vpack.c.bf16 %v3145_v59, %v3145_v59  ;;  %v3661_v15 = vpack.c.bf16 %v3147_v45, %v3147_v45  ;;  %v3285_v9 = vunpack.c.l.b16 %v3658_v11 }
 0x31a   : >> { %v3312_v14 = vsel %vm3311_vm14, %v3310_v52, %v3309_v44  ;;  %v3287_v47 = vunpack.c.l.b16 %v3660_v25  ;;  %v2792_v32 = vmax.f32 %v6471_v4, %v3838_v10  ;;  %v2788_v24 = vadd.f32 %v6521_v22, %v6463_v0 }
 0x31b   : >> { %v3315_v23 = vsel %vm3314_vm15, %v3313_v37, %v3312_v14  ;;  %v3286_v12 = vunpack.c.l.b16 %v3659_v38  ;;  %v3288_v63 = vunpack.c.l.b16 %v3661_v15  ;;  %v3332_v61 = vrot.slane %v3285_v9, 4 }
 0x31c   : >> { %v3350_v21 = vpack.c.b16 %v3315_v23, %v3315_v23  ;;  %v3336_v53 = vrot.slane %v3287_v47, 2  ;;  %v2840_v13 = vcombine.high %v2792_v32, %v2792_v32  ;;  %v2847_v62 = vrot.slane %v2792_v32, %v6473_v8 }
 0x31d   : >> { %v3333_v4 = vsel %vm3305_vm12, %v3332_v61, %v6554_v36  ;;  %v3334_v0 = vrot.slane %v3286_v12, 3  ;;  %v3338_v22 = vrot.slane %v3288_v63, 1  ;;  %v2796_v26 = vmax.f32 %v6468_v1, %v2788_v24 }
 0x31e   : >> { %3363 = vst [vmem:[%s6578_s22] sm:$0xf] %v3350_v21  ;;  %v2854_v30 = vrot.slane %v2840_v13, %v6473_v8  ;;  %v2855_v34 = vcombine.high %v2847_v62, %v2847_v62  ;;  %v3586_v57 = vrot.slane %v2847_v62, 9  ;;  %v3839_v41 = vadd.f32 %v6528_v50, %v6461_v49 }
 0x31f   : >> { %v3335_v55 = vsel %vm3308_vm13, %v3334_v0, %v3333_v4  ;;  %v2899_v40 = vcombine.high %v2796_v26, %v2796_v26  ;;  %v2906_v42 = vrot.slane %v2796_v26, %v6473_v8  ;;  %v2789_v36 = vadd.f32 %v6525_v43, %v6465_v60 }
 0x320   : >> { %v3337_v17 = vsel %vm3311_vm14, %v3336_v53, %v3335_v55  ;;  %v2856_v1 = vcombine.high %v2854_v30, %v2854_v30  ;;  %v3587_v48 = vrot.slane %v2855_v34, 9  ;;  %v3588_v28 = vrot.slane %v2854_v30, 9 }
 0x321   : >> { %v3339_v31 = vsel %vm3314_vm15, %v3338_v22, %v3337_v17  ;;  %v2913_v46 = vrot.slane %v2899_v40, %v6473_v8  ;;  %v2914_v51 = vcombine.high %v2906_v42, %v2906_v42  ;;  %v3044_v39 = vmax.f32 %v2847_v62, %v3586_v57 }
 0x322   : >> { %v3352_v49 = vpack.c.b16 %v3339_v31, %v3339_v31  ;;  %v3589_v50 = vrot.slane %v2856_v1, 9  ;;  %v3045_v27 = vmax.f32 %v2855_v34, %v3587_v48  ;;  %v3046_v6 = vmax.f32 %v2854_v30, %v3588_v28 }
 0x323   : >> { %v2915_v29 = vcombine.high %v2913_v46, %v2913_v46  ;;  %v3600_v18 = vrot.slane %v2906_v42, 9  ;;  %v3601_v35 = vrot.slane %v2914_v51, 9  ;;  %v3602_v52 = vrot.slane %v2913_v46, 9 }
 0x324   : >> { %3365 = vst [vmem:[%s6578_s22 + $0x8] sm:$0xf] %v3352_v49  ;;  %v3047_v60 = vmax.f32 %v2856_v1, %v3589_v50  ;;  %v3107_v43 = vadd.f32 %v6499_v16, %v3045_v27  ;;  %v3108_v58 = vadd.f32 %v6491_v54, %v3046_v6  ;;  %v3106_v25 = vadd.f32 %v6484_v19, %v3044_v39 }
 0x325   : >> { %v3603_v59 = vrot.slane %v2915_v29, 9  ;;  %v3058_v45 = vmax.f32 %v2906_v42, %v3600_v18  ;;  %v3059_v11 = vmax.f32 %v2914_v51, %v3601_v35  ;;  %v3060_v37 = vmax.f32 %v2913_v46, %v3602_v52 }
 0x326   : >> { %v3135_v20 = vmax.f32 %v3107_v43, 0.0  ;;  %v3109_v10 = vadd.f32 %v6502_v7, %v3047_v60  ;;  %v3136_v15 = vmax.f32 %v3108_v58, 0.0  ;;  %v3134_v12 = vmax.f32 %v3106_v25, 0.0 }
 0x327   : >> { %v3061_v44 = vmax.f32 %v2915_v29, %v3603_v59  ;;  %v3121_v38 = vadd.f32 %v6499_v16, %v3059_v11  ;;  %v3122_v9 = vadd.f32 %v6491_v54, %v3060_v37  ;;  %v3120_v47 = vadd.f32 %v6484_v19, %v3058_v45 }
 0x328   : >> { %v3649_v14 = vpack.c.bf16 %v3135_v20, %v3135_v20  ;;  %v3137_v63 = vmax.f32 %v3109_v10, 0.0  ;;  %v2793_v21 = vmax.f32 %v6480_v56, %v3839_v41  ;;  %v3650_v53 = vpack.c.bf16 %v3136_v15, %v3136_v15 }
 0x329   : >> { %v3123_v32 = vadd.f32 %v6502_v7, %v3061_v44  ;;  %v3149_v24 = vmax.f32 %v3121_v38, 0.0  ;;  %v3150_v23 = vmax.f32 %v3122_v9, 0.0  ;;  %v3148_v62 = vmax.f32 %v3120_v47, 0.0 }
 0x32a   : >> { %v3276_v13 = vunpack.c.l.b16 %v3649_v14  ;;  %v2863_v16 = vrot.slane %v2793_v21, %v6473_v8  ;;  %v2797_v54 = vmax.f32 %v6477_v2, %v2789_v36  ;;  %v3648_v22 = vpack.c.bf16 %v3134_v12, %v3134_v12 }
 0x32b   : >> { %v3663_v61 = vpack.c.bf16 %v3149_v24, %v3149_v24  ;;  %v3151_v4 = vmax.f32 %v3123_v32, 0.0  ;;  %v3664_v0 = vpack.c.bf16 %v3150_v23, %v3150_v23  ;;  %v3651_v19 = vpack.c.bf16 %v3137_v63, %v3137_v63 }
 0x32c   : >> { %v2864_v7 = vcombine.high %v2863_v16, %v2863_v16  ;;  %v3277_v30 = vunpack.c.l.b16 %v3650_v53  ;;  %v3590_v34 = vrot.slane %v2863_v16, 9  ;;  %v2922_v57 = vrot.slane %v2797_v54, %v6473_v8 }
 0x32d   : >> { %v3290_v26 = vunpack.c.l.b16 %v3663_v61  ;;  %v3316_v55 = vrot.slane %v3276_v13, 7  ;;  %v3662_v40 = vpack.c.bf16 %v3148_v62, %v3148_v62  ;;  %v3665_v56 = vpack.c.bf16 %v3151_v4, %v3151_v4 }
 0x32e   : >> { %v3591_v41 = vrot.slane %v2864_v7, 9  ;;  %v3291_v42 = vunpack.c.l.b16 %v3664_v0  ;;  %v3048_v17 = vmax.f32 %v2863_v16, %v3590_v34  ;;  %v2923_v1 = vcombine.high %v2922_v57, %v2922_v57 }
 0x32f   : >> { %v3604_v48 = vrot.slane %v2922_v57, 9  ;;  %v3275_v28 = vunpack.c.l.b16 %v3648_v22  ;;  %v3278_v31 = vunpack.c.l.b16 %v3651_v19  ;;  %v3340_v46 = vrot.slane %v3290_v26, 7 }
 0x330   : >> { %v3049_v2 = vmax.f32 %v2864_v7, %v3591_v41  ;;  %v3318_v36 = vrot.slane %v3277_v30, 6  ;;  %v3110_v51 = vadd.f32 %v6487_v33, %v3048_v17  ;;  %v3605_v49 = vrot.slane %v2923_v1, 9 }
 0x331   : >> { %v3062_v50 = vmax.f32 %v2922_v57, %v3604_v48  ;;  %v3317_v27 = vsel %vm3296_vm9, %v3316_v55, %v3275_v28  ;;  %v3289_v8 = vunpack.c.l.b16 %v3662_v40  ;;  %v3292_v6 = vunpack.c.l.b16 %v3665_v56 }
 0x332   : >> { %v3111_v39 = vadd.f32 %v6507_v3, %v3049_v2  ;;  %v3342_v29 = vrot.slane %v3291_v42, 6  ;;  %v3138_v18 = vmax.f32 %v3110_v51, 0.0  ;;  %v3063_v35 = vmax.f32 %v2923_v1, %v3605_v49 }
 0x333   : >> { %v3124_v60 = vadd.f32 %v6487_v33, %v3062_v50  ;;  %v3320_v43 = vrot.slane %v3278_v31, 5  ;;  %v3341_v58 = vsel %vm3296_vm9, %v3340_v46, %v3289_v8  ;;  %v3319_v59 = vsel %vm3299_vm10, %v3318_v36, %v3317_v27 }
 0x334   : >> { %v3139_v52 = vmax.f32 %v3111_v39, 0.0  ;;  %v3652_v45 = vpack.c.bf16 %v3138_v18, %v3138_v18  ;;  %v3125_v11 = vadd.f32 %v6507_v3, %v3063_v35  ;;  %v3344_v37 = vrot.slane %v3292_v6, 5 }
 0x335   : >> { %v3152_v20 = vmax.f32 %v3124_v60, 0.0  ;;  %v3343_v10 = vsel %vm3299_vm10, %v3342_v29, %v3341_v58  ;;  %v3321_v33 = vsel %vm3302_vm11, %v3320_v43, %v3319_v59 }
 0x336   : >> { %v3653_v25 = vpack.c.bf16 %v3139_v52, %v3139_v52  ;;  %v3279_v44 = vunpack.c.l.b16 %v3652_v45  ;;  %v3153_v38 = vmax.f32 %v3125_v11, 0.0  ;;  %v3345_v23 = vsel %vm3302_vm11, %v3344_v37, %v3343_v10 }
 0x337   : >> { %v3666_v15 = vpack.c.bf16 %v3152_v20, %v3152_v20 }
 0x338   : >> { %v3280_v9 = vunpack.c.l.b16 %v3653_v25  ;;  %v3322_v14 = vrot.slane %v3279_v44, 4  ;;  %v3667_v47 = vpack.c.bf16 %v3153_v38, %v3153_v38 }
 0x339   : >> { %v3293_v32 = vunpack.c.l.b16 %v3666_v15 }
 0x33a   : >> { %v3324_v24 = vrot.slane %v3280_v9, 3  ;;  %v3323_v3 = vsel %vm3305_vm12, %v3322_v14, %v3321_v33  ;;  %v3294_v12 = vunpack.c.l.b16 %v3667_v47 }
 0x33b   : >> { %v3346_v63 = vrot.slane %v3293_v32, 4  ;;  %1963 = sbr.rel (!%p1961_p0) target bundleno = 415 (0x19f), region = 54 }
 0x33c   : >> { %v3325_v61 = vsel %vm3308_vm13, %v3324_v24, %v3323_v3  ;;  %v3348_v13 = vrot.slane %v3294_v12, 3 }
 0x33d   : >> { %v3351_v21 = vpack.c.b16 %v3325_v61, %v3325_v61  ;;  %v3347_v53 = vsel %vm3305_vm12, %v3346_v63, %v3345_v23 }
 0x33e   : >> { %v3349_v62 = vsel %vm3308_vm13, %v3348_v13, %v3347_v53 }
 0x33f   : >> { %3364 = vst [vmem:[%s6578_s22 + $0x4] sm:$0x7] %v3351_v21  ;;  %v3353_v4 = vpack.c.b16 %v3349_v62, %v3349_v62 }
 0x341   : >> { %3366 = vst [vmem:[%s6578_s22 + $0xc] sm:$0x7] %v3353_v4 }
 0x342   :  { %322 = sbr.rel (!%p320_p1) target bundleno = 152 (0x98), region = 65 }

// kernel: normal_cnn_forward.7
= control target key start
LH: loop header
LB: loop body
LE: loop exit
PB: predicated region body
PF: predicated region fallthrough
CT: control target
= control target key end

     0   :  { %s1194_s1 = inlined_call_operand.vmem [shape: bf16[1024,128], index: 1, kind: input, shape index: {}]   ;;  %s1195_s0 = inlined_call_operand.vmem [shape: bf16[8,1024], index: 0, kind: input, shape index: {}]   ;;  %s1196_s2 = inlined_call_operand.vmem [shape: f32[1,128], index: 2, kind: input, shape index: {}]   ;;  %s1197_s3 = inlined_call_operand.vmem [shape: f32[8,128], index: 3, kind: output, shape index: {}]  }
   0x1   :  { %v892_v0 = vld [vmem:[%s1194_s1 + $0x40] sm:$0xff]   ;;  %v896_v4 = vld [vmem:[%s1194_s1 + $0x48] sm:$0xff]   ;;  %v900_v8 = vld [vmem:[%s1194_s1 + $0x50] sm:$0xff]  }
   0x2   :  { %v893_v1 = vld [vmem:[%s1194_s1 + $0xc0] sm:$0xff]   ;;  %804 = vmatprep.subr.bf16.mxu0 %v892_v0  ;;  %v897_v5 = vld [vmem:[%s1194_s1 + $0xc8] sm:$0xff]   ;;  %v901_v9 = vld [vmem:[%s1194_s1 + $0xd0] sm:$0xff]  }
   0x3   :  { %v894_v2 = vld [vmem:[%s1194_s1] sm:$0xff]   ;;  %826 = vmatprep.subr.bf16.mxu1 %v893_v1  ;;  %v898_v6 = vld [vmem:[%s1194_s1 + $0x8] sm:$0xff]   ;;  %v902_v10 = vld [vmem:[%s1194_s1 + $0x10] sm:$0xff]  }
   0x4   :  { %v895_v3 = vld [vmem:[%s1194_s1 + $0x80] sm:$0xff]   ;;  %805 = vmatpush3.bf16.msra.mxu0 %v894_v2  ;;  %v899_v7 = vld [vmem:[%s1194_s1 + $0x88] sm:$0xff]   ;;  %v903_v11 = vld [vmem:[%s1194_s1 + $0x90] sm:$0xff]  }
   0x5   :  { %827 = vmatpush3.bf16.msra.mxu1 %v895_v3  ;;  %806 = vmatprep.subr.bf16.mxu0 %v896_v4  ;;  %v904_v12 = vld [vmem:[%s1194_s1 + $0x58] sm:$0xff]   ;;  %v908_v16 = vld [vmem:[%s1194_s1 + $0x60] sm:$0xff]   ;;  %v912_v20 = vld [vmem:[%s1194_s1 + $0x68] sm:$0xff]  }
   0x6   :  { %828 = vmatprep.subr.bf16.mxu1 %v897_v5  ;;  %v905_v13 = vld [vmem:[%s1194_s1 + $0xd8] sm:$0xff]   ;;  %v909_v17 = vld [vmem:[%s1194_s1 + $0xe0] sm:$0xff]   ;;  %v913_v21 = vld [vmem:[%s1194_s1 + $0xe8] sm:$0xff]  }
   0x7   :  { %v906_v14 = vld [vmem:[%s1194_s1 + $0x18] sm:$0xff]   ;;  %v910_v18 = vld [vmem:[%s1194_s1 + $0x20] sm:$0xff]   ;;  %v914_v22 = vld [vmem:[%s1194_s1 + $0x28] sm:$0xff]  }
   0x8   :  { %807 = vmatpush3.bf16.msra.mxu0 %v898_v6  ;;  %v907_v15 = vld [vmem:[%s1194_s1 + $0x98] sm:$0xff]   ;;  %v911_v19 = vld [vmem:[%s1194_s1 + $0xa0] sm:$0xff]   ;;  %v915_v23 = vld [vmem:[%s1194_s1 + $0xa8] sm:$0xff]  }
   0x9   :  { %829 = vmatpush3.bf16.msra.mxu1 %v899_v7  ;;  %808 = vmatprep.subr.bf16.mxu0 %v900_v8  ;;  %v916_v24 = vld [vmem:[%s1194_s1 + $0x70] sm:$0xff]   ;;  %v920_v28 = vld [vmem:[%s1194_s1 + $0x78] sm:$0xff]   ;;  %v15_v32 = vld [vmem:[%s1195_s0] sm:$0xff] }
   0xa   :  { %830 = vmatprep.subr.bf16.mxu1 %v901_v9  ;;  %v917_v25 = vld [vmem:[%s1194_s1 + $0xf0] sm:$0xff]   ;;  %v921_v29 = vld [vmem:[%s1194_s1 + $0xf8] sm:$0xff]   ;;  %v16_v33 = vld [vmem:[%s1195_s0 + $0x8] sm:$0xff]  ;;  %v732_v34 = vcombine.low %v15_v32, %v15_v32  ;;  %v733_v35 = vcombine.high %v15_v32, %v15_v32 }
   0xb   :  { %v918_v26 = vld [vmem:[%s1194_s1 + $0x30] sm:$0xff]   ;;  %v922_v30 = vld [vmem:[%s1194_s1 + $0x38] sm:$0xff]   ;;  %v734_v36 = vcombine.low %v16_v33, %v16_v33  ;;  %v735_v37 = vcombine.high %v16_v33, %v16_v33  ;;  %v928_v38 = vld [vmem:[%s1194_s1 + $0x140] sm:$0xff]  }
   0xc   :  { %809 = vmatpush3.bf16.msra.mxu0 %v902_v10  ;;  %v919_v27 = vld [vmem:[%s1194_s1 + $0xb0] sm:$0xff]   ;;  %v923_v31 = vld [vmem:[%s1194_s1 + $0xb8] sm:$0xff]   ;;  %v929_v39 = vld [vmem:[%s1194_s1 + $0x1c0] sm:$0xff]   ;;  %598 = vmatprep.mubr.bf16.mxu0 %v733_v35 }
   0xd   :  { %831 = vmatpush3.bf16.msra.mxu1 %v903_v11  ;;  %810 = vmatprep.subr.bf16.mxu0 %v904_v12  ;;  %v930_v40 = vld [vmem:[%s1194_s1 + $0x100] sm:$0xff]   ;;  %v932_v42 = vld [vmem:[%s1194_s1 + $0x148] sm:$0xff]   ;;  %v936_v46 = vld [vmem:[%s1194_s1 + $0x150] sm:$0xff]  }
   0xe   :  { %832 = vmatprep.subr.bf16.mxu1 %v905_v13  ;;  %638 = vmatprep.mubr.bf16.mxu1 %v735_v37  ;;  %v931_v41 = vld [vmem:[%s1194_s1 + $0x180] sm:$0xff]   ;;  %v933_v43 = vld [vmem:[%s1194_s1 + $0x1c8] sm:$0xff]   ;;  %v937_v47 = vld [vmem:[%s1194_s1 + $0x1d0] sm:$0xff]  }
   0xf   :  { %v934_v44 = vld [vmem:[%s1194_s1 + $0x108] sm:$0xff]   ;;  %v938_v48 = vld [vmem:[%s1194_s1 + $0x110] sm:$0xff]   ;;  %v940_v50 = vld [vmem:[%s1194_s1 + $0x158] sm:$0xff]  }
  0x10   :  { %811 = vmatpush3.bf16.msra.mxu0 %v906_v14  ;;  %v935_v45 = vld [vmem:[%s1194_s1 + $0x188] sm:$0xff]   ;;  %v939_v49 = vld [vmem:[%s1194_s1 + $0x190] sm:$0xff]   ;;  %v941_v51 = vld [vmem:[%s1194_s1 + $0x1d8] sm:$0xff]  }
  0x11   :  { %833 = vmatpush3.bf16.msra.mxu1 %v907_v15  ;;  %812 = vmatprep.subr.bf16.mxu0 %v908_v16  ;;  %v942_v52 = vld [vmem:[%s1194_s1 + $0x118] sm:$0xff]   ;;  %v944_v54 = vld [vmem:[%s1194_s1 + $0x160] sm:$0xff]   ;;  %v948_v58 = vld [vmem:[%s1194_s1 + $0x168] sm:$0xff]  }
  0x12   :  { %834 = vmatprep.subr.bf16.mxu1 %v909_v17  ;;  %v943_v53 = vld [vmem:[%s1194_s1 + $0x198] sm:$0xff]   ;;  %v945_v55 = vld [vmem:[%s1194_s1 + $0x1e0] sm:$0xff]   ;;  %v949_v59 = vld [vmem:[%s1194_s1 + $0x1e8] sm:$0xff]  }
  0x13   :  { %v946_v56 = vld [vmem:[%s1194_s1 + $0x120] sm:$0xff]   ;;  %v950_v60 = vld [vmem:[%s1194_s1 + $0x128] sm:$0xff]   ;;  %v952_v62 = vld [vmem:[%s1194_s1 + $0x170] sm:$0xff]  }
  0x14   :  { %813 = vmatpush3.bf16.msra.mxu0 %v910_v18  ;;  %v947_v57 = vld [vmem:[%s1194_s1 + $0x1a0] sm:$0xff]   ;;  %v951_v61 = vld [vmem:[%s1194_s1 + $0x1a8] sm:$0xff]   ;;  %v953_v63 = vld [vmem:[%s1194_s1 + $0x1f0] sm:$0xff]  }
  0x15   :  { %835 = vmatpush3.bf16.msra.mxu1 %v911_v19  ;;  %814 = vmatprep.subr.bf16.mxu0 %v912_v20  ;;  %v954_v0 = vld [vmem:[%s1194_s1 + $0x130] sm:$0xff]   ;;  %v956_v2 = vld [vmem:[%s1194_s1 + $0x178] sm:$0xff]   ;;  %v731_v14 = vld [vmem:[%s1196_s2] ss:$0 sm:$0xff] }
  0x16   :  { %836 = vmatprep.subr.bf16.mxu1 %v913_v21  ;;  %v955_v1 = vld [vmem:[%s1194_s1 + $0x1b0] sm:$0xff]   ;;  %v957_v3 = vld [vmem:[%s1194_s1 + $0x1f8] sm:$0xff]  }
  0x17   :  { %v958_v4 = vld [vmem:[%s1194_s1 + $0x138] sm:$0xff]   ;;  %v17_v6 = vld [vmem:[%s1195_s0 + $0x10] sm:$0xff] }
  0x18   :  { %815 = vmatpush3.bf16.msra.mxu0 %v914_v22  ;;  %v959_v5 = vld [vmem:[%s1194_s1 + $0x1b8] sm:$0xff]   ;;  %v736_v7 = vcombine.low %v17_v6, %v17_v6  ;;  %v737_v8 = vcombine.high %v17_v6, %v17_v6 }
  0x19   :  { %837 = vmatpush3.bf16.msra.mxu1 %v915_v23  ;;  %816 = vmatprep.subr.bf16.mxu0 %v916_v24  ;;  %v18_v9 = vld [vmem:[%s1195_s0 + $0x18] sm:$0xff] }
  0x1a   :  { %838 = vmatprep.subr.bf16.mxu1 %v917_v25  ;;  %v738_v10 = vcombine.low %v18_v9, %v18_v9  ;;  %v739_v11 = vcombine.high %v18_v9, %v18_v9 }
  0x1c   :  { %817 = vmatpush3.bf16.msra.mxu0 %v918_v26 }
  0x1d   :  { %839 = vmatpush3.bf16.msra.mxu1 %v919_v27  ;;  %818 = vmatprep.subr.bf16.mxu0 %v920_v28 }
  0x1e   :  { %840 = vmatprep.subr.bf16.mxu1 %v921_v29 }
  0x20   :  { %819 = vmatpush3.bf16.msra.mxu0 %v922_v30 }
  0x21   :  { %841 = vmatpush3.bf16.msra.mxu1 %v923_v31  ;;  %848 = vmatprep.subr.bf16.mxu0 %v928_v38 }
  0x22   :  { %870 = vmatprep.subr.bf16.mxu1 %v929_v39 }
  0x23   :  { %599 = vmatmul.mubr.bf16.vlgmr.msra.gmra.mrb[0].mxu0 %v732_v34 }
  0x24   :  { %639 = vmatmul.mubr.bf16.vlgmr.msra.gmra.mrb[0].mxu1 %v734_v36  ;;  %849 = vmatpush3.bf16.msra.mxu0 %v930_v40 }
  0x25   :  { %871 = vmatpush3.bf16.msra.mxu1 %v931_v41  ;;  %850 = vmatprep.subr.bf16.mxu0 %v932_v42 }
  0x26   :  { %872 = vmatprep.subr.bf16.mxu1 %v933_v43  ;;  %678 = vmatprep.mubr.bf16.mxu0 %v737_v8 }
  0x27   :  { %718 = vmatprep.mubr.bf16.mxu1 %v739_v11 }
  0x28   :  { %851 = vmatpush3.bf16.msra.mxu0 %v934_v44 }
  0x29   :  { %873 = vmatpush3.bf16.msra.mxu1 %v935_v45  ;;  %852 = vmatprep.subr.bf16.mxu0 %v936_v46 }
  0x2a   :  { %874 = vmatprep.subr.bf16.mxu1 %v937_v47 }
  0x2c   :  { %853 = vmatpush3.bf16.msra.mxu0 %v938_v48 }
  0x2d   :  { %875 = vmatpush3.bf16.msra.mxu1 %v939_v49  ;;  %854 = vmatprep.subr.bf16.mxu0 %v940_v50 }
  0x2e   :  { %876 = vmatprep.subr.bf16.mxu1 %v941_v51 }
  0x30   :  { %855 = vmatpush3.bf16.msra.mxu0 %v942_v52 }
  0x31   :  { %877 = vmatpush3.bf16.msra.mxu1 %v943_v53  ;;  %856 = vmatprep.subr.bf16.mxu0 %v944_v54 }
  0x32   :  { %878 = vmatprep.subr.bf16.mxu1 %v945_v55 }
  0x34   :  { %857 = vmatpush3.bf16.msra.mxu0 %v946_v56 }
  0x35   :  { %879 = vmatpush3.bf16.msra.mxu1 %v947_v57  ;;  %858 = vmatprep.subr.bf16.mxu0 %v948_v58 }
  0x36   :  { %880 = vmatprep.subr.bf16.mxu1 %v949_v59 }
  0x38   :  { %859 = vmatpush3.bf16.msra.mxu0 %v950_v60 }
  0x39   :  { %881 = vmatpush3.bf16.msra.mxu1 %v951_v61  ;;  %860 = vmatprep.subr.bf16.mxu0 %v952_v62 }
  0x3a   :  { %882 = vmatprep.subr.bf16.mxu1 %v953_v63 }
  0x3c   :  { %861 = vmatpush3.bf16.msra.mxu0 %v954_v0 }
  0x3d   :  { %883 = vmatpush3.bf16.msra.mxu1 %v955_v1  ;;  %862 = vmatprep.subr.bf16.mxu0 %v956_v2 }
  0x3e   :  { %884 = vmatprep.subr.bf16.mxu1 %v957_v3 }
  0x40   :  { %863 = vmatpush3.bf16.msra.mxu0 %v958_v4 }
  0x41   :  { %885 = vmatpush3.bf16.msra.mxu1 %v959_v5 }
  0x43   :  { %679 = vmatmul.mubr.bf16.vlgmr.msra.gmra.mrb[4].mxu0 %v736_v7 }
  0x44   :  { %719 = vmatmul.mubr.bf16.vlgmr.msra.gmra.mrb[4].mxu1 %v738_v10 }
  0xf6   :  { %v820_v12 = vpop.f32.mrb[0].mxu0 }
  0xf7   :  { %v842_v13 = vpop.f32.mrb[0].mxu1  ;;  %v821_v15 = vpop.f32.mrb[1].mxu0 }
  0xf8   :  { %v843_v16 = vpop.f32.mrb[1].mxu1  ;;  %v822_v17 = vadd.f32 %v821_v15, %v820_v12  ;;  %v823_v19 = vpop.f32.mrb[2].mxu0 }
  0xf9   :  { %v844_v18 = vadd.f32 %v843_v16, %v842_v13  ;;  %v845_v20 = vpop.f32.mrb[2].mxu1  ;;  %v824_v21 = vpop.f32.mrb[3].mxu0 }
  0xfa   :  { %v846_v22 = vpop.f32.mrb[3].mxu1  ;;  %v601_v23 = vadd.f32 %v822_v17, %v731_v14 }
  0xfc   :  { %v641_v24 = vadd.f32 %v844_v18, %v601_v23 }
 0x116   :  { %v864_v25 = vpop.f32.mrb[4].mxu0 }
 0x117   :  { %v886_v26 = vpop.f32.mrb[4].mxu1  ;;  %v865_v27 = vpop.f32.mrb[5].mxu0 }
 0x118   :  { %v887_v28 = vpop.f32.mrb[5].mxu1  ;;  %v866_v29 = vadd.f32 %v865_v27, %v864_v25  ;;  %v867_v31 = vpop.f32.mrb[6].mxu0 }
 0x119   :  { %v888_v30 = vadd.f32 %v887_v28, %v886_v26  ;;  %v889_v32 = vpop.f32.mrb[6].mxu1  ;;  %v868_v33 = vpop.f32.mrb[7].mxu0 }
 0x11a   :  { %v890_v34 = vpop.f32.mrb[7].mxu1  ;;  %v681_v35 = vadd.f32 %v866_v29, %v641_v24 }
 0x11c   :  { %v721_v36 = vadd.f32 %v888_v30, %v681_v35 }
 0x11e   :  { %726 = vst [vmem:[%s1197_s3] sm:$0xff] %v721_v36 }

// kernel: normal_cnn_forward.6
= control target key start
LH: loop header
LB: loop body
LE: loop exit
PB: predicated region body
PF: predicated region fallthrough
CT: control target
= control target key end

     0   :  { %8 = vsyncpa [#allocation4], 0  ;;  %s5905_s0 = inlined_call_operand.vmem [shape: bf16[8,25088], index: 0, kind: input, shape index: {}]   ;;  %s5906_s1 = inlined_call_operand.hbm [shape: bf16[25088,1024], index: 1, kind: input, shape index: {}]   ;;  %s5907_s2 = inlined_call_operand.vmem [shape: f32[1,1024], index: 2, kind: input, shape index: {}]   ;;  %s5908_s3 = inlined_call_operand.vmem [shape: bf16[8,1024], index: 3, kind: output, shape index: {}]  }
   0x1   :  { %10 = vsyncpa [#allocation4 + $0x1], 0  ;;  %s5174_s12 = smov 0   ;;  %s5176_s13 = smov 0  }
   0x2   :  { %s5178_s14 = smov 0   ;;  %s5180_s15 = smov 0  }
   0x3   :  { %s5182_s16 = smov 0   ;;  %s5184_s17 = smov 0  }
   0x4   :  { %s5186_s18 = smov 0   ;;  %s5188_s19 = smov 0  }
   0x5 LB: > { %s3805_s20 = sadd.s32 4294967295, %s5147_s19   ;;  %s28_s21 = sadd.s32 1, %s5139_s17  ;;  %s5147_s19 = sphi %s5188_s19, %s16_s19   ;;  %s5143_s18 = sphi %s5186_s18, %s5918_s18   ;;  %s5139_s17 = sphi %s5184_s17, %s5917_s17   ;;  %s5135_s16 = sphi %s5182_s16, %s5916_s16   ;;  %s5131_s15 = sphi %s5180_s15, %s5915_s15   ;;  %s5127_s14 = sphi %s5178_s14, %s5914_s14   ;;  %s5123_s13 = sphi %s5176_s13, %s5913_s13   ;;  %s5119_s12 = sphi %s5174_s12, %s5912_s12  }
   0x6   : > { %p29_p0 = scmp.ge.s32.totalorder %s28_s21, 14  ;;  %s31_s22 = sadd.s32 1, %s5143_s18 }
   0x7   : > { %s72_s23 = sadd.s32 1, %s5127_s14  ;;  %p79_p1 = scmp.ne.s32.totalorder %s5127_s14, %s5123_s13 }
   0x8   : > { %s5920_s21 = smov (%p29_p0, %s28_s21), 0  ;;  %s5922_s22 = smov (!%p29_p0, %s31_s22), %s5143_s18 }
   0x9   : > { %s67_s24 = ssub.s32 %s5139_s17, %s5920_s21  ;;  %p80_p2 = scmp.eq.s32.totalorder %s5147_s19, 0 }
   0xa   : > { %p33_p3 = scmp.ge.s32.totalorder %s5922_s22, 2  ;;  %p85_p4 = scmp.ne.s32.totalorder %s5123_s13, %s5119_s12 }
   0xb   : > { %p5225_p5 = por %p80_p2, %p79_p1  ;;  %p86_p6 = scmp.eq.s32.totalorder %s3805_s20, 0 }
   0xc   : > { %s5924_s22 = smov (%p33_p3, %s5922_s22), 0  ;;  %p4296_p8 = scmp.lt.s32.totalorder %s5147_s19, 28 }
   0xd   : > { %p5231_p7 = por %p86_p6, %p85_p4  ;;  %s68_s27 = ssub.s32 %s5143_s18, %s5924_s22 }
   0xe   : > { %s69_s28 = sor.u32 %s68_s27, %s67_s24  ;;  %s176_s29 = sand.u32 1, %s5127_s14  }
   0xf   : > { %p70_p9 = scmp.eq.s32.totalorder %s69_s28, 0  ;;  %s4288_s30 = smul.u32 3584, %s176_s29 }
  0x10   : > { %s3809_s4 = sshll.u32 %s5143_s18, 2  ;;  %s4285_s6 = smul.u32 1792, %s5139_s17 }
  0x11   : > { %s5241_s5 = scalar_select %p70_p9, %s5127_s14, %s72_s23  }
  0x12   : > { %s180_s7 = scalar_lea.vmem [#allocation3], %s4288_s30  ;;  %p5246_p10 = pnand %p4296_p8, %p5225_p5 }
  0x13   : > { %s190_s8 = sshll.u32 %s180_s7, 4  ;;  %s187_s10 = sadd.s32 %s4285_s6, %s3809_s4  ;;  %s5250_s8 = int_to_ptr.vmem [resolvable:$true] %s190_s8 }
  0x14   : > { %s3811_s11 = sshll.u32 %s187_s10, 6  ;;  %s5257_s23 = scalar_lea.sflag [#allocation4], %s176_s29 }
  0x15   : > { %s5255_s24 = scalar_lea.hbm %s5906_s1, %s3811_s11  ;;  %p5053_p12 = pneg %p5246_p10 }
  0x16   : > { %s5051_s25 = scalar_lea.hbm %s5255_s24, 57344  ;;  %s5056_s30 = scalar_lea.hbm %s5906_s1, 1605632 }
  0x17   : > { %p5052_p11 = scmp.ne.s32.totalorder %s5255_s24, %s5051_s25  ;;  %p5057_p1 = scmp.lt.u32.totalorder %s5255_s24, %s5906_s1 }
  0x18   : > { %p5058_p2 = scmp.lt.u32.totalorder %s5056_s30, %s5051_s25  ;;  %p5060_p4 = scmp.lt.u32.totalorder %s5051_s25, %s5255_s24 }
  0x19   : > { %p5054_p13 = pnand %p5053_p12, %p5052_p11 }
  0x1a   : > { %p5059_p3 = por %p5058_p2, %p5057_p1 }
  0x1b   : > { %p5055_p0 = pneg %p5054_p13 }
  0x1c   : > { %p5061_p5 = por %p5060_p4, %p5059_p3 }
  0x1e   : > { %p5062_p6 = pnand %p5061_p5, %p5055_p0 }
  0x20   : > { %5065 = shalt.err (!%p5062_p6)
}
  0x21   : > { %s5066_s29 = scalar_lea.vmem %s5250_s8, 57344  ;;  %s5149_s7 = smov [#allocation3]  }
  0x22   : > { %p5067_p8 = scmp.ne.s32.totalorder %s5250_s8, %s5066_s29  ;;  %s5071_s10 = sshll.u32 %s5149_s7, 4  ;;  %s5072_s10 = int_to_ptr.vmem [resolvable:$false] %s5071_s10 }
  0x23   : > { %s5073_s11 = scalar_lea.vmem %s5072_s10, 114688  ;;  %p5074_p13 = scmp.lt.s32.totalorder %s5250_s8, %s5072_s10 }
  0x24   : > { %p5069_p9 = pnand %p5067_p8, %p5053_p12  ;;  %p5075_p1 = scmp.lt.s32.totalorder %s5073_s11, %s5066_s29 }
  0x26   : > { %p5070_p11 = pneg %p5069_p9  ;;  %p5076_p2 = por %p5075_p1, %p5074_p13 }
  0x28   : > { %p5077_p3 = pnand %p5076_p2, %p5070_p11 }
  0x2a   : > { %5080 = shalt.err (!%p5077_p3)
}
  0x2b   : > { %s5150_s12 = smov 512   ;;  %s5151_s20 = smov 256  }
  0x2c   : > { %s5152_s25 = smov 16   ;;  %p3812_p12 = scmp.ge.s32.totalorder %s5147_s19, 1 }
  0x2d   : > { %4295 = dma.hbm_to_vmem [thread:$0]  (!%p5246_p10), %s5255_s24, 57344, %s5250_s8, %s5257_s23, %s5150_s12, %s5151_s20, %s5152_s25  }
  0x2e   : > { %p206_p0 = scmp.lt.s32.totalorder %s5147_s19, 29 }
  0x30   : > { %p207_p4 = pnand %p3812_p12, %p206_p0 }
  0x31   : > { %s212_s27 = sand.u32 (!%p207_p4), 1, %s5123_s13  }
  0x32   : > { %210 = sbr.rel (%p207_p4) target bundleno = 751 (0x2ef), region = 32  ;;  %s213_s30 = scalar_lea.sflag (!%p207_p4), [#allocation4], %s212_s27 }
  0x33   : > { %s4289_s28 = smul.u32 (!%p207_p4), 3584, %s212_s27 }
  0x35   : > { %s5288_s4 = scalar_lea.vmem (!%p207_p4), [#allocation3], %s4289_s28 }
  0x39   : > { %5114 = dma.done.wait (%p5231_p7), %s213_s30, 57344  }
  0x3a   : > { %5116 = vsyncadd (%p5231_p7), %s213_s30, 4294909952  ;;  %s256_s9 = smul.u32 14, %s5131_s15  ;;  %s3814_s8 = sshll.u32 %s5135_s16, 2 }
  0x3b   : > { %p269_p10 = scmp.lt.s32.totalorder %s3814_s8, 7  ;;  %p3817_p7 = scmp.ne.s32.totalorder %s5131_s15, 0 }
  0x3c   : > { %p259_p5 = scmp.lt.s32.totalorder %s256_s9, 195  ;;  %v5153_v0 = vmov (!%p3817_p7), 0.0  }
  0x3d   : > { %s5926_s8 = smov (!%p269_p10, %s3814_s8), 7  ;;  %286 = sbr.rel (%p3817_p7) target bundleno = 68 (0x44), region = 40 }
  0x3e   : > { %s5928_s9 = smov (!%p259_p5, %s256_s9), 195  ;;  %s271_s6 = scalar_lea.vmem %s5907_s2, %s5926_s8  ;;  %287 = vst [vmem:[#allocation2] sm:$0xff] (!%p3817_p7), %v5153_v0  ;;  %288 = vst [vmem:[#allocation2 + $0x8] sm:$0xff] (!%p3817_p7), %v5153_v0 }
  0x3f   : > { %s3816_s29 = sshll.u32 %s5926_s8, 2  ;;  %s3813_s7 = sshll.u32 %s5928_s9, 2  ;;  %289 = vst [vmem:[#allocation2 + $0x10] sm:$0xff] (!%p3817_p7), %v5153_v0  ;;  %290 = vst [vmem:[#allocation2 + $0x18] sm:$0xff] (!%p3817_p7), %v5153_v0 }
  0x40   : > { %s5306_s11 = scalar_lea.vmem %s5908_s3, %s3816_s29  ;;  %s5311_s20 = scalar_lea.vmem %s5905_s0, %s3813_s7 }
  0x44 PF: > { %v4365_v1 = vld [vmem:[%s5288_s4 + $0x4] ss:$16 sps:$4 sm:$0xff]   ;;  %v4369_v3 = vld [vmem:[%s5288_s4] ss:$16 sps:$4 sm:$0xff]   ;;  %v296_v49 = vld [vmem:[%s5311_s20 + $0x8] sm:$0xff]  ;;  %p4280_p6 = scmp.ne.s32.totalorder %s5131_s15, 13 }
  0x45   : > { %v4367_v2 = vld [vmem:[%s5288_s4 + $0x204] ss:$16 sps:$4 sm:$0xff]   ;;  %3039 = vmatprep.subr.bf16.mxu0 %v4365_v1  ;;  %v4370_v4 = vld [vmem:[%s5288_s4 + $0x200] ss:$16 sps:$4 sm:$0xff]   ;;  %v5366_v52 = vcombine.high %v296_v49, %v296_v49 }
  0x46   : > { %3080 = vmatprep.subr.bf16.mxu1 %v4367_v2  ;;  %v4371_v5 = vld [vmem:[%s5288_s4 + $0x24] ss:$16 sps:$4 sm:$0xff]   ;;  %3040 = vmatpush1.bf16.msra.mxu0 %v4369_v3  ;;  %v4375_v7 = vld [vmem:[%s5288_s4 + $0x20] ss:$16 sps:$4 sm:$0xff]  }
  0x47   : > { %3081 = vmatpush1.bf16.msra.mxu1 %v4370_v4  ;;  %v4373_v6 = vld [vmem:[%s5288_s4 + $0x224] ss:$16 sps:$4 sm:$0xff]   ;;  %3041 = vmatprep.subr.bf16.mxu0 %v4371_v5  ;;  %v4376_v8 = vld [vmem:[%s5288_s4 + $0x220] ss:$16 sps:$4 sm:$0xff]  }
  0x48   : > { %3082 = vmatprep.subr.bf16.mxu1 %v4373_v6  ;;  %v4377_v9 = vld [vmem:[%s5288_s4 + $0x44] ss:$16 sps:$4 sm:$0xff]   ;;  %v4381_v11 = vld [vmem:[%s5288_s4 + $0x40] ss:$16 sps:$4 sm:$0xff]   ;;  %3112 = vmatprep.mubr.bf16.mxu1 %v5366_v52 }
  0x49   : > { %v4379_v10 = vld [vmem:[%s5288_s4 + $0x244] ss:$16 sps:$4 sm:$0xff]   ;;  %v4382_v12 = vld [vmem:[%s5288_s4 + $0x240] ss:$16 sps:$4 sm:$0xff]  }
  0x4a   : > { %3042 = vmatpush1.bf16.msra.mxu0 %v4375_v7  ;;  %v4383_v13 = vld [vmem:[%s5288_s4 + $0x64] ss:$16 sps:$4 sm:$0xff]   ;;  %v4387_v15 = vld [vmem:[%s5288_s4 + $0x60] ss:$16 sps:$4 sm:$0xff]  }
  0x4b   : > { %3083 = vmatpush1.bf16.msra.mxu1 %v4376_v8  ;;  %3043 = vmatprep.subr.bf16.mxu0 %v4377_v9  ;;  %v4385_v14 = vld [vmem:[%s5288_s4 + $0x264] ss:$16 sps:$4 sm:$0xff]   ;;  %v4388_v16 = vld [vmem:[%s5288_s4 + $0x260] ss:$16 sps:$4 sm:$0xff]   ;;  %v5390_v8 = vcombine.low %v296_v49, %v296_v49 }
  0x4c   : > { %3084 = vmatprep.subr.bf16.mxu1 %v4379_v10  ;;  %v4389_v17 = vld [vmem:[%s5288_s4 + $0x84] ss:$16 sps:$4 sm:$0xff]   ;;  %v4393_v19 = vld [vmem:[%s5288_s4 + $0x80] ss:$16 sps:$4 sm:$0xff]  }
  0x4d   : > { %v4391_v18 = vld [vmem:[%s5288_s4 + $0x284] ss:$16 sps:$4 sm:$0xff]   ;;  %v4394_v20 = vld [vmem:[%s5288_s4 + $0x280] ss:$16 sps:$4 sm:$0xff]  }
  0x4e   : > { %3044 = vmatpush1.bf16.msra.mxu0 %v4381_v11  ;;  %v4395_v21 = vld [vmem:[%s5288_s4 + $0xa4] ss:$16 sps:$4 sm:$0xff]   ;;  %v4399_v23 = vld [vmem:[%s5288_s4 + $0xa0] ss:$16 sps:$4 sm:$0xff]  }
  0x4f   : > { %3085 = vmatpush1.bf16.msra.mxu1 %v4382_v12  ;;  %3045 = vmatprep.subr.bf16.mxu0 %v4383_v13  ;;  %v4397_v22 = vld [vmem:[%s5288_s4 + $0x2a4] ss:$16 sps:$4 sm:$0xff]   ;;  %v4400_v24 = vld [vmem:[%s5288_s4 + $0x2a0] ss:$16 sps:$4 sm:$0xff]  }
  0x50   : > { %3086 = vmatprep.subr.bf16.mxu1 %v4385_v14  ;;  %v4401_v25 = vld [vmem:[%s5288_s4 + $0xc4] ss:$16 sps:$4 sm:$0xff]   ;;  %v4405_v27 = vld [vmem:[%s5288_s4 + $0xc0] ss:$16 sps:$4 sm:$0xff]  }
  0x51   : > { %v4403_v26 = vld [vmem:[%s5288_s4 + $0x2c4] ss:$16 sps:$4 sm:$0xff]   ;;  %v4406_v28 = vld [vmem:[%s5288_s4 + $0x2c0] ss:$16 sps:$4 sm:$0xff]  }
  0x52   : > { %3046 = vmatpush1.bf16.msra.mxu0 %v4387_v15  ;;  %v4407_v29 = vld [vmem:[%s5288_s4 + $0xe4] ss:$16 sps:$4 sm:$0xff]   ;;  %v4411_v31 = vld [vmem:[%s5288_s4 + $0xe0] ss:$16 sps:$4 sm:$0xff]  }
  0x53   : > { %3087 = vmatpush1.bf16.msra.mxu1 %v4388_v16  ;;  %3047 = vmatprep.subr.bf16.mxu0 %v4389_v17  ;;  %v4409_v30 = vld [vmem:[%s5288_s4 + $0x2e4] ss:$16 sps:$4 sm:$0xff]   ;;  %v4412_v32 = vld [vmem:[%s5288_s4 + $0x2e0] ss:$16 sps:$4 sm:$0xff]  }
  0x54   : > { %3088 = vmatprep.subr.bf16.mxu1 %v4391_v18  ;;  %v4413_v33 = vld [vmem:[%s5288_s4 + $0x104] ss:$16 sps:$4 sm:$0xff]   ;;  %v4417_v35 = vld [vmem:[%s5288_s4 + $0x100] ss:$16 sps:$4 sm:$0xff]  }
  0x55   : > { %v4415_v34 = vld [vmem:[%s5288_s4 + $0x304] ss:$16 sps:$4 sm:$0xff]   ;;  %v4418_v36 = vld [vmem:[%s5288_s4 + $0x300] ss:$16 sps:$4 sm:$0xff]  }
  0x56   : > { %3048 = vmatpush1.bf16.msra.mxu0 %v4393_v19  ;;  %v4419_v37 = vld [vmem:[%s5288_s4 + $0x124] ss:$16 sps:$4 sm:$0xff]   ;;  %v4423_v39 = vld [vmem:[%s5288_s4 + $0x120] ss:$16 sps:$4 sm:$0xff]  }
  0x57   : > { %3089 = vmatpush1.bf16.msra.mxu1 %v4394_v20  ;;  %3049 = vmatprep.subr.bf16.mxu0 %v4395_v21  ;;  %v4421_v38 = vld [vmem:[%s5288_s4 + $0x324] ss:$16 sps:$4 sm:$0xff]   ;;  %v4424_v40 = vld [vmem:[%s5288_s4 + $0x320] ss:$16 sps:$4 sm:$0xff]  }
  0x58   : > { %3090 = vmatprep.subr.bf16.mxu1 %v4397_v22  ;;  %v4425_v41 = vld [vmem:[%s5288_s4 + $0x144] ss:$16 sps:$4 sm:$0xff]   ;;  %v4429_v43 = vld [vmem:[%s5288_s4 + $0x140] ss:$16 sps:$4 sm:$0xff]  }
  0x59   : > { %v4427_v42 = vld [vmem:[%s5288_s4 + $0x344] ss:$16 sps:$4 sm:$0xff]   ;;  %v4430_v44 = vld [vmem:[%s5288_s4 + $0x340] ss:$16 sps:$4 sm:$0xff]  }
  0x5a   : > { %3050 = vmatpush1.bf16.msra.mxu0 %v4399_v23  ;;  %v4431_v45 = vld [vmem:[%s5288_s4 + $0x164] ss:$16 sps:$4 sm:$0xff]   ;;  %v4435_v50 = vld [vmem:[%s5288_s4 + $0x160] ss:$16 sps:$4 sm:$0xff]  }
  0x5b   : > { %3091 = vmatpush1.bf16.msra.mxu1 %v4400_v24  ;;  %3051 = vmatprep.subr.bf16.mxu0 %v4401_v25  ;;  %v4433_v46 = vld [vmem:[%s5288_s4 + $0x364] ss:$16 sps:$4 sm:$0xff]   ;;  %v4436_v51 = vld [vmem:[%s5288_s4 + $0x360] ss:$16 sps:$4 sm:$0xff]  }
  0x5c   : > { %3092 = vmatprep.subr.bf16.mxu1 %v4403_v26  ;;  %v295_v47 = vld [vmem:[%s5311_s20] sm:$0xff] }
  0x5d   : > { %v5361_v48 = vcombine.high %v295_v47, %v295_v47  ;;  %v4437_v53 = vld [vmem:[%s5288_s4 + $0x184] ss:$16 sps:$4 sm:$0xff]   ;;  %v4441_v55 = vld [vmem:[%s5288_s4 + $0x180] ss:$16 sps:$4 sm:$0xff]   ;;  %v5388_v7 = vcombine.low %v295_v47, %v295_v47 }
  0x5e   : > { %3052 = vmatpush1.bf16.msra.mxu0 %v4405_v27  ;;  %v4439_v54 = vld [vmem:[%s5288_s4 + $0x384] ss:$16 sps:$4 sm:$0xff]   ;;  %v4442_v56 = vld [vmem:[%s5288_s4 + $0x380] ss:$16 sps:$4 sm:$0xff]  }
  0x5f   : > { %3093 = vmatpush1.bf16.msra.mxu1 %v4406_v28  ;;  %3053 = vmatprep.subr.bf16.mxu0 %v4407_v29  ;;  %v4443_v57 = vld [vmem:[%s5288_s4 + $0x1a4] ss:$16 sps:$4 sm:$0xff]   ;;  %v4447_v59 = vld [vmem:[%s5288_s4 + $0x1a0] ss:$16 sps:$4 sm:$0xff]  }
  0x60   : > { %3094 = vmatprep.subr.bf16.mxu1 %v4409_v30  ;;  %3071 = vmatprep.mubr.bf16.mxu0 %v5361_v48  ;;  %v4445_v58 = vld [vmem:[%s5288_s4 + $0x3a4] ss:$16 sps:$4 sm:$0xff]   ;;  %v4448_v60 = vld [vmem:[%s5288_s4 + $0x3a0] ss:$16 sps:$4 sm:$0xff]  }
  0x61   : > { %v4449_v61 = vld [vmem:[%s5288_s4 + $0x1c4] ss:$16 sps:$4 sm:$0xff]   ;;  %v4453_v63 = vld [vmem:[%s5288_s4 + $0x1c0] ss:$16 sps:$4 sm:$0xff]  }
  0x62   : > { %3054 = vmatpush1.bf16.msra.mxu0 %v4411_v31  ;;  %v4451_v62 = vld [vmem:[%s5288_s4 + $0x3c4] ss:$16 sps:$4 sm:$0xff]   ;;  %v4454_v0 = vld [vmem:[%s5288_s4 + $0x3c0] ss:$16 sps:$4 sm:$0xff]  }
  0x63   : > { %3095 = vmatpush1.bf16.msra.mxu1 %v4412_v32  ;;  %3055 = vmatprep.subr.bf16.mxu0 %v4413_v33  ;;  %v4455_v1 = vld [vmem:[%s5288_s4 + $0x1e4] ss:$16 sps:$4 sm:$0xff]   ;;  %v4459_v3 = vld [vmem:[%s5288_s4 + $0x1e0] ss:$16 sps:$4 sm:$0xff]  }
  0x64   : > { %3096 = vmatprep.subr.bf16.mxu1 %v4415_v34  ;;  %v4457_v2 = vld [vmem:[%s5288_s4 + $0x3e4] ss:$16 sps:$4 sm:$0xff]   ;;  %v4460_v4 = vld [vmem:[%s5288_s4 + $0x3e0] ss:$16 sps:$4 sm:$0xff]   ;;  %v5422_v34 = vld [vmem:[%s5311_s20 + $0x18] sm:$0xff] }
  0x65   : > { %v4467_v5 = vld [vmem:[%s5288_s4 + $0x404] ss:$16 sps:$4 sm:$0xff]   ;;  %v4465_v9 = vld [vmem:[%s5288_s4 + $0x400] ss:$16 sps:$4 sm:$0xff]  }
  0x66   : > { %3056 = vmatpush1.bf16.msra.mxu0 %v4417_v35  ;;  %v4470_v6 = vld [vmem:[%s5288_s4 + $0x604] ss:$16 sps:$4 sm:$0xff]   ;;  %v4468_v10 = vld [vmem:[%s5288_s4 + $0x600] ss:$16 sps:$4 sm:$0xff]  }
  0x67   : > { %3097 = vmatpush1.bf16.msra.mxu1 %v4418_v36  ;;  %3057 = vmatprep.subr.bf16.mxu0 %v4419_v37  ;;  %v4473_v11 = vld [vmem:[%s5288_s4 + $0x424] ss:$16 sps:$4 sm:$0xff]   ;;  %v4471_v13 = vld [vmem:[%s5288_s4 + $0x420] ss:$16 sps:$4 sm:$0xff]  }
  0x68   : > { %3098 = vmatprep.subr.bf16.mxu1 %v4421_v38  ;;  %v4476_v12 = vld [vmem:[%s5288_s4 + $0x624] ss:$16 sps:$4 sm:$0xff]   ;;  %v4474_v14 = vld [vmem:[%s5288_s4 + $0x620] ss:$16 sps:$4 sm:$0xff]   ;;  %v5432_v38 = vcombine.high %v5422_v34, %v5422_v34 }
  0x69   : > { %v4479_v15 = vld [vmem:[%s5288_s4 + $0x444] ss:$16 sps:$4 sm:$0xff]   ;;  %v4477_v17 = vld [vmem:[%s5288_s4 + $0x440] ss:$16 sps:$4 sm:$0xff]  }
  0x6a   : > { %3058 = vmatpush1.bf16.msra.mxu0 %v4423_v39  ;;  %v4482_v16 = vld [vmem:[%s5288_s4 + $0x644] ss:$16 sps:$4 sm:$0xff]   ;;  %v4480_v18 = vld [vmem:[%s5288_s4 + $0x640] ss:$16 sps:$4 sm:$0xff]  }
  0x6b   : > { %3099 = vmatpush1.bf16.msra.mxu1 %v4424_v40  ;;  %3059 = vmatprep.subr.bf16.mxu0 %v4425_v41  ;;  %v4485_v19 = vld [vmem:[%s5288_s4 + $0x464] ss:$16 sps:$4 sm:$0xff]   ;;  %v4483_v21 = vld [vmem:[%s5288_s4 + $0x460] ss:$16 sps:$4 sm:$0xff]  }
  0x6c   : > { %3100 = vmatprep.subr.bf16.mxu1 %v4427_v42  ;;  %v4488_v20 = vld [vmem:[%s5288_s4 + $0x664] ss:$16 sps:$4 sm:$0xff]   ;;  %v4486_v22 = vld [vmem:[%s5288_s4 + $0x660] ss:$16 sps:$4 sm:$0xff]  }
  0x6d   : > { %v4491_v23 = vld [vmem:[%s5288_s4 + $0x484] ss:$16 sps:$4 sm:$0xff]   ;;  %v4489_v25 = vld [vmem:[%s5288_s4 + $0x480] ss:$16 sps:$4 sm:$0xff]  }
  0x6e   : > { %3060 = vmatpush1.bf16.msra.mxu0 %v4429_v43  ;;  %v4494_v24 = vld [vmem:[%s5288_s4 + $0x684] ss:$16 sps:$4 sm:$0xff]   ;;  %v4492_v26 = vld [vmem:[%s5288_s4 + $0x680] ss:$16 sps:$4 sm:$0xff]  }
  0x6f   : > { %3101 = vmatpush1.bf16.msra.mxu1 %v4430_v44  ;;  %3061 = vmatprep.subr.bf16.mxu0 %v4431_v45  ;;  %v4497_v27 = vld [vmem:[%s5288_s4 + $0x4a4] ss:$16 sps:$4 sm:$0xff]   ;;  %v4495_v29 = vld [vmem:[%s5288_s4 + $0x4a0] ss:$16 sps:$4 sm:$0xff]  }
  0x70   : > { %3102 = vmatprep.subr.bf16.mxu1 %v4433_v46  ;;  %v4500_v28 = vld [vmem:[%s5288_s4 + $0x6a4] ss:$16 sps:$4 sm:$0xff]   ;;  %v4498_v30 = vld [vmem:[%s5288_s4 + $0x6a0] ss:$16 sps:$4 sm:$0xff]  }
  0x71   : > { %v4503_v31 = vld [vmem:[%s5288_s4 + $0x4c4] ss:$16 sps:$4 sm:$0xff]   ;;  %v4501_v35 = vld [vmem:[%s5288_s4 + $0x4c0] ss:$16 sps:$4 sm:$0xff]  }
  0x72   : > { %3062 = vmatpush1.bf16.msra.mxu0 %v4435_v50  ;;  %v4506_v32 = vld [vmem:[%s5288_s4 + $0x6c4] ss:$16 sps:$4 sm:$0xff]   ;;  %v4504_v36 = vld [vmem:[%s5288_s4 + $0x6c0] ss:$16 sps:$4 sm:$0xff]  }
  0x73   : > { %3103 = vmatpush1.bf16.msra.mxu1 %v4436_v51  ;;  %3063 = vmatprep.subr.bf16.mxu0 %v4437_v53  ;;  %v5419_v33 = vld [vmem:[%s5311_s20 + $0x10] sm:$0xff] }
  0x74   : > { %3104 = vmatprep.subr.bf16.mxu1 %v4439_v54  ;;  %v5428_v37 = vcombine.high %v5419_v33, %v5419_v33  ;;  %v4509_v39 = vld [vmem:[%s5288_s4 + $0x4e4] ss:$16 sps:$4 sm:$0xff]   ;;  %v4507_v41 = vld [vmem:[%s5288_s4 + $0x4e0] ss:$16 sps:$4 sm:$0xff]  }
  0x75   : > { %v4512_v40 = vld [vmem:[%s5288_s4 + $0x6e4] ss:$16 sps:$4 sm:$0xff]   ;;  %v4510_v42 = vld [vmem:[%s5288_s4 + $0x6e0] ss:$16 sps:$4 sm:$0xff]  }
  0x76   : > { %3064 = vmatpush1.bf16.msra.mxu0 %v4441_v55  ;;  %v4515_v43 = vld [vmem:[%s5288_s4 + $0x504] ss:$16 sps:$4 sm:$0xff]   ;;  %v4513_v45 = vld [vmem:[%s5288_s4 + $0x500] ss:$16 sps:$4 sm:$0xff]  }
  0x77   : > { %3105 = vmatpush1.bf16.msra.mxu1 %v4442_v56  ;;  %3065 = vmatprep.subr.bf16.mxu0 %v4443_v57  ;;  %v4518_v44 = vld [vmem:[%s5288_s4 + $0x704] ss:$16 sps:$4 sm:$0xff]   ;;  %v4516_v46 = vld [vmem:[%s5288_s4 + $0x700] ss:$16 sps:$4 sm:$0xff]  }
  0x78   : > { %3106 = vmatprep.subr.bf16.mxu1 %v4445_v58  ;;  %v4521_v47 = vld [vmem:[%s5288_s4 + $0x524] ss:$16 sps:$4 sm:$0xff]   ;;  %v4519_v50 = vld [vmem:[%s5288_s4 + $0x520] ss:$16 sps:$4 sm:$0xff]  }
  0x79   : > { %v4524_v49 = vld [vmem:[%s5288_s4 + $0x724] ss:$16 sps:$4 sm:$0xff]   ;;  %v4522_v51 = vld [vmem:[%s5288_s4 + $0x720] ss:$16 sps:$4 sm:$0xff]  }
  0x7a   : > { %3066 = vmatpush1.bf16.msra.mxu0 %v4447_v59  ;;  %v4527_v53 = vld [vmem:[%s5288_s4 + $0x544] ss:$16 sps:$4 sm:$0xff]   ;;  %v4525_v55 = vld [vmem:[%s5288_s4 + $0x540] ss:$16 sps:$4 sm:$0xff]  }
  0x7b   : > { %3107 = vmatpush1.bf16.msra.mxu1 %v4448_v60  ;;  %3067 = vmatprep.subr.bf16.mxu0 %v4449_v61  ;;  %v4530_v54 = vld [vmem:[%s5288_s4 + $0x744] ss:$16 sps:$4 sm:$0xff]   ;;  %v4528_v56 = vld [vmem:[%s5288_s4 + $0x740] ss:$16 sps:$4 sm:$0xff]  }
  0x7c   : > { %3108 = vmatprep.subr.bf16.mxu1 %v4451_v62  ;;  %v4533_v57 = vld [vmem:[%s5288_s4 + $0x564] ss:$16 sps:$4 sm:$0xff]   ;;  %v4531_v59 = vld [vmem:[%s5288_s4 + $0x560] ss:$16 sps:$4 sm:$0xff]  }
  0x7d   : > { %v4536_v58 = vld [vmem:[%s5288_s4 + $0x764] ss:$16 sps:$4 sm:$0xff]   ;;  %v4534_v60 = vld [vmem:[%s5288_s4 + $0x760] ss:$16 sps:$4 sm:$0xff]  }
  0x7e   : > { %3068 = vmatpush1.bf16.msra.mxu0 %v4453_v63  ;;  %v4539_v61 = vld [vmem:[%s5288_s4 + $0x584] ss:$16 sps:$4 sm:$0xff]   ;;  %v4537_v63 = vld [vmem:[%s5288_s4 + $0x580] ss:$16 sps:$4 sm:$0xff]  }
  0x7f   : > { %3109 = vmatpush1.bf16.msra.mxu1 %v4454_v0  ;;  %3069 = vmatprep.subr.bf16.mxu0 %v4455_v1  ;;  %v4542_v62 = vld [vmem:[%s5288_s4 + $0x784] ss:$16 sps:$4 sm:$0xff]   ;;  %v4540_v0 = vld [vmem:[%s5288_s4 + $0x780] ss:$16 sps:$4 sm:$0xff]  }
  0x80   : > { %3110 = vmatprep.subr.bf16.mxu1 %v4457_v2  ;;  %v4545_v1 = vld [vmem:[%s5288_s4 + $0x5a4] ss:$16 sps:$4 sm:$0xff]  }
  0x81   : > { %v4548_v2 = vld [vmem:[%s5288_s4 + $0x7a4] ss:$16 sps:$4 sm:$0xff]  }
  0x82   : > { %3070 = vmatpush1.bf16.msra.mxu0 %v4459_v3  ;;  %v4543_v3 = vld [vmem:[%s5288_s4 + $0x5a0] ss:$16 sps:$4 sm:$0xff]  }
  0x83   : > { %3111 = vmatpush1.bf16.msra.mxu1 %v4460_v4  ;;  %3121 = vmatprep.subr.bf16.mxu0 %v4467_v5  ;;  %v4546_v4 = vld [vmem:[%s5288_s4 + $0x7a0] ss:$16 sps:$4 sm:$0xff]   ;;  %v4551_v5 = vld [vmem:[%s5288_s4 + $0x5c4] ss:$16 sps:$4 sm:$0xff]  }
  0x84   : > { %3162 = vmatprep.subr.bf16.mxu1 %v4470_v6  ;;  %v4554_v6 = vld [vmem:[%s5288_s4 + $0x7c4] ss:$16 sps:$4 sm:$0xff]  }
  0x85   : > { %3072 = vmatmul.mubr.bf16.vlgmr.msra.gmra.mrb[0].mxu0 %v5388_v7 }
  0x86   : > { %3113 = vmatmul.mubr.bf16.vlgmr.msra.gmra.mrb[0].mxu1 %v5390_v8  ;;  %3122 = vmatpush1.bf16.msra.mxu0 %v4465_v9  ;;  %v4549_v9 = vld [vmem:[%s5288_s4 + $0x5c0] ss:$16 sps:$4 sm:$0xff]  }
  0x87   : > { %3163 = vmatpush1.bf16.msra.mxu1 %v4468_v10  ;;  %3123 = vmatprep.subr.bf16.mxu0 %v4473_v11  ;;  %v4552_v10 = vld [vmem:[%s5288_s4 + $0x7c0] ss:$16 sps:$4 sm:$0xff]   ;;  %v4557_v11 = vld [vmem:[%s5288_s4 + $0x5e4] ss:$16 sps:$4 sm:$0xff]  }
  0x88   : > { %3164 = vmatprep.subr.bf16.mxu1 %v4476_v12  ;;  %3153 = vmatprep.mubr.bf16.mxu0 %v5428_v37  ;;  %v4560_v12 = vld [vmem:[%s5288_s4 + $0x7e4] ss:$16 sps:$4 sm:$0xff]  }
  0x89   : > { %3194 = vmatprep.mubr.bf16.mxu1 %v5432_v38 }
  0x8a   : > { %3124 = vmatpush1.bf16.msra.mxu0 %v4471_v13  ;;  %v4555_v13 = vld [vmem:[%s5288_s4 + $0x5e0] ss:$16 sps:$4 sm:$0xff]  }
  0x8b   : > { %3165 = vmatpush1.bf16.msra.mxu1 %v4474_v14  ;;  %3125 = vmatprep.subr.bf16.mxu0 %v4479_v15  ;;  %v4558_v14 = vld [vmem:[%s5288_s4 + $0x7e0] ss:$16 sps:$4 sm:$0xff]   ;;  %v4567_v15 = vld [vmem:[%s5288_s4 + $0x804] ss:$16 sps:$4 sm:$0xff]  }
  0x8c   : > { %3166 = vmatprep.subr.bf16.mxu1 %v4482_v16  ;;  %v4570_v16 = vld [vmem:[%s5288_s4 + $0xa04] ss:$16 sps:$4 sm:$0xff]  }
  0x8e   : > { %3126 = vmatpush1.bf16.msra.mxu0 %v4477_v17  ;;  %v5476_v17 = vcombine.low %v5419_v33, %v5419_v33  ;;  %v4585_v33 = vld [vmem:[%s5288_s4 + $0x864] ss:$16 sps:$4 sm:$0xff]  }
  0x8f   : > { %3167 = vmatpush1.bf16.msra.mxu1 %v4480_v18  ;;  %3127 = vmatprep.subr.bf16.mxu0 %v4485_v19  ;;  %v5480_v18 = vcombine.low %v5422_v34, %v5422_v34  ;;  %v4565_v19 = vld [vmem:[%s5288_s4 + $0x800] ss:$16 sps:$4 sm:$0xff]   ;;  %v4588_v34 = vld [vmem:[%s5288_s4 + $0xa64] ss:$16 sps:$4 sm:$0xff]  }
  0x90   : > { %3168 = vmatprep.subr.bf16.mxu1 %v4488_v20  ;;  %v4568_v20 = vld [vmem:[%s5288_s4 + $0xa00] ss:$16 sps:$4 sm:$0xff]  }
  0x92   : > { %3128 = vmatpush1.bf16.msra.mxu0 %v4483_v21  ;;  %v4573_v21 = vld [vmem:[%s5288_s4 + $0x824] ss:$16 sps:$4 sm:$0xff]  }
  0x93   : > { %3169 = vmatpush1.bf16.msra.mxu1 %v4486_v22  ;;  %3129 = vmatprep.subr.bf16.mxu0 %v4491_v23  ;;  %v4576_v22 = vld [vmem:[%s5288_s4 + $0xa24] ss:$16 sps:$4 sm:$0xff]  }
  0x94   : > { %3170 = vmatprep.subr.bf16.mxu1 %v4494_v24  ;;  %v5487_v23 = vld [vmem:[%s5311_s20 + $0x20] sm:$0xff]  ;;  %v5490_v24 = vld [vmem:[%s5311_s20 + $0x28] sm:$0xff] }
  0x96   : > { %3130 = vmatpush1.bf16.msra.mxu0 %v4489_v25  ;;  %v5494_v25 = vcombine.high %v5487_v23, %v5487_v23 }
  0x97   : > { %3171 = vmatpush1.bf16.msra.mxu1 %v4492_v26  ;;  %3131 = vmatprep.subr.bf16.mxu0 %v4497_v27  ;;  %v5498_v26 = vcombine.high %v5490_v24, %v5490_v24  ;;  %v4571_v27 = vld [vmem:[%s5288_s4 + $0x820] ss:$16 sps:$4 sm:$0xff]  }
  0x98   : > { %3172 = vmatprep.subr.bf16.mxu1 %v4500_v28  ;;  %v4574_v28 = vld [vmem:[%s5288_s4 + $0xa20] ss:$16 sps:$4 sm:$0xff]  }
  0x9a   : > { %3132 = vmatpush1.bf16.msra.mxu0 %v4495_v29  ;;  %v4579_v29 = vld [vmem:[%s5288_s4 + $0x844] ss:$16 sps:$4 sm:$0xff]  }
  0x9b   : > { %3173 = vmatpush1.bf16.msra.mxu1 %v4498_v30  ;;  %3133 = vmatprep.subr.bf16.mxu0 %v4503_v31  ;;  %v4582_v30 = vld [vmem:[%s5288_s4 + $0xa44] ss:$16 sps:$4 sm:$0xff]   ;;  %v4577_v31 = vld [vmem:[%s5288_s4 + $0x840] ss:$16 sps:$4 sm:$0xff]  }
  0x9c   : > { %3174 = vmatprep.subr.bf16.mxu1 %v4506_v32  ;;  %v4580_v32 = vld [vmem:[%s5288_s4 + $0xa40] ss:$16 sps:$4 sm:$0xff]  }
  0x9e   : > { %3134 = vmatpush1.bf16.msra.mxu0 %v4501_v35  ;;  %v4583_v35 = vld [vmem:[%s5288_s4 + $0x860] ss:$16 sps:$4 sm:$0xff]  }
  0x9f   : > { %3175 = vmatpush1.bf16.msra.mxu1 %v4504_v36  ;;  %3135 = vmatprep.subr.bf16.mxu0 %v4509_v39  ;;  %v4586_v36 = vld [vmem:[%s5288_s4 + $0xa60] ss:$16 sps:$4 sm:$0xff]   ;;  %v4591_v39 = vld [vmem:[%s5288_s4 + $0x884] ss:$16 sps:$4 sm:$0xff]  }
  0xa0   : > { %3176 = vmatprep.subr.bf16.mxu1 %v4512_v40  ;;  %v4594_v40 = vld [vmem:[%s5288_s4 + $0xa84] ss:$16 sps:$4 sm:$0xff]  }
  0xa2   : > { %3136 = vmatpush1.bf16.msra.mxu0 %v4507_v41  ;;  %v4589_v41 = vld [vmem:[%s5288_s4 + $0x880] ss:$16 sps:$4 sm:$0xff]  }
  0xa3   : > { %3177 = vmatpush1.bf16.msra.mxu1 %v4510_v42  ;;  %3137 = vmatprep.subr.bf16.mxu0 %v4515_v43  ;;  %v4592_v42 = vld [vmem:[%s5288_s4 + $0xa80] ss:$16 sps:$4 sm:$0xff]   ;;  %v4597_v43 = vld [vmem:[%s5288_s4 + $0x8a4] ss:$16 sps:$4 sm:$0xff]  }
  0xa4   : > { %3178 = vmatprep.subr.bf16.mxu1 %v4518_v44  ;;  %v4600_v44 = vld [vmem:[%s5288_s4 + $0xaa4] ss:$16 sps:$4 sm:$0xff]  }
  0xa6   : > { %3138 = vmatpush1.bf16.msra.mxu0 %v4513_v45  ;;  %v4595_v45 = vld [vmem:[%s5288_s4 + $0x8a0] ss:$16 sps:$4 sm:$0xff]  }
  0xa7   : > { %3179 = vmatpush1.bf16.msra.mxu1 %v4516_v46  ;;  %3139 = vmatprep.subr.bf16.mxu0 %v4521_v47  ;;  %v4598_v46 = vld [vmem:[%s5288_s4 + $0xaa0] ss:$16 sps:$4 sm:$0xff]   ;;  %v4603_v47 = vld [vmem:[%s5288_s4 + $0x8c4] ss:$16 sps:$4 sm:$0xff]  }
  0xa8   : > { %3180 = vmatprep.subr.bf16.mxu1 %v4524_v49  ;;  %v4606_v49 = vld [vmem:[%s5288_s4 + $0xac4] ss:$16 sps:$4 sm:$0xff]  }
  0xaa   : > { %3140 = vmatpush1.bf16.msra.mxu0 %v4519_v50  ;;  %v4601_v50 = vld [vmem:[%s5288_s4 + $0x8c0] ss:$16 sps:$4 sm:$0xff]  }
  0xab   : > { %3181 = vmatpush1.bf16.msra.mxu1 %v4522_v51  ;;  %3141 = vmatprep.subr.bf16.mxu0 %v4527_v53  ;;  %v4604_v51 = vld [vmem:[%s5288_s4 + $0xac0] ss:$16 sps:$4 sm:$0xff]   ;;  %v4609_v53 = vld [vmem:[%s5288_s4 + $0x8e4] ss:$16 sps:$4 sm:$0xff]  }
  0xac   : > { %3182 = vmatprep.subr.bf16.mxu1 %v4530_v54  ;;  %v4612_v54 = vld [vmem:[%s5288_s4 + $0xae4] ss:$16 sps:$4 sm:$0xff]  }
  0xae   : > { %3142 = vmatpush1.bf16.msra.mxu0 %v4525_v55  ;;  %v4607_v55 = vld [vmem:[%s5288_s4 + $0x8e0] ss:$16 sps:$4 sm:$0xff]  }
  0xaf   : > { %3183 = vmatpush1.bf16.msra.mxu1 %v4528_v56  ;;  %3143 = vmatprep.subr.bf16.mxu0 %v4533_v57  ;;  %v4610_v56 = vld [vmem:[%s5288_s4 + $0xae0] ss:$16 sps:$4 sm:$0xff]   ;;  %v4615_v57 = vld [vmem:[%s5288_s4 + $0x904] ss:$16 sps:$4 sm:$0xff]  }
  0xb0   : > { %3184 = vmatprep.subr.bf16.mxu1 %v4536_v58  ;;  %v4618_v58 = vld [vmem:[%s5288_s4 + $0xb04] ss:$16 sps:$4 sm:$0xff]  }
  0xb2   : > { %3144 = vmatpush1.bf16.msra.mxu0 %v4531_v59  ;;  %v4613_v59 = vld [vmem:[%s5288_s4 + $0x900] ss:$16 sps:$4 sm:$0xff]  }
  0xb3   : > { %3185 = vmatpush1.bf16.msra.mxu1 %v4534_v60  ;;  %3145 = vmatprep.subr.bf16.mxu0 %v4539_v61  ;;  %v4616_v60 = vld [vmem:[%s5288_s4 + $0xb00] ss:$16 sps:$4 sm:$0xff]   ;;  %v4621_v61 = vld [vmem:[%s5288_s4 + $0x924] ss:$16 sps:$4 sm:$0xff]  }
  0xb4   : > { %3186 = vmatprep.subr.bf16.mxu1 %v4542_v62  ;;  %v4624_v62 = vld [vmem:[%s5288_s4 + $0xb24] ss:$16 sps:$4 sm:$0xff]  }
  0xb6   : > { %3146 = vmatpush1.bf16.msra.mxu0 %v4537_v63  ;;  %v4619_v63 = vld [vmem:[%s5288_s4 + $0x920] ss:$16 sps:$4 sm:$0xff]  }
  0xb7   : > { %3187 = vmatpush1.bf16.msra.mxu1 %v4540_v0  ;;  %3147 = vmatprep.subr.bf16.mxu0 %v4545_v1  ;;  %v4622_v0 = vld [vmem:[%s5288_s4 + $0xb20] ss:$16 sps:$4 sm:$0xff]   ;;  %v4627_v1 = vld [vmem:[%s5288_s4 + $0x944] ss:$16 sps:$4 sm:$0xff]  }
  0xb8   : > { %3188 = vmatprep.subr.bf16.mxu1 %v4548_v2  ;;  %v4630_v2 = vld [vmem:[%s5288_s4 + $0xb44] ss:$16 sps:$4 sm:$0xff]  }
  0xba   : > { %3148 = vmatpush1.bf16.msra.mxu0 %v4543_v3  ;;  %v4625_v3 = vld [vmem:[%s5288_s4 + $0x940] ss:$16 sps:$4 sm:$0xff]  }
  0xbb   : > { %3189 = vmatpush1.bf16.msra.mxu1 %v4546_v4  ;;  %3149 = vmatprep.subr.bf16.mxu0 %v4551_v5  ;;  %v4628_v4 = vld [vmem:[%s5288_s4 + $0xb40] ss:$16 sps:$4 sm:$0xff]   ;;  %v4633_v5 = vld [vmem:[%s5288_s4 + $0x964] ss:$16 sps:$4 sm:$0xff]  }
  0xbc   : > { %3190 = vmatprep.subr.bf16.mxu1 %v4554_v6  ;;  %v4636_v6 = vld [vmem:[%s5288_s4 + $0xb64] ss:$16 sps:$4 sm:$0xff]  }
  0xbe   : > { %3150 = vmatpush1.bf16.msra.mxu0 %v4549_v9  ;;  %v4631_v9 = vld [vmem:[%s5288_s4 + $0x960] ss:$16 sps:$4 sm:$0xff]  }
  0xbf   : > { %3191 = vmatpush1.bf16.msra.mxu1 %v4552_v10  ;;  %3151 = vmatprep.subr.bf16.mxu0 %v4557_v11  ;;  %v4634_v10 = vld [vmem:[%s5288_s4 + $0xb60] ss:$16 sps:$4 sm:$0xff]   ;;  %v4639_v11 = vld [vmem:[%s5288_s4 + $0x984] ss:$16 sps:$4 sm:$0xff]  }
  0xc0   : > { %3192 = vmatprep.subr.bf16.mxu1 %v4560_v12  ;;  %v4642_v12 = vld [vmem:[%s5288_s4 + $0xb84] ss:$16 sps:$4 sm:$0xff]  }
  0xc2   : > { %3152 = vmatpush1.bf16.msra.mxu0 %v4555_v13  ;;  %v4637_v13 = vld [vmem:[%s5288_s4 + $0x980] ss:$16 sps:$4 sm:$0xff]  }
  0xc3   : > { %3193 = vmatpush1.bf16.msra.mxu1 %v4558_v14  ;;  %3203 = vmatprep.subr.bf16.mxu0 %v4567_v15  ;;  %v4640_v14 = vld [vmem:[%s5288_s4 + $0xb80] ss:$16 sps:$4 sm:$0xff]   ;;  %v4645_v15 = vld [vmem:[%s5288_s4 + $0x9a4] ss:$16 sps:$4 sm:$0xff]  }
  0xc4   : > { %3244 = vmatprep.subr.bf16.mxu1 %v4570_v16  ;;  %v4648_v16 = vld [vmem:[%s5288_s4 + $0xba4] ss:$16 sps:$4 sm:$0xff]  }
  0xc5   : > { %3154 = vmatmul.mubr.bf16.vlgmr.msra.gmra.mrb[4].mxu0 %v5476_v17 }
  0xc6   : > { %3195 = vmatmul.mubr.bf16.vlgmr.msra.gmra.mrb[4].mxu1 %v5480_v18  ;;  %3204 = vmatpush1.bf16.msra.mxu0 %v4565_v19  ;;  %v4643_v19 = vld [vmem:[%s5288_s4 + $0x9a0] ss:$16 sps:$4 sm:$0xff]  }
  0xc7   : > { %3245 = vmatpush1.bf16.msra.mxu1 %v4568_v20  ;;  %3205 = vmatprep.subr.bf16.mxu0 %v4573_v21  ;;  %v4646_v20 = vld [vmem:[%s5288_s4 + $0xba0] ss:$16 sps:$4 sm:$0xff]   ;;  %v4651_v21 = vld [vmem:[%s5288_s4 + $0x9c4] ss:$16 sps:$4 sm:$0xff]  }
  0xc8   : > { %3246 = vmatprep.subr.bf16.mxu1 %v4576_v22  ;;  %3235 = vmatprep.mubr.bf16.mxu0 %v5494_v25  ;;  %v4654_v22 = vld [vmem:[%s5288_s4 + $0xbc4] ss:$16 sps:$4 sm:$0xff]  }
  0xc9   : > { %3276 = vmatprep.mubr.bf16.mxu1 %v5498_v26 }
  0xca   : > { %3206 = vmatpush1.bf16.msra.mxu0 %v4571_v27  ;;  %v4649_v27 = vld [vmem:[%s5288_s4 + $0x9c0] ss:$16 sps:$4 sm:$0xff]  }
  0xcb   : > { %3247 = vmatpush1.bf16.msra.mxu1 %v4574_v28  ;;  %3207 = vmatprep.subr.bf16.mxu0 %v4579_v29  ;;  %v4652_v28 = vld [vmem:[%s5288_s4 + $0xbc0] ss:$16 sps:$4 sm:$0xff]   ;;  %v4657_v29 = vld [vmem:[%s5288_s4 + $0x9e4] ss:$16 sps:$4 sm:$0xff]  }
  0xcc   : > { %3248 = vmatprep.subr.bf16.mxu1 %v4582_v30  ;;  %v4660_v30 = vld [vmem:[%s5288_s4 + $0xbe4] ss:$16 sps:$4 sm:$0xff]  }
  0xce   : > { %3208 = vmatpush1.bf16.msra.mxu0 %v4577_v31  ;;  %v4655_v31 = vld [vmem:[%s5288_s4 + $0x9e0] ss:$16 sps:$4 sm:$0xff]  }
  0xcf   : > { %3249 = vmatpush1.bf16.msra.mxu1 %v4580_v32  ;;  %3209 = vmatprep.subr.bf16.mxu0 %v4585_v33  ;;  %v4658_v32 = vld [vmem:[%s5288_s4 + $0xbe0] ss:$16 sps:$4 sm:$0xff]   ;;  %v4667_v33 = vld [vmem:[%s5288_s4 + $0xc04] ss:$16 sps:$4 sm:$0xff]  }
  0xd0   : > { %3250 = vmatprep.subr.bf16.mxu1 %v4588_v34  ;;  %v4670_v34 = vld [vmem:[%s5288_s4 + $0xc] ss:$16 sps:$4 sm:$0xff]  }
  0xd2   : > { %3210 = vmatpush1.bf16.msra.mxu0 %v4583_v35  ;;  %v5566_v35 = vcombine.low %v5487_v23, %v5487_v23 }
  0xd3   : > { %3251 = vmatpush1.bf16.msra.mxu1 %v4586_v36  ;;  %3211 = vmatprep.subr.bf16.mxu0 %v4591_v39  ;;  %v5570_v36 = vcombine.low %v5490_v24, %v5490_v24  ;;  %v4665_v39 = vld [vmem:[%s5288_s4 + $0xc00] ss:$16 sps:$4 sm:$0xff]  }
  0xd4   : > { %3252 = vmatprep.subr.bf16.mxu1 %v4594_v40  ;;  %v5574_v40 = vld [vmem:[%s5311_s20 + $0x30] sm:$0xff] }
  0xd5   : > { %v5581_v23 = vcombine.high %v5574_v40, %v5574_v40  ;;  %v4671_v24 = vld [vmem:[%s5288_s4 + $0xc20] ss:$16 sps:$4 sm:$0xff]  }
  0xd6   : > { %3212 = vmatpush1.bf16.msra.mxu0 %v4589_v41  ;;  %v4668_v41 = vld [vmem:[%s5288_s4 + $0x8] ss:$16 sps:$4 sm:$0xff]  }
  0xd7   : > { %3253 = vmatpush1.bf16.msra.mxu1 %v4592_v42  ;;  %3213 = vmatprep.subr.bf16.mxu0 %v4597_v43  ;;  %v4673_v42 = vld [vmem:[%s5288_s4 + $0xc24] ss:$16 sps:$4 sm:$0xff]   ;;  %v4676_v43 = vld [vmem:[%s5288_s4 + $0x2c] ss:$16 sps:$4 sm:$0xff]  }
  0xd8   : > { %3254 = vmatprep.subr.bf16.mxu1 %v4600_v44  ;;  %v4674_v44 = vld [vmem:[%s5288_s4 + $0x28] ss:$16 sps:$4 sm:$0xff]  }
  0xda   : > { %3214 = vmatpush1.bf16.msra.mxu0 %v4595_v45  ;;  %v4679_v45 = vld [vmem:[%s5288_s4 + $0xc44] ss:$16 sps:$4 sm:$0xff]  }
  0xdb   : > { %3255 = vmatpush1.bf16.msra.mxu1 %v4598_v46  ;;  %3215 = vmatprep.subr.bf16.mxu0 %v4603_v47  ;;  %v4682_v46 = vld [vmem:[%s5288_s4 + $0x4c] ss:$16 sps:$4 sm:$0xff]   ;;  %v4677_v47 = vld [vmem:[%s5288_s4 + $0xc40] ss:$16 sps:$4 sm:$0xff]  }
  0xdc   : > { %3256 = vmatprep.subr.bf16.mxu1 %v4606_v49  ;;  %v4680_v49 = vld [vmem:[%s5288_s4 + $0x48] ss:$16 sps:$4 sm:$0xff]  }
  0xde   : > { %3216 = vmatpush1.bf16.msra.mxu0 %v4601_v50  ;;  %v4685_v50 = vld [vmem:[%s5288_s4 + $0xc64] ss:$16 sps:$4 sm:$0xff]  }
  0xdf   : > { %3257 = vmatpush1.bf16.msra.mxu1 %v4604_v51  ;;  %3217 = vmatprep.subr.bf16.mxu0 %v4609_v53  ;;  %v4688_v51 = vld [vmem:[%s5288_s4 + $0x6c] ss:$16 sps:$4 sm:$0xff]   ;;  %v4683_v53 = vld [vmem:[%s5288_s4 + $0xc60] ss:$16 sps:$4 sm:$0xff]  }
  0xe0   : > { %3258 = vmatprep.subr.bf16.mxu1 %v4612_v54  ;;  %v4686_v54 = vld [vmem:[%s5288_s4 + $0x68] ss:$16 sps:$4 sm:$0xff]  }
  0xe2   : > { %3218 = vmatpush1.bf16.msra.mxu0 %v4607_v55  ;;  %v4694_v55 = vld [vmem:[%s5288_s4 + $0x8c] ss:$16 sps:$4 sm:$0xff]  }
  0xe3   : > { %3259 = vmatpush1.bf16.msra.mxu1 %v4610_v56  ;;  %3219 = vmatprep.subr.bf16.mxu0 %v4615_v57  ;;  %v4689_v56 = vld [vmem:[%s5288_s4 + $0xc80] ss:$16 sps:$4 sm:$0xff]   ;;  %v4692_v57 = vld [vmem:[%s5288_s4 + $0x88] ss:$16 sps:$4 sm:$0xff]  }
  0xe4   : > { %3260 = vmatprep.subr.bf16.mxu1 %v4618_v58  ;;  %v4697_v58 = vld [vmem:[%s5288_s4 + $0xca4] ss:$16 sps:$4 sm:$0xff]  }
  0xe6   : > { %3220 = vmatpush1.bf16.msra.mxu0 %v4613_v59  ;;  %v4700_v59 = vld [vmem:[%s5288_s4 + $0xac] ss:$16 sps:$4 sm:$0xff]  }
  0xe7   : > { %3261 = vmatpush1.bf16.msra.mxu1 %v4616_v60  ;;  %3221 = vmatprep.subr.bf16.mxu0 %v4621_v61  ;;  %v4695_v60 = vld [vmem:[%s5288_s4 + $0xca0] ss:$16 sps:$4 sm:$0xff]   ;;  %v4698_v61 = vld [vmem:[%s5288_s4 + $0xa8] ss:$16 sps:$4 sm:$0xff]  }
  0xe8   : > { %3262 = vmatprep.subr.bf16.mxu1 %v4624_v62  ;;  %v4703_v62 = vld [vmem:[%s5288_s4 + $0xcc4] ss:$16 sps:$4 sm:$0xff]  }
  0xea   : > { %3222 = vmatpush1.bf16.msra.mxu0 %v4619_v63  ;;  %v4706_v63 = vld [vmem:[%s5288_s4 + $0xcc] ss:$16 sps:$4 sm:$0xff]  }
  0xeb   : > { %3263 = vmatpush1.bf16.msra.mxu1 %v4622_v0  ;;  %3223 = vmatprep.subr.bf16.mxu0 %v4627_v1  ;;  %v4701_v0 = vld [vmem:[%s5288_s4 + $0xcc0] ss:$16 sps:$4 sm:$0xff]   ;;  %v4704_v1 = vld [vmem:[%s5288_s4 + $0xc8] ss:$16 sps:$4 sm:$0xff]  }
  0xec   : > { %3264 = vmatprep.subr.bf16.mxu1 %v4630_v2  ;;  %v4709_v2 = vld [vmem:[%s5288_s4 + $0xce4] ss:$16 sps:$4 sm:$0xff]  }
  0xee   : > { %3224 = vmatpush1.bf16.msra.mxu0 %v4625_v3  ;;  %v4712_v3 = vld [vmem:[%s5288_s4 + $0xec] ss:$16 sps:$4 sm:$0xff]  }
  0xef   : > { %3265 = vmatpush1.bf16.msra.mxu1 %v4628_v4  ;;  %3225 = vmatprep.subr.bf16.mxu0 %v4633_v5  ;;  %v4707_v4 = vld [vmem:[%s5288_s4 + $0xce0] ss:$16 sps:$4 sm:$0xff]   ;;  %v4710_v5 = vld [vmem:[%s5288_s4 + $0xe8] ss:$16 sps:$4 sm:$0xff]  }
  0xf0   : > { %3266 = vmatprep.subr.bf16.mxu1 %v4636_v6  ;;  %v4715_v6 = vld [vmem:[%s5288_s4 + $0xd04] ss:$16 sps:$4 sm:$0xff]  }
  0xf2   : > { %3226 = vmatpush1.bf16.msra.mxu0 %v4631_v9  ;;  %v4718_v9 = vld [vmem:[%s5288_s4 + $0x10c] ss:$16 sps:$4 sm:$0xff]  }
  0xf3   : > { %3267 = vmatpush1.bf16.msra.mxu1 %v4634_v10  ;;  %3227 = vmatprep.subr.bf16.mxu0 %v4639_v11  ;;  %v4713_v10 = vld [vmem:[%s5288_s4 + $0xd00] ss:$16 sps:$4 sm:$0xff]   ;;  %v4716_v11 = vld [vmem:[%s5288_s4 + $0x108] ss:$16 sps:$4 sm:$0xff]  }
  0xf4   : > { %3268 = vmatprep.subr.bf16.mxu1 %v4642_v12  ;;  %v4721_v12 = vld [vmem:[%s5288_s4 + $0xd24] ss:$16 sps:$4 sm:$0xff]  }
  0xf6   : > { %3228 = vmatpush1.bf16.msra.mxu0 %v4637_v13  ;;  %v4724_v13 = vld [vmem:[%s5288_s4 + $0x12c] ss:$16 sps:$4 sm:$0xff]  }
  0xf7   : > { %3269 = vmatpush1.bf16.msra.mxu1 %v4640_v14  ;;  %3229 = vmatprep.subr.bf16.mxu0 %v4645_v15  ;;  %v4719_v14 = vld [vmem:[%s5288_s4 + $0xd20] ss:$16 sps:$4 sm:$0xff]   ;;  %v4722_v15 = vld [vmem:[%s5288_s4 + $0x128] ss:$16 sps:$4 sm:$0xff]  }
  0xf8   : > { %3270 = vmatprep.subr.bf16.mxu1 %v4648_v16  ;;  %v4727_v16 = vld [vmem:[%s5288_s4 + $0xd44] ss:$16 sps:$4 sm:$0xff]  }
  0xfa   : > { %3230 = vmatpush1.bf16.msra.mxu0 %v4643_v19  ;;  %v4730_v19 = vld [vmem:[%s5288_s4 + $0x14c] ss:$16 sps:$4 sm:$0xff]  }
  0xfb   : > { %3271 = vmatpush1.bf16.msra.mxu1 %v4646_v20  ;;  %3231 = vmatprep.subr.bf16.mxu0 %v4651_v21  ;;  %v4725_v20 = vld [vmem:[%s5288_s4 + $0xd40] ss:$16 sps:$4 sm:$0xff]   ;;  %v4728_v21 = vld [vmem:[%s5288_s4 + $0x148] ss:$16 sps:$4 sm:$0xff]  }
  0xfc   : > { %3272 = vmatprep.subr.bf16.mxu1 %v4654_v22  ;;  %v4733_v22 = vld [vmem:[%s5288_s4 + $0xd64] ss:$16 sps:$4 sm:$0xff]  }
  0xfe   : > { %3232 = vmatpush1.bf16.msra.mxu0 %v4649_v27  ;;  %v4736_v27 = vld [vmem:[%s5288_s4 + $0x16c] ss:$16 sps:$4 sm:$0xff]  }
  0xff   : > { %3273 = vmatpush1.bf16.msra.mxu1 %v4652_v28  ;;  %3233 = vmatprep.subr.bf16.mxu0 %v4657_v29  ;;  %v4731_v28 = vld [vmem:[%s5288_s4 + $0xd60] ss:$16 sps:$4 sm:$0xff]   ;;  %v4734_v29 = vld [vmem:[%s5288_s4 + $0x168] ss:$16 sps:$4 sm:$0xff]  }
 0x100   : > { %3274 = vmatprep.subr.bf16.mxu1 %v4660_v30  ;;  %v4739_v30 = vld [vmem:[%s5288_s4 + $0xd84] ss:$16 sps:$4 sm:$0xff]  }
 0x102   : > { %3234 = vmatpush1.bf16.msra.mxu0 %v4655_v31  ;;  %v4742_v31 = vld [vmem:[%s5288_s4 + $0x18c] ss:$16 sps:$4 sm:$0xff]  }
 0x103   : > { %3275 = vmatpush1.bf16.msra.mxu1 %v4658_v32  ;;  %3285 = vmatprep.subr.bf16.mxu0 %v4667_v33  ;;  %v4737_v32 = vld [vmem:[%s5288_s4 + $0xd80] ss:$16 sps:$4 sm:$0xff]   ;;  %v4740_v33 = vld [vmem:[%s5288_s4 + $0x188] ss:$16 sps:$4 sm:$0xff]  }
 0x104   : > { %3326 = vmatprep.subr.bf16.mxu1 %v4670_v34  ;;  %v4745_v34 = vld [vmem:[%s5288_s4 + $0xda4] ss:$16 sps:$4 sm:$0xff]  }
 0x105   : > { %3236 = vmatmul.mubr.bf16.vlgmr.msra.gmra.mrb[8].mxu0 %v5566_v35 }
 0x106   : > { %3277 = vmatmul.mubr.bf16.vlgmr.msra.gmra.mrb[8].mxu1 %v5570_v36  ;;  %3286 = vmatpush1.bf16.msra.mxu0 %v4665_v39  ;;  %v4748_v39 = vld [vmem:[%s5288_s4 + $0x1ac] ss:$16 sps:$4 sm:$0xff]  }
 0x107   : > { %3327 = vmatpush1.bf16.msra.mxu1 %v4668_v41  ;;  %3287 = vmatprep.subr.bf16.mxu0 %v4673_v42  ;;  %v4743_v41 = vld [vmem:[%s5288_s4 + $0xda0] ss:$16 sps:$4 sm:$0xff]   ;;  %v4746_v42 = vld [vmem:[%s5288_s4 + $0x1a8] ss:$16 sps:$4 sm:$0xff]  }
 0x108   : > { %3328 = vmatprep.subr.bf16.mxu1 %v4676_v43  ;;  %3317 = vmatprep.mubr.bf16.mxu0 %v5581_v23  ;;  %v4751_v43 = vld [vmem:[%s5288_s4 + $0xdc4] ss:$16 sps:$4 sm:$0xff]  }
 0x109   : > { %3358 = vmatprep.mubr.bf16.mxu1 %v5361_v48  ;;  %v4691_v48 = vld [vmem:[%s5288_s4 + $0xc84] ss:$16 sps:$4 sm:$0xff]  }
 0x10a   : > { %3288 = vmatpush1.bf16.msra.mxu0 %v4671_v24  ;;  %v4754_v24 = vld [vmem:[%s5288_s4 + $0x1cc] ss:$16 sps:$4 sm:$0xff]  }
 0x10b   : > { %3329 = vmatpush1.bf16.msra.mxu1 %v4674_v44  ;;  %3289 = vmatprep.subr.bf16.mxu0 %v4679_v45  ;;  %v4749_v44 = vld [vmem:[%s5288_s4 + $0xdc0] ss:$16 sps:$4 sm:$0xff]   ;;  %v4752_v45 = vld [vmem:[%s5288_s4 + $0x1c8] ss:$16 sps:$4 sm:$0xff]  }
 0x10c   : > { %3330 = vmatprep.subr.bf16.mxu1 %v4682_v46  ;;  %v4757_v46 = vld [vmem:[%s5288_s4 + $0xde4] ss:$16 sps:$4 sm:$0xff]  }
 0x10e   : > { %3290 = vmatpush1.bf16.msra.mxu0 %v4677_v47  ;;  %v4760_v47 = vld [vmem:[%s5288_s4 + $0x1ec] ss:$16 sps:$4 sm:$0xff]  }
 0x10f   : > { %3331 = vmatpush1.bf16.msra.mxu1 %v4680_v49  ;;  %3291 = vmatprep.subr.bf16.mxu0 %v4685_v50  ;;  %v4755_v49 = vld [vmem:[%s5288_s4 + $0xde0] ss:$16 sps:$4 sm:$0xff]   ;;  %v4758_v50 = vld [vmem:[%s5288_s4 + $0x1e8] ss:$16 sps:$4 sm:$0xff]  }
 0x110   : > { %3332 = vmatprep.subr.bf16.mxu1 %v4688_v51  ;;  %v4765_v51 = vld [vmem:[%s5288_s4 + $0x20c] ss:$16 sps:$4 sm:$0xff]  }
 0x112   : > { %3292 = vmatpush1.bf16.msra.mxu0 %v4683_v53  ;;  %v4768_v53 = vld [vmem:[%s5288_s4 + $0x40c] ss:$16 sps:$4 sm:$0xff]  }
 0x113   : > { %3333 = vmatpush1.bf16.msra.mxu1 %v4686_v54  ;;  %3293 = vmatprep.subr.bf16.mxu0 %v4691_v48  ;;  %v5649_v54 = vcombine.low %v5574_v40, %v5574_v40  ;;  %v4763_v48 = vld [vmem:[%s5288_s4 + $0x208] ss:$16 sps:$4 sm:$0xff]  }
 0x114   : > { %3334 = vmatprep.subr.bf16.mxu1 %v4694_v55  ;;  %v4766_v55 = vld [vmem:[%s5288_s4 + $0x408] ss:$16 sps:$4 sm:$0xff]  }
 0x115   : > { %v4772_v40 = vld [vmem:[%s5288_s4 + $0x428] ss:$16 sps:$4 sm:$0xff]  }
 0x116   : > { %3294 = vmatpush1.bf16.msra.mxu0 %v4689_v56  ;;  %v4771_v56 = vld [vmem:[%s5288_s4 + $0x22c] ss:$16 sps:$4 sm:$0xff]  }
 0x117   : > { %3335 = vmatpush1.bf16.msra.mxu1 %v4692_v57  ;;  %3295 = vmatprep.subr.bf16.mxu0 %v4697_v58  ;;  %v4774_v57 = vld [vmem:[%s5288_s4 + $0x42c] ss:$16 sps:$4 sm:$0xff]   ;;  %v4769_v58 = vld [vmem:[%s5288_s4 + $0x228] ss:$16 sps:$4 sm:$0xff]  }
 0x118   : > { %3336 = vmatprep.subr.bf16.mxu1 %v4700_v59  ;;  %v4777_v59 = vld [vmem:[%s5288_s4 + $0x24c] ss:$16 sps:$4 sm:$0xff]  }
 0x11a   : > { %3296 = vmatpush1.bf16.msra.mxu0 %v4695_v60  ;;  %v4780_v60 = vld [vmem:[%s5288_s4 + $0x44c] ss:$16 sps:$4 sm:$0xff]  }
 0x11b   : > { %3337 = vmatpush1.bf16.msra.mxu1 %v4698_v61  ;;  %3297 = vmatprep.subr.bf16.mxu0 %v4703_v62  ;;  %v4775_v61 = vld [vmem:[%s5288_s4 + $0x248] ss:$16 sps:$4 sm:$0xff]   ;;  %v4783_v62 = vld [vmem:[%s5288_s4 + $0x26c] ss:$16 sps:$4 sm:$0xff]  }
 0x11c   : > { %3338 = vmatprep.subr.bf16.mxu1 %v4706_v63  ;;  %v4786_v63 = vld [vmem:[%s5288_s4 + $0x46c] ss:$16 sps:$4 sm:$0xff]  }
 0x11e   : > { %3298 = vmatpush1.bf16.msra.mxu0 %v4701_v0  ;;  %v4784_v0 = vld [vmem:[%s5288_s4 + $0x468] ss:$16 sps:$4 sm:$0xff]  }
 0x11f   : > { %3339 = vmatpush1.bf16.msra.mxu1 %v4704_v1  ;;  %3299 = vmatprep.subr.bf16.mxu0 %v4709_v2  ;;  %v4792_v1 = vld [vmem:[%s5288_s4 + $0x48c] ss:$16 sps:$4 sm:$0xff]   ;;  %v4787_v2 = vld [vmem:[%s5288_s4 + $0x288] ss:$16 sps:$4 sm:$0xff]  }
 0x120   : > { %3340 = vmatprep.subr.bf16.mxu1 %v4712_v3  ;;  %v4790_v3 = vld [vmem:[%s5288_s4 + $0x488] ss:$16 sps:$4 sm:$0xff]  }
 0x122   : > { %3300 = vmatpush1.bf16.msra.mxu0 %v4707_v4  ;;  %v4795_v4 = vld [vmem:[%s5288_s4 + $0x2ac] ss:$16 sps:$4 sm:$0xff]  }
 0x123   : > { %3341 = vmatpush1.bf16.msra.mxu1 %v4710_v5  ;;  %3301 = vmatprep.subr.bf16.mxu0 %v4715_v6  ;;  %v4798_v5 = vld [vmem:[%s5288_s4 + $0x4ac] ss:$16 sps:$4 sm:$0xff]   ;;  %v4793_v6 = vld [vmem:[%s5288_s4 + $0x2a8] ss:$16 sps:$4 sm:$0xff]  }
 0x124   : > { %3342 = vmatprep.subr.bf16.mxu1 %v4718_v9  ;;  %v4796_v9 = vld [vmem:[%s5288_s4 + $0x4a8] ss:$16 sps:$4 sm:$0xff]  }
 0x126   : > { %3302 = vmatpush1.bf16.msra.mxu0 %v4713_v10  ;;  %v4801_v10 = vld [vmem:[%s5288_s4 + $0x2cc] ss:$16 sps:$4 sm:$0xff]  }
 0x127   : > { %3343 = vmatpush1.bf16.msra.mxu1 %v4716_v11  ;;  %3303 = vmatprep.subr.bf16.mxu0 %v4721_v12  ;;  %v4804_v11 = vld [vmem:[%s5288_s4 + $0x4cc] ss:$16 sps:$4 sm:$0xff]  }
 0x128   : > { %3344 = vmatprep.subr.bf16.mxu1 %v4724_v13 }
 0x12a   : > { %3304 = vmatpush1.bf16.msra.mxu0 %v4719_v14  ;;  %v4799_v14 = vld [vmem:[%s5288_s4 + $0x2c8] ss:$16 sps:$4 sm:$0xff]  }
 0x12b   : > { %3345 = vmatpush1.bf16.msra.mxu1 %v4722_v15  ;;  %3305 = vmatprep.subr.bf16.mxu0 %v4727_v16  ;;  %v4802_v15 = vld [vmem:[%s5288_s4 + $0x4c8] ss:$16 sps:$4 sm:$0xff]  }
 0x12c   : > { %3346 = vmatprep.subr.bf16.mxu1 %v4730_v19 }
 0x12e   : > { %3306 = vmatpush1.bf16.msra.mxu0 %v4725_v20 }
 0x12f   : > { %3347 = vmatpush1.bf16.msra.mxu1 %v4728_v21  ;;  %3307 = vmatprep.subr.bf16.mxu0 %v4733_v22 }
 0x130   : > { %3348 = vmatprep.subr.bf16.mxu1 %v4736_v27 }
 0x132   : > { %3308 = vmatpush1.bf16.msra.mxu0 %v4731_v28 }
 0x133   : > { %3349 = vmatpush1.bf16.msra.mxu1 %v4734_v29  ;;  %3309 = vmatprep.subr.bf16.mxu0 %v4739_v30  ;;  %v4807_v30 = vld [vmem:[%s5288_s4 + $0x2ec] ss:$16 sps:$4 sm:$0xff]  }
 0x134   : > { %3350 = vmatprep.subr.bf16.mxu1 %v4742_v31  ;;  %v4810_v31 = vld [vmem:[%s5288_s4 + $0x4ec] ss:$16 sps:$4 sm:$0xff]  }
 0x136   : > { %3310 = vmatpush1.bf16.msra.mxu0 %v4737_v32  ;;  %v4805_v32 = vld [vmem:[%s5288_s4 + $0x2e8] ss:$16 sps:$4 sm:$0xff]  }
 0x137   : > { %3351 = vmatpush1.bf16.msra.mxu1 %v4740_v33  ;;  %3311 = vmatprep.subr.bf16.mxu0 %v4745_v34  ;;  %v4808_v33 = vld [vmem:[%s5288_s4 + $0x4e8] ss:$16 sps:$4 sm:$0xff]   ;;  %v4813_v34 = vld [vmem:[%s5288_s4 + $0x30c] ss:$16 sps:$4 sm:$0xff]  }
 0x138   : > { %3352 = vmatprep.subr.bf16.mxu1 %v4748_v39  ;;  %v4816_v39 = vld [vmem:[%s5288_s4 + $0x50c] ss:$16 sps:$4 sm:$0xff]  }
 0x13a   : > { %3312 = vmatpush1.bf16.msra.mxu0 %v4743_v41  ;;  %v4811_v41 = vld [vmem:[%s5288_s4 + $0x308] ss:$16 sps:$4 sm:$0xff]  }
 0x13b   : > { %3353 = vmatpush1.bf16.msra.mxu1 %v4746_v42  ;;  %3313 = vmatprep.subr.bf16.mxu0 %v4751_v43  ;;  %v4814_v42 = vld [vmem:[%s5288_s4 + $0x508] ss:$16 sps:$4 sm:$0xff]   ;;  %v4819_v43 = vld [vmem:[%s5288_s4 + $0x32c] ss:$16 sps:$4 sm:$0xff]  }
 0x13c   : > { %3354 = vmatprep.subr.bf16.mxu1 %v4754_v24  ;;  %v4822_v24 = vld [vmem:[%s5288_s4 + $0x52c] ss:$16 sps:$4 sm:$0xff]  }
 0x13e   : > { %3314 = vmatpush1.bf16.msra.mxu0 %v4749_v44  ;;  %v4817_v44 = vld [vmem:[%s5288_s4 + $0x328] ss:$16 sps:$4 sm:$0xff]  }
 0x13f   : > { %3355 = vmatpush1.bf16.msra.mxu1 %v4752_v45  ;;  %3315 = vmatprep.subr.bf16.mxu0 %v4757_v46  ;;  %v4820_v45 = vld [vmem:[%s5288_s4 + $0x528] ss:$16 sps:$4 sm:$0xff]   ;;  %v4825_v46 = vld [vmem:[%s5288_s4 + $0x34c] ss:$16 sps:$4 sm:$0xff]  }
 0x140   : > { %3356 = vmatprep.subr.bf16.mxu1 %v4760_v47  ;;  %v4828_v47 = vld [vmem:[%s5288_s4 + $0x54c] ss:$16 sps:$4 sm:$0xff]  }
 0x142   : > { %3316 = vmatpush1.bf16.msra.mxu0 %v4755_v49  ;;  %v4823_v49 = vld [vmem:[%s5288_s4 + $0x348] ss:$16 sps:$4 sm:$0xff]  }
 0x143   : > { %3357 = vmatpush1.bf16.msra.mxu1 %v4758_v50  ;;  %3367 = vmatprep.subr.bf16.mxu0 %v4765_v51  ;;  %v4826_v50 = vld [vmem:[%s5288_s4 + $0x548] ss:$16 sps:$4 sm:$0xff]   ;;  %v4831_v51 = vld [vmem:[%s5288_s4 + $0x36c] ss:$16 sps:$4 sm:$0xff]  }
 0x144   : > { %3408 = vmatprep.subr.bf16.mxu1 %v4768_v53  ;;  %v4834_v53 = vld [vmem:[%s5288_s4 + $0x56c] ss:$16 sps:$4 sm:$0xff]  }
 0x145   : > { %3318 = vmatmul.mubr.bf16.vlgmr.msra.gmra.mrb[12].mxu0 %v5649_v54 }
 0x146   : > { %3359 = vmatmul.mubr.bf16.vlgmr.msra.gmra.mrb[12].mxu1 %v5388_v7  ;;  %3368 = vmatpush1.bf16.msra.mxu0 %v4763_v48  ;;  %v4778_v7 = vld [vmem:[%s5288_s4 + $0x448] ss:$16 sps:$4 sm:$0xff]  }
 0x147   : > { %3409 = vmatpush1.bf16.msra.mxu1 %v4766_v55  ;;  %3369 = vmatprep.subr.bf16.mxu0 %v4771_v56  ;;  %v4829_v48 = vld [vmem:[%s5288_s4 + $0x368] ss:$16 sps:$4 sm:$0xff]   ;;  %v4837_v56 = vld [vmem:[%s5288_s4 + $0x38c] ss:$16 sps:$4 sm:$0xff]  }
 0x148   : > { %3410 = vmatprep.subr.bf16.mxu1 %v4774_v57  ;;  %3399 = vmatprep.mubr.bf16.mxu0 %v5366_v52  ;;  %v4781_v52 = vld [vmem:[%s5288_s4 + $0x268] ss:$16 sps:$4 sm:$0xff]   ;;  %v4840_v57 = vld [vmem:[%s5288_s4 + $0x58c] ss:$16 sps:$4 sm:$0xff]  }
 0x149   : > { %3440 = vmatprep.mubr.bf16.mxu1 %v5428_v37  ;;  %v4789_v37 = vld [vmem:[%s5288_s4 + $0x28c] ss:$16 sps:$4 sm:$0xff]   ;;  %v4832_v55 = vld [vmem:[%s5288_s4 + $0x568] ss:$16 sps:$4 sm:$0xff]  }
 0x14a   : > { %3370 = vmatpush1.bf16.msra.mxu0 %v4769_v58  ;;  %v4835_v58 = vld [vmem:[%s5288_s4 + $0x388] ss:$16 sps:$4 sm:$0xff]  }
 0x14b   : > { %3411 = vmatpush1.bf16.msra.mxu1 %v4772_v40  ;;  %3371 = vmatprep.subr.bf16.mxu0 %v4777_v59  ;;  %v4838_v40 = vld [vmem:[%s5288_s4 + $0x588] ss:$16 sps:$4 sm:$0xff]   ;;  %v4843_v59 = vld [vmem:[%s5288_s4 + $0x3ac] ss:$16 sps:$4 sm:$0xff]  }
 0x14c   : > { %3412 = vmatprep.subr.bf16.mxu1 %v4780_v60  ;;  %v4846_v60 = vld [vmem:[%s5288_s4 + $0x5ac] ss:$16 sps:$4 sm:$0xff]  }
 0x14e   : > { %3372 = vmatpush1.bf16.msra.mxu0 %v4775_v61  ;;  %v4841_v61 = vld [vmem:[%s5288_s4 + $0x3a8] ss:$16 sps:$4 sm:$0xff]  }
 0x14f   : > { %3413 = vmatpush1.bf16.msra.mxu1 %v4778_v7  ;;  %3373 = vmatprep.subr.bf16.mxu0 %v4783_v62  ;;  %v4844_v7 = vld [vmem:[%s5288_s4 + $0x5a8] ss:$16 sps:$4 sm:$0xff]   ;;  %v4849_v62 = vld [vmem:[%s5288_s4 + $0x3cc] ss:$16 sps:$4 sm:$0xff]  }
 0x150   : > { %3414 = vmatprep.subr.bf16.mxu1 %v4786_v63  ;;  %v4852_v63 = vld [vmem:[%s5288_s4 + $0x5cc] ss:$16 sps:$4 sm:$0xff]  }
 0x152   : > { %3374 = vmatpush1.bf16.msra.mxu0 %v4781_v52  ;;  %v4847_v52 = vld [vmem:[%s5288_s4 + $0x3c8] ss:$16 sps:$4 sm:$0xff]  }
 0x153   : > { %3415 = vmatpush1.bf16.msra.mxu1 %v4784_v0  ;;  %3375 = vmatprep.subr.bf16.mxu0 %v4789_v37  ;;  %v4850_v0 = vld [vmem:[%s5288_s4 + $0x5c8] ss:$16 sps:$4 sm:$0xff]   ;;  %v4855_v37 = vld [vmem:[%s5288_s4 + $0x3ec] ss:$16 sps:$4 sm:$0xff]  }
 0x154   : > { %3416 = vmatprep.subr.bf16.mxu1 %v4792_v1  ;;  %v4858_v1 = vld [vmem:[%s5288_s4 + $0x5ec] ss:$16 sps:$4 sm:$0xff]  }
 0x156   : > { %3376 = vmatpush1.bf16.msra.mxu0 %v4787_v2  ;;  %v4853_v2 = vld [vmem:[%s5288_s4 + $0x3e8] ss:$16 sps:$4 sm:$0xff]  }
 0x157   : > { %3417 = vmatpush1.bf16.msra.mxu1 %v4790_v3  ;;  %3377 = vmatprep.subr.bf16.mxu0 %v4795_v4  ;;  %v4856_v3 = vld [vmem:[%s5288_s4 + $0x5e8] ss:$16 sps:$4 sm:$0xff]   ;;  %v4861_v4 = vld [vmem:[%s5288_s4 + $0x60c] ss:$16 sps:$4 sm:$0xff]  }
 0x158   : > { %3418 = vmatprep.subr.bf16.mxu1 %v4798_v5  ;;  %v3073_v12 = vpop.f32.mrb[0].mxu0  ;;  %v4864_v5 = vld [vmem:[%s5288_s4 + $0x80c] ss:$16 sps:$4 sm:$0xff]  }
 0x159   : > { %v3114_v13 = vpop.f32.mrb[0].mxu1  ;;  %v3075_v19 = vpop.f32.mrb[1].mxu0 }
 0x15a   : > { %v5681_v16 = vadd.f32 %v3114_v13, %v3073_v12  ;;  %v3116_v20 = vpop.f32.mrb[1].mxu1  ;;  %v3077_v22 = vpop.f32.mrb[2].mxu0  ;;  %3378 = vmatpush1.bf16.msra.mxu0 %v4793_v6  ;;  %v4859_v6 = vld [vmem:[%s5288_s4 + $0x608] ss:$16 sps:$4 sm:$0xff]  }
 0x15b   : > { %v5683_v21 = vadd.f32 %v3116_v20, %v3075_v19  ;;  %v3118_v27 = vpop.f32.mrb[2].mxu1  ;;  %3419 = vmatpush1.bf16.msra.mxu1 %v4796_v9  ;;  %v3078_v28 = vpop.f32.mrb[3].mxu0  ;;  %3379 = vmatprep.subr.bf16.mxu0 %v4801_v10  ;;  %v4862_v9 = vld [vmem:[%s5288_s4 + $0x808] ss:$16 sps:$4 sm:$0xff]   ;;  %v4867_v10 = vld [vmem:[%s5288_s4 + $0x62c] ss:$16 sps:$4 sm:$0xff]  }
 0x15c   : > { %v3119_v29 = vpop.f32.mrb[3].mxu1  ;;  %3420 = vmatprep.subr.bf16.mxu1 %v4804_v11  ;;  %v4870_v11 = vld [vmem:[%s5288_s4 + $0x82c] ss:$16 sps:$4 sm:$0xff]   ;;  %v4865_v12 = vld [vmem:[%s5288_s4 + $0x628] ss:$16 sps:$4 sm:$0xff]  }
 0x15d   : > { %v4868_v13 = vld [vmem:[%s5288_s4 + $0x828] ss:$16 sps:$4 sm:$0xff]   ;;  %v4879_v19 = vld [vmem:[%s5288_s4 + $0x66c] ss:$16 sps:$4 sm:$0xff]  }
 0x15e   : > { %3380 = vmatpush1.bf16.msra.mxu0 %v4799_v14  ;;  %v4873_v14 = vld [vmem:[%s5288_s4 + $0x64c] ss:$16 sps:$4 sm:$0xff]   ;;  %v4877_v22 = vld [vmem:[%s5288_s4 + $0x668] ss:$16 sps:$4 sm:$0xff]  }
 0x15f   : > { %3421 = vmatpush1.bf16.msra.mxu1 %v4802_v15  ;;  %3381 = vmatprep.subr.bf16.mxu0 %v4807_v30  ;;  %v4876_v15 = vld [vmem:[%s5288_s4 + $0x84c] ss:$16 sps:$4 sm:$0xff]   ;;  %v4883_v28 = vld [vmem:[%s5288_s4 + $0x688] ss:$16 sps:$4 sm:$0xff]  }
 0x160   : > { %3422 = vmatprep.subr.bf16.mxu1 %v4810_v31  ;;  %v4882_v20 = vld [vmem:[%s5288_s4 + $0x86c] ss:$16 sps:$4 sm:$0xff]   ;;  %v4886_v29 = vld [vmem:[%s5288_s4 + $0x888] ss:$16 sps:$4 sm:$0xff]  }
 0x161   : > { %v4888_v27 = vld [vmem:[%s5288_s4 + $0x88c] ss:$16 sps:$4 sm:$0xff]  }
 0x162   : > { %3382 = vmatpush1.bf16.msra.mxu0 %v4805_v32  ;;  %v4891_v30 = vld [vmem:[%s5288_s4 + $0x6ac] ss:$16 sps:$4 sm:$0xff]   ;;  %v4889_v32 = vld [vmem:[%s5288_s4 + $0x6a8] ss:$16 sps:$4 sm:$0xff]  }
 0x163   : > { %3423 = vmatpush1.bf16.msra.mxu1 %v4808_v33  ;;  %3383 = vmatprep.subr.bf16.mxu0 %v4813_v34  ;;  %v4894_v31 = vld [vmem:[%s5288_s4 + $0x8ac] ss:$16 sps:$4 sm:$0xff]   ;;  %v4892_v33 = vld [vmem:[%s5288_s4 + $0x8a8] ss:$16 sps:$4 sm:$0xff]  }
 0x164   : > { %3424 = vmatprep.subr.bf16.mxu1 %v4816_v39  ;;  %v4897_v34 = vld [vmem:[%s5288_s4 + $0x6cc] ss:$16 sps:$4 sm:$0xff]  }
 0x165   : > { %v4900_v39 = vld [vmem:[%s5288_s4 + $0x8cc] ss:$16 sps:$4 sm:$0xff]  }
 0x166   : > { %3384 = vmatpush1.bf16.msra.mxu0 %v4811_v41 }
 0x167   : > { %3425 = vmatpush1.bf16.msra.mxu1 %v4814_v42  ;;  %3385 = vmatprep.subr.bf16.mxu0 %v4819_v43 }
 0x168   : > { %3426 = vmatprep.subr.bf16.mxu1 %v4822_v24 }
 0x16a   : > { %3386 = vmatpush1.bf16.msra.mxu0 %v4817_v44 }
 0x16b   : > { %3427 = vmatpush1.bf16.msra.mxu1 %v4820_v45  ;;  %3387 = vmatprep.subr.bf16.mxu0 %v4825_v46 }
 0x16c   : > { %3428 = vmatprep.subr.bf16.mxu1 %v4828_v47 }
 0x16e   : > { %3388 = vmatpush1.bf16.msra.mxu0 %v4823_v49  ;;  %v4895_v49 = vld [vmem:[%s5288_s4 + $0x6c8] ss:$16 sps:$4 sm:$0xff]  }
 0x16f   : > { %3429 = vmatpush1.bf16.msra.mxu1 %v4826_v50  ;;  %3389 = vmatprep.subr.bf16.mxu0 %v4831_v51  ;;  %v4898_v50 = vld [vmem:[%s5288_s4 + $0x8c8] ss:$16 sps:$4 sm:$0xff]  }
 0x170   : > { %3430 = vmatprep.subr.bf16.mxu1 %v4834_v53 }
 0x172   : > { %3390 = vmatpush1.bf16.msra.mxu0 %v4829_v48 }
 0x173   : > { %3431 = vmatpush1.bf16.msra.mxu1 %v4832_v55  ;;  %3391 = vmatprep.subr.bf16.mxu0 %v4837_v56  ;;  %v4901_v56 = vld [vmem:[%s5288_s4 + $0x6e8] ss:$16 sps:$4 sm:$0xff]  }
 0x174   : > { %3432 = vmatprep.subr.bf16.mxu1 %v4840_v57  ;;  %v4904_v57 = vld [vmem:[%s5288_s4 + $0x8e8] ss:$16 sps:$4 sm:$0xff]  }
 0x176   : > { %3392 = vmatpush1.bf16.msra.mxu0 %v4835_v58  ;;  %v4909_v58 = vld [vmem:[%s5288_s4 + $0x70c] ss:$16 sps:$4 sm:$0xff]  }
 0x177   : > { %3433 = vmatpush1.bf16.msra.mxu1 %v4838_v40  ;;  %3393 = vmatprep.subr.bf16.mxu0 %v4843_v59  ;;  %v4912_v40 = vld [vmem:[%s5288_s4 + $0x90c] ss:$16 sps:$4 sm:$0xff]   ;;  %v4907_v59 = vld [vmem:[%s5288_s4 + $0x708] ss:$16 sps:$4 sm:$0xff]  }
 0x178   : > { %3434 = vmatprep.subr.bf16.mxu1 %v4846_v60  ;;  %v4910_v60 = vld [vmem:[%s5288_s4 + $0x908] ss:$16 sps:$4 sm:$0xff]  }
 0x17a   : > { %3394 = vmatpush1.bf16.msra.mxu0 %v4841_v61  ;;  %v4915_v61 = vld [vmem:[%s5288_s4 + $0x72c] ss:$16 sps:$4 sm:$0xff]  }
 0x17b   : > { %3435 = vmatpush1.bf16.msra.mxu1 %v4844_v7  ;;  %3395 = vmatprep.subr.bf16.mxu0 %v4849_v62  ;;  %v4918_v7 = vld [vmem:[%s5288_s4 + $0x92c] ss:$16 sps:$4 sm:$0xff]   ;;  %v4913_v62 = vld [vmem:[%s5288_s4 + $0x728] ss:$16 sps:$4 sm:$0xff]  }
 0x17c   : > { %3436 = vmatprep.subr.bf16.mxu1 %v4852_v63  ;;  %v4916_v63 = vld [vmem:[%s5288_s4 + $0x928] ss:$16 sps:$4 sm:$0xff]  }
 0x17e   : > { %3396 = vmatpush1.bf16.msra.mxu0 %v4847_v52  ;;  %v4921_v52 = vld [vmem:[%s5288_s4 + $0x74c] ss:$16 sps:$4 sm:$0xff]  }
 0x17f   : > { %3437 = vmatpush1.bf16.msra.mxu1 %v4850_v0  ;;  %3397 = vmatprep.subr.bf16.mxu0 %v4855_v37  ;;  %v4924_v0 = vld [vmem:[%s5288_s4 + $0x94c] ss:$16 sps:$4 sm:$0xff]   ;;  %v4919_v37 = vld [vmem:[%s5288_s4 + $0x748] ss:$16 sps:$4 sm:$0xff]  }
 0x180   : > { %3438 = vmatprep.subr.bf16.mxu1 %v4858_v1  ;;  %v4922_v1 = vld [vmem:[%s5288_s4 + $0x948] ss:$16 sps:$4 sm:$0xff]  }
 0x182   : > { %3398 = vmatpush1.bf16.msra.mxu0 %v4853_v2  ;;  %v4927_v2 = vld [vmem:[%s5288_s4 + $0x76c] ss:$16 sps:$4 sm:$0xff]  }
 0x183   : > { %3439 = vmatpush1.bf16.msra.mxu1 %v4856_v3  ;;  %3449 = vmatprep.subr.bf16.mxu0 %v4861_v4  ;;  %v4930_v3 = vld [vmem:[%s5288_s4 + $0x96c] ss:$16 sps:$4 sm:$0xff]   ;;  %v4925_v4 = vld [vmem:[%s5288_s4 + $0x768] ss:$16 sps:$4 sm:$0xff]  }
 0x184   : > { %3490 = vmatprep.subr.bf16.mxu1 %v4864_v5  ;;  %v4928_v5 = vld [vmem:[%s5288_s4 + $0x968] ss:$16 sps:$4 sm:$0xff]  }
 0x185   : > { %3400 = vmatmul.mubr.bf16.vlgmr.msra.gmra.mrb[16].mxu0 %v5390_v8  ;;  %v4871_v8 = vld [vmem:[%s5288_s4 + $0x648] ss:$16 sps:$4 sm:$0xff]  }
 0x186   : > { %3441 = vmatmul.mubr.bf16.vlgmr.msra.gmra.mrb[16].mxu1 %v5476_v17  ;;  %3450 = vmatpush1.bf16.msra.mxu0 %v4859_v6  ;;  %v4874_v17 = vld [vmem:[%s5288_s4 + $0x848] ss:$16 sps:$4 sm:$0xff]   ;;  %v4933_v6 = vld [vmem:[%s5288_s4 + $0x78c] ss:$16 sps:$4 sm:$0xff]  }
 0x187   : > { %3491 = vmatpush1.bf16.msra.mxu1 %v4862_v9  ;;  %3451 = vmatprep.subr.bf16.mxu0 %v4867_v10  ;;  %v4936_v9 = vld [vmem:[%s5288_s4 + $0x98c] ss:$16 sps:$4 sm:$0xff]   ;;  %v4931_v10 = vld [vmem:[%s5288_s4 + $0x788] ss:$16 sps:$4 sm:$0xff]  }
 0x188   : > { %3492 = vmatprep.subr.bf16.mxu1 %v4870_v11  ;;  %3481 = vmatprep.mubr.bf16.mxu0 %v5432_v38  ;;  %v4880_v38 = vld [vmem:[%s5288_s4 + $0x868] ss:$16 sps:$4 sm:$0xff]  }
 0x189   : > { %3522 = vmatprep.mubr.bf16.mxu1 %v5494_v25  ;;  %v4885_v25 = vld [vmem:[%s5288_s4 + $0x68c] ss:$16 sps:$4 sm:$0xff]   ;;  %v4934_v11 = vld [vmem:[%s5288_s4 + $0x988] ss:$16 sps:$4 sm:$0xff]  }
 0x18a   : > { %3452 = vmatpush1.bf16.msra.mxu0 %v4865_v12  ;;  %v4939_v12 = vld [vmem:[%s5288_s4 + $0x7ac] ss:$16 sps:$4 sm:$0xff]  }
 0x18b   : > { %3493 = vmatpush1.bf16.msra.mxu1 %v4868_v13  ;;  %3453 = vmatprep.subr.bf16.mxu0 %v4873_v14  ;;  %v4942_v13 = vld [vmem:[%s5288_s4 + $0x9ac] ss:$16 sps:$4 sm:$0xff]   ;;  %v4937_v14 = vld [vmem:[%s5288_s4 + $0x7a8] ss:$16 sps:$4 sm:$0xff]  }
 0x18c   : > { %3494 = vmatprep.subr.bf16.mxu1 %v4876_v15  ;;  %v4940_v15 = vld [vmem:[%s5288_s4 + $0x9a8] ss:$16 sps:$4 sm:$0xff]  }
 0x18e   : > { %3454 = vmatpush1.bf16.msra.mxu0 %v4871_v8  ;;  %v4945_v8 = vld [vmem:[%s5288_s4 + $0x7cc] ss:$16 sps:$4 sm:$0xff]  }
 0x18f   : > { %3495 = vmatpush1.bf16.msra.mxu1 %v4874_v17  ;;  %3455 = vmatprep.subr.bf16.mxu0 %v4879_v19  ;;  %v4948_v17 = vld [vmem:[%s5288_s4 + $0x9cc] ss:$16 sps:$4 sm:$0xff]   ;;  %v4943_v19 = vld [vmem:[%s5288_s4 + $0x7c8] ss:$16 sps:$4 sm:$0xff]  }
 0x190   : > { %3496 = vmatprep.subr.bf16.mxu1 %v4882_v20  ;;  %v4946_v20 = vld [vmem:[%s5288_s4 + $0x9c8] ss:$16 sps:$4 sm:$0xff]  }
 0x192   : > { %3456 = vmatpush1.bf16.msra.mxu0 %v4877_v22  ;;  %v4951_v22 = vld [vmem:[%s5288_s4 + $0x7ec] ss:$16 sps:$4 sm:$0xff]  }
 0x193   : > { %3497 = vmatpush1.bf16.msra.mxu1 %v4880_v38  ;;  %3457 = vmatprep.subr.bf16.mxu0 %v4885_v25  ;;  %v4954_v38 = vld [vmem:[%s5288_s4 + $0x9ec] ss:$16 sps:$4 sm:$0xff]   ;;  %v4949_v25 = vld [vmem:[%s5288_s4 + $0x7e8] ss:$16 sps:$4 sm:$0xff]  }
 0x194   : > { %3498 = vmatprep.subr.bf16.mxu1 %v4888_v27  ;;  %v4952_v27 = vld [vmem:[%s5288_s4 + $0x9e8] ss:$16 sps:$4 sm:$0xff]  }
 0x196   : > { %3458 = vmatpush1.bf16.msra.mxu0 %v4883_v28  ;;  %v4957_v28 = vld [vmem:[%s5288_s4 + $0xa0c] ss:$16 sps:$4 sm:$0xff]  }
 0x197   : > { %3499 = vmatpush1.bf16.msra.mxu1 %v4886_v29  ;;  %3459 = vmatprep.subr.bf16.mxu0 %v4891_v30  ;;  %v4960_v29 = vld [vmem:[%s5288_s4 + $0xc0c] ss:$16 sps:$4 sm:$0xff]   ;;  %v4955_v30 = vld [vmem:[%s5288_s4 + $0xa08] ss:$16 sps:$4 sm:$0xff]  }
 0x198   : > { %3500 = vmatprep.subr.bf16.mxu1 %v4894_v31  ;;  %v3155_v41 = vpop.f32.mrb[4].mxu0  ;;  %v4958_v31 = vld [vmem:[%s5288_s4 + $0xc08] ss:$16 sps:$4 sm:$0xff]  }
 0x199   : > { %v3196_v42 = vpop.f32.mrb[4].mxu1  ;;  %v3156_v43 = vadd.f32 %v3155_v41, %v5681_v16  ;;  %v3157_v24 = vpop.f32.mrb[5].mxu0  ;;  %v4903_v16 = vld [vmem:[%s5288_s4 + $0x6ec] ss:$16 sps:$4 sm:$0xff]  }
 0x19a   : > { %v3198_v44 = vpop.f32.mrb[5].mxu1  ;;  %v3158_v45 = vadd.f32 %v3157_v24, %v5683_v21  ;;  %v3159_v46 = vpop.f32.mrb[6].mxu0  ;;  %3460 = vmatpush1.bf16.msra.mxu0 %v4889_v32  ;;  %v4906_v21 = vld [vmem:[%s5288_s4 + $0x8ec] ss:$16 sps:$4 sm:$0xff]  }
 0x19b   : > { %v3200_v47 = vpop.f32.mrb[6].mxu1  ;;  %3501 = vmatpush1.bf16.msra.mxu1 %v4892_v33  ;;  %v5755_v51 = vadd.f32 %v3196_v42, %v3156_v43  ;;  %v3160_v53 = vpop.f32.mrb[7].mxu0  ;;  %3461 = vmatprep.subr.bf16.mxu0 %v4897_v34  ;;  %v4963_v32 = vld [vmem:[%s5288_s4 + $0xa2c] ss:$16 sps:$4 sm:$0xff]   ;;  %v4961_v34 = vld [vmem:[%s5288_s4 + $0xa28] ss:$16 sps:$4 sm:$0xff]  }
 0x19c   : > { %v3201_v48 = vpop.f32.mrb[7].mxu1  ;;  %3502 = vmatprep.subr.bf16.mxu1 %v4900_v39  ;;  %v5759_v55 = vadd.f32 %v3198_v44, %v3158_v45  ;;  %v4966_v33 = vld [vmem:[%s5288_s4 + $0xc2c] ss:$16 sps:$4 sm:$0xff]   ;;  %v4964_v39 = vld [vmem:[%s5288_s4 + $0xc28] ss:$16 sps:$4 sm:$0xff]  }
 0x19d   : > { %v4969_v41 = vld [vmem:[%s5288_s4 + $0xa4c] ss:$16 sps:$4 sm:$0xff]   ;;  %v4973_v44 = vld [vmem:[%s5288_s4 + $0xa68] ss:$16 sps:$4 sm:$0xff]  }
 0x19e   : > { %3462 = vmatpush1.bf16.msra.mxu0 %v4895_v49  ;;  %v4972_v42 = vld [vmem:[%s5288_s4 + $0xc4c] ss:$16 sps:$4 sm:$0xff]   ;;  %v4979_v46 = vld [vmem:[%s5288_s4 + $0xa88] ss:$16 sps:$4 sm:$0xff]  }
 0x19f   : > { %3503 = vmatpush1.bf16.msra.mxu1 %v4898_v50  ;;  %3463 = vmatprep.subr.bf16.mxu0 %v4903_v16  ;;  %v4975_v43 = vld [vmem:[%s5288_s4 + $0xa6c] ss:$16 sps:$4 sm:$0xff]   ;;  %v4982_v47 = vld [vmem:[%s5288_s4 + $0xc88] ss:$16 sps:$4 sm:$0xff]  }
 0x1a0   : > { %3504 = vmatprep.subr.bf16.mxu1 %v4906_v21  ;;  %v4978_v24 = vld [vmem:[%s5288_s4 + $0xc6c] ss:$16 sps:$4 sm:$0xff]   ;;  %v4985_v53 = vld [vmem:[%s5288_s4 + $0xaa8] ss:$16 sps:$4 sm:$0xff]  }
 0x1a1   : > { %v4984_v45 = vld [vmem:[%s5288_s4 + $0xc8c] ss:$16 sps:$4 sm:$0xff]   ;;  %v4988_v48 = vld [vmem:[%s5288_s4 + $0xca8] ss:$16 sps:$4 sm:$0xff]  }
 0x1a2   : > { %3464 = vmatpush1.bf16.msra.mxu0 %v4901_v56  ;;  %v4987_v49 = vld [vmem:[%s5288_s4 + $0xaac] ss:$16 sps:$4 sm:$0xff]  }
 0x1a3   : > { %3505 = vmatpush1.bf16.msra.mxu1 %v4904_v57  ;;  %3465 = vmatprep.subr.bf16.mxu0 %v4909_v58  ;;  %v4990_v50 = vld [vmem:[%s5288_s4 + $0xcac] ss:$16 sps:$4 sm:$0xff]  }
 0x1a4   : > { %3506 = vmatprep.subr.bf16.mxu1 %v4912_v40  ;;  %v4993_v16 = vld [vmem:[%s5288_s4 + $0xacc] ss:$16 sps:$4 sm:$0xff]  }
 0x1a5   : > { %v4996_v21 = vld [vmem:[%s5288_s4 + $0xccc] ss:$16 sps:$4 sm:$0xff]  }
 0x1a6   : > { %3466 = vmatpush1.bf16.msra.mxu0 %v4907_v59 }
 0x1a7   : > { %3507 = vmatpush1.bf16.msra.mxu1 %v4910_v60  ;;  %3467 = vmatprep.subr.bf16.mxu0 %v4915_v61 }
 0x1a8   : > { %3508 = vmatprep.subr.bf16.mxu1 %v4918_v7 }
 0x1aa   : > { %3468 = vmatpush1.bf16.msra.mxu0 %v4913_v62  ;;  %v4991_v62 = vld [vmem:[%s5288_s4 + $0xac8] ss:$16 sps:$4 sm:$0xff]  }
 0x1ab   : > { %3509 = vmatpush1.bf16.msra.mxu1 %v4916_v63  ;;  %3469 = vmatprep.subr.bf16.mxu0 %v4921_v52  ;;  %v4994_v63 = vld [vmem:[%s5288_s4 + $0xcc8] ss:$16 sps:$4 sm:$0xff]  }
 0x1ac   : > { %3510 = vmatprep.subr.bf16.mxu1 %v4924_v0 }
 0x1ae   : > { %3470 = vmatpush1.bf16.msra.mxu0 %v4919_v37 }
 0x1af   : > { %3511 = vmatpush1.bf16.msra.mxu1 %v4922_v1  ;;  %3471 = vmatprep.subr.bf16.mxu0 %v4927_v2  ;;  %v4997_v2 = vld [vmem:[%s5288_s4 + $0xae8] ss:$16 sps:$4 sm:$0xff]  }
 0x1b0   : > { %3512 = vmatprep.subr.bf16.mxu1 %v4930_v3  ;;  %v5000_v3 = vld [vmem:[%s5288_s4 + $0xce8] ss:$16 sps:$4 sm:$0xff]  }
 0x1b2   : > { %3472 = vmatpush1.bf16.msra.mxu0 %v4925_v4  ;;  %v5005_v4 = vld [vmem:[%s5288_s4 + $0xb0c] ss:$16 sps:$4 sm:$0xff]  }
 0x1b3   : > { %3513 = vmatpush1.bf16.msra.mxu1 %v4928_v5  ;;  %3473 = vmatprep.subr.bf16.mxu0 %v4933_v6  ;;  %v5008_v5 = vld [vmem:[%s5288_s4 + $0xd0c] ss:$16 sps:$4 sm:$0xff]   ;;  %v5003_v6 = vld [vmem:[%s5288_s4 + $0xb08] ss:$16 sps:$4 sm:$0xff]  }
 0x1b4   : > { %3514 = vmatprep.subr.bf16.mxu1 %v4936_v9  ;;  %v5006_v9 = vld [vmem:[%s5288_s4 + $0xd08] ss:$16 sps:$4 sm:$0xff]  }
 0x1b6   : > { %3474 = vmatpush1.bf16.msra.mxu0 %v4931_v10  ;;  %v5011_v10 = vld [vmem:[%s5288_s4 + $0xb2c] ss:$16 sps:$4 sm:$0xff]  }
 0x1b7   : > { %3515 = vmatpush1.bf16.msra.mxu1 %v4934_v11  ;;  %3475 = vmatprep.subr.bf16.mxu0 %v4939_v12  ;;  %v5014_v11 = vld [vmem:[%s5288_s4 + $0xd2c] ss:$16 sps:$4 sm:$0xff]   ;;  %v5009_v12 = vld [vmem:[%s5288_s4 + $0xb28] ss:$16 sps:$4 sm:$0xff]  }
 0x1b8   : > { %3516 = vmatprep.subr.bf16.mxu1 %v4942_v13  ;;  %v5012_v13 = vld [vmem:[%s5288_s4 + $0xd28] ss:$16 sps:$4 sm:$0xff]  }
 0x1ba   : > { %3476 = vmatpush1.bf16.msra.mxu0 %v4937_v14  ;;  %v5017_v14 = vld [vmem:[%s5288_s4 + $0xb4c] ss:$16 sps:$4 sm:$0xff]  }
 0x1bb   : > { %3517 = vmatpush1.bf16.msra.mxu1 %v4940_v15  ;;  %3477 = vmatprep.subr.bf16.mxu0 %v4945_v8  ;;  %v5020_v15 = vld [vmem:[%s5288_s4 + $0xd4c] ss:$16 sps:$4 sm:$0xff]   ;;  %v5015_v8 = vld [vmem:[%s5288_s4 + $0xb48] ss:$16 sps:$4 sm:$0xff]  }
 0x1bc   : > { %3518 = vmatprep.subr.bf16.mxu1 %v4948_v17  ;;  %v5018_v17 = vld [vmem:[%s5288_s4 + $0xd48] ss:$16 sps:$4 sm:$0xff]  }
 0x1be   : > { %3478 = vmatpush1.bf16.msra.mxu0 %v4943_v19  ;;  %v5023_v19 = vld [vmem:[%s5288_s4 + $0xb6c] ss:$16 sps:$4 sm:$0xff]  }
 0x1bf   : > { %3519 = vmatpush1.bf16.msra.mxu1 %v4946_v20  ;;  %3479 = vmatprep.subr.bf16.mxu0 %v4951_v22  ;;  %v5026_v20 = vld [vmem:[%s5288_s4 + $0xd6c] ss:$16 sps:$4 sm:$0xff]   ;;  %v5021_v22 = vld [vmem:[%s5288_s4 + $0xb68] ss:$16 sps:$4 sm:$0xff]  }
 0x1c0   : > { %3520 = vmatprep.subr.bf16.mxu1 %v4954_v38  ;;  %v5024_v38 = vld [vmem:[%s5288_s4 + $0xd68] ss:$16 sps:$4 sm:$0xff]  }
 0x1c2   : > { %3480 = vmatpush1.bf16.msra.mxu0 %v4949_v25  ;;  %v5029_v25 = vld [vmem:[%s5288_s4 + $0xb8c] ss:$16 sps:$4 sm:$0xff]  }
 0x1c3   : > { %3521 = vmatpush1.bf16.msra.mxu1 %v4952_v27  ;;  %3531 = vmatprep.subr.bf16.mxu0 %v4957_v28  ;;  %v5032_v27 = vld [vmem:[%s5288_s4 + $0xd8c] ss:$16 sps:$4 sm:$0xff]   ;;  %v5027_v28 = vld [vmem:[%s5288_s4 + $0xb88] ss:$16 sps:$4 sm:$0xff]  }
 0x1c4   : > { %3572 = vmatprep.subr.bf16.mxu1 %v4960_v29  ;;  %v5030_v29 = vld [vmem:[%s5288_s4 + $0xd88] ss:$16 sps:$4 sm:$0xff]  }
 0x1c5   : > { %3482 = vmatmul.mubr.bf16.vlgmr.msra.gmra.mrb[20].mxu0 %v5480_v18  ;;  %v4967_v18 = vld [vmem:[%s5288_s4 + $0xa48] ss:$16 sps:$4 sm:$0xff]  }
 0x1c6   : > { %3523 = vmatmul.mubr.bf16.vlgmr.msra.gmra.mrb[20].mxu1 %v5566_v35  ;;  %3532 = vmatpush1.bf16.msra.mxu0 %v4955_v30  ;;  %v4970_v35 = vld [vmem:[%s5288_s4 + $0xc48] ss:$16 sps:$4 sm:$0xff]   ;;  %v5035_v30 = vld [vmem:[%s5288_s4 + $0xbac] ss:$16 sps:$4 sm:$0xff]  }
 0x1c7   : > { %3573 = vmatpush1.bf16.msra.mxu1 %v4958_v31  ;;  %3533 = vmatprep.subr.bf16.mxu0 %v4963_v32  ;;  %v5038_v31 = vld [vmem:[%s5288_s4 + $0xdac] ss:$16 sps:$4 sm:$0xff]   ;;  %v5033_v32 = vld [vmem:[%s5288_s4 + $0xba8] ss:$16 sps:$4 sm:$0xff]  }
 0x1c8   : > { %3574 = vmatprep.subr.bf16.mxu1 %v4966_v33  ;;  %3563 = vmatprep.mubr.bf16.mxu0 %v5498_v26  ;;  %v4976_v26 = vld [vmem:[%s5288_s4 + $0xc68] ss:$16 sps:$4 sm:$0xff]  }
 0x1c9   : > { %3604 = vmatprep.mubr.bf16.mxu1 %v5581_v23  ;;  %v4981_v23 = vld [vmem:[%s5288_s4 + $0xa8c] ss:$16 sps:$4 sm:$0xff]   ;;  %v5036_v33 = vld [vmem:[%s5288_s4 + $0xda8] ss:$16 sps:$4 sm:$0xff]  }
 0x1ca   : > { %3534 = vmatpush1.bf16.msra.mxu0 %v4961_v34  ;;  %v5041_v34 = vld [vmem:[%s5288_s4 + $0xbcc] ss:$16 sps:$4 sm:$0xff]  }
 0x1cb   : > { %3575 = vmatpush1.bf16.msra.mxu1 %v4964_v39  ;;  %3535 = vmatprep.subr.bf16.mxu0 %v4969_v41  ;;  %v5044_v39 = vld [vmem:[%s5288_s4 + $0xdcc] ss:$16 sps:$4 sm:$0xff]   ;;  %v5039_v41 = vld [vmem:[%s5288_s4 + $0xbc8] ss:$16 sps:$4 sm:$0xff]  }
 0x1cc   : > { %3576 = vmatprep.subr.bf16.mxu1 %v4972_v42  ;;  %v5042_v42 = vld [vmem:[%s5288_s4 + $0xdc8] ss:$16 sps:$4 sm:$0xff]  }
 0x1ce   : > { %3536 = vmatpush1.bf16.msra.mxu0 %v4967_v18  ;;  %v5047_v18 = vld [vmem:[%s5288_s4 + $0xbec] ss:$16 sps:$4 sm:$0xff]  }
 0x1cf   : > { %3577 = vmatpush1.bf16.msra.mxu1 %v4970_v35  ;;  %3537 = vmatprep.subr.bf16.mxu0 %v4975_v43  ;;  %v5050_v35 = vld [vmem:[%s5288_s4 + $0xdec] ss:$16 sps:$4 sm:$0xff]   ;;  %v5045_v43 = vld [vmem:[%s5288_s4 + $0xbe8] ss:$16 sps:$4 sm:$0xff]  }
 0x1d0   : > { %3578 = vmatprep.subr.bf16.mxu1 %v4978_v24  ;;  %v5048_v24 = vld [vmem:[%s5288_s4 + $0xde8] ss:$16 sps:$4 sm:$0xff]  }
 0x1d2   : > { %3538 = vmatpush1.bf16.msra.mxu0 %v4973_v44  ;;  %v291_v44 = vld [vmem:[#allocation2] sm:$0xff] }
 0x1d3   : > { %3579 = vmatpush1.bf16.msra.mxu1 %v4976_v26  ;;  %3539 = vmatprep.subr.bf16.mxu0 %v4981_v23 }
 0x1d4   : > { %3580 = vmatprep.subr.bf16.mxu1 %v4984_v45 }
 0x1d6   : > { %3540 = vmatpush1.bf16.msra.mxu0 %v4979_v46  ;;  %v292_v46 = vld [vmem:[#allocation2 + $0x8] sm:$0xff] }
 0x1d7   : > { %3581 = vmatpush1.bf16.msra.mxu1 %v4982_v47  ;;  %3541 = vmatprep.subr.bf16.mxu0 %v4987_v49 }
 0x1d8   : > { %3582 = vmatprep.subr.bf16.mxu1 %v4990_v50  ;;  %v3237_v56 = vpop.f32.mrb[8].mxu0 }
 0x1d9   : > { %v3278_v57 = vpop.f32.mrb[8].mxu1  ;;  %v3238_v58 = vadd.f32 %v3237_v56, %v5755_v51  ;;  %v3239_v40 = vpop.f32.mrb[9].mxu0  ;;  %v4999_v51 = vld [vmem:[%s5288_s4 + $0xaec] ss:$16 sps:$4 sm:$0xff]  }
 0x1da   : > { %v3280_v59 = vpop.f32.mrb[9].mxu1  ;;  %v3240_v60 = vadd.f32 %v3239_v40, %v5759_v55  ;;  %v3241_v61 = vpop.f32.mrb[10].mxu0  ;;  %3542 = vmatpush1.bf16.msra.mxu0 %v4985_v53  ;;  %v5002_v55 = vld [vmem:[%s5288_s4 + $0xcec] ss:$16 sps:$4 sm:$0xff]  }
 0x1db   : > { %v3282_v7 = vpop.f32.mrb[10].mxu1  ;;  %3583 = vmatpush1.bf16.msra.mxu1 %v4988_v48  ;;  %v5829_v52 = vadd.f32 %v3278_v57, %v3238_v58  ;;  %v3242_v0 = vpop.f32.mrb[11].mxu0  ;;  %3543 = vmatprep.subr.bf16.mxu0 %v4993_v16 }
 0x1dc   : > { %v3283_v37 = vpop.f32.mrb[11].mxu1  ;;  %3584 = vmatprep.subr.bf16.mxu1 %v4996_v21  ;;  %v5833_v1 = vadd.f32 %v3280_v59, %v3240_v60 }
 0x1de   : > { %3544 = vmatpush1.bf16.msra.mxu0 %v4991_v62 }
 0x1df   : > { %3585 = vmatpush1.bf16.msra.mxu1 %v4994_v63  ;;  %3545 = vmatprep.subr.bf16.mxu0 %v4999_v51 }
 0x1e0   : > { %3586 = vmatprep.subr.bf16.mxu1 %v5002_v55 }
 0x1e2   : > { %3546 = vmatpush1.bf16.msra.mxu0 %v4997_v2 }
 0x1e3   : > { %3587 = vmatpush1.bf16.msra.mxu1 %v5000_v3  ;;  %3547 = vmatprep.subr.bf16.mxu0 %v5005_v4 }
 0x1e4   : > { %3588 = vmatprep.subr.bf16.mxu1 %v5008_v5 }
 0x1e6   : > { %3548 = vmatpush1.bf16.msra.mxu0 %v5003_v6 }
 0x1e7   : > { %3589 = vmatpush1.bf16.msra.mxu1 %v5006_v9  ;;  %3549 = vmatprep.subr.bf16.mxu0 %v5011_v10 }
 0x1e8   : > { %3590 = vmatprep.subr.bf16.mxu1 %v5014_v11 }
 0x1ea   : > { %3550 = vmatpush1.bf16.msra.mxu0 %v5009_v12 }
 0x1eb   : > { %3591 = vmatpush1.bf16.msra.mxu1 %v5012_v13  ;;  %3551 = vmatprep.subr.bf16.mxu0 %v5017_v14 }
 0x1ec   : > { %3592 = vmatprep.subr.bf16.mxu1 %v5020_v15 }
 0x1ee   : > { %3552 = vmatpush1.bf16.msra.mxu0 %v5015_v8 }
 0x1ef   : > { %3593 = vmatpush1.bf16.msra.mxu1 %v5018_v17  ;;  %3553 = vmatprep.subr.bf16.mxu0 %v5023_v19  ;;  %v293_v17 = vld [vmem:[#allocation2 + $0x10] sm:$0xff] }
 0x1f0   : > { %3594 = vmatprep.subr.bf16.mxu1 %v5026_v20 }
 0x1f2   : > { %3554 = vmatpush1.bf16.msra.mxu0 %v5021_v22 }
 0x1f3   : > { %3595 = vmatpush1.bf16.msra.mxu1 %v5024_v38  ;;  %3555 = vmatprep.subr.bf16.mxu0 %v5029_v25  ;;  %v294_v25 = vld [vmem:[#allocation2 + $0x18] sm:$0xff] }
 0x1f4   : > { %3596 = vmatprep.subr.bf16.mxu1 %v5032_v27 }
 0x1f6   : > { %3556 = vmatpush1.bf16.msra.mxu0 %v5027_v28 }
 0x1f7   : > { %3597 = vmatpush1.bf16.msra.mxu1 %v5030_v29  ;;  %3557 = vmatprep.subr.bf16.mxu0 %v5035_v30 }
 0x1f8   : > { %3598 = vmatprep.subr.bf16.mxu1 %v5038_v31 }
 0x1fa   : > { %3558 = vmatpush1.bf16.msra.mxu0 %v5033_v32  ;;  %v3631_v32 = vlaneseq (!%p4280_p6) }
 0x1fb   : > { %3599 = vmatpush1.bf16.msra.mxu1 %v5036_v33  ;;  %3559 = vmatprep.subr.bf16.mxu0 %v5041_v34  ;;  %v3629_v34 = vld [vmem:[%s271_s6] sm:$0xf] (!%p4280_p6) }
 0x1fc   : > { %3600 = vmatprep.subr.bf16.mxu1 %v5044_v39  ;;  %v3632_v33 = vshrl.u32 (!%p4280_p6), %v3631_v32, 7 }
 0x1fe   : > { %3560 = vmatpush1.bf16.msra.mxu0 %v5039_v41  ;;  %v3633_v41 = vsub.s32 (!%p4280_p6), 0, %v3632_v33 }
 0x1ff   : > { %3601 = vmatpush1.bf16.msra.mxu1 %v5042_v42  ;;  %3561 = vmatprep.subr.bf16.mxu0 %v5047_v18  ;;  %v3637_v42 = vsub.s32 (!%p4280_p6), 1, %v3632_v33  ;;  %v3641_v18 = vsub.s32 (!%p4280_p6), 2, %v3632_v33 }
 0x200   : > { %3602 = vmatprep.subr.bf16.mxu1 %v5050_v35  ;;  %v3645_v35 = vsub.s32 (!%p4280_p6), 3, %v3632_v33 }
 0x202   : > { %3562 = vmatpush1.bf16.msra.mxu0 %v5045_v43 }
 0x203   : > { %3603 = vmatpush1.bf16.msra.mxu1 %v5048_v24 }
 0x205   : > { %3564 = vmatmul.mubr.bf16.vlgmr.msra.gmra.mrb[24].mxu0 %v5570_v36 }
 0x206   : > { %3605 = vmatmul.mubr.bf16.vlgmr.msra.gmra.mrb[24].mxu1 %v5649_v54 }
 0x218   : > { %v3319_v26 = vpop.f32.mrb[12].mxu0 }
 0x219   : > { %v3360_v23 = vpop.f32.mrb[12].mxu1  ;;  %v3320_v45 = vadd.f32 %v3319_v26, %v5829_v52  ;;  %v3321_v47 = vpop.f32.mrb[13].mxu0  ;;  %v3634_v26 = vrot.slane (!%p4280_p6), %v3629_v34, %v3633_v41 }
 0x21a   : > { %v3362_v49 = vpop.f32.mrb[13].mxu1  ;;  %v3322_v50 = vadd.f32 %v3321_v47, %v5833_v1  ;;  %v3323_v53 = vpop.f32.mrb[14].mxu0 }
 0x21b   : > { %v3364_v48 = vpop.f32.mrb[14].mxu1  ;;  %v3613_v16 = vadd.f32 %v3320_v45, %v291_v44  ;;  %v3324_v21 = vpop.f32.mrb[15].mxu0  ;;  %v3642_v45 = vrot.slane (!%p4280_p6), %v3629_v34, %v3641_v18 }
 0x21c   : > { %v3365_v56 = vpop.f32.mrb[15].mxu1  ;;  %v3614_v57 = vadd.f32 %v3322_v50, %v292_v46  ;;  %v3646_v46 = vrot.slane (!%p4280_p6), %v3629_v34, %v3645_v35 }
 0x21d   : > { %3617 = vst [vmem:[#allocation2] sm:$0xff] %v3613_v16 }
 0x21e   : > { %3618 = vst [vmem:[#allocation2 + $0x8] sm:$0xff] %v3614_v57 }
 0x224   : > { %v3625_v39 = vld [vmem:[#allocation2] sm:$0xff] (!%p4280_p6) }
 0x225   : > { %v3626_v43 = vld [vmem:[#allocation2 + $0x8] sm:$0xff] (!%p4280_p6)  ;;  %v3651_v47 = vadd.f32 (!%p4280_p6), %v3634_v26, %v3625_v39 }
 0x227   : > { %v3655_v48 = vmax.f32 (!%p4280_p6), %v3651_v47, 0.0 }
 0x258   : > { %v3401_v36 = vpop.f32.mrb[16].mxu0 }
 0x259   : > { %v3442_v54 = vpop.f32.mrb[16].mxu1  ;;  %v3402_v58 = vadd.f32 %v3401_v36, %v3360_v23  ;;  %v3403_v40 = vpop.f32.mrb[17].mxu0  ;;  %v3638_v23 = vrot.slane (!%p4280_p6), %v3629_v34, %v3637_v42 }
 0x25a   : > { %v3444_v59 = vpop.f32.mrb[17].mxu1  ;;  %v3404_v60 = vadd.f32 %v3403_v40, %v3362_v49  ;;  %v3405_v61 = vpop.f32.mrb[18].mxu0 }
 0x25b   : > { %v3446_v7 = vpop.f32.mrb[18].mxu1  ;;  %v3443_v62 = vadd.f32 %v3442_v54, %v3402_v58  ;;  %v3406_v63 = vpop.f32.mrb[19].mxu0  ;;  %v3652_v49 = vadd.f32 (!%p4280_p6), %v3638_v23, %v3626_v43 }
 0x25c   : > { %v3447_v52 = vpop.f32.mrb[19].mxu1  ;;  %v3445_v0 = vadd.f32 %v3444_v59, %v3404_v60 }
 0x25d   : > { %v3656_v16 = vmax.f32 (!%p4280_p6), %v3652_v49, 0.0 }
 0x25f   : > { %v4286_v57 = vpack.c.bf16 (!%p4280_p6), %v3656_v16, %v3655_v48 }
 0x261   : > { %3675 = vst [vmem:[%s5306_s11] sm:$0xff] (!%p4280_p6), %v4286_v57 }
 0x298   : > { %v3483_v37 = vpop.f32.mrb[20].mxu0 }
 0x299   : > { %v3524_v51 = vpop.f32.mrb[20].mxu1  ;;  %v3484_v55 = vadd.f32 %v3483_v37, %v3443_v62  ;;  %v3485_v1 = vpop.f32.mrb[21].mxu0 }
 0x29a   : > { %v3526_v2 = vpop.f32.mrb[21].mxu1  ;;  %v3486_v3 = vadd.f32 %v3485_v1, %v3445_v0  ;;  %v3487_v4 = vpop.f32.mrb[22].mxu0 }
 0x29b   : > { %v3528_v5 = vpop.f32.mrb[22].mxu1  ;;  %v3525_v6 = vadd.f32 %v3524_v51, %v3484_v55  ;;  %v3488_v9 = vpop.f32.mrb[23].mxu0 }
 0x29c   : > { %v3529_v10 = vpop.f32.mrb[23].mxu1  ;;  %v3527_v11 = vadd.f32 %v3526_v2, %v3486_v3 }
 0x2d8   : > { %v3565_v12 = vpop.f32.mrb[24].mxu0 }
 0x2d9   : > { %v3606_v13 = vpop.f32.mrb[24].mxu1  ;;  %v3566_v14 = vadd.f32 %v3565_v12, %v3525_v6  ;;  %v3567_v15 = vpop.f32.mrb[25].mxu0 }
 0x2da   : > { %v3608_v8 = vpop.f32.mrb[25].mxu1  ;;  %v3568_v19 = vadd.f32 %v3567_v15, %v3527_v11  ;;  %v3569_v20 = vpop.f32.mrb[26].mxu0  ;;  %3624 = sbr.rel (%p4280_p6) target bundleno = 751 (0x2ef), region = 44 }
 0x2db   : > { %v3610_v22 = vpop.f32.mrb[26].mxu1  ;;  %v3607_v38 = vadd.f32 %v3606_v13, %v3566_v14  ;;  %v3570_v27 = vpop.f32.mrb[27].mxu0 }
 0x2dc   : > { %v3611_v28 = vpop.f32.mrb[27].mxu1  ;;  %v3609_v29 = vadd.f32 %v3608_v8, %v3568_v19 }
 0x2dd   : > { %v3615_v30 = vadd.f32 %v3607_v38, %v293_v17 }
 0x2de   : > { %v3616_v31 = vadd.f32 %v3609_v29, %v294_v25 }
 0x2df   : > { %3619 = vst [vmem:[#allocation2 + $0x10] sm:$0xff] %v3615_v30 }
 0x2e0   : > { %3620 = vst [vmem:[#allocation2 + $0x18] sm:$0xff] %v3616_v31 }
 0x2e6   : > { %v3627_v24 = vld [vmem:[#allocation2 + $0x10] sm:$0xff] }
 0x2e7   : > { %v3628_v44 = vld [vmem:[#allocation2 + $0x18] sm:$0xff]  ;;  %v3653_v50 = vadd.f32 %v3642_v45, %v3627_v24 }
 0x2e8   : > { %v3654_v53 = vadd.f32 %v3646_v46, %v3628_v44 }
 0x2e9   : > { %v3657_v21 = vmax.f32 %v3653_v50, 0.0 }
 0x2ea   : > { %v3658_v56 = vmax.f32 %v3654_v53, 0.0 }
 0x2ec   : > { %v4287_v36 = vpack.c.bf16 %v3658_v56, %v3657_v21 }
 0x2ee   : > { %3676 = vst [vmem:[%s5306_s11 + $0x8] sm:$0xff] %v4287_v36 }
 0x2ef PF: > { %s16_s19 = sadd.s32 1, %s5147_s19   ;;  %s5912_s12 = smov %s5123_s13 }
 0x2f0   : > { %p13_p8 = scmp.ge.s32.totalorder %s16_s19, 30   ;;  %s5913_s13 = smov %s5127_s14 }
 0x2f1   : > { %s5914_s14 = smov %s5241_s5  ;;  %s5915_s15 = smov %s5139_s17 }
 0x2f2   : > { %s5916_s16 = smov %s5143_s18  ;;  %s5917_s17 = smov %s5920_s21 }
 0x2f3   : > { %s5918_s18 = smov %s5924_s22  ;;  %15 = sbr.rel (!%p13_p8) target bundleno = 5 (0x5), region = 86 }
 0x2fa   :  { %3707 = vsyncpa [#allocation4], 1 }
 0x2fb   :  { %3709 = vsyncpa [#allocation4 + $0x1], 1 }

</bundles_post_ra>
